<compile_context>
chip_gen: v7x
topology: tpu7x:2x2x1
jax: 0.10.0
libtpu: 0.0.40
codegen_flags: <defaults>
</compile_context>

<pallas_src>
import functools
import math

import jax
import jax.numpy as jnp
from jax.experimental import pallas as pl
from jax.experimental.pallas import tpu as pltpu


# ----------------- fused Conv3x3 + bias + ReLU (+ 2x2 maxpool) --------------

def conv3x3_kernel(x_ref, w_ref, b_ref, o_ref, pad_scr, *, pool):
    # x_ref:   (1, H, W, Cin)   bf16 un-padded activation for batch element n
    # w_ref:   (9*Cin, Cout)    bf16 weights, K ordered (tap-major, then cin)
    # b_ref:   (1, Cout)        f32 bias
    # o_ref:   (1, Ho, Wo, Cout) bf16; Ho/Wo already halved when pool=True
    # pad_scr: ((H+2)*(W+2)+2, Cin) bf16 flat zero-padded image scratch
    _, H, W, Cin = x_ref.shape
    Cout = w_ref.shape[-1]
    Wp = W + 2
    M = H * Wp            # rows of the flat tap views (2 junk cols per image row)

    # In-kernel zero padding.  The scratch is zeroed every step so the kernel
    # stays correct under any grid partitioning (megacore), then the image is
    # copied into the interior of the flat padded layout (static offsets).
    pad_scr[...] = jnp.zeros_like(pad_scr)
    for h in range(H):
        pad_scr[pl.ds((h + 1) * Wp + 1, W), :] = x_ref[0, h, :, :]

    # im2col: each 3x3 tap is a pure sublane shift of the flat padded image.
    # Folding the 9 taps into the contraction axis gives one MXU matmul with
    # K = 9*Cin instead of 9 shallow matmuls + 8 f32 accumulator passes.
    taps = [pad_scr[pl.ds(kh * Wp + kw, M), :]
            for kh in range(3) for kw in range(3)]
    lhs = jnp.concatenate(taps, axis=-1)                       # (M, 9*Cin) bf16

    acc = jnp.dot(lhs, w_ref[...], preferred_element_type=jnp.float32)
    y = jnp.maximum(acc + b_ref[...], 0.0)                     # bias + ReLU (f32)
    y = y.reshape(H, Wp, Cout)                                 # 2 junk cols per row

    if pool:                                                   # fused MaxPool2d(2,2)
        # The junk columns (W, W+1) form their own W-pair and are dropped.
        y4 = y.reshape(H, Wp // 2, 2, Cout)
        yw = jnp.maximum(y4[:, :, 0, :], y4[:, :, 1, :])[:, :W // 2, :]
        yh = yw.reshape(H // 2, 2, W // 2, Cout)
        o_ref[0] = jnp.maximum(yh[:, 0], yh[:, 1]).astype(o_ref.dtype)
    else:
        o_ref[0] = y[:, :W, :].astype(o_ref.dtype)


def conv3x3_relu(x, w, b, *, pool):
    # x: (N, H, W, Cin) bf16; w: (3, 3, Cin, Cout) f32; b: (Cout,) f32
    N, H, W, Cin = x.shape
    Cout = w.shape[-1]
    if pool:
        assert H % 2 == 0 and W % 2 == 0, "MaxPool2d(2,2) fusion needs even H, W"
    Hp, Wp = H + 2, W + 2
    Ho, Wo = (H // 2, W // 2) if pool else (H, W)

    # K order (tap, cin) matches the LHS concat order in the kernel.
    w2 = w.reshape(9 * Cin, Cout).astype(jnp.bfloat16)
    b2 = b.reshape(1, Cout).astype(jnp.float32)

    # Request scoped VMEM sized to the actual working set (with headroom for
    # double buffering and epilogue temporaries).
    bytes_needed = (2 * H * W * Cin * 2            # input block, double buffered
                    + 2 * Ho * Wo * Cout * 2       # output block, double buffered
                    + 9 * Cin * Cout * 2 + 4 * Cout
                    + (Hp * Wp + 2) * Cin * 2      # flat padded-image scratch
                    + H * Wp * 9 * Cin * 2         # im2col temporary (bf16)
                    + 2 * H * Wp * Cout * 4)       # f32 matmul result + epilogue
    vmem_limit = int(min(max(6 * bytes_needed, 16 << 20), 48 << 20))

    return pl.pallas_call(
        functools.partial(conv3x3_kernel, pool=pool),
        out_shape=jax.ShapeDtypeStruct((N, Ho, Wo, Cout), jnp.bfloat16),
        grid_spec=pltpu.PrefetchScalarGridSpec(
            num_scalar_prefetch=0,
            grid=(N,),   # TODO(synk): add a row-tile axis with a 2-row halo at real VGG sizes
            in_specs=[
                pl.BlockSpec((1, H, W, Cin), lambda n: (n, 0, 0, 0)),
                pl.BlockSpec((9 * Cin, Cout), lambda n: (0, 0)),
                pl.BlockSpec((1, Cout), lambda n: (0, 0)),
            ],
            out_specs=pl.BlockSpec((1, Ho, Wo, Cout), lambda n: (n, 0, 0, 0)),
            scratch_shapes=[pltpu.VMEM((Hp * Wp + 2, Cin), jnp.bfloat16)],
        ),
        compiler_params=pltpu.CompilerParams(
            dimension_semantics=("parallel",),
            vmem_limit_bytes=vmem_limit),
    )(x, w2, b2)


# --------------------- standalone MaxPool2d(2,2) kernel ---------------------
# Only used for an "M" layer that is not directly preceded by a conv.

def maxpool2x2_kernel(x_ref, o_ref):
    _, H, W, C = x_ref.shape
    x = x_ref[0]
    x4 = x.reshape(H, W // 2, 2, C)
    yw = jnp.maximum(x4[:, :, 0, :], x4[:, :, 1, :])
    yh = yw.reshape(H // 2, 2, W // 2, C)
    o_ref[0] = jnp.maximum(yh[:, 0], yh[:, 1]).astype(o_ref.dtype)


def maxpool2x2(x):
    N, H, W, C = x.shape
    assert H % 2 == 0 and W % 2 == 0  # TODO(synk): odd sizes (PyTorch floors) unsupported
    return pl.pallas_call(
        maxpool2x2_kernel,
        out_shape=jax.ShapeDtypeStruct((N, H // 2, W // 2, C), x.dtype),
        grid_spec=pltpu.PrefetchScalarGridSpec(
            num_scalar_prefetch=0,
            grid=(N,),
            in_specs=[pl.BlockSpec((1, H, W, C), lambda n: (n, 0, 0, 0))],
            out_specs=pl.BlockSpec((1, H // 2, W // 2, C), lambda n: (n, 0, 0, 0)),
        ),
        compiler_params=pltpu.CompilerParams(dimension_semantics=("parallel",)),
    )(x)


# --------------------------- VGG features module ----------------------------

def init_vgg_features_params(key, cfg, in_channels):
    # Matches VGG._initialize_weights: conv weight ~ N(0, sqrt(2/(k*k*Cout))), bias 0.
    params = []
    c = in_channels
    for v in cfg:
        if v == "M":
            params.append(("M", None))
        else:
            cout = int(v)
            n = 3 * 3 * cout
            key, wk = jax.random.split(key)
            w = jax.random.normal(wk, (3, 3, c, cout), jnp.float32) * math.sqrt(2.0 / n)
            b = jnp.zeros((cout,), jnp.float32)
            params.append(("C", (w, b)))
            c = cout
    return params


def vgg_features_forward(x_nchw, params):
    # Reproduces VGG.forward: sequentially apply the feature layers.
    # A conv immediately followed by "M" runs as one fused kernel.
    # TODO(synk): the classifier (Linear/ReLU/Dropout) built in __init__ is
    # never called by forward(), so it is intentionally not implemented.
    x = jnp.transpose(x_nchw, (0, 2, 3, 1)).astype(jnp.bfloat16)   # NCHW -> NHWC, bf16
    i, n = 0, len(params)
    while i < n:
        kind, p = params[i]
        if kind == "C":
            w, b = p
            fuse_pool = (i + 1 < n) and params[i + 1][0] == "M"
            x = conv3x3_relu(x, w, b, pool=fuse_pool)
            i += 2 if fuse_pool else 1
        else:
            x = maxpool2x2(x)
            i += 1
    return jnp.transpose(x, (0, 3, 1, 2)).astype(jnp.float32)      # NHWC -> NCHW


# -------------------------------- reference ---------------------------------

def _ref_forward(x_nchw, params):
    # XLA reference with the same precision policy: bf16 operands and bf16
    # inter-layer activations, f32 accumulation / bias / ReLU.
    x = x_nchw.astype(jnp.bfloat16)
    for kind, p in params:
        if kind == "C":
            w, b = p
            w_oihw = jnp.transpose(w, (3, 2, 0, 1)).astype(jnp.bfloat16)
            y = jax.lax.conv_general_dilated(
                x, w_oihw, (1, 1), ((1, 1), (1, 1)),
                dimension_numbers=("NCHW", "OIHW", "NCHW"),
                preferred_element_type=jnp.float32)
            x = jnp.maximum(y + b.reshape(1, -1, 1, 1), 0.0).astype(jnp.bfloat16)
        else:
            N, C, H, W = x.shape
            x = x.reshape(N, C, H // 2, 2, W // 2, 2).max(axis=(3, 5))
    return x.astype(jnp.float32)


if __name__ == "__main__":
    key = jax.random.PRNGKey(0)
    kx, kp = jax.random.split(key)

    # Small VGG-style config: Conv16+ReLU, Pool, Conv32+ReLU, Conv32+ReLU, Pool
    cfg = [16, "M", 32, 32, "M"]
    x = jax.random.normal(kx, (2, 4, 16, 16), jnp.float32)   # NCHW input
    params = init_vgg_features_params(kp, cfg, in_channels=4)

    fwd = jax.jit(lambda a: vgg_features_forward(a, params))
    out = jax.block_until_ready(fwd(x))
    assert out.shape == (2, 32, 4, 4), out.shape

    ref = _ref_forward(x, params)
    err = float(jnp.max(jnp.abs(out - ref)))
    assert jnp.allclose(out, ref, rtol=2e-2, atol=2e-2), \
        f"mismatch vs reference (max abs err {err})"

    print("KERNEL_OK")
</pallas_src>

<mosaic_0001>
module attributes {stable_mosaic.version = 11 : i64} {
  func.func @conv3x3_kernel(%arg0: i32, %arg1: memref<1x16x16x4xbf16, #tpu.memory_space<vmem>>, %arg2: memref<36x16xbf16, #tpu.memory_space<vmem>>, %arg3: memref<1x16xf32, #tpu.memory_space<vmem>>, %arg4: memref<1x8x8x16xbf16, #tpu.memory_space<vmem>>, %arg5: memref<326x4xbf16, #tpu.memory_space<vmem>>) attributes {dimension_semantics = [#tpu.dimension_semantics<parallel>], iteration_bounds = array<i64: 2>, scalar_prefetch = 0 : i64, scratch_operands = 1 : i64, tpu.core_type = #tpu.core_type<tc>, window_params = [{transform_indices = @transform_0, window_bounds = array<i64: 1, 16, 16, 4>}, {pipeline_mode = #tpu.pipeline_mode<synchronous>, transform_indices = @transform_1, window_bounds = array<i64: 36, 16>}, {pipeline_mode = #tpu.pipeline_mode<synchronous>, transform_indices = @transform_2, window_bounds = array<i64: 1, 16>}, {transform_indices = @transform_3, window_bounds = array<i64: 1, 8, 8, 16>}]} {
    %cst = arith.constant 0.000000e+00 : bf16
    %0 = vector.broadcast %cst : bf16 to vector<326x4xbf16>
    %c0 = arith.constant 0 : index
    %c0_0 = arith.constant 0 : index
    %1 = vector.load %arg5[%c0, %c0_0] : memref<326x4xbf16, #tpu.memory_space<vmem>>, vector<326x4xbf16>
    tpu.vector_store %arg5[%c0, %c0_0], %0 {strides = array<i32>} : memref<326x4xbf16, #tpu.memory_space<vmem>>, vector<326x4xbf16>,
    %c0_1 = arith.constant 0 : index
    %c0_2 = arith.constant 0 : index
    %c0_3 = arith.constant 0 : index
    %c0_4 = arith.constant 0 : index
    %2 = vector.load %arg1[%c0_1, %c0_2, %c0_3, %c0_4] : memref<1x16x16x4xbf16, #tpu.memory_space<vmem>>, vector<1x1x16x4xbf16>
    %3 = vector.shape_cast %2 : vector<1x1x16x4xbf16> to vector<16x4xbf16>
    %c19 = arith.constant 19 : index
    %c0_5 = arith.constant 0 : index
    %4 = vector.load %arg5[%c19, %c0_5] : memref<326x4xbf16, #tpu.memory_space<vmem>>, vector<16x4xbf16>
    tpu.vector_store %arg5[%c19, %c0_5], %3 {strides = array<i32>} : memref<326x4xbf16, #tpu.memory_space<vmem>>, vector<16x4xbf16>,
    %c0_6 = arith.constant 0 : index
    %c1 = arith.constant 1 : index
    %c0_7 = arith.constant 0 : index
    %c0_8 = arith.constant 0 : index
    %5 = vector.load %arg1[%c0_6, %c1, %c0_7, %c0_8] : memref<1x16x16x4xbf16, #tpu.memory_space<vmem>>, vector<1x1x16x4xbf16>
    %6 = vector.shape_cast %5 : vector<1x1x16x4xbf16> to vector<16x4xbf16>
    %c37 = arith.constant 37 : index
    %c0_9 = arith.constant 0 : index
    %7 = vector.load %arg5[%c37, %c0_9] : memref<326x4xbf16, #tpu.memory_space<vmem>>, vector<16x4xbf16>
    tpu.vector_store %arg5[%c37, %c0_9], %6 {strides = array<i32>} : memref<326x4xbf16, #tpu.memory_space<vmem>>, vector<16x4xbf16>,
    %c0_10 = arith.constant 0 : index
    %c2 = arith.constant 2 : index
    %c0_11 = arith.constant 0 : index
    %c0_12 = arith.constant 0 : index
    %8 = vector.load %arg1[%c0_10, %c2, %c0_11, %c0_12] : memref<1x16x16x4xbf16, #tpu.memory_space<vmem>>, vector<1x1x16x4xbf16>
    %9 = vector.shape_cast %8 : vector<1x1x16x4xbf16> to vector<16x4xbf16>
    %c55 = arith.constant 55 : index
    %c0_13 = arith.constant 0 : index
    %10 = vector.load %arg5[%c55, %c0_13] : memref<326x4xbf16, #tpu.memory_space<vmem>>, vector<16x4xbf16>
    tpu.vector_store %arg5[%c55, %c0_13], %9 {strides = array<i32>} : memref<326x4xbf16, #tpu.memory_space<vmem>>, vector<16x4xbf16>,
    %c0_14 = arith.constant 0 : index
    %c3 = arith.constant 3 : index
    %c0_15 = arith.constant 0 : index
    %c0_16 = arith.constant 0 : index
    %11 = vector.load %arg1[%c0_14, %c3, %c0_15, %c0_16] : memref<1x16x16x4xbf16, #tpu.memory_space<vmem>>, vector<1x1x16x4xbf16>
    %12 = vector.shape_cast %11 : vector<1x1x16x4xbf16> to vector<16x4xbf16>
    %c73 = arith.constant 73 : index
    %c0_17 = arith.constant 0 : index
    %13 = vector.load %arg5[%c73, %c0_17] : memref<326x4xbf16, #tpu.memory_space<vmem>>, vector<16x4xbf16>
    tpu.vector_store %arg5[%c73, %c0_17], %12 {strides = array<i32>} : memref<326x4xbf16, #tpu.memory_space<vmem>>, vector<16x4xbf16>,
    %c0_18 = arith.constant 0 : index
    %c4 = arith.constant 4 : index
    %c0_19 = arith.constant 0 : index
    %c0_20 = arith.constant 0 : index
    %14 = vector.load %arg1[%c0_18, %c4, %c0_19, %c0_20] : memref<1x16x16x4xbf16, #tpu.memory_space<vmem>>, vector<1x1x16x4xbf16>
    %15 = vector.shape_cast %14 : vector<1x1x16x4xbf16> to vector<16x4xbf16>
    %c91 = arith.constant 91 : index
    %c0_21 = arith.constant 0 : index
    %16 = vector.load %arg5[%c91, %c0_21] : memref<326x4xbf16, #tpu.memory_space<vmem>>, vector<16x4xbf16>
    tpu.vector_store %arg5[%c91, %c0_21], %15 {strides = array<i32>} : memref<326x4xbf16, #tpu.memory_space<vmem>>, vector<16x4xbf16>,
    %c0_22 = arith.constant 0 : index
    %c5 = arith.constant 5 : index
    %c0_23 = arith.constant 0 : index
    %c0_24 = arith.constant 0 : index
    %17 = vector.load %arg1[%c0_22, %c5, %c0_23, %c0_24] : memref<1x16x16x4xbf16, #tpu.memory_space<vmem>>, vector<1x1x16x4xbf16>
    %18 = vector.shape_cast %17 : vector<1x1x16x4xbf16> to vector<16x4xbf16>
    %c109 = arith.constant 109 : index
    %c0_25 = arith.constant 0 : index
    %19 = vector.load %arg5[%c109, %c0_25] : memref<326x4xbf16, #tpu.memory_space<vmem>>, vector<16x4xbf16>
    tpu.vector_store %arg5[%c109, %c0_25], %18 {strides = array<i32>} : memref<326x4xbf16, #tpu.memory_space<vmem>>, vector<16x4xbf16>,
    %c0_26 = arith.constant 0 : index
    %c6 = arith.constant 6 : index
    %c0_27 = arith.constant 0 : index
    %c0_28 = arith.constant 0 : index
    %20 = vector.load %arg1[%c0_26, %c6, %c0_27, %c0_28] : memref<1x16x16x4xbf16, #tpu.memory_space<vmem>>, vector<1x1x16x4xbf16>
    %21 = vector.shape_cast %20 : vector<1x1x16x4xbf16> to vector<16x4xbf16>
    %c127 = arith.constant 127 : index
    %c0_29 = arith.constant 0 : index
    %22 = vector.load %arg5[%c127, %c0_29] : memref<326x4xbf16, #tpu.memory_space<vmem>>, vector<16x4xbf16>
    tpu.vector_store %arg5[%c127, %c0_29], %21 {strides = array<i32>} : memref<326x4xbf16, #tpu.memory_space<vmem>>, vector<16x4xbf16>,
    %c0_30 = arith.constant 0 : index
    %c7 = arith.constant 7 : index
    %c0_31 = arith.constant 0 : index
    %c0_32 = arith.constant 0 : index
    %23 = vector.load %arg1[%c0_30, %c7, %c0_31, %c0_32] : memref<1x16x16x4xbf16, #tpu.memory_space<vmem>>, vector<1x1x16x4xbf16>
    %24 = vector.shape_cast %23 : vector<1x1x16x4xbf16> to vector<16x4xbf16>
    %c145 = arith.constant 145 : index
    %c0_33 = arith.constant 0 : index
    %25 = vector.load %arg5[%c145, %c0_33] : memref<326x4xbf16, #tpu.memory_space<vmem>>, vector<16x4xbf16>
    tpu.vector_store %arg5[%c145, %c0_33], %24 {strides = array<i32>} : memref<326x4xbf16, #tpu.memory_space<vmem>>, vector<16x4xbf16>,
    %c0_34 = arith.constant 0 : index
    %c8 = arith.constant 8 : index
    %c0_35 = arith.constant 0 : index
    %c0_36 = arith.constant 0 : index
    %26 = vector.load %arg1[%c0_34, %c8, %c0_35, %c0_36] : memref<1x16x16x4xbf16, #tpu.memory_space<vmem>>, vector<1x1x16x4xbf16>
    %27 = vector.shape_cast %26 : vector<1x1x16x4xbf16> to vector<16x4xbf16>
    %c163 = arith.constant 163 : index
    %c0_37 = arith.constant 0 : index
    %28 = vector.load %arg5[%c163, %c0_37] : memref<326x4xbf16, #tpu.memory_space<vmem>>, vector<16x4xbf16>
    tpu.vector_store %arg5[%c163, %c0_37], %27 {strides = array<i32>} : memref<326x4xbf16, #tpu.memory_space<vmem>>, vector<16x4xbf16>,
    %c0_38 = arith.constant 0 : index
    %c9 = arith.constant 9 : index
    %c0_39 = arith.constant 0 : index
    %c0_40 = arith.constant 0 : index
    %29 = vector.load %arg1[%c0_38, %c9, %c0_39, %c0_40] : memref<1x16x16x4xbf16, #tpu.memory_space<vmem>>, vector<1x1x16x4xbf16>
    %30 = vector.shape_cast %29 : vector<1x1x16x4xbf16> to vector<16x4xbf16>
    %c181 = arith.constant 181 : index
    %c0_41 = arith.constant 0 : index
    %31 = vector.load %arg5[%c181, %c0_41] : memref<326x4xbf16, #tpu.memory_space<vmem>>, vector<16x4xbf16>
    tpu.vector_store %arg5[%c181, %c0_41], %30 {strides = array<i32>} : memref<326x4xbf16, #tpu.memory_space<vmem>>, vector<16x4xbf16>,
    %c0_42 = arith.constant 0 : index
    %c10 = arith.constant 10 : index
    %c0_43 = arith.constant 0 : index
    %c0_44 = arith.constant 0 : index
    %32 = vector.load %arg1[%c0_42, %c10, %c0_43, %c0_44] : memref<1x16x16x4xbf16, #tpu.memory_space<vmem>>, vector<1x1x16x4xbf16>
    %33 = vector.shape_cast %32 : vector<1x1x16x4xbf16> to vector<16x4xbf16>
    %c199 = arith.constant 199 : index
    %c0_45 = arith.constant 0 : index
    %34 = vector.load %arg5[%c199, %c0_45] : memref<326x4xbf16, #tpu.memory_space<vmem>>, vector<16x4xbf16>
    tpu.vector_store %arg5[%c199, %c0_45], %33 {strides = array<i32>} : memref<326x4xbf16, #tpu.memory_space<vmem>>, vector<16x4xbf16>,
    %c0_46 = arith.constant 0 : index
    %c11 = arith.constant 11 : index
    %c0_47 = arith.constant 0 : index
    %c0_48 = arith.constant 0 : index
    %35 = vector.load %arg1[%c0_46, %c11, %c0_47, %c0_48] : memref<1x16x16x4xbf16, #tpu.memory_space<vmem>>, vector<1x1x16x4xbf16>
    %36 = vector.shape_cast %35 : vector<1x1x16x4xbf16> to vector<16x4xbf16>
    %c217 = arith.constant 217 : index
    %c0_49 = arith.constant 0 : index
    %37 = vector.load %arg5[%c217, %c0_49] : memref<326x4xbf16, #tpu.memory_space<vmem>>, vector<16x4xbf16>
    tpu.vector_store %arg5[%c217, %c0_49], %36 {strides = array<i32>} : memref<326x4xbf16, #tpu.memory_space<vmem>>, vector<16x4xbf16>,
    %c0_50 = arith.constant 0 : index
    %c12 = arith.constant 12 : index
    %c0_51 = arith.constant 0 : index
    %c0_52 = arith.constant 0 : index
    %38 = vector.load %arg1[%c0_50, %c12, %c0_51, %c0_52] : memref<1x16x16x4xbf16, #tpu.memory_space<vmem>>, vector<1x1x16x4xbf16>
    %39 = vector.shape_cast %38 : vector<1x1x16x4xbf16> to vector<16x4xbf16>
    %c235 = arith.constant 235 : index
    %c0_53 = arith.constant 0 : index
    %40 = vector.load %arg5[%c235, %c0_53] : memref<326x4xbf16, #tpu.memory_space<vmem>>, vector<16x4xbf16>
    tpu.vector_store %arg5[%c235, %c0_53], %39 {strides = array<i32>} : memref<326x4xbf16, #tpu.memory_space<vmem>>, vector<16x4xbf16>,
    %c0_54 = arith.constant 0 : index
    %c13 = arith.constant 13 : index
    %c0_55 = arith.constant 0 : index
    %c0_56 = arith.constant 0 : index
    %41 = vector.load %arg1[%c0_54, %c13, %c0_55, %c0_56] : memref<1x16x16x4xbf16, #tpu.memory_space<vmem>>, vector<1x1x16x4xbf16>
    %42 = vector.shape_cast %41 : vector<1x1x16x4xbf16> to vector<16x4xbf16>
    %c253 = arith.constant 253 : index
    %c0_57 = arith.constant 0 : index
    %43 = vector.load %arg5[%c253, %c0_57] : memref<326x4xbf16, #tpu.memory_space<vmem>>, vector<16x4xbf16>
    tpu.vector_store %arg5[%c253, %c0_57], %42 {strides = array<i32>} : memref<326x4xbf16, #tpu.memory_space<vmem>>, vector<16x4xbf16>,
    %c0_58 = arith.constant 0 : index
    %c14 = arith.constant 14 : index
    %c0_59 = arith.constant 0 : index
    %c0_60 = arith.constant 0 : index
    %44 = vector.load %arg1[%c0_58, %c14, %c0_59, %c0_60] : memref<1x16x16x4xbf16, #tpu.memory_space<vmem>>, vector<1x1x16x4xbf16>
    %45 = vector.shape_cast %44 : vector<1x1x16x4xbf16> to vector<16x4xbf16>
    %c271 = arith.constant 271 : index
    %c0_61 = arith.constant 0 : index
    %46 = vector.load %arg5[%c271, %c0_61] : memref<326x4xbf16, #tpu.memory_space<vmem>>, vector<16x4xbf16>
    tpu.vector_store %arg5[%c271, %c0_61], %45 {strides = array<i32>} : memref<326x4xbf16, #tpu.memory_space<vmem>>, vector<16x4xbf16>,
    %c0_62 = arith.constant 0 : index
    %c15 = arith.constant 15 : index
    %c0_63 = arith.constant 0 : index
    %c0_64 = arith.constant 0 : index
    %47 = vector.load %arg1[%c0_62, %c15, %c0_63, %c0_64] : memref<1x16x16x4xbf16, #tpu.memory_space<vmem>>, vector<1x1x16x4xbf16>
    %48 = vector.shape_cast %47 : vector<1x1x16x4xbf16> to vector<16x4xbf16>
    %c289 = arith.constant 289 : index
    %c0_65 = arith.constant 0 : index
    %49 = vector.load %arg5[%c289, %c0_65] : memref<326x4xbf16, #tpu.memory_space<vmem>>, vector<16x4xbf16>
    tpu.vector_store %arg5[%c289, %c0_65], %48 {strides = array<i32>} : memref<326x4xbf16, #tpu.memory_space<vmem>>, vector<16x4xbf16>,
    %c0_66 = arith.constant 0 : index
    %c0_67 = arith.constant 0 : index
    %50 = vector.load %arg5[%c0_66, %c0_67] : memref<326x4xbf16, #tpu.memory_space<vmem>>, vector<288x4xbf16>
    %c1_68 = arith.constant 1 : index
    %c0_69 = arith.constant 0 : index
    %51 = vector.load %arg5[%c1_68, %c0_69] : memref<326x4xbf16, #tpu.memory_space<vmem>>, vector<288x4xbf16>
    %c2_70 = arith.constant 2 : index
    %c0_71 = arith.constant 0 : index
    %52 = vector.load %arg5[%c2_70, %c0_71] : memref<326x4xbf16, #tpu.memory_space<vmem>>, vector<288x4xbf16>
    %c18 = arith.constant 18 : index
    %c0_72 = arith.constant 0 : index
    %53 = vector.load %arg5[%c18, %c0_72] : memref<326x4xbf16, #tpu.memory_space<vmem>>, vector<288x4xbf16>
    %c19_73 = arith.constant 19 : index
    %c0_74 = arith.constant 0 : index
    %54 = vector.load %arg5[%c19_73, %c0_74] : memref<326x4xbf16, #tpu.memory_space<vmem>>, vector<288x4xbf16>
    %c20 = arith.constant 20 : index
    %c0_75 = arith.constant 0 : index
    %55 = vector.load %arg5[%c20, %c0_75] : memref<326x4xbf16, #tpu.memory_space<vmem>>, vector<288x4xbf16>
    %c36 = arith.constant 36 : index
    %c0_76 = arith.constant 0 : index
    %56 = vector.load %arg5[%c36, %c0_76] : memref<326x4xbf16, #tpu.memory_space<vmem>>, vector<288x4xbf16>
    %c37_77 = arith.constant 37 : index
    %c0_78 = arith.constant 0 : index
    %57 = vector.load %arg5[%c37_77, %c0_78] : memref<326x4xbf16, #tpu.memory_space<vmem>>, vector<288x4xbf16>
    %c38 = arith.constant 38 : index
    %c0_79 = arith.constant 0 : index
    %58 = vector.load %arg5[%c38, %c0_79] : memref<326x4xbf16, #tpu.memory_space<vmem>>, vector<288x4xbf16>
    %59 = tpu.concatenate %50, %51, %52, %53, %54, %55, %56, %57, %58 in 1 : vector<288x4xbf16>, vector<288x4xbf16>, vector<288x4xbf16>, vector<288x4xbf16>, vector<288x4xbf16>, vector<288x4xbf16>, vector<288x4xbf16>, vector<288x4xbf16>, vector<288x4xbf16> -> vector<288x36xbf16>
    %c0_80 = arith.constant 0 : index
    %c0_81 = arith.constant 0 : index
    %60 = vector.load %arg2[%c0_80, %c0_81] : memref<36x16xbf16, #tpu.memory_space<vmem>>, vector<36x16xbf16>
    %cst_82 = arith.constant dense<0.000000e+00> : vector<288x16xf32>
    %61 = tpu.matmul %59, %60, %cst_82 {dimension_numbers = #tpu.dot_dimension_numbers<[1], [0], [0], [1], [0, 0, 1, 1], [], []>} : vector<288x36xbf16>, vector<36x16xbf16>, vector<288x16xf32> -> vector<288x16xf32>
    %c0_83 = arith.constant 0 : index
    %c0_84 = arith.constant 0 : index
    %62 = vector.load %arg3[%c0_83, %c0_84] : memref<1x16xf32, #tpu.memory_space<vmem>>, vector<1x16xf32>
    %63 = vector.broadcast %62 : vector<1x16xf32> to vector<288x16xf32>
    %64 = arith.addf %61, %63 : vector<288x16xf32>
    %cst_85 = arith.constant 0.000000e+00 : f32
    %65 = vector.broadcast %cst_85 : f32 to vector<288x16xf32>
    %66 = arith.maximumf %64, %65 : vector<288x16xf32>
    %67 = vector.shape_cast %66 : vector<288x16xf32> to vector<16x18x16xf32>
    %68 = vector.shape_cast %67 : vector<16x18x16xf32> to vector<16x9x2x16xf32>
    %69 = vector.extract_strided_slice %68 {offsets = [0, 0, 0, 0], sizes = [16, 9, 1, 16], strides = [1, 1, 1, 1]} : vector<16x9x2x16xf32> to vector<16x9x1x16xf32>
    %70 = vector.shape_cast %69 : vector<16x9x1x16xf32> to vector<16x9x16xf32>
    %71 = vector.extract_strided_slice %68 {offsets = [0, 0, 1, 0], sizes = [16, 9, 1, 16], strides = [1, 1, 1, 1]} : vector<16x9x2x16xf32> to vector<16x9x1x16xf32>
    %72 = vector.shape_cast %71 : vector<16x9x1x16xf32> to vector<16x9x16xf32>
    %73 = arith.maximumf %70, %72 : vector<16x9x16xf32>
    %74 = vector.extract_strided_slice %73 {offsets = [0, 0, 0], sizes = [16, 8, 16], strides = [1, 1, 1]} : vector<16x9x16xf32> to vector<16x8x16xf32>
    %75 = vector.shape_cast %74 : vector<16x8x16xf32> to vector<8x2x8x16xf32>
    %76 = vector.extract_strided_slice %75 {offsets = [0, 0, 0, 0], sizes = [8, 1, 8, 16], strides = [1, 1, 1, 1]} : vector<8x2x8x16xf32> to vector<8x1x8x16xf32>
    %77 = vector.shape_cast %76 : vector<8x1x8x16xf32> to vector<8x8x16xf32>
    %78 = vector.extract_strided_slice %75 {offsets = [0, 1, 0, 0], sizes = [8, 1, 8, 16], strides = [1, 1, 1, 1]} : vector<8x2x8x16xf32> to vector<8x1x8x16xf32>
    %79 = vector.shape_cast %78 : vector<8x1x8x16xf32> to vector<8x8x16xf32>
    %80 = arith.maximumf %77, %79 : vector<8x8x16xf32>
    %81 = arith.truncf %80 : vector<8x8x16xf32> to vector<8x8x16xbf16>
    %c0_86 = arith.constant 0 : index
    %c0_87 = arith.constant 0 : index
    %c0_88 = arith.constant 0 : index
    %c0_89 = arith.constant 0 : index
    %82 = vector.load %arg4[%c0_86, %c0_87, %c0_88, %c0_89] : memref<1x8x8x16xbf16, #tpu.memory_space<vmem>>, vector<1x8x8x16xbf16>
    %83 = vector.shape_cast %82 : vector<1x8x8x16xbf16> to vector<8x8x16xbf16>
    %84 = vector.shape_cast %81 : vector<8x8x16xbf16> to vector<1x8x8x16xbf16>
    tpu.vector_store %arg4[%c0_86, %c0_87, %c0_88, %c0_89], %84 {strides = array<i32>} : memref<1x8x8x16xbf16, #tpu.memory_space<vmem>>, vector<1x8x8x16xbf16>,
    return
  }
  func.func @transform_0(%arg0: i32) -> (i32, i32, i32, i32) {
    %c0_i32 = arith.constant 0 : i32
    %c0_i32_0 = arith.constant 0 : i32
    %c0_i32_1 = arith.constant 0 : i32
    %c0_i32_2 = arith.constant 0 : i32
    return %arg0, %c0_i32, %c0_i32_0, %c0_i32_1 : i32, i32, i32, i32
  }
  func.func @transform_1(%arg0: i32) -> (i32, i32) {
    %c0_i32 = arith.constant 0 : i32
    %c0_i32_0 = arith.constant 0 : i32
    %c0_i32_1 = arith.constant 0 : i32
    return %c0_i32, %c0_i32_0 : i32, i32
  }
  func.func @transform_2(%arg0: i32) -> (i32, i32) {
    %c0_i32 = arith.constant 0 : i32
    %c0_i32_0 = arith.constant 0 : i32
    %c0_i32_1 = arith.constant 0 : i32
    return %c0_i32, %c0_i32_0 : i32, i32
  }
  func.func @transform_3(%arg0: i32) -> (i32, i32, i32, i32) {
    %c0_i32 = arith.constant 0 : i32
    %c0_i32_0 = arith.constant 0 : i32
    %c0_i32_1 = arith.constant 0 : i32
    %c0_i32_2 = arith.constant 0 : i32
    return %arg0, %c0_i32, %c0_i32_0, %c0_i32_1 : i32, i32, i32, i32
  }
}

module attributes {stable_mosaic.version = 11 : i64} {
  func.func @conv3x3_kernel(%arg0: i32, %arg1: memref<1x8x8x16xbf16, #tpu.memory_space<vmem>>, %arg2: memref<144x32xbf16, #tpu.memory_space<vmem>>, %arg3: memref<1x32xf32, #tpu.memory_space<vmem>>, %arg4: memref<1x8x8x32xbf16, #tpu.memory_space<vmem>>, %arg5: memref<102x16xbf16, #tpu.memory_space<vmem>>) attributes {dimension_semantics = [#tpu.dimension_semantics<parallel>], iteration_bounds = array<i64: 2>, scalar_prefetch = 0 : i64, scratch_operands = 1 : i64, tpu.core_type = #tpu.core_type<tc>, window_params = [{transform_indices = @transform_0, window_bounds = array<i64: 1, 8, 8, 16>}, {pipeline_mode = #tpu.pipeline_mode<synchronous>, transform_indices = @transform_1, window_bounds = array<i64: 144, 32>}, {pipeline_mode = #tpu.pipeline_mode<synchronous>, transform_indices = @transform_2, window_bounds = array<i64: 1, 32>}, {transform_indices = @transform_3, window_bounds = array<i64: 1, 8, 8, 32>}]} {
    %cst = arith.constant 0.000000e+00 : bf16
    %0 = vector.broadcast %cst : bf16 to vector<102x16xbf16>
    %c0 = arith.constant 0 : index
    %c0_0 = arith.constant 0 : index
    %1 = vector.load %arg5[%c0, %c0_0] : memref<102x16xbf16, #tpu.memory_space<vmem>>, vector<102x16xbf16>
    tpu.vector_store %arg5[%c0, %c0_0], %0 {strides = array<i32>} : memref<102x16xbf16, #tpu.memory_space<vmem>>, vector<102x16xbf16>,
    %c0_1 = arith.constant 0 : index
    %c0_2 = arith.constant 0 : index
    %c0_3 = arith.constant 0 : index
    %c0_4 = arith.constant 0 : index
    %2 = vector.load %arg1[%c0_1, %c0_2, %c0_3, %c0_4] : memref<1x8x8x16xbf16, #tpu.memory_space<vmem>>, vector<1x1x8x16xbf16>
    %3 = vector.shape_cast %2 : vector<1x1x8x16xbf16> to vector<8x16xbf16>
    %c11 = arith.constant 11 : index
    %c0_5 = arith.constant 0 : index
    %4 = vector.load %arg5[%c11, %c0_5] : memref<102x16xbf16, #tpu.memory_space<vmem>>, vector<8x16xbf16>
    tpu.vector_store %arg5[%c11, %c0_5], %3 {strides = array<i32>} : memref<102x16xbf16, #tpu.memory_space<vmem>>, vector<8x16xbf16>,
    %c0_6 = arith.constant 0 : index
    %c1 = arith.constant 1 : index
    %c0_7 = arith.constant 0 : index
    %c0_8 = arith.constant 0 : index
    %5 = vector.load %arg1[%c0_6, %c1, %c0_7, %c0_8] : memref<1x8x8x16xbf16, #tpu.memory_space<vmem>>, vector<1x1x8x16xbf16>
    %6 = vector.shape_cast %5 : vector<1x1x8x16xbf16> to vector<8x16xbf16>
    %c21 = arith.constant 21 : index
    %c0_9 = arith.constant 0 : index
    %7 = vector.load %arg5[%c21, %c0_9] : memref<102x16xbf16, #tpu.memory_space<vmem>>, vector<8x16xbf16>
    tpu.vector_store %arg5[%c21, %c0_9], %6 {strides = array<i32>} : memref<102x16xbf16, #tpu.memory_space<vmem>>, vector<8x16xbf16>,
    %c0_10 = arith.constant 0 : index
    %c2 = arith.constant 2 : index
    %c0_11 = arith.constant 0 : index
    %c0_12 = arith.constant 0 : index
    %8 = vector.load %arg1[%c0_10, %c2, %c0_11, %c0_12] : memref<1x8x8x16xbf16, #tpu.memory_space<vmem>>, vector<1x1x8x16xbf16>
    %9 = vector.shape_cast %8 : vector<1x1x8x16xbf16> to vector<8x16xbf16>
    %c31 = arith.constant 31 : index
    %c0_13 = arith.constant 0 : index
    %10 = vector.load %arg5[%c31, %c0_13] : memref<102x16xbf16, #tpu.memory_space<vmem>>, vector<8x16xbf16>
    tpu.vector_store %arg5[%c31, %c0_13], %9 {strides = array<i32>} : memref<102x16xbf16, #tpu.memory_space<vmem>>, vector<8x16xbf16>,
    %c0_14 = arith.constant 0 : index
    %c3 = arith.constant 3 : index
    %c0_15 = arith.constant 0 : index
    %c0_16 = arith.constant 0 : index
    %11 = vector.load %arg1[%c0_14, %c3, %c0_15, %c0_16] : memref<1x8x8x16xbf16, #tpu.memory_space<vmem>>, vector<1x1x8x16xbf16>
    %12 = vector.shape_cast %11 : vector<1x1x8x16xbf16> to vector<8x16xbf16>
    %c41 = arith.constant 41 : index
    %c0_17 = arith.constant 0 : index
    %13 = vector.load %arg5[%c41, %c0_17] : memref<102x16xbf16, #tpu.memory_space<vmem>>, vector<8x16xbf16>
    tpu.vector_store %arg5[%c41, %c0_17], %12 {strides = array<i32>} : memref<102x16xbf16, #tpu.memory_space<vmem>>, vector<8x16xbf16>,
    %c0_18 = arith.constant 0 : index
    %c4 = arith.constant 4 : index
    %c0_19 = arith.constant 0 : index
    %c0_20 = arith.constant 0 : index
    %14 = vector.load %arg1[%c0_18, %c4, %c0_19, %c0_20] : memref<1x8x8x16xbf16, #tpu.memory_space<vmem>>, vector<1x1x8x16xbf16>
    %15 = vector.shape_cast %14 : vector<1x1x8x16xbf16> to vector<8x16xbf16>
    %c51 = arith.constant 51 : index
    %c0_21 = arith.constant 0 : index
    %16 = vector.load %arg5[%c51, %c0_21] : memref<102x16xbf16, #tpu.memory_space<vmem>>, vector<8x16xbf16>
    tpu.vector_store %arg5[%c51, %c0_21], %15 {strides = array<i32>} : memref<102x16xbf16, #tpu.memory_space<vmem>>, vector<8x16xbf16>,
    %c0_22 = arith.constant 0 : index
    %c5 = arith.constant 5 : index
    %c0_23 = arith.constant 0 : index
    %c0_24 = arith.constant 0 : index
    %17 = vector.load %arg1[%c0_22, %c5, %c0_23, %c0_24] : memref<1x8x8x16xbf16, #tpu.memory_space<vmem>>, vector<1x1x8x16xbf16>
    %18 = vector.shape_cast %17 : vector<1x1x8x16xbf16> to vector<8x16xbf16>
    %c61 = arith.constant 61 : index
    %c0_25 = arith.constant 0 : index
    %19 = vector.load %arg5[%c61, %c0_25] : memref<102x16xbf16, #tpu.memory_space<vmem>>, vector<8x16xbf16>
    tpu.vector_store %arg5[%c61, %c0_25], %18 {strides = array<i32>} : memref<102x16xbf16, #tpu.memory_space<vmem>>, vector<8x16xbf16>,
    %c0_26 = arith.constant 0 : index
    %c6 = arith.constant 6 : index
    %c0_27 = arith.constant 0 : index
    %c0_28 = arith.constant 0 : index
    %20 = vector.load %arg1[%c0_26, %c6, %c0_27, %c0_28] : memref<1x8x8x16xbf16, #tpu.memory_space<vmem>>, vector<1x1x8x16xbf16>
    %21 = vector.shape_cast %20 : vector<1x1x8x16xbf16> to vector<8x16xbf16>
    %c71 = arith.constant 71 : index
    %c0_29 = arith.constant 0 : index
    %22 = vector.load %arg5[%c71, %c0_29] : memref<102x16xbf16, #tpu.memory_space<vmem>>, vector<8x16xbf16>
    tpu.vector_store %arg5[%c71, %c0_29], %21 {strides = array<i32>} : memref<102x16xbf16, #tpu.memory_space<vmem>>, vector<8x16xbf16>,
    %c0_30 = arith.constant 0 : index
    %c7 = arith.constant 7 : index
    %c0_31 = arith.constant 0 : index
    %c0_32 = arith.constant 0 : index
    %23 = vector.load %arg1[%c0_30, %c7, %c0_31, %c0_32] : memref<1x8x8x16xbf16, #tpu.memory_space<vmem>>, vector<1x1x8x16xbf16>
    %24 = vector.shape_cast %23 : vector<1x1x8x16xbf16> to vector<8x16xbf16>
    %c81 = arith.constant 81 : index
    %c0_33 = arith.constant 0 : index
    %25 = vector.load %arg5[%c81, %c0_33] : memref<102x16xbf16, #tpu.memory_space<vmem>>, vector<8x16xbf16>
    tpu.vector_store %arg5[%c81, %c0_33], %24 {strides = array<i32>} : memref<102x16xbf16, #tpu.memory_space<vmem>>, vector<8x16xbf16>,
    %c0_34 = arith.constant 0 : index
    %c0_35 = arith.constant 0 : index
    %26 = vector.load %arg5[%c0_34, %c0_35] : memref<102x16xbf16, #tpu.memory_space<vmem>>, vector<80x16xbf16>
    %c1_36 = arith.constant 1 : index
    %c0_37 = arith.constant 0 : index
    %27 = vector.load %arg5[%c1_36, %c0_37] : memref<102x16xbf16, #tpu.memory_space<vmem>>, vector<80x16xbf16>
    %c2_38 = arith.constant 2 : index
    %c0_39 = arith.constant 0 : index
    %28 = vector.load %arg5[%c2_38, %c0_39] : memref<102x16xbf16, #tpu.memory_space<vmem>>, vector<80x16xbf16>
    %c10 = arith.constant 10 : index
    %c0_40 = arith.constant 0 : index
    %29 = vector.load %arg5[%c10, %c0_40] : memref<102x16xbf16, #tpu.memory_space<vmem>>, vector<80x16xbf16>
    %c11_41 = arith.constant 11 : index
    %c0_42 = arith.constant 0 : index
    %30 = vector.load %arg5[%c11_41, %c0_42] : memref<102x16xbf16, #tpu.memory_space<vmem>>, vector<80x16xbf16>
    %c12 = arith.constant 12 : index
    %c0_43 = arith.constant 0 : index
    %31 = vector.load %arg5[%c12, %c0_43] : memref<102x16xbf16, #tpu.memory_space<vmem>>, vector<80x16xbf16>
    %c20 = arith.constant 20 : index
    %c0_44 = arith.constant 0 : index
    %32 = vector.load %arg5[%c20, %c0_44] : memref<102x16xbf16, #tpu.memory_space<vmem>>, vector<80x16xbf16>
    %c21_45 = arith.constant 21 : index
    %c0_46 = arith.constant 0 : index
    %33 = vector.load %arg5[%c21_45, %c0_46] : memref<102x16xbf16, #tpu.memory_space<vmem>>, vector<80x16xbf16>
    %c22 = arith.constant 22 : index
    %c0_47 = arith.constant 0 : index
    %34 = vector.load %arg5[%c22, %c0_47] : memref<102x16xbf16, #tpu.memory_space<vmem>>, vector<80x16xbf16>
    %35 = tpu.concatenate %26, %27, %28, %29, %30, %31, %32, %33, %34 in 1 : vector<80x16xbf16>, vector<80x16xbf16>, vector<80x16xbf16>, vector<80x16xbf16>, vector<80x16xbf16>, vector<80x16xbf16>, vector<80x16xbf16>, vector<80x16xbf16>, vector<80x16xbf16> -> vector<80x144xbf16>
    %c0_48 = arith.constant 0 : index
    %c0_49 = arith.constant 0 : index
    %36 = vector.load %arg2[%c0_48, %c0_49] : memref<144x32xbf16, #tpu.memory_space<vmem>>, vector<144x32xbf16>
    %cst_50 = arith.constant dense<0.000000e+00> : vector<80x32xf32>
    %37 = tpu.matmul %35, %36, %cst_50 {dimension_numbers = #tpu.dot_dimension_numbers<[1], [0], [0], [1], [0, 0, 1, 1], [], []>} : vector<80x144xbf16>, vector<144x32xbf16>, vector<80x32xf32> -> vector<80x32xf32>
    %c0_51 = arith.constant 0 : index
    %c0_52 = arith.constant 0 : index
    %38 = vector.load %arg3[%c0_51, %c0_52] : memref<1x32xf32, #tpu.memory_space<vmem>>, vector<1x32xf32>
    %39 = vector.broadcast %38 : vector<1x32xf32> to vector<80x32xf32>
    %40 = arith.addf %37, %39 : vector<80x32xf32>
    %cst_53 = arith.constant 0.000000e+00 : f32
    %41 = vector.broadcast %cst_53 : f32 to vector<80x32xf32>
    %42 = arith.maximumf %40, %41 : vector<80x32xf32>
    %43 = vector.shape_cast %42 : vector<80x32xf32> to vector<8x10x32xf32>
    %44 = vector.extract_strided_slice %43 {offsets = [0, 0, 0], sizes = [8, 8, 32], strides = [1, 1, 1]} : vector<8x10x32xf32> to vector<8x8x32xf32>
    %45 = arith.truncf %44 : vector<8x8x32xf32> to vector<8x8x32xbf16>
    %c0_54 = arith.constant 0 : index
    %c0_55 = arith.constant 0 : index
    %c0_56 = arith.constant 0 : index
    %c0_57 = arith.constant 0 : index
    %46 = vector.load %arg4[%c0_54, %c0_55, %c0_56, %c0_57] : memref<1x8x8x32xbf16, #tpu.memory_space<vmem>>, vector<1x8x8x32xbf16>
    %47 = vector.shape_cast %46 : vector<1x8x8x32xbf16> to vector<8x8x32xbf16>
    %48 = vector.shape_cast %45 : vector<8x8x32xbf16> to vector<1x8x8x32xbf16>
    tpu.vector_store %arg4[%c0_54, %c0_55, %c0_56, %c0_57], %48 {strides = array<i32>} : memref<1x8x8x32xbf16, #tpu.memory_space<vmem>>, vector<1x8x8x32xbf16>,
    return
  }
  func.func @transform_0(%arg0: i32) -> (i32, i32, i32, i32) {
    %c0_i32 = arith.constant 0 : i32
    %c0_i32_0 = arith.constant 0 : i32
    %c0_i32_1 = arith.constant 0 : i32
    %c0_i32_2 = arith.constant 0 : i32
    return %arg0, %c0_i32, %c0_i32_0, %c0_i32_1 : i32, i32, i32, i32
  }
  func.func @transform_1(%arg0: i32) -> (i32, i32) {
    %c0_i32 = arith.constant 0 : i32
    %c0_i32_0 = arith.constant 0 : i32
    %c0_i32_1 = arith.constant 0 : i32
    return %c0_i32, %c0_i32_0 : i32, i32
  }
  func.func @transform_2(%arg0: i32) -> (i32, i32) {
    %c0_i32 = arith.constant 0 : i32
    %c0_i32_0 = arith.constant 0 : i32
    %c0_i32_1 = arith.constant 0 : i32
    return %c0_i32, %c0_i32_0 : i32, i32
  }
  func.func @transform_3(%arg0: i32) -> (i32, i32, i32, i32) {
    %c0_i32 = arith.constant 0 : i32
    %c0_i32_0 = arith.constant 0 : i32
    %c0_i32_1 = arith.constant 0 : i32
    %c0_i32_2 = arith.constant 0 : i32
    return %arg0, %c0_i32, %c0_i32_0, %c0_i32_1 : i32, i32, i32, i32
  }
}

module attributes {stable_mosaic.version = 11 : i64} {
  func.func @conv3x3_kernel(%arg0: i32, %arg1: memref<1x8x8x32xbf16, #tpu.memory_space<vmem>>, %arg2: memref<288x32xbf16, #tpu.memory_space<vmem>>, %arg3: memref<1x32xf32, #tpu.memory_space<vmem>>, %arg4: memref<1x4x4x32xbf16, #tpu.memory_space<vmem>>, %arg5: memref<102x32xbf16, #tpu.memory_space<vmem>>) attributes {dimension_semantics = [#tpu.dimension_semantics<parallel>], iteration_bounds = array<i64: 2>, scalar_prefetch = 0 : i64, scratch_operands = 1 : i64, tpu.core_type = #tpu.core_type<tc>, window_params = [{transform_indices = @transform_0, window_bounds = array<i64: 1, 8, 8, 32>}, {pipeline_mode = #tpu.pipeline_mode<synchronous>, transform_indices = @transform_1, window_bounds = array<i64: 288, 32>}, {pipeline_mode = #tpu.pipeline_mode<synchronous>, transform_indices = @transform_2, window_bounds = array<i64: 1, 32>}, {transform_indices = @transform_3, window_bounds = array<i64: 1, 4, 4, 32>}]} {
    %cst = arith.constant 0.000000e+00 : bf16
    %0 = vector.broadcast %cst : bf16 to vector<102x32xbf16>
    %c0 = arith.constant 0 : index
    %c0_0 = arith.constant 0 : index
    %1 = vector.load %arg5[%c0, %c0_0] : memref<102x32xbf16, #tpu.memory_space<vmem>>, vector<102x32xbf16>
    tpu.vector_store %arg5[%c0, %c0_0], %0 {strides = array<i32>} : memref<102x32xbf16, #tpu.memory_space<vmem>>, vector<102x32xbf16>,
    %c0_1 = arith.constant 0 : index
    %c0_2 = arith.constant 0 : index
    %c0_3 = arith.constant 0 : index
    %c0_4 = arith.constant 0 : index
    %2 = vector.load %arg1[%c0_1, %c0_2, %c0_3, %c0_4] : memref<1x8x8x32xbf16, #tpu.memory_space<vmem>>, vector<1x1x8x32xbf16>
    %3 = vector.shape_cast %2 : vector<1x1x8x32xbf16> to vector<8x32xbf16>
    %c11 = arith.constant 11 : index
    %c0_5 = arith.constant 0 : index
    %4 = vector.load %arg5[%c11, %c0_5] : memref<102x32xbf16, #tpu.memory_space<vmem>>, vector<8x32xbf16>
    tpu.vector_store %arg5[%c11, %c0_5], %3 {strides = array<i32>} : memref<102x32xbf16, #tpu.memory_space<vmem>>, vector<8x32xbf16>,
    %c0_6 = arith.constant 0 : index
    %c1 = arith.constant 1 : index
    %c0_7 = arith.constant 0 : index
    %c0_8 = arith.constant 0 : index
    %5 = vector.load %arg1[%c0_6, %c1, %c0_7, %c0_8] : memref<1x8x8x32xbf16, #tpu.memory_space<vmem>>, vector<1x1x8x32xbf16>
    %6 = vector.shape_cast %5 : vector<1x1x8x32xbf16> to vector<8x32xbf16>
    %c21 = arith.constant 21 : index
    %c0_9 = arith.constant 0 : index
    %7 = vector.load %arg5[%c21, %c0_9] : memref<102x32xbf16, #tpu.memory_space<vmem>>, vector<8x32xbf16>
    tpu.vector_store %arg5[%c21, %c0_9], %6 {strides = array<i32>} : memref<102x32xbf16, #tpu.memory_space<vmem>>, vector<8x32xbf16>,
    %c0_10 = arith.constant 0 : index
    %c2 = arith.constant 2 : index
    %c0_11 = arith.constant 0 : index
    %c0_12 = arith.constant 0 : index
    %8 = vector.load %arg1[%c0_10, %c2, %c0_11, %c0_12] : memref<1x8x8x32xbf16, #tpu.memory_space<vmem>>, vector<1x1x8x32xbf16>
    %9 = vector.shape_cast %8 : vector<1x1x8x32xbf16> to vector<8x32xbf16>
    %c31 = arith.constant 31 : index
    %c0_13 = arith.constant 0 : index
    %10 = vector.load %arg5[%c31, %c0_13] : memref<102x32xbf16, #tpu.memory_space<vmem>>, vector<8x32xbf16>
    tpu.vector_store %arg5[%c31, %c0_13], %9 {strides = array<i32>} : memref<102x32xbf16, #tpu.memory_space<vmem>>, vector<8x32xbf16>,
    %c0_14 = arith.constant 0 : index
    %c3 = arith.constant 3 : index
    %c0_15 = arith.constant 0 : index
    %c0_16 = arith.constant 0 : index
    %11 = vector.load %arg1[%c0_14, %c3, %c0_15, %c0_16] : memref<1x8x8x32xbf16, #tpu.memory_space<vmem>>, vector<1x1x8x32xbf16>
    %12 = vector.shape_cast %11 : vector<1x1x8x32xbf16> to vector<8x32xbf16>
    %c41 = arith.constant 41 : index
    %c0_17 = arith.constant 0 : index
    %13 = vector.load %arg5[%c41, %c0_17] : memref<102x32xbf16, #tpu.memory_space<vmem>>, vector<8x32xbf16>
    tpu.vector_store %arg5[%c41, %c0_17], %12 {strides = array<i32>} : memref<102x32xbf16, #tpu.memory_space<vmem>>, vector<8x32xbf16>,
    %c0_18 = arith.constant 0 : index
    %c4 = arith.constant 4 : index
    %c0_19 = arith.constant 0 : index
    %c0_20 = arith.constant 0 : index
    %14 = vector.load %arg1[%c0_18, %c4, %c0_19, %c0_20] : memref<1x8x8x32xbf16, #tpu.memory_space<vmem>>, vector<1x1x8x32xbf16>
    %15 = vector.shape_cast %14 : vector<1x1x8x32xbf16> to vector<8x32xbf16>
    %c51 = arith.constant 51 : index
    %c0_21 = arith.constant 0 : index
    %16 = vector.load %arg5[%c51, %c0_21] : memref<102x32xbf16, #tpu.memory_space<vmem>>, vector<8x32xbf16>
    tpu.vector_store %arg5[%c51, %c0_21], %15 {strides = array<i32>} : memref<102x32xbf16, #tpu.memory_space<vmem>>, vector<8x32xbf16>,
    %c0_22 = arith.constant 0 : index
    %c5 = arith.constant 5 : index
    %c0_23 = arith.constant 0 : index
    %c0_24 = arith.constant 0 : index
    %17 = vector.load %arg1[%c0_22, %c5, %c0_23, %c0_24] : memref<1x8x8x32xbf16, #tpu.memory_space<vmem>>, vector<1x1x8x32xbf16>
    %18 = vector.shape_cast %17 : vector<1x1x8x32xbf16> to vector<8x32xbf16>
    %c61 = arith.constant 61 : index
    %c0_25 = arith.constant 0 : index
    %19 = vector.load %arg5[%c61, %c0_25] : memref<102x32xbf16, #tpu.memory_space<vmem>>, vector<8x32xbf16>
    tpu.vector_store %arg5[%c61, %c0_25], %18 {strides = array<i32>} : memref<102x32xbf16, #tpu.memory_space<vmem>>, vector<8x32xbf16>,
    %c0_26 = arith.constant 0 : index
    %c6 = arith.constant 6 : index
    %c0_27 = arith.constant 0 : index
    %c0_28 = arith.constant 0 : index
    %20 = vector.load %arg1[%c0_26, %c6, %c0_27, %c0_28] : memref<1x8x8x32xbf16, #tpu.memory_space<vmem>>, vector<1x1x8x32xbf16>
    %21 = vector.shape_cast %20 : vector<1x1x8x32xbf16> to vector<8x32xbf16>
    %c71 = arith.constant 71 : index
    %c0_29 = arith.constant 0 : index
    %22 = vector.load %arg5[%c71, %c0_29] : memref<102x32xbf16, #tpu.memory_space<vmem>>, vector<8x32xbf16>
    tpu.vector_store %arg5[%c71, %c0_29], %21 {strides = array<i32>} : memref<102x32xbf16, #tpu.memory_space<vmem>>, vector<8x32xbf16>,
    %c0_30 = arith.constant 0 : index
    %c7 = arith.constant 7 : index
    %c0_31 = arith.constant 0 : index
    %c0_32 = arith.constant 0 : index
    %23 = vector.load %arg1[%c0_30, %c7, %c0_31, %c0_32] : memref<1x8x8x32xbf16, #tpu.memory_space<vmem>>, vector<1x1x8x32xbf16>
    %24 = vector.shape_cast %23 : vector<1x1x8x32xbf16> to vector<8x32xbf16>
    %c81 = arith.constant 81 : index
    %c0_33 = arith.constant 0 : index
    %25 = vector.load %arg5[%c81, %c0_33] : memref<102x32xbf16, #tpu.memory_space<vmem>>, vector<8x32xbf16>
    tpu.vector_store %arg5[%c81, %c0_33], %24 {strides = array<i32>} : memref<102x32xbf16, #tpu.memory_space<vmem>>, vector<8x32xbf16>,
    %c0_34 = arith.constant 0 : index
    %c0_35 = arith.constant 0 : index
    %26 = vector.load %arg5[%c0_34, %c0_35] : memref<102x32xbf16, #tpu.memory_space<vmem>>, vector<80x32xbf16>
    %c1_36 = arith.constant 1 : index
    %c0_37 = arith.constant 0 : index
    %27 = vector.load %arg5[%c1_36, %c0_37] : memref<102x32xbf16, #tpu.memory_space<vmem>>, vector<80x32xbf16>
    %c2_38 = arith.constant 2 : index
    %c0_39 = arith.constant 0 : index
    %28 = vector.load %arg5[%c2_38, %c0_39] : memref<102x32xbf16, #tpu.memory_space<vmem>>, vector<80x32xbf16>
    %c10 = arith.constant 10 : index
    %c0_40 = arith.constant 0 : index
    %29 = vector.load %arg5[%c10, %c0_40] : memref<102x32xbf16, #tpu.memory_space<vmem>>, vector<80x32xbf16>
    %c11_41 = arith.constant 11 : index
    %c0_42 = arith.constant 0 : index
    %30 = vector.load %arg5[%c11_41, %c0_42] : memref<102x32xbf16, #tpu.memory_space<vmem>>, vector<80x32xbf16>
    %c12 = arith.constant 12 : index
    %c0_43 = arith.constant 0 : index
    %31 = vector.load %arg5[%c12, %c0_43] : memref<102x32xbf16, #tpu.memory_space<vmem>>, vector<80x32xbf16>
    %c20 = arith.constant 20 : index
    %c0_44 = arith.constant 0 : index
    %32 = vector.load %arg5[%c20, %c0_44] : memref<102x32xbf16, #tpu.memory_space<vmem>>, vector<80x32xbf16>
    %c21_45 = arith.constant 21 : index
    %c0_46 = arith.constant 0 : index
    %33 = vector.load %arg5[%c21_45, %c0_46] : memref<102x32xbf16, #tpu.memory_space<vmem>>, vector<80x32xbf16>
    %c22 = arith.constant 22 : index
    %c0_47 = arith.constant 0 : index
    %34 = vector.load %arg5[%c22, %c0_47] : memref<102x32xbf16, #tpu.memory_space<vmem>>, vector<80x32xbf16>
    %35 = tpu.concatenate %26, %27, %28, %29, %30, %31, %32, %33, %34 in 1 : vector<80x32xbf16>, vector<80x32xbf16>, vector<80x32xbf16>, vector<80x32xbf16>, vector<80x32xbf16>, vector<80x32xbf16>, vector<80x32xbf16>, vector<80x32xbf16>, vector<80x32xbf16> -> vector<80x288xbf16>
    %c0_48 = arith.constant 0 : index
    %c0_49 = arith.constant 0 : index
    %36 = vector.load %arg2[%c0_48, %c0_49] : memref<288x32xbf16, #tpu.memory_space<vmem>>, vector<288x32xbf16>
    %cst_50 = arith.constant dense<0.000000e+00> : vector<80x32xf32>
    %37 = tpu.matmul %35, %36, %cst_50 {dimension_numbers = #tpu.dot_dimension_numbers<[1], [0], [0], [1], [0, 0, 1, 1], [], []>} : vector<80x288xbf16>, vector<288x32xbf16>, vector<80x32xf32> -> vector<80x32xf32>
    %c0_51 = arith.constant 0 : index
    %c0_52 = arith.constant 0 : index
    %38 = vector.load %arg3[%c0_51, %c0_52] : memref<1x32xf32, #tpu.memory_space<vmem>>, vector<1x32xf32>
    %39 = vector.broadcast %38 : vector<1x32xf32> to vector<80x32xf32>
    %40 = arith.addf %37, %39 : vector<80x32xf32>
    %cst_53 = arith.constant 0.000000e+00 : f32
    %41 = vector.broadcast %cst_53 : f32 to vector<80x32xf32>
    %42 = arith.maximumf %40, %41 : vector<80x32xf32>
    %43 = vector.shape_cast %42 : vector<80x32xf32> to vector<8x10x32xf32>
    %44 = vector.shape_cast %43 : vector<8x10x32xf32> to vector<8x5x2x32xf32>
    %45 = vector.extract_strided_slice %44 {offsets = [0, 0, 0, 0], sizes = [8, 5, 1, 32], strides = [1, 1, 1, 1]} : vector<8x5x2x32xf32> to vector<8x5x1x32xf32>
    %46 = vector.shape_cast %45 : vector<8x5x1x32xf32> to vector<8x5x32xf32>
    %47 = vector.extract_strided_slice %44 {offsets = [0, 0, 1, 0], sizes = [8, 5, 1, 32], strides = [1, 1, 1, 1]} : vector<8x5x2x32xf32> to vector<8x5x1x32xf32>
    %48 = vector.shape_cast %47 : vector<8x5x1x32xf32> to vector<8x5x32xf32>
    %49 = arith.maximumf %46, %48 : vector<8x5x32xf32>
    %50 = vector.extract_strided_slice %49 {offsets = [0, 0, 0], sizes = [8, 4, 32], strides = [1, 1, 1]} : vector<8x5x32xf32> to vector<8x4x32xf32>
    %51 = vector.shape_cast %50 : vector<8x4x32xf32> to vector<4x2x4x32xf32>
    %52 = vector.extract_strided_slice %51 {offsets = [0, 0, 0, 0], sizes = [4, 1, 4, 32], strides = [1, 1, 1, 1]} : vector<4x2x4x32xf32> to vector<4x1x4x32xf32>
    %53 = vector.shape_cast %52 : vector<4x1x4x32xf32> to vector<4x4x32xf32>
    %54 = vector.extract_strided_slice %51 {offsets = [0, 1, 0, 0], sizes = [4, 1, 4, 32], strides = [1, 1, 1, 1]} : vector<4x2x4x32xf32> to vector<4x1x4x32xf32>
    %55 = vector.shape_cast %54 : vector<4x1x4x32xf32> to vector<4x4x32xf32>
    %56 = arith.maximumf %53, %55 : vector<4x4x32xf32>
    %57 = arith.truncf %56 : vector<4x4x32xf32> to vector<4x4x32xbf16>
    %c0_54 = arith.constant 0 : index
    %c0_55 = arith.constant 0 : index
    %c0_56 = arith.constant 0 : index
    %c0_57 = arith.constant 0 : index
    %58 = vector.load %arg4[%c0_54, %c0_55, %c0_56, %c0_57] : memref<1x4x4x32xbf16, #tpu.memory_space<vmem>>, vector<1x4x4x32xbf16>
    %59 = vector.shape_cast %58 : vector<1x4x4x32xbf16> to vector<4x4x32xbf16>
    %60 = vector.shape_cast %57 : vector<4x4x32xbf16> to vector<1x4x4x32xbf16>
    tpu.vector_store %arg4[%c0_54, %c0_55, %c0_56, %c0_57], %60 {strides = array<i32>} : memref<1x4x4x32xbf16, #tpu.memory_space<vmem>>, vector<1x4x4x32xbf16>,
    return
  }
  func.func @transform_0(%arg0: i32) -> (i32, i32, i32, i32) {
    %c0_i32 = arith.constant 0 : i32
    %c0_i32_0 = arith.constant 0 : i32
    %c0_i32_1 = arith.constant 0 : i32
    %c0_i32_2 = arith.constant 0 : i32
    return %arg0, %c0_i32, %c0_i32_0, %c0_i32_1 : i32, i32, i32, i32
  }
  func.func @transform_1(%arg0: i32) -> (i32, i32) {
    %c0_i32 = arith.constant 0 : i32
    %c0_i32_0 = arith.constant 0 : i32
    %c0_i32_1 = arith.constant 0 : i32
    return %c0_i32, %c0_i32_0 : i32, i32
  }
  func.func @transform_2(%arg0: i32) -> (i32, i32) {
    %c0_i32 = arith.constant 0 : i32
    %c0_i32_0 = arith.constant 0 : i32
    %c0_i32_1 = arith.constant 0 : i32
    return %c0_i32, %c0_i32_0 : i32, i32
  }
  func.func @transform_3(%arg0: i32) -> (i32, i32, i32, i32) {
    %c0_i32 = arith.constant 0 : i32
    %c0_i32_0 = arith.constant 0 : i32
    %c0_i32_1 = arith.constant 0 : i32
    %c0_i32_2 = arith.constant 0 : i32
    return %arg0, %c0_i32, %c0_i32_0, %c0_i32_1 : i32, i32, i32, i32
  }
}

</mosaic_0001>

<bundles_post_ra>
// kernel: _lambda_.4
= control target key start
LH: loop header
LB: loop body
LE: loop exit
PB: predicated region body
PF: predicated region fallthrough
CT: control target
= control target key end

     0   :  { %s1511_s12 = smov 0   ;;  %s2082_s0 = inlined_call_operand.vmem [shape: bf16[2,8,8,16], index: 0, kind: input, shape index: {}]   ;;  %s2083_s1 = inlined_call_operand.vmem [shape: bf16[144,32], index: 1, kind: input, shape index: {}]   ;;  %s2084_s2 = inlined_call_operand.vmem [shape: f32[1,32], index: 2, kind: input, shape index: {}]   ;;  %s2085_s3 = inlined_call_operand.vmem [shape: bf16[2,8,8,32], index: 3, kind: output, shape index: {}]  }
   0x1 LB: > { %s1362_s13 = sadd.s32 4294967295, %s1480_s12   ;;  %p1366_p0 = scmp.ge.s32.totalorder %s1480_s12, 1  ;;  %s1480_s12 = sphi %s1511_s12, %s13_s12  }
   0x2   : > { %p137_p1 = scmp.lt.s32.totalorder %s1480_s12, 3 }
   0x4   : > { %p138_p2 = pnand %p1366_p0, %p137_p1 }
   0x5   : > { %p1519_p3 = scmp.lt.s32.totalorder (!%p138_p2), %s1362_s13, 1  ;;  %vm172_vm0 = vcmask (!%p138_p2), 125952   ;;  %vm185_vm1 = vcmask (!%p138_p2), 124928   ;;  %v1482_v0 = vmov (!%p138_p2), 0   ;;  %vm199_vm2 = vcmask (!%p138_p2), 125953   ;;  %v1465_v1 = vld [vmem:[%s2083_s1] sm:$0xff] (!%p138_p2)  }
   0x6   : > { %141 = sbr.rel (%p138_p2) target bundleno = 457 (0x1c9), region = 32  ;;  %174 = vst.msk [vmem:[#allocation2 + $0x4] sm:$0xf] (!%p138_p2), %vm172_vm0, %v1482_v0  ;;  %175 = vst.msk [vmem:[#allocation2 + $0x8] sm:$0xf] (!%p138_p2), %vm172_vm0, %v1482_v0  ;;  %887 = vmatprep.subr.bf16.mxu0 (!%p138_p2), %v1482_v0  ;;  %1417 = vmatprep.subr.bf16.mxu1 (!%p138_p2), %v1482_v0  ;;  %vm205_vm5 = vcmask (!%p138_p2), 123904  }
   0x7   : > { %176 = vst.msk [vmem:[#allocation2 + $0xc] sm:$0xf] (!%p138_p2), %vm172_vm0, %v1482_v0  ;;  %177 = vst.msk [vmem:[#allocation2 + $0x10] sm:$0xf] (!%p138_p2), %vm172_vm0, %v1482_v0  ;;  %vm200_vm3 = vsmask.f32 (!%p138_p2), 7942  ;;  %888 = vmatpush1.bf16.msra.mxu0 (!%p138_p2), %v1465_v1  ;;  %1426 = vmatpush1.bf16.msra.mxu1 (!%p138_p2), %v1465_v1 }
   0x8   : > { %178 = vst.msk [vmem:[#allocation2 + $0x14] sm:$0xf] (!%p138_p2), %vm172_vm0, %v1482_v0  ;;  %179 = vst.msk [vmem:[#allocation2 + $0x18] sm:$0xf] (!%p138_p2), %vm172_vm0, %v1482_v0  ;;  %vm206_vm4 = vsmask.f32 (!%p138_p2), 1280  ;;  %889 = vmatprep.subr.bf16.mxu0 (!%p138_p2), %v1482_v0  ;;  %1418 = vmatprep.subr.bf16.mxu1 (!%p138_p2), %v1482_v0 }
   0x9   : > { %180 = vst.msk [vmem:[#allocation2 + $0x1c] sm:$0xf] (!%p138_p2), %vm172_vm0, %v1482_v0  ;;  %181 = vst.msk [vmem:[#allocation2 + $0x20] sm:$0xf] (!%p138_p2), %vm172_vm0, %v1482_v0  ;;  %vm224_vm6 = vcmask (!%p138_p2), 125954   ;;  %vm249_vm13 = vcmask (!%p138_p2), 125955  }
   0xa   : > { %182 = vst.msk [vmem:[#allocation2 + $0x24] sm:$0xf] (!%p138_p2), %vm172_vm0, %v1482_v0  ;;  %173 = vst.msk [vmem:[#allocation2] sm:$0xf] (!%p138_p2), %vm172_vm0, %v1482_v0  ;;  %vm225_vm7 = vsmask.f32 (!%p138_p2), 7946 }
   0xb   : > { %183 = vst.msk [vmem:[#allocation2 + $0x28] sm:$0xf] (!%p138_p2), %vm172_vm0, %v1482_v0  ;;  %184 = vst.msk [vmem:[#allocation2 + $0x2c] sm:$0xf] (!%p138_p2), %vm172_vm0, %v1482_v0  ;;  %vm231_vm8 = vsmask.f32 (!%p138_p2), 2304 }
   0xc   : > { %186 = vst.msk [vmem:[#allocation2 + $0x30] sm:$0x7] (!%p138_p2), %vm185_vm1, %v1482_v0  ;;  %vm250_vm9 = vsmask.f32 (!%p138_p2), 7950  ;;  %vm256_vm10 = vsmask.f32 (!%p138_p2), 3328  ;;  %vm1573_vm12 = vmand (!%p138_p2), %vm199_vm2, %vm200_vm3 }
   0xd   : > { %s2105_s13 = smov (!%p1519_p3, %s1362_s13), 1  ;;  %vm278_vm14 = vcmask 122880   ;;  %vm279_vm15 = vsmask.f32 256  ;;  %v202_v13 = vld [vmem:[#allocation2 + $0x4] sm:$0xe]  ;;  %vm1580_vm11 = vmand %vm205_vm5, %vm206_vm4 }
   0xe   : > { %s1415_s15 = sshll.u32 %s2105_s13, 5  ;;  %v208_v17 = vld [vmem:[#allocation2 + $0x8] sm:$0x3]  ;;  %vm1586_vm2 = vmand %vm224_vm6, %vm225_vm7  ;;  %v227_v19 = vld [vmem:[#allocation2 + $0x8] sm:$0xc]  ;;  %vm467_vm7 = vcmask 1046528  }
   0xf   : > { %s1564_s20 = scalar_lea.vmem %s2082_s0, %s1415_s15  ;;  %vm1592_vm3 = vmand %vm249_vm13, %vm250_vm9  ;;  %v252_v25 = vld [vmem:[#allocation2 + $0xc] sm:$0x8]  ;;  %v233_v30 = vld [vmem:[#allocation2 + $0xc] sm:$0x7]  ;;  %vm2099_vm5 = vsmask.f32 7938  ;;  %s2027_s24 = scalar_lea.vmem %s2085_s3, %s1415_s15 }
  0x10   : > { %v187_v2 = vld [vmem:[%s1564_s20] sm:$0xf]  ;;  %v1371_v3 = vld [vmem:[%s1564_s20 + $0x4] sm:$0xf]  ;;  %v1372_v8 = vld [vmem:[%s1564_s20 + $0x8] sm:$0xf] }
  0x11   : > { %v189_v4 = vshrl.u32 %v187_v2, 16  ;;  %v192_v5 = vshll.u32 %v187_v2, 16  ;;  %v214_v6 = vshrl.u32 %v1371_v3, 16  ;;  %v217_v7 = vshll.u32 %v1371_v3, 16  ;;  %v1373_v10 = vld [vmem:[%s1564_s20 + $0xc] sm:$0xf]  ;;  %vm1599_vm4 = vmand %vm185_vm1, %vm231_vm8 }
  0x12   : > { %v239_v20 = vshll.u32 %v1372_v8, 16  ;;  %v242_v21 = vshrl.u32 %v1372_v8, 16  ;;  %v264_v26 = vshrl.u32 %v1373_v10, 16  ;;  %v267_v27 = vshll.u32 %v1373_v10, 16  ;;  %v1374_v28 = vld [vmem:[%s1564_s20 + $0x10] sm:$0xf]  ;;  %vm1612_vm1 = vmand %vm172_vm0, %vm256_vm10 }
  0x13   : > { %v191_v11 = vrot.slane %v189_v4, 6  ;;  %v194_v12 = vrot.slane %v192_v5, 7  ;;  %v216_v15 = vrot.slane %v214_v6, 5  ;;  %v219_v16 = vrot.slane %v217_v7, 6  ;;  %v1375_v39 = vld [vmem:[%s1564_s20 + $0x14] sm:$0xf]  ;;  %vm1622_vm6 = vmand %vm172_vm0, %vm2099_vm5 }
  0x14   : > { %v241_v31 = vrot.slane %v239_v20, 5  ;;  %v244_v32 = vrot.slane %v242_v21, 4  ;;  %v287_v33 = vshrl.u32 %v1374_v28, 16  ;;  %v290_v34 = vshll.u32 %v1374_v28, 16  ;;  %v258_v43 = vld [vmem:[#allocation2 + $0x10] sm:$0xf]  ;;  %vm1629_vm0 = vmand %vm278_vm14, %vm279_vm15 }
  0x15   : > { %v195_v22 = vor.u32 %v194_v12, %v191_v11  ;;  %v220_v23 = vor.u32 %v219_v16, %v216_v15  ;;  %v266_v44 = vrot.slane %v264_v26, 7  ;;  %v275_v45 = vld [vmem:[#allocation2 + $0x14] sm:$0xf]  ;;  %v297_v51 = vld [vmem:[#allocation2 + $0x18] sm:$0xe]  ;;  %v306_v52 = vshrl.u32 %v1375_v39, 16 }
  0x16   : > { %v245_v40 = vor.u32 %v244_v32, %v241_v31  ;;  %v253_v41 = vsel %vm1592_vm3, %v241_v31, %v252_v25  ;;  %v289_v46 = vrot.slane %v287_v33, 6  ;;  %v292_v50 = vrot.slane %v290_v34, 7  ;;  %v1376_v53 = vld [vmem:[%s1564_s20 + $0x18] sm:$0xf]  ;;  %v300_v57 = vld [vmem:[#allocation2 + $0x1c] sm:$0x3] }
  0x17   : > { %v196_v35 = vrot.slane %v195_v22, 4  ;;  %v203_v36 = vsel %vm1573_vm12, %v195_v22, %v202_v13  ;;  %v221_v37 = vrot.slane %v220_v23, 4  ;;  %v228_v38 = vsel %vm1586_vm2, %v220_v23, %v227_v19  ;;  %254 = vst [vmem:[#allocation2 + $0xc] sm:$0x8] %v253_v41  ;;  %v316_v61 = vld [vmem:[#allocation2 + $0x1c] sm:$0xc] }
  0x18   : > { %204 = vst [vmem:[#allocation2 + $0x4] sm:$0xe] %v203_v36  ;;  %229 = vst [vmem:[#allocation2 + $0x8] sm:$0xc] %v228_v38  ;;  %v246_v54 = vrot.slane %v245_v40, 4  ;;  %v269_v55 = vor.u32 %v267_v27, %v266_v44  ;;  %v270_v56 = vrot.slane %v266_v44, 4  ;;  %v293_v59 = vor.u32 %v292_v50, %v289_v46 }
  0x19   : > { %v209_v47 = vsel %vm1580_vm11, %v196_v35, %v208_v17  ;;  %v234_v48 = vsel %vm1599_vm4, %v221_v37, %v233_v30  ;;  %v309_v58 = vshll.u32 %v1375_v39, 16  ;;  %v308_v60 = vrot.slane %v306_v52, 5  ;;  %v335_v1 = vld [vmem:[#allocation2 + $0x20] sm:$0x8]  ;;  %v281_v7 = vld [vmem:[#allocation2 + $0x18] sm:$0x1] }
  0x1a   : > { %210 = vst [vmem:[#allocation2 + $0x8] sm:$0x3] %v209_v47  ;;  %235 = vst [vmem:[#allocation2 + $0xc] sm:$0x7] %v234_v48  ;;  %v325_v62 = vshll.u32 %v1376_v53, 16  ;;  %v328_v63 = vshrl.u32 %v1376_v53, 16  ;;  %v259_v3 = vsel %vm1612_vm1, %v246_v54, %v258_v43  ;;  %v276_v4 = vsel %vm1622_vm6, %v269_v55, %v275_v45 }
  0x1b   : > { %v311_v5 = vrot.slane %v309_v58, 6  ;;  %v370_v6 = vld [vmem:[#allocation2] sm:$0xe]  ;;  %260 = vst [vmem:[#allocation2 + $0x10] sm:$0xf] %v259_v3  ;;  %v294_v8 = vrot.slane %v293_v59, 4  ;;  %v298_v10 = vsel %vm1573_vm12, %v293_v59, %v297_v51  ;;  %v282_v19 = vsel %vm1629_vm0, %v270_v56, %v281_v7 }
  0x1c   : > { %277 = vst [vmem:[#allocation2 + $0x14] sm:$0xf] %v276_v4  ;;  %v327_v11 = vrot.slane %v325_v62, 5  ;;  %v330_v12 = vrot.slane %v328_v63, 4  ;;  %v1377_v13 = vld [vmem:[%s1564_s20 + $0x1c] sm:$0xf] }
  0x1d   : > { %299 = vst [vmem:[#allocation2 + $0x18] sm:$0xe] %v298_v10  ;;  %v312_v15 = vor.u32 %v311_v5, %v308_v60  ;;  %v319_v16 = vld [vmem:[#allocation2 + $0x20] sm:$0x7]  ;;  %v338_v17 = vld [vmem:[#allocation2 + $0x24] sm:$0xf]  ;;  %v301_v22 = vsel %vm1580_vm11, %v294_v8, %v300_v57 }
  0x1e   : > { %vm592_vm8 = vcmask 1045504   ;;  %v344_v20 = vshrl.u32 %v1377_v13, 16  ;;  %v347_v21 = vshll.u32 %v1377_v13, 16  ;;  %v331_v23 = vor.u32 %v330_v12, %v327_v11  ;;  %283 = vst [vmem:[#allocation2 + $0x18] sm:$0x1] %v282_v19  ;;  %v1466_v14 = vld [vmem:[%s2083_s1 + $0x8] sm:$0xff]  }
  0x1f   : > { %v336_v9 = vsel %vm1592_vm3, %v327_v11, %v335_v1  ;;  %v371_v25 = vld [vmem:[#allocation2 + $0x4] sm:$0xe]  ;;  %v376_v27 = vld [vmem:[#allocation2 + $0x8] sm:$0xc]  ;;  %302 = vst [vmem:[#allocation2 + $0x1c] sm:$0x3] %v301_v22  ;;  %v317_v30 = vsel %vm1586_vm2, %v312_v15, %v316_v61  ;;  %890 = vmatpush1.bf16.msra.mxu0 %v1466_v14  ;;  %1427 = vmatpush1.bf16.msra.mxu1 %v1466_v14 }
  0x20   : > { %v1646_v26 = vld [vmem:[#allocation2 + $0x4] sm:$0xf]  ;;  %v313_v28 = vrot.slane %v312_v15, 4  ;;  %337 = vst [vmem:[#allocation2 + $0x20] sm:$0x8] %v336_v9  ;;  %v332_v24 = vrot.slane %v331_v23, 4  ;;  %891 = vmatprep.subr.bf16.mxu0 %v1482_v0  ;;  %1419 = vmatprep.subr.bf16.mxu1 %v1482_v0 }
  0x21   : > { %v1384_v31 = vcombine.low %v370_v6, %v1646_v26  ;;  %v375_v32 = vld [vmem:[#allocation2 + $0x4] sm:$0xc]  ;;  %318 = vst [vmem:[#allocation2 + $0x1c] sm:$0xc] %v317_v30  ;;  %v361_v33 = vld [vmem:[#allocation2 + $0x8] sm:$0xf] }
  0x22   : > { %v1654_v34 = vld [vmem:[#allocation2 + $0xc] sm:$0xf]  ;;  %v1656_v35 = vrot.slane %v344_v20, 7  ;;  %v320_v36 = vsel %vm1599_vm4, %v313_v28, %v319_v16  ;;  %v1660_v18 = vcombine.low %v371_v25, %v361_v33  ;;  %v339_v39 = vsel %vm1612_vm1, %v332_v24, %v338_v17  ;;  %v353_v29 = vld [vmem:[#allocation2 + $0x28] sm:$0xf]  ;;  %v1467_v44 = vld [vmem:[%s2083_s1 + $0x10] sm:$0xff]  }
  0x23   : > { %v1663_v37 = vcombine.low %v361_v33, %v1654_v34  ;;  %v468_v38 = vrot.slane %v1384_v31, 1  ;;  %321 = vst [vmem:[#allocation2 + $0x20] sm:$0x7] %v320_v36  ;;  %v1668_v40 = vcombine.low %v376_v27, %v1654_v34  ;;  %v1392_v41 = vcombine.low %v375_v32, %v361_v33  ;;  %340 = vst [vmem:[#allocation2 + $0x24] sm:$0xf] %v339_v39  ;;  %s1483_s25 = smov 32  }
  0x24   : > { %v349_v43 = vor.u32 %v347_v21, %v1656_v35  ;;  %v363_v45 = vld [vmem:[#allocation2 + $0x10] sm:$0xf]  ;;  %v364_v46 = vld [vmem:[#allocation2 + $0x14] sm:$0xf]  ;;  %v501_v50 = vrot.slane %v1660_v18, 1  ;;  %892 = vmatpush1.bf16.msra.mxu0 %v1467_v44  ;;  %1428 = vmatpush1.bf16.msra.mxu1 %v1467_v44  ;;  %v527_v62 = vshrl.u32 %v1660_v18, 16 }
  0x25   : > { %v469_v42 = vrot.slane %v1663_v37, 1  ;;  %v1677_v47 = vcombine.low %v363_v45, %v364_v46  ;;  %v1680_v48 = vcombine.low %v1654_v34, %v363_v45  ;;  %v593_v51 = vrot.slane %v1392_v41, 2  ;;  %v359_v52 = vld [vmem:[#allocation2] sm:$0xf]  ;;  %v365_v54 = vld [vmem:[#allocation2 + $0x18] sm:$0xf]  ;;  %893 = vmatprep.subr.bf16.mxu0 %v1482_v0  ;;  %1420 = vmatprep.subr.bf16.mxu1 %v1482_v0 }
  0x26   : > { %v354_v55 = vsel %vm1622_vm6, %v349_v43, %v353_v29  ;;  %v623_v57 = vrot.slane %v1668_v40, 2  ;;  %v1693_v61 = vcombine.low %v364_v46, %v365_v54  ;;  %v530_v63 = vshll.u32 %v1660_v18, 16  ;;  %v1468_v1 = vld [vmem:[%s2083_s1 + $0x18] sm:$0xff]   ;;  %s1484_s28 = smov 48   ;;  %s1485_s29 = smov 80   ;;  %v1469_v15 = vld [vmem:[%s2083_s1 + $0x20] sm:$0xff]  }
  0x27   : > { %v470_v53 = vsel %vm467_vm7, %v468_v38, %v469_v42  ;;  %v502_v56 = vrot.slane %v1680_v48, 1  ;;  %v624_v58 = vrot.slane %v1677_v47, 2  ;;  %v594_v59 = vrot.slane %v1680_v48, 2  ;;  %355 = vst [vmem:[#allocation2 + $0x28] sm:$0xf] %v354_v55  ;;  %s1486_s5 = smov 96  }
  0x28   : > { %479 = vrot.lane.b32.xlu0 %v470_v53, %s1483_s25  ;;  %v366_v60 = vld [vmem:[#allocation2 + $0x1c] sm:$0xf]  ;;  %v471_v49 = vrot.slane %v1677_v47, 1  ;;  %v535_v7 = vshrl.u32 %v1680_v48, 16  ;;  %894 = vmatpush1.bf16.msra.mxu0 %v1468_v1  ;;  %v1710_v8 = vcombine.low %v359_v52, %v1646_v26  ;;  %v538_v13 = vshll.u32 %v1680_v48, 16  ;;  %v1470_v27 = vld [vmem:[%s2083_s1 + $0x28] sm:$0xff]  }
  0x29   : > { %v503_v3 = vsel %vm467_vm7, %v501_v50, %v502_v56  ;;  %v595_v4 = vsel %vm592_vm8, %v593_v51, %v594_v59  ;;  %v1705_v5 = vcombine.low %v365_v54, %v366_v60  ;;  %v625_v10 = vsel %vm592_vm8, %v623_v57, %v624_v58  ;;  %895 = vmatprep.subr.bf16.mxu0 %v1482_v0  ;;  %v1471_v44 = vld [vmem:[%s2083_s1 + $0x30] sm:$0xff]   ;;  %s1487_s17 = smov 64   ;;  %s1488_s18 = smov 16  }
  0x2a   : > { %512 = vrot.lane.b32.xlu1 %v503_v3, %s1484_s28  ;;  %v367_v6 = vld [vmem:[#allocation2 + $0x20] sm:$0xf]  ;;  %v368_v11 = vld [vmem:[#allocation2 + $0x24] sm:$0xf]  ;;  %v472_v19 = vsel %vm467_vm7, %v469_v42, %v471_v49  ;;  %v504_v20 = vrot.slane %v1693_v61, 1  ;;  %1429 = vmatpush1.bf16.msra.mxu1 %v1468_v1  ;;  %v529_v21 = vrot.slane %v527_v62, 1 }
  0x2b   : > { %v1716_v12 = vcombine.low %v366_v60, %v367_v6  ;;  %v1723_v16 = vcombine.low %v367_v6, %v368_v11  ;;  %v473_v17 = vrot.slane %v1705_v5, 1  ;;  %v532_v22 = vrot.slane %v530_v63, 2  ;;  %1421 = vmatprep.subr.bf16.mxu1 %v1482_v0  ;;  %s1489_s19 = smov 112  }
  0x2c   : > { %604 = vrot.lane.b32.xlu0 %v595_v4, %s1485_s29  ;;  %v537_v25 = vrot.slane %v535_v7, 1  ;;  %v540_v26 = vrot.slane %v538_v13, 2  ;;  %896 = vmatpush1.bf16.msra.mxu0 %v1469_v15  ;;  %v596_v31 = vrot.slane %v1693_v61, 2  ;;  %v505_v14 = vsel %vm467_vm7, %v502_v56, %v504_v20  ;;  %v356_v13 = vld [vmem:[#allocation2 + $0x2c] sm:$0x1] }
  0x2d   : > { %v475_v23 = vrot.slane %v1723_v16, 1  ;;  %v506_v30 = vrot.slane %v1716_v12, 1  ;;  %897 = vmatprep.subr.bf16.mxu0 %v1482_v0  ;;  %v418_v24 = vshll.u32 %v1663_v37, 16  ;;  %v413_v33 = vshll.u32 %v1710_v8, 16 }
  0x2e   : > { %634 = vrot.lane.b32.xlu1 %v625_v10, %s1486_s5  ;;  %v1733_v9 = vld [vmem:[#allocation2 + $0x28] sm:$0xf]  ;;  %1430 = vmatpush1.bf16.msra.mxu1 %v1469_v15  ;;  %vm525_vm9 = vsmask.f32 6400  ;;  %v533_v18 = vor.u32 %v532_v22, %v529_v21  ;;  %v626_v38 = vrot.slane %v1705_v5, 2  ;;  %v598_v39 = vrot.slane %v1716_v12, 2 }
  0x2f   : > { %v1740_v28 = vcombine.low %v368_v11, %v1733_v9  ;;  %v476_v32 = vsel %vm467_vm7, %v473_v17, %v475_v23  ;;  %1422 = vmatprep.subr.bf16.mxu1 %v1482_v0  ;;  %v1761_v43 = vor.u32 %v540_v26, %v537_v25  ;;  %v411_v29 = vshrl.u32 %v1710_v8, 16  ;;  %v1473_v25 = vld [vmem:[%s2083_s1 + $0x40] sm:$0xff]  }
  0x30   : > { %481 = vrot.lane.b32.xlu0 %v472_v19, %s1483_s25  ;;  %898 = vmatpush1.bf16.msra.mxu0 %v1470_v27  ;;  %v415_v46 = vrot.slane %v413_v33, 1  ;;  %v430_v42 = vshrl.u32 %v1677_v47, 16  ;;  %v597_v50 = vsel %vm592_vm8, %v594_v59, %v596_v31  ;;  %v420_v51 = vrot.slane %v418_v24, 1  ;;  %v1472_v59 = vld [vmem:[%s2083_s1 + $0x38] sm:$0xff]  }
  0x31   : > { %v508_v36 = vrot.slane %v1740_v28, 1  ;;  %v600_v41 = vrot.slane %v1740_v28, 2  ;;  %899 = vmatprep.subr.bf16.mxu0 %v1482_v0  ;;  %v422_v52 = vshrl.u32 %v1663_v37, 16  ;;  %v426_v53 = vshll.u32 %v1677_v47, 16 }
  0x32   : > { %485 = vrot.lane.b32.xlu1 %v476_v32, %s1483_s25  ;;  %1431 = vmatpush1.bf16.msra.mxu1 %v1470_v27  ;;  %v434_v54 = vshll.u32 %v1705_v5, 16  ;;  %v649_v55 = vshrl.u32 %v1668_v40, 16  ;;  %v652_v56 = vshll.u32 %v1668_v40, 16  ;;  %v542_v48 = vsel %vm525_vm9, %v533_v18, %v1761_v43 }
  0x33   : > { %v509_v45 = vsel %vm467_vm7, %v506_v30, %v508_v36  ;;  %1423 = vmatprep.subr.bf16.mxu1 %v1482_v0  ;;  %v627_v57 = vsel %vm592_vm8, %v624_v58, %v626_v38  ;;  %vm409_vm10 = vsmask.f32 7424  ;;  %v601_v40 = vsel %vm592_vm8, %v598_v39, %v600_v41 }
  0x34   : > { %514 = vrot.lane.b32.xlu0 %v505_v14, %s1484_s28  ;;  %900 = vmatpush1.bf16.msra.mxu0 %v1471_v44  ;;  %v416_v60 = vor.u32 %v415_v46, %v411_v29  ;;  %v656_v62 = vrot.slane %v430_v42, 2  ;;  %v657_v63 = vrot.slane %v426_v53, 3  ;;  %v424_v58 = vor.u32 %v422_v52, %v420_v51 }
  0x35   : > { %901 = vmatprep.subr.bf16.mxu0 %v1482_v0  ;;  %v1806_v1 = vrot.slane %v426_v53, 1  ;;  %v651_v3 = vrot.slane %v649_v55, 2  ;;  %v654_v4 = vrot.slane %v652_v56, 3  ;;  %v1808_v6 = vrot.slane %v434_v54, 1 }
  0x36   : > { %518 = vrot.lane.b32.xlu1 %v509_v45, %s1484_s28  ;;  %1432 = vmatpush1.bf16.msra.mxu1 %v1471_v44  ;;  %v553_v7 = vshrl.u32 %v1716_v12, 16  ;;  %v544_v10 = vshrl.u32 %v1693_v61, 16  ;;  %v547_v11 = vshll.u32 %v1693_v61, 16  ;;  %v556_v15 = vshll.u32 %v1716_v12, 16 }
  0x37   : > { %1424 = vmatprep.subr.bf16.mxu1 %v1482_v0  ;;  %v562_v19 = vshrl.u32 %v1740_v28, 16  ;;  %v565_v21 = vshll.u32 %v1740_v28, 16  ;;  %v350_v22 = vrot.slane %v1656_v35, 4  ;;  %v421_v26 = vsel %vm409_vm10, %v416_v60, %v420_v51 }
  0x38   : > { %606 = vrot.lane.b32.xlu0 %v597_v50, %s1485_s29  ;;  %902 = vmatpush1.bf16.msra.mxu0 %v1472_v59  ;;  %v438_v27 = vshrl.u32 %v1705_v5, 16  ;;  %v442_v32 = vshll.u32 %v1723_v16, 16  ;;  %v658_v14 = vor.u32 %v657_v63, %v656_v62  ;;  %v655_v24 = vor.u32 %v654_v4, %v651_v3 }
  0x39   : > { %903 = vmatprep.subr.bf16.mxu0 %v1482_v0  ;;  %v546_v33 = vrot.slane %v544_v10, 1  ;;  %v549_v18 = vrot.slane %v547_v11, 2  ;;  %v357_v35 = vsel %vm1629_vm0, %v350_v22, %v356_v13  ;;  %vm647_vm11 = vsmask.f32 5376 }
  0x3a   : > { %610 = vrot.lane.b32.xlu1 %v601_v40, %s1485_s29  ;;  %1433 = vmatpush1.bf16.msra.mxu1 %v1472_v59  ;;  %358 = vst [vmem:[#allocation2 + $0x2c] sm:$0x1] %v357_v35  ;;  %v555_v29 = vrot.slane %v553_v7, 1  ;;  %v558_v44 = vrot.slane %v556_v15, 2  ;;  %v564_v45 = vrot.slane %v562_v19, 1  ;;  %v567_v46 = vrot.slane %v565_v21, 2 }
  0x3b   : > { %1425 = vmatprep.subr.bf16.mxu1 %v1482_v0  ;;  %v429_v50 = vsel %vm409_vm10, %v424_v58, %v1806_v1  ;;  %v440_v2 = vor.u32 %v438_v27, %v1808_v6  ;;  %v444_v51 = vrot.slane %v442_v32, 1  ;;  %v659_v52 = vsel %vm647_vm11, %v655_v24, %v658_v14  ;;  %v1460_v10 = vld [vmem:[#allocation2 + $0x28] ss:$0 sps:$4 sm:$0x11]  }
  0x3c   : > { %636 = vrot.lane.b32.xlu0 %v627_v57, %s1486_s5  ;;  %904 = vmatpush1.bf16.msra.mxu0 %v1473_v25  ;;  %v1836_v0 = vor.u32 %v549_v18, %v546_v33  ;;  %v660_v53 = vrot.slane %v438_v27, 2  ;;  %v661_v55 = vrot.slane %v434_v54, 3  ;;  %v1839_v56 = vor.u32 %v558_v44, %v555_v29  ;;  %v380_v57 = vld [vmem:[#allocation2 + $0x8] sm:$0x8] }
  0x3d   : > { %v445_v59 = vsel %vm409_vm10, %v440_v2, %v444_v51  ;;  %v446_v40 = vshrl.u32 %v1723_v16, 16  ;;  %v1397_v58 = vcombine.low %v380_v57, %v1654_v34  ;;  %v628_v4 = vrot.slane %v1723_v16, 2 }
  0x3e   : > { %579 = vrot.lane.b32.xlu1 %v542_v48, %s1487_s17  ;;  %1434 = vmatpush1.bf16.msra.mxu1 %v1473_v25  ;;  %v1841_v48 = vor.u32 %v567_v46, %v564_v45  ;;  %v551_v60 = vsel %vm525_vm9, %v1761_v43, %v1836_v0  ;;  %v1849_v62 = vor.u32 %v661_v55, %v660_v53  ;;  %v665_v7 = vrot.slane %v442_v32, 3 }
  0x3f   : > { %v664_v11 = vrot.slane %v446_v40, 2  ;;  %v432_v15 = vor.u32 %v430_v42, %v1806_v1  ;;  %v700_v22 = vrot.slane %v1397_v58, 3  ;;  %v450_v25 = vshll.u32 %v1460_v10, 16 }
  0x40   : > { %454 = vrot.lane.b32.xlu0 %v421_v26, %s1488_s18  ;;  %v569_v3 = vsel %vm525_vm9, %v1839_v56, %v1841_v48  ;;  %v663_v34 = vsel %vm647_vm11, %v658_v14, %v1849_v62  ;;  %vm699_vm12 = vcmask 1044480   ;;  %v701_v42 = vrot.slane %v1677_v47, 3 }
  0x41   : > { %v377_v54 = vld [vmem:[#allocation2 + $0x2c] sm:$0xf]  ;;  %v666_v27 = vor.u32 %v665_v7, %v664_v11  ;;  %v437_v1 = vsel %vm409_vm10, %v432_v15, %v1808_v6  ;;  %v703_v14 = vrot.slane %v1705_v5, 3  ;;  %vm711_vm13 = vcmask 130048  }
  0x42   : > { %456 = vrot.lane.b32.xlu1 %v429_v50, %s1488_s18  ;;  %v1852_v63 = vcombine.low %v1733_v9, %v377_v54  ;;  %v702_v24 = vsel %vm699_vm12, %v700_v22, %v701_v42  ;;  %v705_v33 = vrot.slane %v1723_v16, 3  ;;  %v448_v6 = vor.u32 %v446_v40, %v444_v51  ;;  %v1462_v45 = vld [vmem:[#allocation2 + $0x2c] ss:$0 sps:$4 sm:$0x33]  }
  0x43   : > { %1408 = vmatprep.mubr.msk.bf16.mxu0 %vm711_vm13, %v702_v24  ;;  %v1887_v18 = vsel %vm699_vm12, %v701_v42, %v703_v14  ;;  %v452_v44 = vrot.slane %v450_v25, 1  ;;  %v474_v46 = vsel %vm467_vm7, %v471_v49, %v473_v17  ;;  %v1461_v51 = vld [vmem:[#allocation2 + $0x2c] ss:$0 sps:$4 sm:$0x11]   ;;  %v571_v53 = vshrl.u32 %v1462_v45, 16 }
  0x44   : > { %686 = vrot.lane.b32.xlu0 %v659_v52, %s1489_s19  ;;  %v630_v43 = vrot.slane %v1852_v63, 2  ;;  %v669_v9 = vshrl.u32 %v1852_v63, 16  ;;  %v672_v13 = vshll.u32 %v1852_v63, 16  ;;  %v707_v35 = vrot.slane %v1852_v63, 3 }
  0x45   : > { %v453_v2 = vsel %vm409_vm10, %v448_v6, %v452_v44  ;;  %v477_v52 = vrot.slane %v1460_v10, 1  ;;  %v574_v55 = vshll.u32 %v1462_v45, 16  ;;  %v507_v49 = vsel %vm467_vm7, %v504_v20, %v506_v30  ;;  %v1464_v54 = vld [vmem:[#allocation2 + $0x30] ss:$0 sps:$4 sm:$0x77]  }
  0x46   : > { %460 = vrot.lane.b32.xlu1 %v445_v59, %s1488_s18  ;;  %v671_v19 = vrot.slane %v669_v9, 2  ;;  %v674_v21 = vrot.slane %v672_v13, 3  ;;  %v631_v26 = vsel %vm592_vm8, %v628_v4, %v630_v43  ;;  %v708_v50 = vsel %vm699_vm12, %v705_v33, %v707_v35  ;;  %v1463_v10 = vld [vmem:[#allocation2 + $0x30] ss:$0 sps:$4 sm:$0x33]  }
  0x47   : > { %1411 = vmatprep.mubr.msk.bf16.mxu1 %vm711_vm13, %v708_v50  ;;  %v478_v17 = vsel %vm467_vm7, %v475_v23, %v477_v52  ;;  %v510_v57 = vrot.slane %v1461_v51, 1  ;;  %v573_v59 = vrot.slane %v571_v53, 1  ;;  %v576_v40 = vrot.slane %v574_v55, 2 }
  0x48   : > { %581 = vrot.lane.b32.xlu0 %v551_v60, %s1487_s17  ;;  %v1876_v32 = vor.u32 %v674_v21, %v671_v19  ;;  %v560_v60 = vsel %vm525_vm9, %v1836_v0, %v1839_v56  ;;  %v599_v23 = vsel %vm592_vm8, %v596_v31, %v598_v39  ;;  %v678_v58 = vshrl.u32 %v1464_v54, 16 }
  0x49   : > { %v511_v20 = vsel %vm467_vm7, %v508_v36, %v510_v57  ;;  %v577_v30 = vor.u32 %v576_v40, %v573_v59  ;;  %v1927_v0 = vsel %vm699_vm12, %v703_v14, %v705_v33  ;;  %v709_v56 = vrot.slane %v1464_v54, 3 }
  0x4a   : > { %585 = vrot.lane.b32.xlu1 %v569_v3, %s1487_s17  ;;  %v676_v29 = vsel %vm647_vm11, %v666_v27, %v1876_v32  ;;  %v681_v3 = vshll.u32 %v1464_v54, 16  ;;  %v602_v7 = vrot.slane %v1462_v45, 2  ;;  %v629_v61 = vsel %vm592_vm8, %v626_v38, %v628_v4 }
  0x4b   : > { %v578_v36 = vsel %vm525_vm9, %v1841_v48, %v577_v30  ;;  %v1934_v12 = vsel %vm699_vm12, %v707_v35, %v709_v56  ;;  %v680_v31 = vrot.slane %v678_v58, 2  ;;  %v632_v11 = vrot.slane %v1463_v10, 2 }
  0x4c   : > { %688 = vrot.lane.b32.xlu0 %v663_v34, %s1489_s19  ;;  %v683_v39 = vrot.slane %v681_v3, 3  ;;  %v603_v48 = vsel %vm592_vm8, %v600_v41, %v602_v7  ;;  %v667_v9 = vsel %vm647_vm11, %v1849_v62, %v666_v27  ;;  %vm722_vm14 = vcmask 261120  }
  0x4d   : > { %v633_v38 = vsel %vm592_vm8, %v630_v43, %v632_v11  ;;  %vm733_vm15 = vcmask 392192   ;;  %vm744_vm2 = vcmask 523264   ;;  %vm755_vm3 = vcmask 654336  }
  0x4e   : > { %640 = vrot.lane.b32.xlu1 %v631_v26, %s1486_s5  ;;  %v684_v13 = vor.u32 %v683_v39, %v680_v31  ;;  %vm766_vm4 = vcmask 785408   ;;  %vm777_vm1 = vcmask 916480   ;;  %vm1298_vm5 = vcmask 257024  }
  0x50   : > { %458 = vrot.lane.b32.xlu0 %v437_v1, %s1488_s18  ;;  %v685_v28 = vsel %vm647_vm11, %v1876_v32, %v684_v13 }
  0x52   : > { %692 = vrot.lane.b32.xlu1 %v676_v29, %s1489_s19 }
  0x54   : > { %483 = vrot.lane.b32.xlu0 %v474_v46, %s1483_s25 }
  0x56   : > { %462 = vrot.lane.b32.xlu1 %v453_v2, %s1488_s18 }
  0x58   : > { %516 = vrot.lane.b32.xlu0 %v507_v49, %s1484_s28 }
  0x5a   : > { %487 = vrot.lane.b32.xlu1 %v478_v17, %s1483_s25 }
  0x5c   : > { %583 = vrot.lane.b32.xlu0 %v560_v60, %s1487_s17 }
  0x5e   : > { %520 = vrot.lane.b32.xlu1 %v511_v20, %s1484_s28 }
  0x60   : > { %608 = vrot.lane.b32.xlu0 %v599_v23, %s1485_s29 }
  0x62   : > { %587 = vrot.lane.b32.xlu1 %v578_v36, %s1487_s17 }
  0x64   : > { %638 = vrot.lane.b32.xlu0 %v629_v61, %s1486_s5 }
  0x66   : > { %612 = vrot.lane.b32.xlu1 %v603_v48, %s1485_s29 }
  0x68   : > { %690 = vrot.lane.b32.xlu0 %v667_v9, %s1489_s19 }
  0x6a   : > { %642 = vrot.lane.b32.xlu1 %v633_v38, %s1486_s5 }
  0x6c   : > { %694 = vrot.lane.b32.xlu0 %v685_v28, %s1489_s19 }
  0x9a   : > { %v480_v41 = vpop.permute.xlu0 %479 }
  0x9c   : > { %v513_v4 = vpop.permute.xlu1 %512 }
  0x9e   : > { %v605_v34 = vpop.permute.xlu0 %604 }
  0xa0   : > { %v635_v62 = vpop.permute.xlu1 %634 }
  0xa2   : > { %v482_v15 = vpop.permute.xlu0 %481 }
  0xa4   : > { %v486_v19 = vpop.permute.xlu1 %485 }
  0xa6   : > { %v515_v21 = vpop.permute.xlu0 %514 }
  0xa8   : > { %v519_v22 = vpop.permute.xlu1 %518 }
  0xaa   : > { %v607_v63 = vpop.permute.xlu0 %606 }
  0xac   : > { %v611_v25 = vpop.permute.xlu1 %610 }
  0xae   : > { %v637_v43 = vpop.permute.xlu0 %636 }
  0xb0   : > { %v580_v26 = vpop.permute.xlu1 %579 }
  0xb2   : > { %v455_v27 = vpop.permute.xlu0 %454 }
  0xb3   : > { %v713_v32 = vsel %vm711_vm13, %v1710_v8, %v455_v27 }
  0xb4   : > { %v724_v42 = vsel %vm722_vm14, %v713_v32, %v480_v41  ;;  %v457_v1 = vpop.permute.xlu1 %456 }
  0xb5   : > { %v735_v14 = vsel %vm733_vm15, %v724_v42, %v513_v4  ;;  %v715_v24 = vsel %vm711_vm13, %v1663_v37, %v457_v1 }
  0xb6   : > { %v687_v33 = vpop.permute.xlu0 %686  ;;  %v746_v35 = vsel %vm744_vm2, %v735_v14, %v580_v26  ;;  %v726_v29 = vsel %vm722_vm14, %v715_v24, %v482_v15  ;;  %v2006_v26 = vld [vmem:[%s2084_s2] ss:$0 sm:$0xff] }
  0xb7   : > { %v757_v6 = vsel %vm755_vm3, %v746_v35, %v605_v34  ;;  %v737_v50 = vsel %vm733_vm15, %v726_v29, %v515_v21  ;;  %v1490_v21 = vmov 1983009808  }
  0xb8   : > { %v768_v8 = vsel %vm766_vm4, %v757_v6, %v635_v62  ;;  %v461_v44 = vpop.permute.xlu1 %460 }
  0xb9   : > { %v779_v45 = vsel %vm777_vm1, %v768_v8, %v687_v33  ;;  %v719_v46 = vsel %vm711_vm13, %v1705_v5, %v461_v44 }
  0xba   : > { %920 = vmatmul.mubr.bf16.vlgmr.msra.gmra.mrb[0].mxu0 %v779_v45  ;;  %v582_v37 = vpop.permute.xlu0 %581  ;;  %v730_v2 = vsel %vm722_vm14, %v719_v46, %v486_v19 }
  0xbb   : > { %v748_v52 = vsel %vm744_vm2, %v737_v50, %v582_v37  ;;  %1409 = vmatprep.mubr.msk.bf16.mxu0 %vm711_vm13, %v1887_v18  ;;  %v741_v55 = vsel %vm733_vm15, %v730_v2, %v519_v22  ;;  %v982_v22 = vunpack.c.l.s4 %v1490_v21 }
  0xbc   : > { %v759_v51 = vsel %vm755_vm3, %v748_v52, %v607_v63  ;;  %v586_v53 = vpop.permute.xlu1 %585  ;;  %v984_v63 = vlaneseq }
  0xbd   : > { %v770_v17 = vsel %vm766_vm4, %v759_v51, %v637_v43  ;;  %v752_v5 = vsel %vm744_vm2, %v741_v55, %v586_v53 }
  0xbe   : > { %v689_v49 = vpop.permute.xlu0 %688  ;;  %v763_v18 = vsel %vm755_vm3, %v752_v5, %v611_v25  ;;  %v983_v25 = vunpack.c.0.s8 %v982_v22  ;;  %v985_v43 = vshrl.u32 %v984_v63, 7 }
  0xbf   : > { %v782_v59 = vsel %vm777_vm1, %v770_v17, %v689_v49 }
  0xc0   : > { %v641_v57 = vpop.permute.xlu1 %640  ;;  %v2009_v42 = vsub.s32 %v983_v25, %v985_v43 }
  0xc1   : > { %v774_v60 = vsel %vm766_vm4, %v763_v18, %v641_v57 }
  0xc2   : > { %928 = vmatmul.mubr.bf16.gmra.mrb[4].mxu0 %v782_v59  ;;  %v459_v40 = vpop.permute.xlu0 %458 }
  0xc3   : > { %1410 = vmatprep.mubr.msk.bf16.mxu0 %vm711_vm13, %v1927_v0  ;;  %v717_v0 = vsel %vm711_vm13, %v1677_v47, %v459_v40 }
  0xc4   : > { %v693_v54 = vpop.permute.xlu1 %692 }
  0xc5   : > { %v788_v20 = vsel %vm777_vm1, %v774_v60, %v693_v54 }
  0xc6   : > { %v484_v30 = vpop.permute.xlu0 %483  ;;  %944 = vmatmul.mubr.bf16.vlgmr.msra.gmra.mrb[0].mxu1 %v788_v20 }
  0xc7   : > { %1412 = vmatprep.mubr.msk.bf16.mxu1 %vm711_vm13, %v1934_v12  ;;  %v728_v61 = vsel %vm722_vm14, %v717_v0, %v484_v30 }
  0xc8   : > { %v463_v23 = vpop.permute.xlu1 %462 }
  0xc9   : > { %v721_v39 = vsel %vm711_vm13, %v1723_v16, %v463_v23 }
  0xca   : > { %v517_v58 = vpop.permute.xlu0 %516 }
  0xcb   : > { %v739_v48 = vsel %vm733_vm15, %v728_v61, %v517_v58 }
  0xcc   : > { %v488_v3 = vpop.permute.xlu1 %487 }
  0xcd   : > { %v732_v13 = vsel %vm722_vm14, %v721_v39, %v488_v3 }
  0xce   : > { %v584_v56 = vpop.permute.xlu0 %583 }
  0xcf   : > { %v750_v12 = vsel %vm744_vm2, %v739_v48, %v584_v56 }
  0xd0   : > { %v521_v36 = vpop.permute.xlu1 %520 }
  0xd1   : > { %v743_v47 = vsel %vm733_vm15, %v732_v13, %v521_v36 }
  0xd2   : > { %v609_v7 = vpop.permute.xlu0 %608 }
  0xd3   : > { %v761_v11 = vsel %vm755_vm3, %v750_v12, %v609_v7 }
  0xd4   : > { %v588_v10 = vpop.permute.xlu1 %587 }
  0xd5   : > { %v754_v4 = vsel %vm744_vm2, %v743_v47, %v588_v10 }
  0xd6   : > { %v639_v31 = vpop.permute.xlu0 %638 }
  0xd7   : > { %v772_v38 = vsel %vm766_vm4, %v761_v11, %v639_v31 }
  0xd8   : > { %v613_v9 = vpop.permute.xlu1 %612 }
  0xd9   : > { %v765_v16 = vsel %vm755_vm3, %v754_v4, %v613_v9 }
  0xda   : > { %v691_v28 = vpop.permute.xlu0 %690 }
  0xdb   : > { %v785_v41 = vsel %vm777_vm1, %v772_v38, %v691_v28 }
  0xdc   : > { %936 = vmatmul.mubr.bf16.gmra.mrb[8].mxu0 %v785_v41  ;;  %v643_v34 = vpop.permute.xlu1 %642 }
  0xdd   : > { %v776_v62 = vsel %vm766_vm4, %v765_v16, %v643_v34 }
  0xde   : > { %v695_v15 = vpop.permute.xlu0 %694 }
  0xdf   : > { %v791_v19 = vsel %vm777_vm1, %v776_v62, %v695_v15 }
  0xe0   : > { %952 = vmatmul.mubr.bf16.gmra.mrb[4].mxu1 %v791_v19 }
 0x18d   : > { %v921_v27 = vpop.f32.mrb[0].mxu0 }
 0x18e   : > { %v922_v32 = vadd.f32 %v2006_v26, %v921_v27  ;;  %v923_v1 = vpop.f32.mrb[1].mxu0 }
 0x18f   : > { %v924_v14 = vpop.f32.mrb[2].mxu0 }
 0x190   : > { %v960_v24 = vmax.f32 %v922_v32, 0.0  ;;  %v925_v33 = vadd.f32 %v2006_v26, %v924_v14  ;;  %v926_v35 = vpop.f32.mrb[3].mxu0 }
 0x192   : > { %v980_v29 = vcombine.high %v960_v24, %v960_v24  ;;  %v987_v6 = vrot.slane %v960_v24, %v2009_v42  ;;  %v961_v8 = vmax.f32 %v925_v33, 0.0 }
 0x194   : > { %v994_v44 = vrot.slane %v980_v29, %v2009_v42  ;;  %v995_v45 = vcombine.high %v987_v6, %v987_v6  ;;  %v997_v46 = vcombine.high %v961_v8, %v961_v8  ;;  %v1004_v50 = vrot.slane %v961_v8, %v2009_v42 }
 0x195   : > { %v929_v37 = vpop.f32.mrb[4].mxu0 }
 0x196   : > { %v996_v2 = vcombine.high %v994_v44, %v994_v44  ;;  %v1146_v52 = vcombine.low %v987_v6, %v995_v45  ;;  %v1011_v51 = vrot.slane %v997_v46, %v2009_v42  ;;  %v1012_v53 = vcombine.high %v1004_v50, %v1004_v50  ;;  %v931_v55 = vpop.f32.mrb[5].mxu0 }
 0x197   : > { %v930_v49 = vadd.f32 %v2006_v26, %v929_v37  ;;  %v932_v17 = vpop.f32.mrb[6].mxu0 }
 0x198   : > { %v1147_v5 = vcombine.low %v994_v44, %v996_v2  ;;  %v934_v57 = vpop.f32.mrb[7].mxu0  ;;  %v933_v40 = vadd.f32 %v2006_v26, %v932_v17  ;;  %v1154_v18 = vrot.slane %v1146_v52, %v2009_v42  ;;  %v1163_v54 = vcombine.low %v1012_v53, %v1011_v51 }
 0x199   : > { %v962_v59 = vmax.f32 %v930_v49, 0.0  ;;  %v1013_v20 = vcombine.high %v1011_v51, %v1011_v51  ;;  %v945_v30 = vpop.f32.mrb[0].mxu1 }
 0x19a   : > { %v1161_v60 = vrot.slane %v1147_v5, %v2009_v42  ;;  %v963_v3 = vmax.f32 %v933_v40, 0.0  ;;  %v946_v56 = vadd.f32 %v2006_v26, %v945_v30  ;;  %v947_v36 = vpop.f32.mrb[1].mxu1  ;;  %v1171_v9 = vrot.slane %v1163_v54, %v2009_v42 }
 0x19b   : > { %v1014_v23 = vcombine.high %v962_v59, %v962_v59  ;;  %v1021_v58 = vrot.slane %v962_v59, %v2009_v42  ;;  %v948_v0 = vpop.f32.mrb[2].mxu1 }
 0x19c   : > { %v1162_v7 = vcombine.low %v1154_v18, %v1161_v60  ;;  %v1037_v31 = vrot.slane %v963_v3, %v2009_v42  ;;  %v950_v39 = vpop.f32.mrb[3].mxu1  ;;  %v966_v12 = vmax.f32 %v946_v56, 0.0  ;;  %v949_v11 = vadd.f32 %v2006_v26, %v948_v0 }
 0x19d   : > { %v1028_v10 = vrot.slane %v1014_v23, %v2009_v42  ;;  %v1164_v61 = vcombine.low %v1013_v20, %v1021_v58  ;;  %v1030_v29 = vcombine.high %v963_v3, %v963_v3 }
 0x19e   : > { %v1290_v48 = vpack.c.bf16 %v1162_v7, %v1162_v7  ;;  %v1045_v28 = vcombine.high %v1037_v31, %v1037_v31  ;;  %v1080_v47 = vcombine.high %v966_v12, %v966_v12  ;;  %v1087_v41 = vrot.slane %v966_v12, %v2009_v42 }
 0x19f   : > { %v1029_v13 = vcombine.high %v1028_v10, %v1028_v10  ;;  %v1178_v38 = vrot.slane %v1164_v61, %v2009_v42  ;;  %v967_v4 = vmax.f32 %v949_v11, 0.0  ;;  %v1044_v44 = vrot.slane %v1030_v29, %v2009_v42 }
 0x1a0   : > { %1299 = vst.msk [vmem:[%s2027_s24] sm:$0xf] %vm1298_vm5, %v1290_v48  ;;  %v1181_v62 = vcombine.low %v1037_v31, %v1045_v28  ;;  %v1094_v15 = vrot.slane %v1080_v47, %v2009_v42  ;;  %v1095_v19 = vcombine.high %v1087_v41, %v1087_v41 }
 0x1a1   : > { %v1179_v16 = vcombine.low %v1171_v9, %v1178_v38  ;;  %v1180_v34 = vcombine.low %v1028_v10, %v1029_v13  ;;  %v1104_v27 = vrot.slane %v967_v4, %v2009_v42  ;;  %v1097_v8 = vcombine.high %v967_v4, %v967_v4 }
 0x1a2   : > { %v1195_v63 = vrot.slane %v1181_v62, %v2009_v42  ;;  %v1231_v25 = vcombine.low %v1095_v19, %v1094_v15  ;;  %v1096_v43 = vcombine.high %v1094_v15, %v1094_v15  ;;  %v1046_v55 = vcombine.high %v1044_v44, %v1044_v44 }
 0x1a3   : > { %v1188_v21 = vrot.slane %v1180_v34, %v2009_v42  ;;  %v1291_v22 = vpack.c.bf16 %v1179_v16, %v1179_v16  ;;  %v1111_v37 = vrot.slane %v1097_v8, %v2009_v42 }
 0x1a4   : > { %v1232_v1 = vcombine.low %v1096_v43, %v1104_v27  ;;  %v1239_v24 = vrot.slane %v1231_v25, %v2009_v42 }
 0x1a5   : > { %1300 = vst.msk [vmem:[%s2027_s24 + $0x4] sm:$0xf] %vm1298_vm5, %v1291_v22  ;;  %v1196_v32 = vcombine.low %v1188_v21, %v1195_v63  ;;  %v1112_v18 = vcombine.high %v1111_v37, %v1111_v37 }
 0x1a6   : > { %v1246_v33 = vrot.slane %v1232_v1, %v2009_v42 }
 0x1a7   : > { %v1292_v14 = vpack.c.bf16 %v1196_v32, %v1196_v32  ;;  %v1248_v48 = vcombine.low %v1111_v37, %v1112_v18 }
 0x1a8   : > { %v1247_v35 = vcombine.low %v1239_v24, %v1246_v33 }
 0x1a9   : > { %1301 = vst.msk [vmem:[%s2027_s24 + $0x8] sm:$0xf] %vm1298_vm5, %v1292_v14  ;;  %v1256_v63 = vrot.slane %v1248_v48, %v2009_v42 }
 0x1aa   : > { %v1295_v6 = vpack.c.bf16 %v1247_v35, %v1247_v35 }
 0x1ac   : > { %1304 = vst.msk [vmem:[%s2027_s24 + $0x14] sm:$0xf] %vm1298_vm5, %v1295_v6 }
 0x1af   : > { %v937_v45 = vpop.f32.mrb[8].mxu0 }
 0x1b0   : > { %v938_v46 = vadd.f32 %v2006_v26, %v937_v45  ;;  %v939_v50 = vpop.f32.mrb[9].mxu0 }
 0x1b1   : > { %v940_v2 = vpop.f32.mrb[10].mxu0 }
 0x1b2   : > { %v964_v52 = vmax.f32 %v938_v46, 0.0  ;;  %v941_v51 = vadd.f32 %v2006_v26, %v940_v2  ;;  %v942_v53 = vpop.f32.mrb[11].mxu0 }
 0x1b3   : > { %v953_v49 = vpop.f32.mrb[4].mxu1 }
 0x1b4   : > { %v1047_v17 = vcombine.high %v964_v52, %v964_v52  ;;  %v1054_v5 = vrot.slane %v964_v52, %v2009_v42  ;;  %v965_v57 = vmax.f32 %v941_v51, 0.0  ;;  %v954_v59 = vadd.f32 %v2006_v26, %v953_v49  ;;  %v955_v40 = vpop.f32.mrb[5].mxu1 }
 0x1b5   : > { %v956_v60 = vpop.f32.mrb[6].mxu1 }
 0x1b6   : > { %v1061_v54 = vrot.slane %v1047_v17, %v2009_v42  ;;  %v1062_v20 = vcombine.high %v1054_v5, %v1054_v5  ;;  %v1197_v30 = vcombine.low %v1046_v55, %v1054_v5  ;;  %v1063_v23 = vcombine.high %v965_v57, %v965_v57  ;;  %v958_v58 = vpop.f32.mrb[7].mxu1 }
 0x1b7   : > { %v1070_v3 = vrot.slane %v965_v57, %v2009_v42  ;;  %v968_v56 = vmax.f32 %v954_v59, 0.0  ;;  %v957_v36 = vadd.f32 %v2006_v26, %v956_v60 }
 0x1b8   : > { %v1198_v7 = vcombine.low %v1062_v20, %v1061_v54  ;;  %v1077_v0 = vrot.slane %v1063_v23, %v2009_v42  ;;  %v1205_v12 = vrot.slane %v1197_v30, %v2009_v42 }
 0x1b9   : > { %v1078_v10 = vcombine.high %v1070_v3, %v1070_v3  ;;  %v1113_v61 = vcombine.high %v968_v56, %v968_v56  ;;  %v1120_v31 = vrot.slane %v968_v56, %v2009_v42  ;;  %v969_v39 = vmax.f32 %v957_v36, 0.0 }
 0x1ba   : > { %v1212_v11 = vrot.slane %v1198_v7, %v2009_v42  ;;  %v1079_v9 = vcombine.high %v1077_v0, %v1077_v0 }
 0x1bb   : > { %v1214_v13 = vcombine.low %v1070_v3, %v1078_v10  ;;  %v1127_v38 = vrot.slane %v1113_v61, %v2009_v42  ;;  %v1128_v28 = vcombine.high %v1120_v31, %v1120_v31  ;;  %v1130_v26 = vcombine.high %v969_v39, %v969_v39 }
 0x1bc   : > { %v1213_v47 = vcombine.low %v1205_v12, %v1212_v11  ;;  %v1215_v41 = vcombine.low %v1077_v0, %v1079_v9  ;;  %v1137_v4 = vrot.slane %v969_v39, %v2009_v42 }
 0x1bd   : > { %v1129_v16 = vcombine.high %v1127_v38, %v1127_v38  ;;  %v1249_v34 = vcombine.low %v1120_v31, %v1128_v28  ;;  %v1144_v62 = vrot.slane %v1130_v26, %v2009_v42  ;;  %v1222_v19 = vrot.slane %v1214_v13, %v2009_v42 }
 0x1be   : > { %v1293_v15 = vpack.c.bf16 %v1213_v47, %v1213_v47  ;;  %v1229_v21 = vrot.slane %v1215_v41, %v2009_v42  ;;  %v1145_v22 = vcombine.high %v1137_v4, %v1137_v4 }
 0x1bf   : > { %v1263_v25 = vrot.slane %v1249_v34, %v2009_v42  ;;  %v1265_v43 = vcombine.low %v1129_v16, %v1137_v4 }
 0x1c0   : > { %1302 = vst.msk [vmem:[%s2027_s24 + $0xc] sm:$0xf] %vm1298_vm5, %v1293_v15  ;;  %v1230_v27 = vcombine.low %v1222_v19, %v1229_v21  ;;  %v1266_v32 = vcombine.low %v1145_v22, %v1144_v62 }
 0x1c1   : > { %v1264_v1 = vcombine.low %v1256_v63, %v1263_v25  ;;  %v1273_v14 = vrot.slane %v1265_v43, %v2009_v42 }
 0x1c2   : > { %v1294_v24 = vpack.c.bf16 %v1230_v27, %v1230_v27  ;;  %v1280_v33 = vrot.slane %v1266_v32, %v2009_v42 }
 0x1c3   : > { %v1296_v35 = vpack.c.bf16 %v1264_v1, %v1264_v1 }
 0x1c4   : > { %1303 = vst.msk [vmem:[%s2027_s24 + $0x10] sm:$0xf] %vm1298_vm5, %v1294_v24  ;;  %v1281_v29 = vcombine.low %v1273_v14, %v1280_v33 }
 0x1c5   : > { %1305 = vst.msk [vmem:[%s2027_s24 + $0x18] sm:$0xf] %vm1298_vm5, %v1296_v35 }
 0x1c6   : > { %v1297_v6 = vpack.c.bf16 %v1281_v29, %v1281_v29 }
 0x1c8   : > { %1306 = vst.msk [vmem:[%s2027_s24 + $0x1c] sm:$0xf] %vm1298_vm5, %v1297_v6 }
 0x1c9 PF: > { %s13_s12 = sadd.s32 1, %s1480_s12  }
 0x1ca   : > { %p10_p4 = scmp.ge.s32.totalorder %s13_s12, 4  }
 0x1cc   :  { %12 = sbr.rel (!%p10_p4) target bundleno = 1 (0x1), region = 69 }

// kernel: _lambda_.5
= control target key start
LH: loop header
LB: loop body
LE: loop exit
PB: predicated region body
PF: predicated region fallthrough
CT: control target
= control target key end

     0   :  { %s2102_s12 = smov 0   ;;  %s2665_s0 = inlined_call_operand.vmem [shape: bf16[2,8,8,32], index: 0, kind: input, shape index: {}]   ;;  %s2666_s1 = inlined_call_operand.vmem [shape: bf16[288,32], index: 1, kind: input, shape index: {}]   ;;  %s2667_s2 = inlined_call_operand.vmem [shape: f32[1,32], index: 2, kind: input, shape index: {}]   ;;  %s2668_s3 = inlined_call_operand.vmem [shape: bf16[2,4,4,32], index: 3, kind: output, shape index: {}]  }
   0x1 LB: > { %s1848_s13 = sadd.s32 4294967295, %s2073_s12   ;;  %p1852_p0 = scmp.ge.s32.totalorder %s2073_s12, 1  ;;  %s2073_s12 = sphi %s2102_s12, %s13_s12  }
   0x2   : > { %p137_p1 = scmp.lt.s32.totalorder %s2073_s12, 3 }
   0x4   : > { %p138_p2 = pnand %p1852_p0, %p137_p1 }
   0x5   : > { %p2110_p3 = scmp.lt.s32.totalorder (!%p138_p2), %s1848_s13, 1  ;;  %vm172_vm0 = vcmask (!%p138_p2), 257024   ;;  %vm185_vm1 = vcmask (!%p138_p2), 256000   ;;  %v2075_v0 = vmov (!%p138_p2), 0   ;;  %vm225_vm2 = vsmask.f32 (!%p138_p2), 7946 }
   0x6   : > { %141 = sbr.rel (%p138_p2) target bundleno = 485 (0x1e5), region = 32  ;;  %175 = vst.msk [vmem:[#allocation2 + $0x8] sm:$0xf] (!%p138_p2), %vm172_vm0, %v2075_v0  ;;  %176 = vst.msk [vmem:[#allocation2 + $0xc] sm:$0xf] (!%p138_p2), %vm172_vm0, %v2075_v0  ;;  %vm224_vm4 = vcmask (!%p138_p2), 257026  }
   0x7   : > { %177 = vst.msk [vmem:[#allocation2 + $0x10] sm:$0xf] (!%p138_p2), %vm172_vm0, %v2075_v0  ;;  %178 = vst.msk [vmem:[#allocation2 + $0x14] sm:$0xf] (!%p138_p2), %vm172_vm0, %v2075_v0  ;;  %vm231_vm3 = vsmask.f32 (!%p138_p2), 2304 }
   0x8   : > { %180 = vst.msk [vmem:[#allocation2 + $0x1c] sm:$0xf] (!%p138_p2), %vm172_vm0, %v2075_v0  ;;  %173 = vst.msk [vmem:[#allocation2] sm:$0xf] (!%p138_p2), %vm172_vm0, %v2075_v0  ;;  %vm250_vm5 = vsmask.f32 (!%p138_p2), 7950 }
   0x9   : > { %174 = vst.msk [vmem:[#allocation2 + $0x4] sm:$0xf] (!%p138_p2), %vm172_vm0, %v2075_v0  ;;  %179 = vst.msk [vmem:[#allocation2 + $0x18] sm:$0xf] (!%p138_p2), %vm172_vm0, %v2075_v0  ;;  %vm256_vm6 = vsmask.f32 (!%p138_p2), 3328 }
   0xa   : > { %181 = vst.msk [vmem:[#allocation2 + $0x20] sm:$0xf] (!%p138_p2), %vm172_vm0, %v2075_v0  ;;  %182 = vst.msk [vmem:[#allocation2 + $0x24] sm:$0xf] (!%p138_p2), %vm172_vm0, %v2075_v0  ;;  %vm249_vm7 = vcmask (!%p138_p2), 257027   ;;  %vm205_vm13 = vcmask (!%p138_p2), 254976  }
   0xb   : > { %183 = vst.msk [vmem:[#allocation2 + $0x28] sm:$0xf] (!%p138_p2), %vm172_vm0, %v2075_v0  ;;  %184 = vst.msk [vmem:[#allocation2 + $0x2c] sm:$0xf] (!%p138_p2), %vm172_vm0, %v2075_v0  ;;  %vm273_vm8 = vsmask.f32 (!%p138_p2), 7938 }
   0xc   : > { %186 = vst.msk [vmem:[#allocation2 + $0x30] sm:$0x7] (!%p138_p2), %vm185_vm1, %v2075_v0  ;;  %vm200_vm10 = vsmask.f32 (!%p138_p2), 7942  ;;  %vm206_vm11 = vsmask.f32 (!%p138_p2), 1280  ;;  %vm2142_vm12 = vmand (!%p138_p2), %vm249_vm7, %vm250_vm5 }
   0xd   : > { %s2688_s13 = smov (!%p2110_p3, %s1848_s13), 1  ;;  %v252_v10 = vld [vmem:[#allocation2 + $0xc] sm:$0x8]  ;;  %vm278_vm14 = vcmask 253952   ;;  %vm279_vm15 = vsmask.f32 256  ;;  %vm2148_vm9 = vmand %vm224_vm4, %vm225_vm2 }
   0xe   : > { %s1942_s15 = sshll.u32 %s2688_s13, 5  ;;  %v227_v14 = vld [vmem:[#allocation2 + $0x8] sm:$0xc]  ;;  %vm2154_vm5 = vmand %vm185_vm1, %vm231_vm3  ;;  %v233_v18 = vld [vmem:[#allocation2 + $0xc] sm:$0x7]  ;;  %vm2682_vm3 = vcmask 257025  }
   0xf   : > { %s2135_s18 = scalar_lea.vmem %s2665_s0, %s1942_s15  ;;  %v258_v26 = vld [vmem:[#allocation2 + $0x10] sm:$0xf]  ;;  %v275_v27 = vld [vmem:[#allocation2 + $0x14] sm:$0xf]  ;;  %vm2163_vm1 = vmand %vm172_vm0, %vm256_vm6  ;;  %vm582_vm7 = vcmask 1045504   ;;  %s2076_s6 = smov 64  }
  0x10   : > { %v1857_v1 = vld [vmem:[%s2135_s18 + $0x4] sm:$0xf]  ;;  %v1858_v2 = vld [vmem:[%s2135_s18 + $0x8] sm:$0xf]  ;;  %v1859_v3 = vld [vmem:[%s2135_s18 + $0xc] sm:$0xf] }
  0x11   : > { %v214_v4 = vshrl.u32 %v1857_v1, 16  ;;  %v217_v5 = vshll.u32 %v1857_v1, 16  ;;  %v239_v6 = vshll.u32 %v1858_v2, 16  ;;  %v242_v7 = vshrl.u32 %v1858_v2, 16  ;;  %v1861_v8 = vld [vmem:[%s2135_s18 + $0x14] sm:$0xf]  ;;  %vm2171_vm2 = vmand %vm172_vm0, %vm273_vm8 }
  0x12   : > { %v264_v19 = vshrl.u32 %v1859_v3, 16  ;;  %v267_v20 = vshll.u32 %v1859_v3, 16  ;;  %v306_v21 = vshrl.u32 %v1861_v8, 16  ;;  %v309_v22 = vshll.u32 %v1861_v8, 16  ;;  %v187_v28 = vld [vmem:[%s2135_s18] sm:$0xf]  ;;  %vm2185_vm0 = vmand %vm278_vm14, %vm279_vm15 }
  0x13   : > { %v216_v11 = vrot.slane %v214_v4, 5  ;;  %v219_v12 = vrot.slane %v217_v5, 6  ;;  %v241_v15 = vrot.slane %v239_v6, 5  ;;  %v244_v16 = vrot.slane %v242_v7, 4  ;;  %v316_v33 = vld [vmem:[#allocation2 + $0x1c] sm:$0xc]  ;;  %vm2195_vm4 = vmand %vm2682_vm3, %vm200_vm10 }
  0x14   : > { %v266_v30 = vrot.slane %v264_v19, 7  ;;  %v308_v31 = vrot.slane %v306_v21, 5  ;;  %v311_v32 = vrot.slane %v309_v22, 6  ;;  %v189_v34 = vshrl.u32 %v187_v28, 16  ;;  %v1860_v40 = vld [vmem:[%s2135_s18 + $0x10] sm:$0xf]  ;;  %vm2202_vm6 = vmand %vm205_vm13, %vm206_vm11 }
  0x15   : > { %v220_v23 = vor.u32 %v219_v12, %v216_v11  ;;  %v245_v24 = vor.u32 %v244_v16, %v241_v15  ;;  %v253_v25 = vsel %vm2142_vm12, %v241_v15, %v252_v10  ;;  %v192_v39 = vshll.u32 %v187_v28, 16  ;;  %v2049_v41 = vld [vmem:[%s2666_s1 + $0x40] sm:$0xff]   ;;  %v281_v51 = vld [vmem:[#allocation2 + $0x18] sm:$0x1]  ;;  %v208_v60 = vld [vmem:[#allocation2 + $0x8] sm:$0x3] }
  0x16   : > { %254 = vst [vmem:[#allocation2 + $0xc] sm:$0x8] %v253_v25  ;;  %v269_v42 = vor.u32 %v267_v20, %v266_v30  ;;  %v312_v43 = vor.u32 %v311_v32, %v308_v31  ;;  %v191_v44 = vrot.slane %v189_v34, 6  ;;  %v287_v45 = vshrl.u32 %v1860_v40, 16  ;;  %1944 = vmatprep.subr.bf16.mxu0 %v2049_v41  ;;  %v202_v55 = vld [vmem:[#allocation2 + $0x4] sm:$0xe] }
  0x17   : > { %v221_v35 = vrot.slane %v220_v23, 4  ;;  %v228_v36 = vsel %vm2148_vm9, %v220_v23, %v227_v14  ;;  %v246_v37 = vrot.slane %v245_v24, 4  ;;  %v194_v48 = vrot.slane %v192_v39, 7  ;;  %v319_v58 = vld [vmem:[#allocation2 + $0x20] sm:$0x7]  ;;  %v2051_v32 = vld [vmem:[%s2666_s1 + $0x48] sm:$0xff]  }
  0x18   : > { %229 = vst [vmem:[#allocation2 + $0x8] sm:$0xc] %v228_v36  ;;  %v290_v49 = vshll.u32 %v1860_v40, 16  ;;  %v276_v52 = vsel %vm2171_vm2, %v269_v42, %v275_v27  ;;  %v317_v53 = vsel %vm2148_vm9, %v312_v43, %v316_v33  ;;  %v289_v56 = vrot.slane %v287_v45, 6  ;;  %v1862_v63 = vld [vmem:[%s2135_s18 + $0x18] sm:$0xf] }
  0x19   : > { %v234_v46 = vsel %vm2154_vm5, %v221_v35, %v233_v18  ;;  %v259_v47 = vsel %vm2163_vm1, %v246_v37, %v258_v26  ;;  %v270_v57 = vrot.slane %v266_v30, 4  ;;  %277 = vst [vmem:[#allocation2 + $0x14] sm:$0xf] %v276_v52  ;;  %318 = vst [vmem:[#allocation2 + $0x1c] sm:$0xc] %v317_v53  ;;  %v195_v59 = vor.u32 %v194_v48, %v191_v44  ;;  %v2050_v13 = vld [vmem:[%s2666_s1] sm:$0xff]  }
  0x1a   : > { %235 = vst [vmem:[#allocation2 + $0xc] sm:$0x7] %v234_v46  ;;  %260 = vst [vmem:[#allocation2 + $0x10] sm:$0xf] %v259_v47  ;;  %v292_v61 = vrot.slane %v290_v49, 7  ;;  %v313_v62 = vrot.slane %v312_v43, 4  ;;  %1945 = vmatpush3.bf16.msra.mxu0 %v2050_v13 }
  0x1b   : > { %v297_v1 = vld [vmem:[#allocation2 + $0x18] sm:$0xe]  ;;  %v282_v2 = vsel %vm2185_vm0, %v270_v57, %v281_v51  ;;  %v325_v3 = vshll.u32 %v1862_v63, 16  ;;  %v328_v4 = vshrl.u32 %v1862_v63, 16  ;;  %v1863_v5 = vld [vmem:[%s2135_s18 + $0x1c] sm:$0xf]  ;;  %v203_v7 = vsel %vm2195_vm4, %v195_v59, %v202_v55  ;;  %1946 = vmatprep.subr.bf16.mxu0 %v2051_v32 }
  0x1c   : > { %v196_v6 = vrot.slane %v195_v59, 4  ;;  %v293_v8 = vor.u32 %v292_v61, %v289_v56  ;;  %v300_v10 = vld [vmem:[#allocation2 + $0x1c] sm:$0x3]  ;;  %283 = vst [vmem:[#allocation2 + $0x18] sm:$0x1] %v282_v2  ;;  %v320_v11 = vsel %vm2154_vm5, %v313_v62, %v319_v58  ;;  %v344_v16 = vshrl.u32 %v1863_v5, 16 }
  0x1d   : > { %v335_v12 = vld [vmem:[#allocation2 + $0x20] sm:$0x8]  ;;  %204 = vst [vmem:[#allocation2 + $0x4] sm:$0xe] %v203_v7  ;;  %321 = vst [vmem:[#allocation2 + $0x20] sm:$0x7] %v320_v11 }
  0x1e   : > { %v327_v14 = vrot.slane %v325_v3, 5  ;;  %v330_v15 = vrot.slane %v328_v4, 4  ;;  %v347_v18 = vshll.u32 %v1863_v5, 16  ;;  %v209_v20 = vsel %vm2202_vm6, %v196_v6, %v208_v60  ;;  %v338_v22 = vld [vmem:[#allocation2 + $0x24] sm:$0xf]  ;;  %v2052_v36 = vld [vmem:[%s2666_s1 + $0x8] sm:$0xff]  }
  0x1f   : > { %v376_v19 = vld [vmem:[#allocation2 + $0x8] sm:$0xc]  ;;  %v294_v21 = vrot.slane %v293_v8, 4  ;;  %v298_v17 = vsel %vm2195_vm4, %v293_v8, %v297_v1  ;;  %210 = vst [vmem:[#allocation2 + $0x8] sm:$0x3] %v209_v20  ;;  %v346_v25 = vrot.slane %v344_v16, 7  ;;  %1947 = vmatpush3.bf16.msra.mxu0 %v2052_v36 }
  0x20   : > { %299 = vst [vmem:[#allocation2 + $0x18] sm:$0xe] %v298_v17  ;;  %v331_v23 = vor.u32 %v330_v15, %v327_v14  ;;  %v336_v24 = vsel %vm2142_vm12, %v327_v14, %v335_v12  ;;  %v353_v26 = vld [vmem:[#allocation2 + $0x28] sm:$0xf]  ;;  %v356_v27 = vld [vmem:[#allocation2 + $0x2c] sm:$0x1] }
  0x21   : > { %v2222_v28 = vld [vmem:[#allocation2 + $0xc] sm:$0xf]  ;;  %v363_v30 = vld [vmem:[#allocation2 + $0x10] sm:$0xf]  ;;  %v301_v31 = vsel %vm2202_vm6, %v294_v21, %v300_v10  ;;  %337 = vst [vmem:[#allocation2 + $0x20] sm:$0x8] %v336_v24  ;;  %v349_v35 = vor.u32 %v347_v18, %v346_v25 }
  0x22   : > { %v364_v33 = vld [vmem:[#allocation2 + $0x14] sm:$0xf]  ;;  %v2230_v34 = vcombine.low %v376_v19, %v2222_v28  ;;  %302 = vst [vmem:[#allocation2 + $0x1c] sm:$0x3] %v301_v31  ;;  %v332_v9 = vrot.slane %v331_v23, 4  ;;  %v2238_v39 = vcombine.low %v2222_v28, %v363_v30  ;;  %v350_v40 = vrot.slane %v346_v25, 4 }
  0x23   : > { %v2235_v37 = vcombine.low %v363_v30, %v364_v33  ;;  %v2053_v41 = vld [vmem:[%s2666_s1 + $0x50] sm:$0xff]   ;;  %v370_v43 = vld [vmem:[#allocation2] sm:$0xe]  ;;  %v354_v48 = vsel %vm2171_vm2, %v349_v35, %v353_v26  ;;  %v2055_v50 = vld [vmem:[%s2666_s1 + $0x58] sm:$0xff]   ;;  %vm467_vm8 = vcmask 1046528   ;;  %s2077_s11 = smov 32  }
  0x24   : > { %v613_v42 = vrot.slane %v2230_v34, 2  ;;  %v339_v44 = vsel %vm2163_vm1, %v332_v9, %v338_v22  ;;  %v371_v46 = vld [vmem:[#allocation2 + $0x4] sm:$0xe]  ;;  %v357_v49 = vsel %vm2185_vm0, %v350_v40, %v356_v27  ;;  %1948 = vmatprep.subr.bf16.mxu0 %v2053_v41  ;;  %v2054_v51 = vld [vmem:[%s2666_s1 + $0x10] sm:$0xff]   ;;  %v359_v52 = vld [vmem:[#allocation2] sm:$0xf] }
  0x25   : > { %v614_v45 = vrot.slane %v2235_v37, 2  ;;  %v375_v47 = vld [vmem:[#allocation2 + $0x4] sm:$0xc]  ;;  %340 = vst [vmem:[#allocation2 + $0x24] sm:$0xf] %v339_v44  ;;  %v584_v38 = vrot.slane %v2238_v39, 2  ;;  %1949 = vmatpush3.bf16.msra.mxu0 %v2054_v51 }
  0x26   : > { %v360_v29 = vld [vmem:[#allocation2 + $0x4] sm:$0xf]  ;;  %355 = vst [vmem:[#allocation2 + $0x28] sm:$0xf] %v354_v48  ;;  %358 = vst [vmem:[#allocation2 + $0x2c] sm:$0x1] %v357_v49  ;;  %1950 = vmatprep.subr.bf16.mxu0 %v2055_v50 }
  0x27   : > { %v615_v53 = vsel %vm582_vm7, %v613_v42, %v614_v45  ;;  %v361_v54 = vld [vmem:[#allocation2 + $0x8] sm:$0xf]  ;;  %v365_v55 = vld [vmem:[#allocation2 + $0x18] sm:$0xf]  ;;  %v1870_v56 = vcombine.low %v370_v43, %v360_v29  ;;  %v2269_v62 = vcombine.low %v359_v52, %v360_v29  ;;  %v502_v0 = vrot.slane %v2238_v39, 1  ;;  %v2057_v8 = vld [vmem:[%s2666_s1 + $0x60] sm:$0xff]  }
  0x28   : > { %624 = vrot.lane.b32.xlu1 %v615_v53, %s2076_s6  ;;  %v1878_v57 = vcombine.low %v375_v47, %v361_v54  ;;  %v2263_v58 = vcombine.low %v361_v54, %v2222_v28  ;;  %v2265_v59 = vcombine.low %v371_v46, %v361_v54  ;;  %v2267_v60 = vcombine.low %v364_v33, %v365_v55  ;;  %v2056_v5 = vld [vmem:[%s2666_s1 + $0x18] sm:$0xff]   ;;  %v367_v7 = vld [vmem:[#allocation2 + $0x20] sm:$0xf]  ;;  %v2059_v22 = vld [vmem:[%s2666_s1 + $0x68] sm:$0xff]   ;;  %s2078_s18 = smov 96   ;;  %s1943_s8 = sshll.u32 %s2688_s13, 3 }
  0x29   : > { %v366_v61 = vld [vmem:[#allocation2 + $0x1c] sm:$0xf]  ;;  %v468_v63 = vrot.slane %v1870_v56, 1  ;;  %v471_v13 = vrot.slane %v2235_v37, 1  ;;  %v413_v14 = vshll.u32 %v2269_v62, 16  ;;  %v639_v15 = vshrl.u32 %v2230_v34, 16  ;;  %1951 = vmatpush3.bf16.msra.mxu0 %v2056_v5  ;;  %s2600_s13 = scalar_lea.vmem %s2668_s3, %s1943_s8 }
  0x2a   : > { %v583_v1 = vrot.slane %v1878_v57, 2  ;;  %v2272_v2 = vcombine.low %v365_v55, %v366_v61  ;;  %v586_v3 = vrot.slane %v2267_v60, 2  ;;  %v469_v4 = vrot.slane %v2263_v58, 1  ;;  %v2058_v21 = vld [vmem:[%s2666_s1 + $0x20] sm:$0xff]   ;;  %1952 = vmatprep.subr.bf16.mxu0 %v2057_v8  ;;  %v2061_v36 = vld [vmem:[%s2666_s1 + $0x70] sm:$0xff]  }
  0x2b   : > { %v501_v6 = vrot.slane %v2265_v59, 1  ;;  %v2295_v20 = vcombine.low %v366_v61, %v367_v7  ;;  %v426_v17 = vshll.u32 %v2235_v37, 16  ;;  %v411_v24 = vshrl.u32 %v2269_v62, 16  ;;  %v2062_v49 = vld [vmem:[%s2666_s1 + $0x30] sm:$0xff]  }
  0x2c   : > { %v585_v10 = vsel %vm582_vm7, %v583_v1, %v584_v38  ;;  %v470_v11 = vsel %vm467_vm8, %v468_v63, %v469_v4  ;;  %v2287_v12 = vld [vmem:[#allocation2 + $0x24] sm:$0xf]  ;;  %v587_v16 = vsel %vm582_vm7, %v584_v38, %v586_v3  ;;  %v616_v18 = vrot.slane %v2272_v2, 2 }
  0x2d   : > { %594 = vrot.lane.b32.xlu0 %v585_v10, %s2077_s11  ;;  %479 = vrot.lane.b32.xlu1 %v470_v11, %s2076_s6  ;;  %v503_v19 = vsel %vm467_vm8, %v501_v6, %v502_v0  ;;  %v2305_v23 = vcombine.low %v367_v7, %v2287_v12  ;;  %v430_v25 = vshrl.u32 %v2235_v37, 16  ;;  %v642_v26 = vshll.u32 %v2230_v34, 16  ;;  %v2060_v34 = vld [vmem:[%s2666_s1 + $0x28] sm:$0xff]   ;;  %v2064_v7 = vld [vmem:[%s2666_s1 + $0x78] sm:$0xff]  }
  0x2e   : > { %v504_v27 = vrot.slane %v2267_v60, 1  ;;  %v641_v30 = vrot.slane %v639_v15, 2  ;;  %v617_v31 = vsel %vm582_vm7, %v614_v45, %v616_v18  ;;  %v588_v32 = vrot.slane %v2295_v20, 2  ;;  %1953 = vmatpush3.bf16.msra.mxu0 %v2058_v21  ;;  %v372_v1 = vld [vmem:[#allocation2 + $0x28] sm:$0xf] }
  0x2f   : > { %v472_v33 = vsel %vm467_vm8, %v469_v4, %v471_v13  ;;  %vm409_vm9 = vsmask.f32 7424  ;;  %v415_v9 = vrot.slane %v413_v14, 1  ;;  %v418_v35 = vshll.u32 %v2263_v58, 16  ;;  %1954 = vmatprep.subr.bf16.mxu0 %v2059_v22  ;;  %v2065_v14 = vld [vmem:[%s2666_s1 + $0x38] sm:$0xff]  }
  0x30   : > { %v618_v40 = vrot.slane %v2305_v23, 2  ;;  %v473_v41 = vrot.slane %v2272_v2, 1  ;;  %v644_v42 = vrot.slane %v642_v26, 3  ;;  %v646_v43 = vrot.slane %v430_v25, 2 }
  0x31   : > { %596 = vrot.lane.b32.xlu0 %v587_v16, %s2077_s11  ;;  %512 = vrot.lane.b32.xlu1 %v503_v19, %s2078_s18  ;;  %v647_v44 = vrot.slane %v426_v17, 3  ;;  %v422_v45 = vshrl.u32 %v2263_v58, 16  ;;  %v589_v46 = vsel %vm582_vm7, %v586_v3, %v588_v32  ;;  %v505_v47 = vsel %vm467_vm8, %v502_v0, %v504_v27 }
  0x32   : > { %v506_v48 = vrot.slane %v2295_v20, 1  ;;  %1955 = vmatpush3.bf16.msra.mxu0 %v2060_v34  ;;  %v420_v51 = vrot.slane %v418_v35, 1  ;;  %v428_v52 = vrot.slane %v426_v17, 1  ;;  %v474_v29 = vsel %vm467_vm8, %v471_v13, %v473_v41  ;;  %v377_v13 = vld [vmem:[#allocation2 + $0x2c] sm:$0xf] }
  0x33   : > { %1956 = vmatprep.subr.bf16.mxu0 %v2061_v36  ;;  %v416_v53 = vor.u32 %v415_v9, %v411_v24  ;;  %v434_v54 = vshll.u32 %v2272_v2, 16  ;;  %v438_v38 = vshrl.u32 %v2272_v2, 16  ;;  %vm637_vm10 = vsmask.f32 5376 }
  0x34   : > { %v645_v55 = vor.u32 %v644_v42, %v641_v30  ;;  %v648_v56 = vor.u32 %v647_v44, %v646_v43  ;;  %v424_v50 = vor.u32 %v422_v45, %v420_v51  ;;  %v619_v57 = vsel %vm582_vm7, %v616_v18, %v618_v40  ;;  %v2063_v45 = vld [vmem:[%s2666_s1 + $0x80] sm:$0xff]  }
  0x35   : > { %626 = vrot.lane.b32.xlu0 %v617_v31, %s2076_s6  ;;  %481 = vrot.lane.b32.xlu1 %v472_v33, %s2076_s6  ;;  %v432_v61 = vor.u32 %v430_v25, %v428_v52  ;;  %v436_v63 = vrot.slane %v434_v54, 1  ;;  %v442_v0 = vshll.u32 %v2305_v23, 16  ;;  %v446_v3 = vshrl.u32 %v2305_v23, 16 }
  0x36   : > { %1957 = vmatpush3.bf16.msra.mxu0 %v2062_v49  ;;  %v507_v4 = vsel %vm467_vm8, %v504_v27, %v506_v48  ;;  %v650_v5 = vrot.slane %v438_v38, 2  ;;  %v651_v6 = vrot.slane %v434_v54, 3  ;;  %v421_v8 = vsel %vm409_vm9, %v416_v53, %v420_v51 }
  0x37   : > { %v649_v10 = vsel %vm637_vm10, %v645_v55, %v648_v56  ;;  %v429_v11 = vsel %vm409_vm9, %v424_v50, %v428_v52  ;;  %v437_v15 = vsel %vm409_vm9, %v432_v61, %v436_v63  ;;  %v655_v16 = vrot.slane %v442_v0, 3  ;;  %1958 = vmatprep.subr.bf16.mxu0 %v2064_v7  ;;  %v380_v52 = vld [vmem:[#allocation2 + $0x8] sm:$0x8] }
  0x38   : > { %v2365_v18 = vrot.slane %v442_v0, 1  ;;  %v535_v19 = vshrl.u32 %v2238_v39, 16  ;;  %v654_v21 = vrot.slane %v446_v3, 2  ;;  %v440_v17 = vor.u32 %v438_v38, %v436_v63  ;;  %v2408_v0 = vld [vmem:[#allocation2 + $0x2c] ss:$0 sps:$4 sm:$0x33]  }
  0x39   : > { %598 = vrot.lane.b32.xlu0 %v589_v46, %s2077_s11  ;;  %514 = vrot.lane.b32.xlu1 %v505_v47, %s2078_s18  ;;  %v2371_v22 = vcombine.low %v2287_v12, %v372_v1  ;;  %v538_v24 = vshll.u32 %v2238_v39, 16  ;;  %v652_v25 = vor.u32 %v651_v6, %v650_v5  ;;  %vm525_vm11 = vsmask.f32 6400 }
  0x3a   : > { %1959 = vmatpush3.bf16.msra.mxu0 %v2065_v14  ;;  %v537_v26 = vrot.slane %v535_v19, 1  ;;  %v527_v27 = vshrl.u32 %v2265_v59, 16  ;;  %v475_v30 = vrot.slane %v2305_v23, 1  ;;  %v530_v33 = vshll.u32 %v2265_v59, 16 }
  0x3b   : > { %v540_v31 = vrot.slane %v538_v24, 2  ;;  %v544_v12 = vshrl.u32 %v2267_v60, 16  ;;  %v2380_v9 = vcombine.low %v372_v1, %v377_v13  ;;  %v547_v34 = vshll.u32 %v2267_v60, 16  ;;  %v2044_v13 = vld [vmem:[#allocation2 + $0x28] ss:$0 sps:$4 sm:$0x11]  }
  0x3c   : > { %v529_v39 = vrot.slane %v527_v27, 1  ;;  %v553_v35 = vshrl.u32 %v2295_v20, 16  ;;  %v532_v42 = vrot.slane %v530_v33, 2  ;;  %v556_v44 = vshll.u32 %v2295_v20, 16 }
  0x3d   : > { %628 = vrot.lane.b32.xlu0 %v619_v57, %s2076_s6  ;;  %483 = vrot.lane.b32.xlu1 %v474_v29, %s2076_s6  ;;  %v541_v36 = vor.u32 %v540_v31, %v537_v26  ;;  %v546_v43 = vrot.slane %v544_v12, 1  ;;  %v445_v59 = vsel %vm409_vm9, %v440_v17, %v2365_v18  ;;  %v549_v46 = vrot.slane %v547_v34, 2  ;;  %v2066_v57 = vld [vmem:[%s2666_s1 + $0x88] sm:$0xff]  }
  0x3e   : > { %v555_v47 = vrot.slane %v553_v35, 1  ;;  %v653_v60 = vsel %vm637_vm10, %v648_v56, %v652_v25  ;;  %v533_v49 = vor.u32 %v532_v42, %v529_v39  ;;  %v558_v51 = vrot.slane %v556_v44, 2  ;;  %v2048_v35 = vld [vmem:[#allocation2 + $0x30] ss:$0 sps:$4 sm:$0x77]  }
  0x3f   : > { %v2393_v29 = vor.u32 %v655_v16, %v654_v21  ;;  %v550_v53 = vor.u32 %v549_v46, %v546_v43  ;;  %v2079_v54 = vmov 0.0   ;;  %vm2080_vm12 = vmmov 0  }
  0x40   : > { %1997 = vmatprep.subr.bf16.mxu1 %v2079_v54  ;;  %2001 = vmatprep.mubr.msk.bf16.mxu1 %vm2080_vm12, %v2079_v54  ;;  %v1883_v38 = vcombine.low %v380_v52, %v2222_v28  ;;  %v562_v55 = vshrl.u32 %v2371_v22, 16  ;;  %v2401_v50 = vsel %vm525_vm11, %v533_v49, %v541_v36  ;;  %v559_v56 = vor.u32 %v558_v51, %v555_v47 }
  0x41   : > { %454 = vrot.lane.b32.xlu0 %v421_v8, %s2077_s11  ;;  %516 = vrot.lane.b32.xlu1 %v507_v4, %s2078_s18  ;;  %v691_v61 = vrot.slane %v2235_v37, 3  ;;  %v565_v63 = vshll.u32 %v2371_v22, 16  ;;  %v2411_v1 = vsel %vm525_vm11, %v541_v36, %v550_v53  ;;  %vm689_vm14 = vcmask 1044480  }
  0x42   : > { %1998 = vmatpush3.bf16.msra.mxu1 %v2063_v45  ;;  %v690_v28 = vrot.slane %v1883_v38, 3  ;;  %v564_v4 = vrot.slane %v562_v55, 1  ;;  %v590_v5 = vrot.slane %v2371_v22, 2  ;;  %v659_v6 = vshrl.u32 %v2380_v9, 16 }
  0x43   : > { %1999 = vmatprep.subr.bf16.mxu1 %v2079_v54  ;;  %v2419_v7 = vsel %vm525_vm11, %v550_v53, %v559_v56  ;;  %v567_v8 = vrot.slane %v565_v63, 2  ;;  %v571_v14 = vshrl.u32 %v2408_v0, 16  ;;  %v574_v16 = vshll.u32 %v2408_v0, 16 }
  0x44   : > { %v476_v21 = vsel %vm467_vm8, %v473_v41, %v475_v30  ;;  %v508_v17 = vrot.slane %v2371_v22, 1  ;;  %v591_v26 = vsel %vm582_vm7, %v588_v32, %v590_v5  ;;  %v620_v27 = vrot.slane %v2380_v9, 2 }
  0x45   : > { %676 = vrot.lane.b32.xlu0 %v649_v10, %s2078_s18  ;;  %456 = vrot.lane.b32.xlu1 %v429_v11, %s2077_s11  ;;  %v657_v10 = vsel %vm637_vm10, %v652_v25, %v2393_v29  ;;  %v662_v11 = vshll.u32 %v2380_v9, 16  ;;  %v568_v19 = vor.u32 %v567_v8, %v564_v4  ;;  %v573_v24 = vrot.slane %v571_v14, 1 }
  0x46   : > { %2000 = vmatpush3.bf16.msra.mxu1 %v2066_v57  ;;  %v576_v25 = vrot.slane %v574_v16, 2  ;;  %vm701_vm15 = vcmask 261120   ;;  %v661_v33 = vrot.slane %v659_v6, 2  ;;  %v450_v12 = vshll.u32 %v2044_v13, 16 }
  0x47   : > { %v2440_v31 = vsel %vm525_vm11, %v559_v56, %v568_v19  ;;  %v664_v41 = vrot.slane %v662_v11, 3  ;;  %v693_v39 = vrot.slane %v2272_v2, 3  ;;  %v448_v32 = vor.u32 %v446_v3, %v2365_v18 }
  0x48   : > { %v577_v22 = vor.u32 %v576_v25, %v573_v24  ;;  %v621_v36 = vsel %vm582_vm7, %v618_v40, %v620_v27  ;;  %v509_v42 = vsel %vm467_vm8, %v506_v48, %v508_v17  ;;  %v452_v44 = vrot.slane %v450_v12, 1  ;;  %v2047_v48 = vld [vmem:[#allocation2 + $0x2c] ss:$0 sps:$4 sm:$0x11]  }
  0x49   : > { %678 = vrot.lane.b32.xlu0 %v653_v60, %s2078_s18  ;;  %458 = vrot.lane.b32.xlu1 %v437_v15, %s2077_s11  ;;  %v692_v15 = vsel %vm689_vm14, %v690_v28, %v691_v61  ;;  %v665_v43 = vor.u32 %v664_v41, %v661_v33  ;;  %v694_v45 = vsel %vm689_vm14, %v691_v61, %v693_v39  ;;  %v668_v46 = vshrl.u32 %v2048_v35, 16 }
  0x4a   : > { %2002 = vmatmul.mubr.msk.bf16.vlgmr.msra.gmra.mrb[0].mxu1 %vm701_vm15, %v692_v15  ;;  %v2447_v34 = vsel %vm525_vm11, %v568_v19, %v577_v22  ;;  %v671_v3 = vshll.u32 %v2048_v35, 16  ;;  %v453_v40 = vsel %vm409_vm9, %v448_v32, %v452_v44  ;;  %v592_v20 = vrot.slane %v2408_v0, 2 }
  0x4b   : > { %2005 = vmatprep.mubr.msk.bf16.mxu1 %vm2080_vm12, %v2079_v54  ;;  %v666_v18 = vsel %vm637_vm10, %v2393_v29, %v665_v43  ;;  %v477_v47 = vrot.slane %v2044_v13, 1  ;;  %v695_v60 = vrot.slane %v2305_v23, 3  ;;  %v670_v51 = vrot.slane %v668_v46, 2 }
  0x4c   : > { %v593_v52 = vsel %vm582_vm7, %v590_v5, %v592_v20  ;;  %v510_v53 = vrot.slane %v2047_v48, 1  ;;  %v673_v38 = vrot.slane %v671_v3, 3  ;;  %v699_v28 = vrot.slane %v2048_v35, 3 }
  0x4d   : > { %680 = vrot.lane.b32.xlu0 %v657_v10, %s2078_s18  ;;  %460 = vrot.lane.b32.xlu1 %v445_v59, %s2077_s11  ;;  %v2046_v59 = vld [vmem:[#allocation2 + $0x30] ss:$0 sps:$4 sm:$0x33]   ;;  %v478_v29 = vsel %vm467_vm8, %v475_v30, %v477_v47  ;;  %v696_v55 = vsel %vm689_vm14, %v693_v39, %v695_v60  ;;  %v697_v30 = vrot.slane %v2380_v9, 3  ;;  %vm712_vm5 = vcmask 523264  }
  0x4e   : > { %v622_v49 = vrot.slane %v2046_v59, 2  ;;  %v511_v57 = vsel %vm467_vm8, %v508_v17, %v510_v53  ;;  %v674_v61 = vor.u32 %v673_v38, %v670_v51  ;;  %vm723_vm1 = vcmask 785408  }
  0x4f   : > { %v698_v0 = vsel %vm689_vm14, %v695_v60, %v697_v30  ;;  %v700_v4 = vsel %vm689_vm14, %v697_v30, %v699_v28  ;;  %vm1726_vm2 = vcmask 1041409   ;;  %vm1729_vm0 = vcmask 1042434  }
  0x50   : > { %v623_v56 = vsel %vm582_vm7, %v620_v27, %v622_v49  ;;  %v675_v63 = vsel %vm637_vm10, %v665_v43, %v674_v61  ;;  %vm1732_vm3 = vcmask 1043459  }
  0x51   : > { %600 = vrot.lane.b32.xlu0 %v591_v26, %s2077_s11  ;;  %485 = vrot.lane.b32.xlu1 %v476_v21, %s2076_s6 }
  0x52   : > { %2006 = vmatmul.mubr.msk.bf16.gmra.mrb[4].mxu1 %vm701_vm15, %v694_v45 }
  0x53   : > { %2009 = vmatprep.mubr.msk.bf16.mxu1 %vm2080_vm12, %v2079_v54 }
  0x55   : > { %630 = vrot.lane.b32.xlu0 %v621_v36, %s2076_s6  ;;  %518 = vrot.lane.b32.xlu1 %v509_v42, %s2078_s18 }
  0x59   : > { %682 = vrot.lane.b32.xlu0 %v666_v18, %s2078_s18  ;;  %462 = vrot.lane.b32.xlu1 %v453_v40, %s2077_s11 }
  0x5a   : > { %2010 = vmatmul.mubr.msk.bf16.gmra.mrb[8].mxu1 %vm701_vm15, %v696_v55 }
  0x5b   : > { %2013 = vmatprep.mubr.msk.bf16.mxu1 %vm2080_vm12, %v2079_v54 }
  0x5d   : > { %602 = vrot.lane.b32.xlu0 %v593_v52, %s2077_s11  ;;  %487 = vrot.lane.b32.xlu1 %v478_v29, %s2076_s6 }
  0x61   : > { %632 = vrot.lane.b32.xlu0 %v623_v56, %s2076_s6  ;;  %520 = vrot.lane.b32.xlu1 %v511_v57, %s2078_s18 }
  0x62   : > { %2014 = vmatmul.mubr.msk.bf16.gmra.mrb[12].mxu1 %vm701_vm15, %v698_v0 }
  0x63   : > { %2017 = vmatprep.mubr.msk.bf16.mxu1 %vm2080_vm12, %v2079_v54 }
  0x65   : > { %684 = vrot.lane.b32.xlu0 %v675_v63, %s2078_s18 }
  0x6a   : > { %2018 = vmatmul.mubr.msk.bf16.gmra.mrb[16].mxu1 %vm701_vm15, %v700_v4 }
  0x9a   : > { %v625_v9 = vpop.permute.xlu1 %624 }
  0x9f   : > { %v595_v5 = vpop.permute.xlu0 %594  ;;  %v480_v6 = vpop.permute.xlu1 %479 }
  0xa0   : > { %v741_v54 = vsel %vm701_vm15, %v2401_v50, %v595_v5 }
  0xa1   : > { %v755_v27 = vsel %vm712_vm5, %v741_v54, %v625_v9 }
  0xa3   : > { %v597_v8 = vpop.permute.xlu0 %596  ;;  %v513_v10 = vpop.permute.xlu1 %512 }
  0xa4   : > { %v744_v22 = vsel %vm701_vm15, %v2411_v1, %v597_v8 }
  0xa7   : > { %v627_v11 = vpop.permute.xlu0 %626  ;;  %v482_v13 = vpop.permute.xlu1 %481 }
  0xa8   : > { %v757_v50 = vsel %vm712_vm5, %v744_v22, %v627_v11  ;;  %v2553_v22 = vld [vmem:[%s2667_s2] ss:$0 sm:$0xff] }
  0xab   : > { %v599_v14 = vpop.permute.xlu0 %598  ;;  %v515_v16 = vpop.permute.xlu1 %514 }
  0xac   : > { %v747_v44 = vsel %vm701_vm15, %v2419_v7, %v599_v14 }
  0xaf   : > { %v629_v15 = vpop.permute.xlu0 %628  ;;  %v484_v19 = vpop.permute.xlu1 %483 }
  0xb0   : > { %v759_v1 = vsel %vm712_vm5, %v747_v44, %v629_v15 }
  0xb3   : > { %v455_v21 = vpop.permute.xlu0 %454  ;;  %v517_v17 = vpop.permute.xlu1 %516 }
  0xb4   : > { %v703_v24 = vsel %vm701_vm15, %v2269_v62, %v455_v21 }
  0xb5   : > { %v714_v25 = vsel %vm712_vm5, %v703_v24, %v480_v6 }
  0xb6   : > { %v725_v12 = vsel %vm723_vm1, %v714_v25, %v513_v10 }
  0xb7   : > { %v677_v26 = vpop.permute.xlu0 %676  ;;  %v457_v33 = vpop.permute.xlu1 %456 }
  0xb8   : > { %v765_v41 = vsel %vm723_vm1, %v755_v27, %v677_v26  ;;  %v705_v62 = vsel %vm701_vm15, %v2263_v58, %v457_v33  ;;  %v2081_v26 = vmov 1983009808   ;;  %v1115_v33 = vlaneseq }
  0xb9   : > { %977 = vmatprep.mubr.bf16.mxu0 %v765_v41  ;;  %v716_v36 = vsel %vm712_vm5, %v705_v62, %v482_v13  ;;  %v1113_v27 = vunpack.c.l.s4 %v2081_v26 }
  0xba   : > { %978 = vmatmul.mubr.bf16.vlgmr.msra.gmra.mrb[0].mxu0 %v725_v12  ;;  %v728_v45 = vsel %vm723_vm1, %v716_v36, %v515_v16 }
  0xbb   : > { %v679_v39 = vpop.permute.xlu0 %678  ;;  %v459_v32 = vpop.permute.xlu1 %458 }
  0xbc   : > { %v768_v35 = vsel %vm723_vm1, %v757_v50, %v679_v39  ;;  %v707_v58 = vsel %vm701_vm15, %v2235_v37, %v459_v32  ;;  %v1114_v39 = vunpack.c.0.s8 %v1113_v27  ;;  %v1116_v32 = vshrl.u32 %v1115_v33, 7 }
  0xbd   : > { %985 = vmatprep.mubr.bf16.mxu0 %v768_v35  ;;  %v718_v18 = vsel %vm712_vm5, %v707_v58, %v484_v19 }
  0xbe   : > { %v731_v47 = vsel %vm723_vm1, %v718_v18, %v517_v17  ;;  %v2556_v44 = vsub.s32 %v1114_v39, %v1116_v32 }
  0xbf   : > { %v681_v42 = vpop.permute.xlu0 %680  ;;  %v461_v43 = vpop.permute.xlu1 %460 }
  0xc0   : > { %v771_v59 = vsel %vm723_vm1, %v759_v1, %v681_v42  ;;  %v709_v37 = vsel %vm701_vm15, %v2272_v2, %v461_v43 }
  0xc2   : > { %986 = vmatmul.mubr.bf16.gmra.mrb[4].mxu0 %v728_v45 }
  0xc3   : > { %993 = vmatprep.mubr.bf16.mxu0 %v771_v59  ;;  %v601_v46 = vpop.permute.xlu0 %600  ;;  %v486_v3 = vpop.permute.xlu1 %485 }
  0xc4   : > { %v750_v7 = vsel %vm701_vm15, %v2440_v31, %v601_v46  ;;  %v720_v53 = vsel %vm712_vm5, %v709_v37, %v486_v3 }
  0xc7   : > { %v631_v40 = vpop.permute.xlu0 %630  ;;  %v519_v20 = vpop.permute.xlu1 %518 }
  0xc8   : > { %v761_v48 = vsel %vm712_vm5, %v750_v7, %v631_v40  ;;  %v734_v38 = vsel %vm723_vm1, %v720_v53, %v519_v20 }
  0xca   : > { %994 = vmatmul.mubr.bf16.gmra.mrb[8].mxu0 %v731_v47 }
  0xcb   : > { %v683_v60 = vpop.permute.xlu0 %682  ;;  %v463_v49 = vpop.permute.xlu1 %462 }
  0xcc   : > { %v774_v51 = vsel %vm723_vm1, %v761_v48, %v683_v60  ;;  %v711_v56 = vsel %vm701_vm15, %v2305_v23, %v463_v49 }
  0xcd   : > { %1001 = vmatprep.mubr.bf16.mxu0 %v774_v51 }
  0xcf   : > { %v603_v52 = vpop.permute.xlu0 %602  ;;  %v488_v29 = vpop.permute.xlu1 %487 }
  0xd0   : > { %v753_v57 = vsel %vm701_vm15, %v2447_v34, %v603_v52  ;;  %v722_v61 = vsel %vm712_vm5, %v711_v56, %v488_v29 }
  0xd2   : > { %1002 = vmatmul.mubr.bf16.gmra.mrb[12].mxu0 %v734_v38 }
  0xd3   : > { %v633_v55 = vpop.permute.xlu0 %632  ;;  %v521_v31 = vpop.permute.xlu1 %520 }
  0xd4   : > { %v763_v30 = vsel %vm712_vm5, %v753_v57, %v633_v55  ;;  %v737_v63 = vsel %vm723_vm1, %v722_v61, %v521_v31 }
  0xd7   : > { %v685_v2 = vpop.permute.xlu0 %684 }
  0xd8   : > { %v777_v0 = vsel %vm723_vm1, %v763_v30, %v685_v2 }
  0xd9   : > { %1009 = vmatprep.mubr.bf16.mxu0 %v777_v0 }
  0xda   : > { %1010 = vmatmul.mubr.bf16.gmra.mrb[16].mxu0 %v737_v63 }
 0x11d   : > { %v1052_v28 = vpop.f32.mrb[0].mxu1 }
 0x11e   : > { %v2003_v4 = vpop.f32.mrb[1].mxu1 }
 0x11f   : > { %v1055_v9 = vpop.f32.mrb[2].mxu1 }
 0x120   : > { %v2004_v5 = vpop.f32.mrb[3].mxu1 }
 0x125   : > { %v1060_v6 = vpop.f32.mrb[4].mxu1 }
 0x126   : > { %v2007_v23 = vpop.f32.mrb[5].mxu1 }
 0x127   : > { %v2536_v8 = vpop.f32.mrb[6].mxu1 }
 0x128   : > { %v2008_v34 = vpop.f32.mrb[7].mxu1 }
 0x12d   : > { %v2538_v10 = vpop.f32.mrb[8].mxu1 }
 0x12e   : > { %v2011_v11 = vpop.f32.mrb[9].mxu1 }
 0x12f   : > { %v2540_v13 = vpop.f32.mrb[10].mxu1 }
 0x130   : > { %v2012_v14 = vpop.f32.mrb[11].mxu1 }
 0x135   : > { %v2542_v16 = vpop.f32.mrb[12].mxu1 }
 0x136   : > { %v2015_v15 = vpop.f32.mrb[13].mxu1 }
 0x137   : > { %v2544_v19 = vpop.f32.mrb[14].mxu1 }
 0x138   : > { %v2016_v21 = vpop.f32.mrb[15].mxu1 }
 0x13d   : > { %v2546_v17 = vpop.f32.mrb[16].mxu1 }
 0x13e   : > { %v2019_v54 = vpop.f32.mrb[17].mxu1 }
 0x13f   : > { %v2548_v24 = vpop.f32.mrb[18].mxu1 }
 0x140   : > { %v2020_v25 = vpop.f32.mrb[19].mxu1 }
 0x18d   : > { %v1960_v41 = vpop.f32.mrb[0].mxu0 }
 0x18e   : > { %v1961_v12 = vpop.f32.mrb[1].mxu0 }
 0x18f   : > { %v1962_v50 = vadd.f32 %v1961_v12, %v1960_v41  ;;  %v1963_v62 = vpop.f32.mrb[2].mxu0 }
 0x190   : > { %v1964_v35 = vpop.f32.mrb[3].mxu0 }
 0x191   : > { %v980_v36 = vadd.f32 %v1962_v50, %v2553_v22  ;;  %v1965_v42 = vadd.f32 %v1964_v35, %v1963_v62 }
 0x193   : > { %v1053_v43 = vadd.f32 %v1052_v28, %v980_v36  ;;  %v983_v1 = vadd.f32 %v1965_v42, %v2553_v22 }
 0x195   : > { %v1091_v45 = vmax.f32 %v1053_v43, 0.0  ;;  %v1056_v59 = vadd.f32 %v1055_v9, %v983_v1  ;;  %v1966_v58 = vpop.f32.mrb[4].mxu0 }
 0x196   : > { %v1967_v46 = vpop.f32.mrb[5].mxu0 }
 0x197   : > { %v1111_v3 = vcombine.high %v1091_v45, %v1091_v45  ;;  %v1118_v18 = vrot.slane %v1091_v45, %v2556_v44  ;;  %v1092_v40 = vmax.f32 %v1056_v59, 0.0  ;;  %v1968_v20 = vadd.f32 %v1967_v46, %v1966_v58  ;;  %v1969_v47 = vpop.f32.mrb[6].mxu0 }
 0x198   : > { %v1970_v7 = vpop.f32.mrb[7].mxu0 }
 0x199   : > { %v1125_v48 = vrot.slane %v1111_v3, %v2556_v44  ;;  %v1126_v60 = vcombine.high %v1118_v18, %v1118_v18  ;;  %v1908_v49 = vrot.slane %v1118_v18, 9  ;;  %v1128_v51 = vcombine.high %v1092_v40, %v1092_v40 }
 0x19a   : > { %v1135_v37 = vrot.slane %v1092_v40, %v2556_v44  ;;  %v988_v52 = vadd.f32 %v1968_v20, %v2553_v22  ;;  %v1971_v29 = vadd.f32 %v1970_v7, %v1969_v47 }
 0x19b   : > { %v1127_v53 = vcombine.high %v1125_v48, %v1125_v48  ;;  %v1909_v38 = vrot.slane %v1126_v60, 9  ;;  %v1910_v55 = vrot.slane %v1125_v48, 9  ;;  %v1142_v31 = vrot.slane %v1128_v51, %v2556_v44 }
 0x19c   : > { %v1143_v56 = vcombine.high %v1135_v37, %v1135_v37  ;;  %v1061_v57 = vadd.f32 %v1060_v6, %v988_v52  ;;  %v991_v61 = vadd.f32 %v1971_v29, %v2553_v22  ;;  %v1405_v30 = vmax.f32 %v1118_v18, %v1908_v49 }
 0x19d   : > { %v1406_v2 = vmax.f32 %v1126_v60, %v1909_v38  ;;  %v1911_v63 = vrot.slane %v1127_v53, 9  ;;  %v1972_v0 = vpop.f32.mrb[8].mxu0  ;;  %v1144_v28 = vcombine.high %v1142_v31, %v1142_v31  ;;  %v1913_v9 = vrot.slane %v1142_v31, 9 }
 0x19e   : > { %v1912_v4 = vrot.slane %v1143_v56, 9  ;;  %v1093_v5 = vmax.f32 %v1061_v57, 0.0  ;;  %v1973_v23 = vpop.f32.mrb[9].mxu0  ;;  %v1407_v34 = vmax.f32 %v1125_v48, %v1910_v55  ;;  %v1064_v14 = vadd.f32 %v2536_v8, %v991_v61 }
 0x19f   : > { %v1408_v11 = vmax.f32 %v1127_v53, %v1911_v63  ;;  %v1974_v15 = vadd.f32 %v1973_v23, %v1972_v0  ;;  %v1975_v21 = vpop.f32.mrb[10].mxu0  ;;  %v1914_v54 = vrot.slane %v1144_v28, 9  ;;  %v1410_v6 = vmax.f32 %v1142_v31, %v1913_v9 }
 0x1a0   : > { %v1409_v25 = vmax.f32 %v1143_v56, %v1912_v4  ;;  %v1145_v26 = vcombine.high %v1093_v5, %v1093_v5  ;;  %v1976_v27 = vpop.f32.mrb[11].mxu0  ;;  %v1152_v33 = vrot.slane %v1093_v5, %v2556_v44  ;;  %v1094_v41 = vmax.f32 %v1064_v14, 0.0 }
 0x1a1   : > { %v996_v12 = vadd.f32 %v1974_v15, %v2553_v22  ;;  %v1977_v50 = vadd.f32 %v1976_v27, %v1975_v21  ;;  %v1411_v62 = vmax.f32 %v1144_v28, %v1914_v54  ;;  %v1438_v32 = vmax.f32 %v1406_v2, %v1410_v6 }
 0x1a2   : > { %v1437_v39 = vmax.f32 %v1405_v30, %v1409_v25  ;;  %v1159_v35 = vrot.slane %v1145_v26, %v2556_v44  ;;  %v1915_v8 = vrot.slane %v1152_v33, 9  ;;  %v1161_v36 = vcombine.high %v1094_v41, %v1094_v41 }
 0x1a3   : > { %v1168_v42 = vrot.slane %v1094_v41, %v2556_v44  ;;  %v1069_v43 = vadd.f32 %v2538_v10, %v996_v12  ;;  %v1439_v1 = vmax.f32 %v1407_v34, %v1411_v62  ;;  %v1454_v59 = vpack.c.bf16 %v1438_v32, %v1438_v32 }
 0x1a4   : > { %v1453_v45 = vpack.c.bf16 %v1437_v39, %v1437_v39  ;;  %v1160_v58 = vcombine.high %v1159_v35, %v1159_v35  ;;  %v1916_v46 = vrot.slane %v1159_v35, 9  ;;  %v1412_v3 = vmax.f32 %v1152_v33, %v1915_v8 }
 0x1a5   : > { %v1175_v18 = vrot.slane %v1161_v36, %v2556_v44  ;;  %v1176_v40 = vcombine.high %v1168_v42, %v1168_v42  ;;  %v1978_v20 = vpop.f32.mrb[12].mxu0  ;;  %v1455_v47 = vpack.c.bf16 %v1439_v1, %v1439_v1  ;;  %v1498_v48 = vrot.slane %v1454_v59, %v2556_v44 }
 0x1a6   : > { %v1491_v7 = vrot.slane %v1453_v45, %v2556_v44  ;;  %v1917_v60 = vrot.slane %v1160_v58, 9  ;;  %v1979_v49 = vpop.f32.mrb[13].mxu0  ;;  %v1413_v51 = vmax.f32 %v1159_v35, %v1916_v46  ;;  %v1440_v10 = vmax.f32 %v1408_v11, %v1412_v3 }
 0x1a7   : > { %v1177_v37 = vcombine.high %v1175_v18, %v1175_v18  ;;  %v1918_v52 = vrot.slane %v1168_v42, 9  ;;  %v2574_v29 = vpop.f32.mrb[14].mxu0  ;;  %v1505_v53 = vrot.slane %v1455_v47, %v2556_v44  ;;  %v1610_v55 = vrot.slane %v1498_v48, %v2556_v44 }
 0x1a8   : > { %v1603_v38 = vrot.slane %v1491_v7, %v2556_v44  ;;  %v1919_v31 = vrot.slane %v1176_v40, 9  ;;  %v2579_v56 = vpop.f32.mrb[15].mxu0  ;;  %v1456_v57 = vpack.c.bf16 %v1440_v10, %v1440_v10  ;;  %v1095_v2 = vmax.f32 %v1069_v43, 0.0 }
 0x1a9   : > { %v1920_v61 = vrot.slane %v1177_v37, 9  ;;  %v1415_v30 = vmax.f32 %v1168_v42, %v1918_v52  ;;  %v1617_v63 = vrot.slane %v1505_v53, %v2556_v44  ;;  %v1710_v28 = vunpack.c.l.b16 %v1610_v55 }
 0x1aa   : > { %v1709_v0 = vunpack.c.l.b16 %v1603_v38  ;;  %v1416_v4 = vmax.f32 %v1176_v40, %v1919_v31  ;;  %v1512_v9 = vrot.slane %v1456_v57, %v2556_v44  ;;  %v1178_v23 = vcombine.high %v1095_v2, %v1095_v2 }
 0x1ab   : > { %v1417_v5 = vmax.f32 %v1177_v37, %v1920_v61  ;;  %v1185_v34 = vrot.slane %v1095_v2, %v2556_v44  ;;  %v1711_v11 = vunpack.c.l.b16 %v1617_v63  ;;  %v1725_v14 = vrot.slane %v1710_v28, 7 }
 0x1ac   : > { %v1414_v15 = vmax.f32 %v1160_v58, %v1917_v60  ;;  %v999_v21 = vadd.f32 %v1977_v50, %v2553_v22  ;;  %v1624_v54 = vrot.slane %v1512_v9, %v2556_v44  ;;  %v1192_v6 = vrot.slane %v1178_v23, %v2556_v44 }
 0x1ad   : > { %v1441_v25 = vmax.f32 %v1413_v51, %v1417_v5  ;;  %v1193_v26 = vcombine.high %v1185_v34, %v1185_v34  ;;  %v1984_v27 = vpop.f32.mrb[16].mxu0  ;;  %v1727_v33 = vsel %vm1726_vm2, %v1725_v14, %v1709_v0  ;;  %v1728_v41 = vrot.slane %v1711_v11, 6 }
 0x1ae   : > { %v1921_v12 = vrot.slane %v1185_v34, 9  ;;  %v1072_v62 = vadd.f32 %v2540_v13, %v999_v21  ;;  %v1985_v39 = vpop.f32.mrb[17].mxu0  ;;  %v1712_v32 = vunpack.c.l.b16 %v1624_v54  ;;  %v1923_v36 = vrot.slane %v1192_v6, 9 }
 0x1af   : > { %v1457_v35 = vpack.c.bf16 %v1441_v25, %v1441_v25  ;;  %v1922_v8 = vrot.slane %v1193_v26, 9  ;;  %v1987_v50 = vpop.f32.mrb[18].mxu0  ;;  %v1730_v42 = vsel %vm1729_vm0, %v1728_v41, %v1727_v33  ;;  %v1980_v45 = vadd.f32 %v1979_v49, %v1978_v20 }
 0x1b0   : > { %v1418_v43 = vmax.f32 %v1185_v34, %v1921_v12  ;;  %v1096_v1 = vmax.f32 %v1072_v62, 0.0  ;;  %v1988_v59 = vpop.f32.mrb[19].mxu0  ;;  %v1731_v58 = vrot.slane %v1712_v32, 5  ;;  %v1420_v18 = vmax.f32 %v1192_v6, %v1923_v36 }
 0x1b1   : > { %v1519_v46 = vrot.slane %v1457_v35, %v2556_v44  ;;  %v1419_v3 = vmax.f32 %v1193_v26, %v1922_v8  ;;  %v1004_v7 = vadd.f32 %v1980_v45, %v2553_v22  ;;  %v1983_v23 = vadd.f32 %v2579_v56, %v2574_v29 }
 0x1b2   : > { %v1442_v13 = vmax.f32 %v1414_v15, %v1418_v43  ;;  %v1194_v40 = vcombine.high %v1096_v1, %v1096_v1  ;;  %v1201_v47 = vrot.slane %v1096_v1, %v2556_v44  ;;  %v1733_v48 = vsel %vm1732_vm3, %v1731_v58, %v1730_v42 }
 0x1b3   : > { %v1631_v60 = vrot.slane %v1519_v46, %v2556_v44  ;;  %v1443_v51 = vmax.f32 %v1415_v30, %v1419_v3  ;;  %v1444_v10 = vmax.f32 %v1416_v4, %v1420_v18  ;;  %v1752_v20 = vpack.c.b16 %v1733_v48, %v1733_v48 }
 0x1b4   : > { %v1458_v49 = vpack.c.bf16 %v1442_v13, %v1442_v13  ;;  %v1208_v37 = vrot.slane %v1194_v40, %v2556_v44  ;;  %v1209_v52 = vcombine.high %v1201_v47, %v1201_v47  ;;  %v1924_v55 = vrot.slane %v1201_v47, 9 }
 0x1b5   : > { %v1459_v53 = vpack.c.bf16 %v1443_v51, %v1443_v51  ;;  %v1460_v38 = vpack.c.bf16 %v1444_v10, %v1444_v10  ;;  %v1762_v31 = vrot.slane %v1752_v20, %v2556_v44  ;;  %v1713_v57 = vunpack.c.l.b16 %v1631_v60 }
 0x1b6   : > { %v1526_v61 = vrot.slane %v1458_v49, %v2556_v44  ;;  %v1925_v30 = vrot.slane %v1209_v52, 9  ;;  %v1210_v0 = vcombine.high %v1208_v37, %v1208_v37  ;;  %v1926_v28 = vrot.slane %v1208_v37, 9 }
 0x1b7   : > { %v1533_v2 = vrot.slane %v1459_v53, %v2556_v44  ;;  %v1540_v63 = vrot.slane %v1460_v38, %v2556_v44  ;;  %1789 = vst.msk [vmem:[%s2600_s13] sm:$0x3] %vm205_vm13, %v1762_v31  ;;  %v1421_v9 = vmax.f32 %v1201_v47, %v1924_v55  ;;  %v1077_v5 = vadd.f32 %v2542_v16, %v1004_v7 }
 0x1b8   : > { %v1638_v4 = vrot.slane %v1526_v61, %v2556_v44  ;;  %v1422_v14 = vmax.f32 %v1209_v52, %v1925_v30  ;;  %v1423_v15 = vmax.f32 %v1208_v37, %v1926_v28  ;;  %v1007_v25 = vadd.f32 %v1983_v23, %v2553_v22 }
 0x1b9   : > { %v1645_v34 = vrot.slane %v1533_v2, %v2556_v44  ;;  %v1652_v11 = vrot.slane %v1540_v63, %v2556_v44  ;;  %v1097_v54 = vmax.f32 %v1077_v5, 0.0  ;;  %v1986_v6 = vadd.f32 %v1985_v39, %v1984_v27 }
 0x1ba   : > { %v1714_v21 = vunpack.c.l.b16 %v1638_v4  ;;  %v1927_v41 = vrot.slane %v1210_v0, 9  ;;  %v1989_v12 = vadd.f32 %v1988_v59, %v1987_v50  ;;  %v1080_v29 = vadd.f32 %v2544_v19, %v1007_v25 }
 0x1bb   : > { %v1715_v26 = vunpack.c.l.b16 %v1645_v34  ;;  %v1716_v33 = vunpack.c.l.b16 %v1652_v11  ;;  %v1211_v16 = vcombine.high %v1097_v54, %v1097_v54  ;;  %v1218_v32 = vrot.slane %v1097_v54, %v2556_v44 }
 0x1bc   : > { %v1734_v62 = vrot.slane %v1714_v21, 7  ;;  %v1012_v8 = vadd.f32 %v1986_v6, %v2553_v22  ;;  %v1015_v36 = vadd.f32 %v1989_v12, %v2553_v22  ;;  %v1098_v43 = vmax.f32 %v1080_v29, 0.0 }
 0x1bd   : > { %v1736_v56 = vrot.slane %v1715_v26, 6  ;;  %v1738_v35 = vrot.slane %v1716_v33, 5  ;;  %v1225_v27 = vrot.slane %v1211_v16, %v2556_v44  ;;  %v1226_v39 = vcombine.high %v1218_v32, %v1218_v32 }
 0x1be   : > { %v1735_v42 = vsel %vm1726_vm2, %v1734_v62, %v1713_v57  ;;  %v1424_v1 = vmax.f32 %v1210_v0, %v1927_v41  ;;  %v1085_v45 = vadd.f32 %v2546_v17, %v1012_v8  ;;  %v1088_v59 = vadd.f32 %v2548_v24, %v1015_v36 }
 0x1bf   : > { %v1737_v50 = vsel %vm1729_vm0, %v1736_v56, %v1735_v42  ;;  %v1227_v58 = vcombine.high %v1225_v27, %v1225_v27  ;;  %v1928_v46 = vrot.slane %v1226_v39, 9  ;;  %v1929_v3 = vrot.slane %v1225_v27, 9 }
 0x1c0   : > { %v1739_v19 = vsel %vm1732_vm3, %v1738_v35, %v1737_v50  ;;  %v1228_v22 = vcombine.high %v1098_v43, %v1098_v43  ;;  %v1235_v13 = vrot.slane %v1098_v43, %v2556_v44  ;;  %v1099_v40 = vmax.f32 %v1085_v45, 0.0 }
 0x1c1   : > { %v1753_v18 = vpack.c.b16 %v1739_v19, %v1739_v19  ;;  %v1930_v47 = vrot.slane %v1227_v58, 9  ;;  %v1425_v7 = vmax.f32 %v1226_v39, %v1928_v46  ;;  %v1426_v48 = vmax.f32 %v1225_v27, %v1929_v3 }
 0x1c2   : > { %v1100_v60 = vmax.f32 %v1088_v59, 0.0  ;;  %v1242_v17 = vrot.slane %v1228_v22, %v2556_v44  ;;  %v1931_v24 = vrot.slane %v1235_v13, 9  ;;  %v1244_v10 = vcombine.high %v1099_v40, %v1099_v40 }
 0x1c3   : > { %v1769_v51 = vrot.slane %v1753_v18, %v2556_v44  ;;  %v1427_v20 = vmax.f32 %v1227_v58, %v1930_v47  ;;  %v1445_v49 = vmax.f32 %v1421_v9, %v1425_v7  ;;  %v1446_v37 = vmax.f32 %v1422_v14, %v1426_v48 }
 0x1c4   : > { %v1251_v52 = vrot.slane %v1099_v40, %v2556_v44  ;;  %v1243_v53 = vcombine.high %v1242_v17, %v1242_v17  ;;  %v1932_v38 = vrot.slane %v1242_v17, 9  ;;  %v1428_v55 = vmax.f32 %v1235_v13, %v1931_v24 }
 0x1c5   : > { %1790 = vst.msk [vmem:[%s2600_s13 + $0x2] sm:$0x3] %vm205_vm13, %v1769_v51  ;;  %v1258_v31 = vrot.slane %v1244_v10, %v2556_v44  ;;  %v1447_v57 = vmax.f32 %v1423_v15, %v1427_v20  ;;  %v1461_v61 = vpack.c.bf16 %v1445_v49, %v1445_v49  ;;  %v1462_v30 = vpack.c.bf16 %v1446_v37, %v1446_v37 }
 0x1c6   : > { %v1259_v2 = vcombine.high %v1251_v52, %v1251_v52  ;;  %v1933_v63 = vrot.slane %v1243_v53, 9  ;;  %v1448_v0 = vmax.f32 %v1424_v1, %v1428_v55  ;;  %v1934_v23 = vrot.slane %v1251_v52, 9 }
 0x1c7   : > { %v1260_v28 = vcombine.high %v1258_v31, %v1258_v31  ;;  %v1463_v4 = vpack.c.bf16 %v1447_v57, %v1447_v57  ;;  %v1547_v9 = vrot.slane %v1461_v61, %v2556_v44  ;;  %v1554_v5 = vrot.slane %v1462_v30, %v2556_v44 }
 0x1c8   : > { %v1429_v34 = vmax.f32 %v1242_v17, %v1932_v38  ;;  %v1464_v11 = vpack.c.bf16 %v1448_v0, %v1448_v0  ;;  %v1261_v21 = vcombine.high %v1100_v60, %v1100_v60  ;;  %v1935_v6 = vrot.slane %v1259_v2, 9 }
 0x1c9   : > { %v1936_v14 = vrot.slane %v1260_v28, 9  ;;  %v1561_v54 = vrot.slane %v1463_v4, %v2556_v44  ;;  %v1659_v15 = vrot.slane %v1547_v9, %v2556_v44  ;;  %v1666_v25 = vrot.slane %v1554_v5, %v2556_v44 }
 0x1ca   : > { %v1568_v26 = vrot.slane %v1464_v11, %v2556_v44  ;;  %v1431_v33 = vmax.f32 %v1251_v52, %v1934_v23  ;;  %v1268_v12 = vrot.slane %v1100_v60, %v2556_v44  ;;  %v1275_v29 = vrot.slane %v1261_v21, %v2556_v44 }
 0x1cb   : > { %v1433_v41 = vmax.f32 %v1260_v28, %v1936_v14  ;;  %v1673_v62 = vrot.slane %v1561_v54, %v2556_v44  ;;  %v1717_v16 = vunpack.c.l.b16 %v1659_v15  ;;  %v1718_v32 = vunpack.c.l.b16 %v1666_v25 }
 0x1cc   : > { %v1680_v56 = vrot.slane %v1568_v26, %v2556_v44  ;;  %v1276_v8 = vcombine.high %v1268_v12, %v1268_v12  ;;  %v1937_v36 = vrot.slane %v1268_v12, 9  ;;  %v1939_v39 = vrot.slane %v1275_v29, 9 }
 0x1cd   : > { %v1449_v35 = vmax.f32 %v1429_v34, %v1433_v41  ;;  %v1719_v42 = vunpack.c.l.b16 %v1673_v62  ;;  %v1740_v27 = vrot.slane %v1718_v32, 7  ;;  %v1430_v43 = vmax.f32 %v1243_v53, %v1933_v63 }
 0x1ce   : > { %v1720_v50 = vunpack.c.l.b16 %v1680_v56  ;;  %v1938_v45 = vrot.slane %v1276_v8, 9  ;;  %v1434_v59 = vmax.f32 %v1268_v12, %v1937_v36  ;;  %v1432_v46 = vmax.f32 %v1259_v2, %v1935_v6 }
 0x1cf   : > { %v1465_v1 = vpack.c.bf16 %v1449_v35, %v1449_v35  ;;  %v1741_v19 = vsel %vm1726_vm2, %v1740_v27, %v1717_v16  ;;  %v1742_v58 = vrot.slane %v1719_v42, 6  ;;  %v1436_v3 = vmax.f32 %v1275_v29, %v1939_v39 }
 0x1d0   : > { %v1744_v18 = vrot.slane %v1720_v50, 5  ;;  %v1435_v13 = vmax.f32 %v1276_v8, %v1938_v45  ;;  %v1450_v40 = vmax.f32 %v1430_v43, %v1434_v59 }
 0x1d1   : > { %v1575_v22 = vrot.slane %v1465_v1, %v2556_v44  ;;  %v1743_v47 = vsel %vm1729_vm0, %v1742_v58, %v1741_v19  ;;  %v1452_v7 = vmax.f32 %v1432_v46, %v1436_v3 }
 0x1d2   : > { %v1745_v48 = vsel %vm1732_vm3, %v1744_v18, %v1743_v47  ;;  %v1451_v60 = vmax.f32 %v1431_v33, %v1435_v13  ;;  %v1466_v51 = vpack.c.bf16 %v1450_v40, %v1450_v40 }
 0x1d3   : > { %v1754_v17 = vpack.c.b16 %v1745_v48, %v1745_v48  ;;  %v1468_v24 = vpack.c.bf16 %v1452_v7, %v1452_v7  ;;  %v1687_v10 = vrot.slane %v1575_v22, %v2556_v44 }
 0x1d4   : > { %v1467_v20 = vpack.c.bf16 %v1451_v60, %v1451_v60  ;;  %v1582_v49 = vrot.slane %v1466_v51, %v2556_v44 }
 0x1d5   : > { %v1776_v37 = vrot.slane %v1754_v17, %v2556_v44  ;;  %v1596_v52 = vrot.slane %v1468_v24, %v2556_v44  ;;  %v1721_v31 = vunpack.c.l.b16 %v1687_v10 }
 0x1d6   : > { %v1589_v53 = vrot.slane %v1467_v20, %v2556_v44  ;;  %v1694_v38 = vrot.slane %v1582_v49, %v2556_v44 }
 0x1d7   : > { %1791 = vst.msk [vmem:[%s2600_s13 + $0x4] sm:$0x3] %vm205_vm13, %v1776_v37  ;;  %v1708_v55 = vrot.slane %v1596_v52, %v2556_v44 }
 0x1d8   : > { %v1701_v57 = vrot.slane %v1589_v53, %v2556_v44  ;;  %v1722_v61 = vunpack.c.l.b16 %v1694_v38 }
 0x1d9   : > { %v1724_v30 = vunpack.c.l.b16 %v1708_v55 }
 0x1da   : > { %v1723_v2 = vunpack.c.l.b16 %v1701_v57  ;;  %v1746_v63 = vrot.slane %v1722_v61, 7 }
 0x1db   : > { %v1750_v0 = vrot.slane %v1724_v30, 5 }
 0x1dc   : > { %v1747_v28 = vsel %vm1726_vm2, %v1746_v63, %v1721_v31  ;;  %v1748_v4 = vrot.slane %v1723_v2, 6 }
 0x1de   : > { %v1749_v9 = vsel %vm1729_vm0, %v1748_v4, %v1747_v28 }
 0x1df   : > { %v1751_v5 = vsel %vm1732_vm3, %v1750_v0, %v1749_v9 }
 0x1e0   : > { %v1755_v23 = vpack.c.b16 %v1751_v5, %v1751_v5 }
 0x1e2   : > { %v1783_v34 = vrot.slane %v1755_v23, %v2556_v44 }
 0x1e4   : > { %1792 = vst.msk [vmem:[%s2600_s13 + $0x6] sm:$0x3] %vm205_vm13, %v1783_v34 }
 0x1e5 PF: > { %s13_s12 = sadd.s32 1, %s2073_s12  }
 0x1e6   : > { %p10_p4 = scmp.ge.s32.totalorder %s13_s12, 4  }
 0x1e8   :  { %12 = sbr.rel (!%p10_p4) target bundleno = 1 (0x1), region = 69 }

// kernel: _lambda_.3
= control target key start
LH: loop header
LB: loop body
LE: loop exit
PB: predicated region body
PF: predicated region fallthrough
CT: control target
= control target key end

     0   :  { %s4634_s12 = smov 0   ;;  %s6531_s0 = inlined_call_operand.vmem [shape: bf16[2,16,16,4], index: 0, kind: input, shape index: {}]   ;;  %s6532_s1 = inlined_call_operand.vmem [shape: bf16[36,16], index: 1, kind: input, shape index: {}]   ;;  %s6533_s2 = inlined_call_operand.vmem [shape: f32[1,16], index: 2, kind: input, shape index: {}]   ;;  %s6534_s3 = inlined_call_operand.vmem [shape: bf16[2,8,8,16], index: 3, kind: output, shape index: {}]  }
   0x1 LB: > { %s4114_s13 = sadd.s32 4294967295, %s4602_s12   ;;  %p4118_p0 = scmp.ge.s32.totalorder %s4602_s12, 1  ;;  %s4602_s12 = sphi %s4634_s12, %s13_s12  }
   0x2   : > { %p137_p1 = scmp.lt.s32.totalorder %s4602_s12, 3 }
   0x4   : > { %p138_p2 = pnand %p4118_p0, %p137_p1 }
   0x6   : > { %141 = sbr.rel (%p138_p2) target bundleno = 743 (0x2e7), region = 32 }
   0xd   : > { %p4644_p3 = scmp.lt.s32.totalorder %s4114_s13, 1  ;;  %vm172_vm0 = vcmask 27648   ;;  %vm213_vm1 = vcmask 26624   ;;  %v4604_v0 = vmov 0   ;;  %vm217_vm2 = vsmask.f32 1280 }
   0xe   : > { %175 = vst.msk [vmem:[#allocation2 + $0x8] sm:$0xf] %vm172_vm0, %v4604_v0  ;;  %176 = vst.msk [vmem:[#allocation2 + $0xc] sm:$0xf] %vm172_vm0, %v4604_v0  ;;  %vm218_vm3 = vsmask.f32 5392 }
   0xf   : > { %177 = vst.msk [vmem:[#allocation2 + $0x10] sm:$0xf] %vm172_vm0, %v4604_v0  ;;  %178 = vst.msk [vmem:[#allocation2 + $0x14] sm:$0xf] %vm172_vm0, %v4604_v0  ;;  %s6655_s13 = smov (!%p4644_p3, %s4114_s13), 1  ;;  %vm242_vm5 = vcmask 27649  }
  0x10   : > { %184 = vst.msk [vmem:[#allocation2 + $0x2c] sm:$0xf] %vm172_vm0, %v4604_v0  ;;  %185 = vst.msk [vmem:[#allocation2 + $0x30] sm:$0xf] %vm172_vm0, %v4604_v0  ;;  %s4399_s15 = sshll.u32 %s6655_s13, 7  ;;  %vm249_vm6 = vcmask 25600  }
  0x11   : > { %186 = vst.msk [vmem:[#allocation2 + $0x34] sm:$0xf] %vm172_vm0, %v4604_v0  ;;  %193 = vst.msk [vmem:[#allocation2 + $0x50] sm:$0xf] %vm172_vm0, %v4604_v0  ;;  %vm243_vm4 = vsmask.f32 7942  ;;  %s4699_s18 = scalar_lea.vmem %s6531_s0, %s4399_s15 }
  0x12   : > { %194 = vst.msk [vmem:[#allocation2 + $0x54] sm:$0xf] %vm172_vm0, %v4604_v0  ;;  %195 = vst.msk [vmem:[#allocation2 + $0x58] sm:$0xf] %vm172_vm0, %v4604_v0  ;;  %vm257_vm7 = vsmask.f32 2304 }
  0x13   : > { %202 = vst.msk [vmem:[#allocation2 + $0x74] sm:$0xf] %vm172_vm0, %v4604_v0  ;;  %203 = vst.msk [vmem:[#allocation2 + $0x78] sm:$0xf] %vm172_vm0, %v4604_v0  ;;  %vm258_vm8 = vsmask.f32 6416 }
  0x14   : > { %204 = vst.msk [vmem:[#allocation2 + $0x7c] sm:$0xf] %vm172_vm0, %v4604_v0  ;;  %173 = vst.msk [vmem:[#allocation2] sm:$0xf] %vm172_vm0, %v4604_v0  ;;  %v215_v1 = vld [vmem:[%s4699_s18] sm:$0xf] }
  0x15   : > { %174 = vst.msk [vmem:[#allocation2 + $0x4] sm:$0xf] %vm172_vm0, %v4604_v0  ;;  %179 = vst.msk [vmem:[#allocation2 + $0x18] sm:$0xf] %vm172_vm0, %v4604_v0  ;;  %v216_v2 = vld [vmem:[%s4699_s18 + $0x4] sm:$0xf] }
  0x16   : > { %180 = vst.msk [vmem:[#allocation2 + $0x1c] sm:$0xf] %vm172_vm0, %v4604_v0  ;;  %181 = vst.msk [vmem:[#allocation2 + $0x20] sm:$0xf] %vm172_vm0, %v4604_v0  ;;  %v4123_v3 = vld [vmem:[%s4699_s18 + $0x8] sm:$0xf] }
  0x17   : > { %182 = vst.msk [vmem:[#allocation2 + $0x24] sm:$0xf] %vm172_vm0, %v4604_v0  ;;  %183 = vst.msk [vmem:[#allocation2 + $0x28] sm:$0xf] %vm172_vm0, %v4604_v0  ;;  %v221_v4 = vshrl.u32 %v215_v1, 16  ;;  %v224_v5 = vshll.u32 %v215_v1, 16 }
  0x18   : > { %187 = vst.msk [vmem:[#allocation2 + $0x38] sm:$0xf] %vm172_vm0, %v4604_v0  ;;  %188 = vst.msk [vmem:[#allocation2 + $0x3c] sm:$0xf] %vm172_vm0, %v4604_v0  ;;  %v230_v6 = vshrl.u32 %v216_v2, 16  ;;  %v233_v7 = vshll.u32 %v216_v2, 16 }
  0x19   : > { %189 = vst.msk [vmem:[#allocation2 + $0x40] sm:$0xf] %vm172_vm0, %v4604_v0  ;;  %190 = vst.msk [vmem:[#allocation2 + $0x44] sm:$0xf] %vm172_vm0, %v4604_v0  ;;  %v4124_v8 = vld [vmem:[%s4699_s18 + $0xc] sm:$0xf] }
  0x1a   : > { %191 = vst.msk [vmem:[#allocation2 + $0x48] sm:$0xf] %vm172_vm0, %v4604_v0  ;;  %192 = vst.msk [vmem:[#allocation2 + $0x4c] sm:$0xf] %vm172_vm0, %v4604_v0  ;;  %v261_v9 = vshrl.u32 %v4123_v3, 16  ;;  %v264_v10 = vshll.u32 %v4123_v3, 16 }
  0x1b   : > { %196 = vst.msk [vmem:[#allocation2 + $0x5c] sm:$0xf] %vm172_vm0, %v4604_v0  ;;  %197 = vst.msk [vmem:[#allocation2 + $0x60] sm:$0xf] %vm172_vm0, %v4604_v0  ;;  %vm282_vm9 = vcmask 27650   ;;  %v223_v12 = vrot.slane %v221_v4, 6 }
  0x1c   : > { %198 = vst.msk [vmem:[#allocation2 + $0x64] sm:$0xf] %vm172_vm0, %v4604_v0  ;;  %199 = vst.msk [vmem:[#allocation2 + $0x68] sm:$0xf] %vm172_vm0, %v4604_v0  ;;  %vm283_vm10 = vsmask.f32 7946 }
  0x1d   : > { %200 = vst.msk [vmem:[#allocation2 + $0x6c] sm:$0xf] %vm172_vm0, %v4604_v0  ;;  %201 = vst.msk [vmem:[#allocation2 + $0x70] sm:$0xf] %vm172_vm0, %v4604_v0  ;;  %v226_v13 = vrot.slane %v224_v5, 7  ;;  %v232_v14 = vrot.slane %v230_v6, 6 }
  0x1e   : > { %205 = vst.msk [vmem:[#allocation2 + $0x80] sm:$0xf] %vm172_vm0, %v4604_v0  ;;  %206 = vst.msk [vmem:[#allocation2 + $0x84] sm:$0xf] %vm172_vm0, %v4604_v0  ;;  %v235_v15 = vrot.slane %v233_v7, 7  ;;  %v263_v18 = vrot.slane %v261_v9, 5 }
  0x1f   : > { %207 = vst.msk [vmem:[#allocation2 + $0x88] sm:$0xf] %vm172_vm0, %v4604_v0  ;;  %208 = vst.msk [vmem:[#allocation2 + $0x8c] sm:$0xf] %vm172_vm0, %v4604_v0  ;;  %v245_v16 = vld [vmem:[#allocation2 + $0x8] sm:$0xe]  ;;  %v227_v23 = vor.u32 %v226_v13, %v223_v12 }
  0x20   : > { %209 = vst.msk [vmem:[#allocation2 + $0x90] sm:$0xf] %vm172_vm0, %v4604_v0  ;;  %210 = vst.msk [vmem:[#allocation2 + $0x94] sm:$0xf] %vm172_vm0, %v4604_v0  ;;  %v266_v19 = vrot.slane %v264_v10, 6  ;;  %v270_v20 = vshrl.u32 %v4124_v8, 16  ;;  %v236_v24 = vor.u32 %v235_v15, %v232_v14 }
  0x21   : > { %211 = vst.msk [vmem:[#allocation2 + $0x98] sm:$0xf] %vm172_vm0, %v4604_v0  ;;  %212 = vst.msk [vmem:[#allocation2 + $0x9c] sm:$0xf] %vm172_vm0, %v4604_v0  ;;  %v273_v21 = vshll.u32 %v4124_v8, 16  ;;  %v228_v36 = vrot.slane %v227_v23, 4 }
  0x22   : > { %214 = vst.msk [vmem:[#allocation2 + $0xa0] sm:$0x7] %vm213_vm1, %v4604_v0  ;;  %vm4707_vm11 = vmor %vm217_vm2, %vm218_vm3  ;;  %v4129_v22 = vld [vmem:[%s4699_s18 + $0x20] sm:$0xf]  ;;  %v285_v26 = vld [vmem:[#allocation2 + $0x10] sm:$0xc]  ;;  %v267_v32 = vor.u32 %v266_v19, %v263_v18 }
  0x23   : > { %vm4713_vm12 = vmand %vm242_vm5, %vm243_vm4  ;;  %v4130_v27 = vld [vmem:[%s4699_s18 + $0x24] sm:$0xf]  ;;  %v375_v28 = vshrl.u32 %v4129_v22, 16  ;;  %v378_v29 = vshll.u32 %v4129_v22, 16  ;;  %v251_v31 = vld [vmem:[#allocation2 + $0x10] sm:$0x3]  ;;  %v237_v47 = vsel %vm4707_vm11, %v228_v36, %v236_v24 }
  0x24   : > { %vm4720_vm13 = vmand %vm282_vm9, %vm283_vm10  ;;  %v272_v33 = vrot.slane %v270_v20, 5  ;;  %v275_v34 = vrot.slane %v273_v21, 6  ;;  %v384_v35 = vshrl.u32 %v4130_v27, 16  ;;  %v238_v37 = vrot.slane %v236_v24, 4  ;;  %v4137_v41 = vld [vmem:[%s4699_s18 + $0x40] sm:$0xf] }
  0x25   : > { %vm4727_vm14 = vmand %vm249_vm6, %vm217_vm2  ;;  %v246_v38 = vsel %vm4713_vm12, %v227_v23, %v245_v16  ;;  %v377_v40 = vrot.slane %v375_v28, 6  ;;  %v268_v42 = vrot.slane %v267_v32, 4  ;;  %v286_v44 = vsel %vm4720_vm13, %v267_v32, %v285_v26  ;;  %v4138_v46 = vld [vmem:[%s4699_s18 + $0x44] sm:$0xf]  ;;  %v396_v51 = vld [vmem:[#allocation2 + $0x2c] sm:$0xe] }
  0x26   : > { %vm4735_vm15 = vmor %vm257_vm7, %vm258_vm8  ;;  %247 = vst [vmem:[#allocation2 + $0x8] sm:$0xe] %v246_v38  ;;  %v4740_v43 = vor.u32 %v275_v34, %v272_v33  ;;  %v380_v45 = vrot.slane %v378_v29, 7  ;;  %v252_v48 = vsel %vm4727_vm14, %v238_v37, %v251_v31  ;;  %v386_v49 = vrot.slane %v384_v35, 6  ;;  %v4145_v52 = vld [vmem:[%s4699_s18 + $0x60] sm:$0xf] }
  0x27   : > { %287 = vst [vmem:[#allocation2 + $0x10] sm:$0xc] %v286_v44  ;;  %v387_v50 = vshll.u32 %v4130_v27, 16  ;;  %248 = vst.msk [vmem:[#allocation2 + $0xc] sm:$0xf] %vm172_vm0, %v237_v47  ;;  %v501_v55 = vshrl.u32 %v4137_v41, 16 }
  0x28   : > { %253 = vst [vmem:[#allocation2 + $0x10] sm:$0x3] %v252_v48  ;;  %v277_v53 = vsel %vm4735_vm15, %v268_v42, %v4740_v43  ;;  %v381_v54 = vor.u32 %v380_v45, %v377_v40  ;;  %v504_v57 = vshll.u32 %v4137_v41, 16  ;;  %v510_v58 = vshrl.u32 %v4138_v46, 16  ;;  %v4146_v60 = vld [vmem:[%s4699_s18 + $0x64] sm:$0xf]  ;;  %vm4776_vm9 = vmand %vm213_vm1, %vm257_vm7 }
  0x29   : > { %288 = vst.msk [vmem:[#allocation2 + $0x14] sm:$0xf] %vm172_vm0, %v277_v53  ;;  %v389_v56 = vrot.slane %v387_v50, 7  ;;  %v513_v59 = vshll.u32 %v4138_v46, 16  ;;  %v400_v63 = vld [vmem:[#allocation2 + $0x34] sm:$0x3] }
  0x2a   : > { %v382_v61 = vrot.slane %v381_v54, 4  ;;  %v397_v62 = vsel %vm4713_vm12, %v381_v54, %v396_v51  ;;  %v503_v0 = vrot.slane %v501_v55, 6  ;;  %v627_v1 = vshrl.u32 %v4145_v52, 16  ;;  %v522_v6 = vld [vmem:[#allocation2 + $0x50] sm:$0xe]  ;;  %s4605_s19 = smov 12  }
  0x2b   : > { %vm1080_vm2 = vcmask 1046528   ;;  %v390_v2 = vor.u32 %v389_v56, %v386_v49  ;;  %398 = vst [vmem:[#allocation2 + $0x2c] sm:$0xe] %v397_v62  ;;  %v506_v3 = vrot.slane %v504_v57, 7  ;;  %v512_v4 = vrot.slane %v510_v58, 6  ;;  %s4606_s20 = smov 8  }
  0x2c   : > { %v515_v5 = vrot.slane %v513_v59, 7  ;;  %v526_v7 = vld [vmem:[#allocation2 + $0x58] sm:$0x3]  ;;  %v629_v8 = vrot.slane %v627_v1, 6  ;;  %v630_v9 = vshll.u32 %v4145_v52, 16  ;;  %v636_v10 = vshrl.u32 %v4146_v60, 16 }
  0x2d   : > { %v639_v12 = vshll.u32 %v4146_v60, 16  ;;  %v4758_v13 = vld [vmem:[#allocation2 + $0x4] sm:$0xf]  ;;  %vm6535_vm3 = vcmask 1045504   ;;  %vm322_vm4 = vcmask 27651   ;;  %v391_v14 = vsel %vm4707_vm11, %v382_v61, %v390_v2  ;;  %s4607_s21 = smov 20  }
  0x2e   : > { %vm323_vm5 = vsmask.f32 7950  ;;  %v392_v15 = vrot.slane %v390_v2, 4  ;;  %v507_v16 = vor.u32 %v506_v3, %v503_v0  ;;  %v516_v18 = vor.u32 %v515_v5, %v512_v4  ;;  %v648_v19 = vld [vmem:[#allocation2 + $0x74] sm:$0xe]  ;;  %s4608_s22 = smov 24  }
  0x2f   : > { %v787_v20 = vld [vmem:[#allocation2 + $0x8] sm:$0xe]  ;;  %v278_v22 = vrot.slane %v4740_v43, 4  ;;  %399 = vst.msk [vmem:[#allocation2 + $0x30] sm:$0xf] %vm172_vm0, %v391_v14  ;;  %v632_v23 = vrot.slane %v630_v9, 7  ;;  %vm4820_vm7 = vmand %vm322_vm4, %vm323_vm5 }
  0x30   : > { %v751_v21 = vld [vmem:[#allocation2 + $0x8] sm:$0xf]  ;;  %v638_v24 = vrot.slane %v636_v10, 6  ;;  %v641_v26 = vrot.slane %v639_v12, 7  ;;  %v786_v27 = vld [vmem:[#allocation2] sm:$0xe]  ;;  %v401_v28 = vsel %vm4727_vm14, %v392_v15, %v400_v63  ;;  %v523_v32 = vsel %vm4713_vm12, %v507_v16, %v522_v6 }
  0x31   : > { %vm297_vm6 = vsmask.f32 3328  ;;  %vm298_vm8 = vsmask.f32 7440  ;;  %v508_v29 = vrot.slane %v507_v16, 4  ;;  %v518_v31 = vrot.slane %v516_v18, 4 }
  0x32   : > { %v752_v33 = vld [vmem:[#allocation2 + $0xc] sm:$0xf]  ;;  %v753_v34 = vld [vmem:[#allocation2 + $0x10] sm:$0xf]  ;;  %524 = vst [vmem:[#allocation2 + $0x50] sm:$0xe] %v523_v32  ;;  %v633_v35 = vor.u32 %v632_v23, %v629_v8  ;;  %v642_v36 = vor.u32 %v641_v26, %v638_v24  ;;  %v4172_v47 = vcombine.low %v786_v27, %v4758_v13  ;;  %vm4827_vm10 = vmor %vm297_vm6, %vm298_vm8 }
  0x33   : > { %v4768_v37 = vld [vmem:[#allocation2 + $0x14] sm:$0xf]  ;;  %v4770_v38 = vcombine.low %v787_v20, %v752_v33  ;;  %402 = vst [vmem:[#allocation2 + $0x34] sm:$0x3] %v401_v28  ;;  %v4772_v40 = vcombine.low %v751_v21, %v752_v33  ;;  %v792_v41 = vld [vmem:[#allocation2 + $0x8] sm:$0xc]  ;;  %v517_v43 = vsel %vm4707_vm11, %v508_v29, %v516_v18  ;;  %v527_v44 = vsel %vm4727_vm14, %v518_v31, %v526_v7 }
  0x34   : > { %v652_v45 = vld [vmem:[#allocation2 + $0x7c] sm:$0x3]  ;;  %v4785_v46 = vcombine.low %v753_v34, %v4768_v37  ;;  %v291_v48 = vld [vmem:[#allocation2 + $0x18] sm:$0x7]  ;;  %525 = vst.msk [vmem:[#allocation2 + $0x54] sm:$0xf] %vm172_vm0, %v517_v43  ;;  %v649_v51 = vsel %vm4713_vm12, %v633_v35, %v648_v19  ;;  %v4177_v57 = vcombine.low %v792_v41, %v752_v33  ;;  %vm4846_vm12 = vmand %vm172_vm0, %vm297_vm6 }
  0x35   : > { %v634_v49 = vrot.slane %v633_v35, 4  ;;  %v644_v50 = vrot.slane %v642_v36, 4  ;;  %v1165_v52 = vrot.slane %v4770_v38, 1  ;;  %528 = vst [vmem:[#allocation2 + $0x58] sm:$0x3] %v527_v44  ;;  %v1081_v55 = vrot.slane %v4172_v47, 1 }
  0x36   : > { %v4125_v53 = vld [vmem:[%s4699_s18 + $0x10] sm:$0xf]  ;;  %650 = vst [vmem:[#allocation2 + $0x74] sm:$0xe] %v649_v51  ;;  %v4794_v54 = vrot.slane %v4785_v46, 1  ;;  %v1082_v56 = vrot.slane %v4772_v40, 1  ;;  %v292_v61 = vsel %vm4776_vm9, %v278_v22, %v291_v48 }
  0x37   : > { %v4126_v58 = vld [vmem:[%s4699_s18 + $0x14] sm:$0xf]  ;;  %v643_v59 = vsel %vm4707_vm11, %v634_v49, %v642_v36  ;;  %v653_v17 = vsel %vm4727_vm14, %v644_v50, %v652_v45  ;;  %v1342_v60 = vrot.slane %v4785_v46, 2  ;;  %v4127_v62 = vld [vmem:[%s4699_s18 + $0x18] sm:$0xf]  ;;  %v1341_v11 = vrot.slane %v4177_v57, 2 }
  0x38   : > { %651 = vst.msk [vmem:[#allocation2 + $0x78] sm:$0xf] %vm172_vm0, %v643_v59  ;;  %v1166_v63 = vsel %vm1080_vm2, %v1165_v52, %v4794_v54  ;;  %654 = vst [vmem:[#allocation2 + $0x7c] sm:$0x3] %v653_v17  ;;  %v1083_v0 = vsel %vm1080_vm2, %v1081_v55, %v1082_v56  ;;  %vm360_vm1 = vsmask.f32 7938  ;;  %v1085_v6 = vsel %vm1080_vm2, %v1082_v56, %v4794_v54 }
  0x39   : > { %293 = vst [vmem:[#allocation2 + $0x18] sm:$0x7] %v292_v61  ;;  %1171 = vrot.lane.b32.xlu0 %v1166_v63, %s4605_s19  ;;  %1118 = vrot.lane.b32.xlu1 %v1083_v0, %s4606_s20  ;;  %v301_v30 = vshll.u32 %v4125_v53, 16  ;;  %v304_v1 = vshrl.u32 %v4125_v53, 16  ;;  %v310_v2 = vshll.u32 %v4126_v58, 16  ;;  %v314_v3 = vshrl.u32 %v4126_v58, 16  ;;  %vm4840_vm11 = vmand %vm172_vm0, %vm360_vm1 }
  0x3a   : > { %v4139_v4 = vld [vmem:[%s4699_s18 + $0x48] sm:$0xf]  ;;  %v1343_v5 = vsel %vm6535_vm3, %v1341_v11, %v1342_v60  ;;  %v325_v8 = vld [vmem:[#allocation2 + $0x18] sm:$0x8]  ;;  %v341_v9 = vshrl.u32 %v4127_v62, 16  ;;  %v344_v10 = vshll.u32 %v4127_v62, 16 }
  0x3b   : > { %v4140_v12 = vld [vmem:[%s4699_s18 + $0x4c] sm:$0xf]  ;;  %v303_v14 = vrot.slane %v301_v30, 5  ;;  %v306_v15 = vrot.slane %v304_v1, 4  ;;  %v312_v16 = vrot.slane %v310_v2, 5  ;;  %v316_v18 = vrot.slane %v314_v3, 4 }
  0x3c   : > { %v331_v20 = vld [vmem:[#allocation2 + $0x20] sm:$0xf]  ;;  %v4831_v21 = vrot.slane %v341_v9, 7  ;;  %v533_v22 = vshrl.u32 %v4139_v4, 16  ;;  %v536_v23 = vshll.u32 %v4139_v4, 16  ;;  %v542_v32 = vshrl.u32 %v4140_v12, 16 }
  0x3d   : > { %v4141_v24 = vld [vmem:[%s4699_s18 + $0x50] sm:$0xf]  ;;  %1378 = vrot.lane.b32.xlu0 %v1343_v5, %s4607_s21  ;;  %1120 = vrot.lane.b32.xlu1 %v1085_v6, %s4606_s20  ;;  %v307_v26 = vor.u32 %v306_v15, %v303_v14  ;;  %v326_v27 = vsel %vm4820_vm7, %v303_v14, %v325_v8  ;;  %v317_v28 = vor.u32 %v316_v18, %v312_v16  ;;  %v362_v31 = vld [vmem:[#allocation2 + $0x24] sm:$0xf]  ;;  %v545_v41 = vshll.u32 %v4140_v12, 16  ;;  %s4609_s23 = smov 4  }
  0x3e   : > { %327 = vst [vmem:[#allocation2 + $0x18] sm:$0x8] %v326_v27  ;;  %v346_v34 = vor.u32 %v344_v10, %v4831_v21  ;;  %v535_v35 = vrot.slane %v533_v22, 5  ;;  %v538_v36 = vrot.slane %v536_v23, 6  ;;  %v4852_v43 = vld [vmem:[%s4699_s18 + $0x54] sm:$0xf] }
  0x3f   : > { %v308_v44 = vrot.slane %v307_v26, 4  ;;  %v318_v45 = vrot.slane %v317_v28, 4  ;;  %v544_v47 = vrot.slane %v542_v32, 5  ;;  %v554_v48 = vld [vmem:[#allocation2 + $0x58] sm:$0xc]  ;;  %v565_v49 = vshll.u32 %v4141_v24, 16 }
  0x40   : > { %v363_v50 = vsel %vm4840_vm11, %v346_v34, %v362_v31  ;;  %v539_v51 = vor.u32 %v538_v36, %v535_v35  ;;  %v547_v52 = vrot.slane %v545_v41, 6  ;;  %v568_v53 = vshrl.u32 %v4141_v24, 16  ;;  %v586_v55 = vld [vmem:[#allocation2 + $0x60] sm:$0x8]  ;;  %v4865_v0 = vld [vmem:[%s4699_s18 + $0x3c] sm:$0xf] }
  0x41   : > { %v313_v56 = vsel %vm4827_vm10, %v308_v44, %v312_v16  ;;  %v332_v57 = vsel %vm4846_vm12, %v318_v45, %v331_v20  ;;  %364 = vst [vmem:[#allocation2 + $0x24] sm:$0xf] %v363_v50  ;;  %v567_v58 = vrot.slane %v565_v49, 5  ;;  %v574_v59 = vshll.u32 %v4852_v43, 16  ;;  %v749_v11 = vld [vmem:[#allocation2] sm:$0xf] }
  0x42   : > { %328 = vst.msk [vmem:[#allocation2 + $0x1c] sm:$0xf] %vm172_vm0, %v313_v56  ;;  %333 = vst [vmem:[#allocation2 + $0x20] sm:$0xf] %v332_v57  ;;  %v540_v17 = vrot.slane %v539_v51, 4  ;;  %v548_v61 = vor.u32 %v547_v52, %v544_v47  ;;  %v555_v62 = vsel %vm4720_vm13, %v539_v51, %v554_v48  ;;  %v570_v63 = vrot.slane %v568_v53, 4 }
  0x43   : > { %556 = vst [vmem:[#allocation2 + $0x58] sm:$0xc] %v555_v62  ;;  %v558_v30 = vld [vmem:[#allocation2 + $0x60] sm:$0x7]  ;;  %v587_v1 = vsel %vm4820_vm7, %v567_v58, %v586_v55  ;;  %v793_v2 = vld [vmem:[#allocation2 + $0x10] sm:$0xc]  ;;  %v4876_v9 = vcombine.low %v749_v11, %v4758_v13 }
  0x44   : > { %v549_v3 = vsel %vm4735_vm15, %v540_v17, %v548_v61  ;;  %v550_v4 = vrot.slane %v548_v61, 4  ;;  %v571_v5 = vor.u32 %v570_v63, %v567_v58  ;;  %v4871_v6 = vrot.slane %v574_v59, 5  ;;  %588 = vst [vmem:[#allocation2 + $0x60] sm:$0x8] %v587_v1  ;;  %v494_v13 = vld [vmem:[#allocation2 + $0x50] sm:$0x1] }
  0x45   : > { %557 = vst.msk [vmem:[#allocation2 + $0x5c] sm:$0xf] %vm172_vm0, %v549_v3  ;;  %vm337_vm14 = vsmask.f32 256  ;;  %vm366_vm4 = vcmask 24576   ;;  %v479_v8 = vshrl.u32 %v4865_v0, 16  ;;  %v4881_v14 = vcombine.low %v793_v2, %v4768_v37 }
  0x46   : > { %v559_v10 = vsel %vm4776_vm9, %v550_v4, %v558_v30  ;;  %v572_v12 = vrot.slane %v571_v5, 4  ;;  %vm4889_vm5 = vmand %vm366_vm4, %vm337_vm14  ;;  %v896_v24 = vshll.u32 %v4876_v9, 16  ;;  %v901_v41 = vshll.u32 %v4772_v40, 16  ;;  %v4936_v51 = vld [vmem:[#allocation2 + $0x10] sm:$0x8]  ;;  %s4610_s28 = smov 16  }
  0x47   : > { %560 = vst [vmem:[#allocation2 + $0x60] sm:$0x7] %v559_v10  ;;  %v4883_v15 = vrot.slane %v479_v8, 7  ;;  %v1425_v28 = vrot.slane %v4881_v14, 2  ;;  %v894_v44 = vshrl.u32 %v4876_v9, 16  ;;  %v909_v47 = vshll.u32 %v4785_v46, 16 }
  0x48   : > { %v577_v16 = vsel %vm4827_vm10, %v572_v12, %v4871_v6  ;;  %v898_v45 = vrot.slane %v896_v24, 1  ;;  %v1212_v55 = vshrl.u32 %v4770_v38, 16  ;;  %v1215_v56 = vshll.u32 %v4770_v38, 16  ;;  %v4143_v24 = vld [vmem:[%s4699_s18 + $0x58] sm:$0xf]  ;;  %s4611_s29 = smov 28  }
  0x49   : > { %v4893_v20 = vld [vmem:[#allocation2 + $0x18] sm:$0xff]   ;;  %589 = vst.msk [vmem:[#allocation2 + $0x64] sm:$0xf] %vm172_vm0, %v577_v16  ;;  %v486_v22 = vrot.slane %v4883_v15, 4  ;;  %v4897_v23 = vld [vmem:[#allocation2 + $0x20] sm:$0xff]   ;;  %v578_v57 = vshrl.u32 %v4852_v43, 16  ;;  %v4182_v1 = vcombine.low %v4936_v51, %v4768_v37 }
  0x4a   : > { %v1344_v26 = vrot.slane %v4893_v20, 2  ;;  %v6541_v27 = vrot.slane %v4893_v20, 1  ;;  %v6539_v32 = vrot.slane %v4897_v23, 2  ;;  %v4931_v49 = vshll.u32 %v4893_v20, 16  ;;  %s4612_s30 = smov 32   ;;  %s4400_s8 = sshll.u32 %s6655_s13, 5 }
  0x4b   : > { %v495_v31 = vsel %vm4889_vm5, %v486_v22, %v494_v13  ;;  %v4934_v50 = vshrl.u32 %v4893_v20, 16  ;;  %vm892_vm6 = vsmask.f32 7424  ;;  %v903_v58 = vrot.slane %v901_v41, 1  ;;  %s6223_s11 = scalar_lea.vmem %s6534_s3, %s4400_s8 }
  0x4c   : > { %v4906_v34 = vld [vmem:[#allocation2 + $0x58] sm:$0xff]   ;;  %496 = vst [vmem:[#allocation2 + $0x50] sm:$0x1] %v495_v31  ;;  %v1345_v35 = vsel %vm6535_vm3, %v1342_v60, %v1344_v26  ;;  %v4915_v36 = vsel %vm1080_vm2, %v4794_v54, %v6541_v27  ;;  %v913_v60 = vshrl.u32 %v4785_v46, 16  ;;  %v4927_v48 = vsel %vm6535_vm3, %v1344_v26, %v6539_v32 }
  0x4d   : > { %6584 = vst [vmem:[#allocation3_spill] sm:$0xff] %v4906_v34  ;;  %1380 = vrot.lane.b32.xlu0 %v1345_v35, %s4607_s21  ;;  %1173 = vrot.lane.b32.xlu1 %v4915_v36, %s4605_s19  ;;  %v1426_v54 = vsel %vm6535_vm3, %v1425_v28, %v1344_v26  ;;  %v1102_v53 = vrot.slane %v4906_v34, 1  ;;  %v905_v59 = vshrl.u32 %v4772_v40, 16  ;;  %v899_v61 = vor.u32 %v898_v45, %v894_v44 }
  0x4e   : > { %v1219_v62 = vrot.slane %v913_v60, 1  ;;  %v1220_v63 = vrot.slane %v909_v47, 2  ;;  %v1223_v43 = vrot.slane %v4934_v50, 1  ;;  %v1224_v11 = vrot.slane %v4931_v49, 2 }
  0x4f   : > { %v1472_v30 = vshrl.u32 %v4881_v14, 16  ;;  %v1214_v3 = vrot.slane %v1212_v55, 1  ;;  %v1217_v4 = vrot.slane %v1215_v56, 2  ;;  %v1475_v5 = vshll.u32 %v4881_v14, 16 }
  0x50   : > { %v4938_v52 = vld [vmem:[#allocation2 + $0x60] sm:$0xff]   ;;  %vm1210_vm8 = vsmask.f32 6400  ;;  %v907_v10 = vor.u32 %v905_v59, %v903_v58  ;;  %v904_v16 = vsel %vm892_vm6, %v899_v61, %v903_v58  ;;  %v1221_v37 = vor.u32 %v1220_v63, %v1219_v62  ;;  %v590_v63 = vld [vmem:[#allocation2 + $0x68] sm:$0xf] }
  0x51   : > { %6585 = vst [vmem:[#allocation4_spill] sm:$0xff] %v4938_v52  ;;  %1433 = vrot.lane.b32.xlu0 %v4927_v48, %s4608_s22  ;;  %1431 = vrot.lane.b32.xlu1 %v1426_v54, %s4608_s22  ;;  %v1104_v17 = vrot.slane %v4938_v52, 1  ;;  %v4968_v13 = vrot.slane %v909_v47, 1  ;;  %v4971_v22 = vshll.u32 %v4906_v34, 16  ;;  %vm1470_vm1 = vsmask.f32 5376 }
  0x52   : > { %v1474_v26 = vrot.slane %v1472_v30, 2  ;;  %v1479_v28 = vrot.slane %v4934_v50, 2  ;;  %v4982_v31 = vor.u32 %v1224_v11, %v1223_v43  ;;  %v1218_v35 = vor.u32 %v1217_v4, %v1214_v3  ;;  %v4570_v58 = vld [vmem:[%s6532_s1] sm:$0xff]   ;;  %v616_v4 = vld [vmem:[#allocation2 + $0x6c] sm:$0xf] }
  0x53   : > { %v4951_v38 = vld [vmem:[#allocation2 + $0x50] sm:$0xff]   ;;  %v1105_v2 = vsel %vm1080_vm2, %v1102_v53, %v1104_v17  ;;  %6586 = vst [vmem:[#allocation5_spill] sm:$0xff] %v4971_v22  ;;  %v1477_v41 = vrot.slane %v1475_v5, 3  ;;  %v580_v44 = vrot.slane %v578_v57, 4  ;;  %v1480_v54 = vrot.slane %v4931_v49, 3  ;;  %4486 = vmatprep.subr.bf16.mxu0 %v4570_v58  ;;  %4528 = vmatprep.subr.bf16.mxu1 %v4570_v58 }
  0x54   : > { %v6536_v8 = vrot.slane %v4951_v38, 1  ;;  %v4964_v12 = vshll.u32 %v4951_v38, 16  ;;  %v4986_v47 = vshrl.u32 %v4951_v38, 16  ;;  %v597_v51 = vshrl.u32 %v4143_v24, 16  ;;  %4487 = vmatpush3.bf16.msra.mxu0 %v4570_v58  ;;  %4531 = vmatpush3.bf16.msra.mxu1 %v4570_v58  ;;  %v4144_v58 = vld [vmem:[%s4699_s18 + $0x5c] sm:$0xf] }
  0x55   : > { %1140 = vrot.lane.b32.xlu0 %v1105_v2, %s4606_s20  ;;  %v4994_v55 = vshll.u32 %v4938_v52, 16  ;;  %v581_v56 = vor.u32 %v580_v44, %v4871_v6  ;;  %v600_v57 = vshll.u32 %v4143_v24, 16  ;;  %v912_v59 = vsel %vm892_vm6, %v907_v10, %v4968_v13 }
  0x56   : > { %v4977_v14 = vsel %vm1080_vm2, %v6536_v8, %v1102_v53  ;;  %v6538_v45 = vrot.slane %v4964_v12, 1  ;;  %v4991_v53 = vshrl.u32 %v4906_v34, 16  ;;  %v5003_v61 = vshll.u32 %v4897_v23, 16 }
  0x57   : > { %1138 = vrot.lane.b32.xlu1 %v4977_v14, %s4606_s20  ;;  %v5006_v62 = vshrl.u32 %v4897_v23, 16  ;;  %v5008_v43 = vrot.slane %v597_v51, 7  ;;  %v1226_v6 = vsel %vm1210_vm8, %v1221_v37, %v4982_v31  ;;  %v983_v11 = vrot.slane %v4971_v22, 1 }
  0x58   : > { %6587 = vst [vmem:[#allocation6_spill] sm:$0xff] %v4991_v53  ;;  %v1478_v30 = vor.u32 %v1477_v41, %v1474_v26  ;;  %v582_v3 = vrot.slane %v581_v56, 4  ;;  %v979_v5 = vor.u32 %v4986_v47, %v6538_v45  ;;  %v1222_v10 = vsel %vm1210_vm8, %v1218_v35, %v1221_v37 }
  0x59   : > { %1041 = vrot.lane.b32.xlu0 %v904_v16, %s4609_s23  ;;  %v1601_v16 = vrot.slane %v4182_v1, 3  ;;  %v602_v24 = vor.u32 %v600_v57, %v5008_v43  ;;  %v987_v26 = vor.u32 %v4991_v53, %v983_v11  ;;  %v6540_v41 = vrot.slane %v4994_v55, 1  ;;  %v4571_v1 = vld [vmem:[%s6532_s1 + $0x8] sm:$0xff]  }
  0x5a   : > { %v591_v44 = vsel %vm4846_vm12, %v582_v3, %v590_v63  ;;  %v6542_v37 = vrot.slane %v4893_v20, 3  ;;  %v1483_v35 = vrot.slane %v5006_v62, 2  ;;  %v1484_v51 = vrot.slane %v5003_v61, 3  ;;  %4488 = vmatprep.subr.bf16.mxu0 %v4571_v1  ;;  %4529 = vmatprep.subr.bf16.mxu1 %v4571_v1 }
  0x5b   : > { %1191 = vrot.lane.b32.xlu1 %v1105_v2, %s4605_s19  ;;  %v1481_v2 = vor.u32 %v1480_v54, %v1479_v28  ;;  %592 = vst [vmem:[#allocation2 + $0x68] sm:$0xf] %v591_v44  ;;  %v617_v28 = vsel %vm4840_vm11, %v602_v24, %v616_v4  ;;  %v4128_v54 = vld [vmem:[%s4699_s18 + $0x1c] sm:$0xf]  ;;  %vm6537_vm4 = vcmask 1044480   ;;  %v984_v56 = vsel %vm892_vm6, %v979_v5, %v983_v11 }
  0x5c   : > { %618 = vst [vmem:[#allocation2 + $0x6c] sm:$0xf] %v617_v28  ;;  %v5036_v57 = vshrl.u32 %v4938_v52, 16  ;;  %4489 = vmatpush3.bf16.msra.mxu0 %v4571_v1  ;;  %vm338_vm3 = vsmask.f32 4368  ;;  %v349_v63 = vshrl.u32 %v4128_v54, 16  ;;  %4532 = vmatpush3.bf16.msra.mxu1 %v4571_v1  ;;  %v1603_v11 = vsel %vm6537_vm4, %v1601_v16, %v6542_v37 }
  0x5d   : > { %1043 = vrot.lane.b32.xlu0 %v912_v59, %s4609_s23  ;;  %v1482_v59 = vsel %vm1470_vm1, %v1478_v30, %v1481_v2  ;;  %v5047_v3 = vor.u32 %v1484_v51, %v1483_v35  ;;  %v352_v4 = vshll.u32 %v4128_v54, 16  ;;  %v368_v5 = vld [vmem:[#allocation2 + $0x2c] sm:$0x1]  ;;  %v347_v30 = vrot.slane %v4831_v21, 4  ;;  %v4131_v1 = vld [vmem:[%s4699_s18 + $0x28] sm:$0xf]  ;;  %vm5058_vm4 = vmor %vm337_vm14, %vm338_vm3 }
  0x5e   : > { %v605_v24 = vshrl.u32 %v4144_v58, 16  ;;  %v608_v44 = vshll.u32 %v4144_v58, 16  ;;  %v1255_v28 = vrot.slane %v4991_v53, 1  ;;  %v1259_v8 = vrot.slane %v5036_v57, 1  ;;  %v620_v51 = vld [vmem:[#allocation2 + $0x74] sm:$0x1] }
  0x5f   : > { %1303 = vrot.lane.b32.xlu1 %v1226_v6, %s4610_s28  ;;  %v992_v6 = vsel %vm892_vm6, %v987_v26, %v6540_v41  ;;  %v1256_v26 = vrot.slane %v4971_v22, 2  ;;  %v1260_v16 = vrot.slane %v4994_v55, 2  ;;  %v4147_v21 = vld [vmem:[%s4699_s18 + $0x68] sm:$0xf]  ;;  %v603_v58 = vrot.slane %v5008_v43, 4 }
  0x60   : > { %v1486_v45 = vsel %vm1470_vm1, %v1481_v2, %v5047_v3  ;;  %v915_v41 = vor.u32 %v913_v60, %v4968_v13  ;;  %v919_v27 = vrot.slane %v4931_v49, 1  ;;  %v407_v37 = vshrl.u32 %v4131_v1, 16  ;;  %v460_v53 = vld [vmem:[#allocation2 + $0x3c] sm:$0x8] }
  0x61   : > { %1301 = vrot.lane.b32.xlu0 %v1222_v10, %s4610_s28  ;;  %v351_v10 = vrot.slane %v349_v63, 7  ;;  %v607_v63 = vrot.slane %v605_v24, 7  ;;  %v410_v60 = vshll.u32 %v4131_v1, 16  ;;  %v659_v13 = vshrl.u32 %v4147_v21, 16 }
  0x62   : > { %v662_v49 = vshll.u32 %v4147_v21, 16  ;;  %v5081_v24 = vor.u32 %v1256_v26, %v1255_v28  ;;  %v428_v21 = vld [vmem:[#allocation2 + $0x34] sm:$0xc]  ;;  %vm6592_vm3 = vcmask 1044480   ;;  %v482_v33 = vshll.u32 %v4865_v0, 16 }
  0x63   : > { %1061 = vrot.lane.b32.xlu1 %v984_v56, %s4609_s23  ;;  %v354_v54 = vor.u32 %v352_v4, %v351_v10  ;;  %v356_v56 = vrot.slane %v351_v10, 4  ;;  %v5067_v32 = vld [vmem:[#allocation2 + $0x68] sm:$0xff]   ;;  %v610_v4 = vor.u32 %v608_v44, %v607_v63  ;;  %v612_v2 = vrot.slane %v607_v63, 4 }
  0x64   : > { %v6546_v10 = vrot.slane %v5067_v32, 1  ;;  %6590 = vst [vmem:[#allocation7_spill] sm:$0xff] %v5081_v24  ;;  %v920_v44 = vsel %vm892_vm6, %v915_v41, %v919_v27  ;;  %v5092_v1 = vshrl.u32 %v5067_v32, 16  ;;  %v412_v28 = vrot.slane %v410_v60, 6 }
  0x65   : > { %1063 = vrot.lane.b32.xlu0 %v992_v6, %s4609_s23  ;;  %v355_v6 = vsel %vm5058_vm4, %v347_v30, %v354_v54  ;;  %v369_v43 = vsel %vm4889_vm5, %v356_v56, %v368_v5  ;;  %v611_v30 = vsel %vm5058_vm4, %v603_v58, %v610_v4  ;;  %v621_v5 = vsel %vm4889_vm5, %v612_v2, %v620_v51  ;;  %v680_v56 = vld [vmem:[#allocation2 + $0x7c] sm:$0xc] }
  0x66   : > { %365 = vst.msk [vmem:[#allocation2 + $0x28] sm:$0xf] %vm172_vm0, %v355_v6  ;;  %370 = vst [vmem:[#allocation2 + $0x2c] sm:$0x1] %v369_v43  ;;  %v5089_v54 = vshll.u32 %v5067_v32, 16  ;;  %v5102_v41 = vsel %vm1080_vm2, %v1104_v17, %v6546_v10  ;;  %v661_v26 = vrot.slane %v659_v13, 5  ;;  %v923_v51 = vor.u32 %v4934_v50, %v919_v27 }
  0x67   : > { %1561 = vrot.lane.b32.xlu1 %v1482_v59, %s4611_s29  ;;  %v1261_v59 = vor.u32 %v1260_v16, %v1259_v8  ;;  %619 = vst.msk [vmem:[#allocation2 + $0x70] sm:$0xf] %vm172_vm0, %v611_v30  ;;  %622 = vst [vmem:[#allocation2 + $0x74] sm:$0x1] %v621_v5  ;;  %v6544_v8 = vrot.slane %v4897_v23, 3  ;;  %v664_v16 = vrot.slane %v662_v49, 6 }
  0x68   : > { %v1263_v58 = vrot.slane %v5092_v1, 1  ;;  %v1264_v17 = vrot.slane %v5089_v54, 2  ;;  %v6591_v43 = vrot.slane %v4893_v20, 3  ;;  %v4132_v13 = vld [vmem:[%s4699_s18 + $0x2c] sm:$0xf]  ;;  %v6543_v49 = vrot.slane %v4906_v34, 2 }
  0x69   : > { %1563 = vrot.lane.b32.xlu0 %v1486_v45, %s4611_s29  ;;  %v409_v45 = vrot.slane %v407_v37, 5  ;;  %v1262_v37 = vsel %vm1210_vm8, %v5081_v24, %v1261_v59  ;;  %v5111_v6 = vor.u32 %v664_v16, %v661_v26  ;;  %v1362_v30 = vrot.slane %v4938_v52, 2  ;;  %v5717_v24 = vld [vmem:[#allocation2 + $0x58] sm:$0xff]  }
  0x6a   : > { %v1605_v27 = vsel %vm6592_vm3, %v6591_v43, %v6544_v8  ;;  %v5129_v60 = vor.u32 %v1264_v17, %v1263_v58  ;;  %v416_v25 = vshrl.u32 %v4132_v13, 16  ;;  %v419_v5 = vshll.u32 %v4132_v13, 16  ;;  %v4148_v8 = vld [vmem:[%s4699_s18 + $0x6c] sm:$0xf] }
  0x6b   : > { %1638 = vrot.lane.b32.xlu1 %v1603_v11, %s4612_s30  ;;  %v6545_v11 = vrot.slane %v5003_v61, 1  ;;  %v413_v63 = vor.u32 %v412_v28, %v409_v45  ;;  %v681_v4 = vsel %vm4720_vm13, %v5111_v6, %v680_v56  ;;  %v1088_v45 = vrot.slane %v4897_v23, 1 }
  0x6c   : > { %682 = vst [vmem:[#allocation2 + $0x7c] sm:$0xc] %v681_v4  ;;  %v418_v26 = vrot.slane %v416_v25, 5  ;;  %v421_v16 = vrot.slane %v419_v5, 6  ;;  %v1228_v56 = vrot.slane %v5003_v61, 2  ;;  %v1515_v13 = vrot.slane %v5036_v57, 2 }
  0x6d   : > { %1045 = vrot.lane.b32.xlu0 %v920_v44, %s4609_s23  ;;  %v429_v50 = vsel %vm4720_vm13, %v413_v63, %v428_v21  ;;  %v928_v2 = vsel %vm892_vm6, %v923_v51, %v6545_v11  ;;  %v1266_v44 = vsel %vm1210_vm8, %v1261_v59, %v5129_v60  ;;  %vm6593_vm13 = vcmask 1045504  }
  0x6e   : > { %430 = vst [vmem:[#allocation2 + $0x34] sm:$0xc] %v429_v50  ;;  %v5144_v28 = vsel %vm6593_vm13, %v6543_v49, %v1362_v30  ;;  %v1364_v59 = vrot.slane %v5067_v32, 2  ;;  %v1227_v21 = vrot.slane %v5006_v62, 1  ;;  %v5157_v58 = vld [vmem:[#allocation2 + $0x70] sm:$0xff]   ;;  %v414_v43 = vrot.slane %v413_v63, 4  ;;  %vm6596_vm14 = vmmov %vm6593_vm13 }
  0x6f   : > { %1193 = vrot.lane.b32.xlu1 %v5102_v41, %s4605_s19  ;;  %6594 = vst [vmem:[#allocation8_spill] sm:$0xff] %v5144_v28  ;;  %v1516_v25 = vrot.slane %v4994_v55, 3  ;;  %v1519_v5 = vrot.slane %v5092_v1, 2  ;;  %v4149_v63 = vld [vmem:[%s4699_s18 + $0x70] sm:$0xf]  ;;  %vm6599_vm3 = vmmov %vm6593_vm13  ;;  %v668_v34 = vshrl.u32 %v4148_v8, 16 }
  0x70   : > { %v1365_v50 = vsel %vm6596_vm14, %v1362_v30, %v1364_v59  ;;  %v1229_v4 = vor.u32 %v1228_v56, %v1227_v21  ;;  %v5178_v30 = vshll.u32 %v5157_v58, 16  ;;  %vm1711_vm14 = vcmask 64512  }
  0x71   : > { %1321 = vrot.lane.b32.xlu0 %v1262_v37, %s4610_s28  ;;  %v6595_v37 = vrot.slane %v4893_v20, 1  ;;  %v5200_v22 = vor.u32 %v1516_v25, %v1515_v13  ;;  %v691_v25 = vshll.u32 %v4149_v63, 16 }
  0x73   : > { %1640 = vrot.lane.b32.xlu1 %v1605_v27, %s4612_s30  ;;  %v1089_v51 = vsel %vm1080_vm2, %v6595_v37, %v1088_v45  ;;  %v422_v27 = vor.u32 %v421_v16, %v418_v26  ;;  %v5174_v37 = vld [vmem:[%s4699_s18 + $0x30] sm:$0xf]  ;;  %v5181_v26 = vshrl.u32 %v5157_v58, 16  ;;  %v432_v16 = vld [vmem:[#allocation2 + $0x3c] sm:$0x7]  ;;  %6597 = vst [vmem:[#allocation9_spill] sm:$0xff] %v5200_v22 }
  0x74   : > { %v439_v10 = vshll.u32 %v5174_v37, 16 }
  0x75   : > { %1047 = vrot.lane.b32.xlu0 %v928_v2, %s4609_s23  ;;  %v423_v56 = vsel %vm4735_vm15, %v414_v43, %v422_v27  ;;  %v424_v49 = vrot.slane %v422_v27, 4  ;;  %v1523_v13 = vrot.slane %v5181_v26, 2 }
  0x76   : > { %431 = vst.msk [vmem:[#allocation2 + $0x38] sm:$0xf] %vm172_vm0, %v423_v56  ;;  %v5209_v56 = vrot.slane %v439_v10, 5  ;;  %v670_v10 = vrot.slane %v668_v34, 5  ;;  %v1622_v34 = vrot.slane %v5067_v32, 3 }
  0x77   : > { %1122 = vrot.lane.b32.xlu1 %v4915_v36, %s4606_s20  ;;  %v5153_v36 = vld [vmem:[#allocation2 + $0x28] sm:$0xff]   ;;  %v433_v27 = vsel %vm4776_vm9, %v424_v49, %v432_v16  ;;  %v1524_v49 = vrot.slane %v5178_v30, 3  ;;  %v693_v16 = vrot.slane %v691_v25, 5 }
  0x78   : > { %v5161_v20 = vshll.u32 %v5153_v36, 16  ;;  %v5164_v17 = vshrl.u32 %v5153_v36, 16  ;;  %v6550_v2 = vrot.slane %v5153_v36, 1  ;;  %434 = vst [vmem:[#allocation2 + $0x3c] sm:$0x7] %v433_v27 }
  0x79   : > { %1323 = vrot.lane.b32.xlu0 %v1266_v44, %s4610_s28  ;;  %v1520_v44 = vrot.slane %v5089_v54, 3 }
  0x7a   : > { %v1232_v21 = vrot.slane %v5161_v20, 2  ;;  %v5192_v11 = vsel %vm1080_vm2, %v1088_v45, %v6550_v2  ;;  %v6598_v45 = vrot.slane %v5157_v58, 2 }
  0x7b   : > { %1398 = vrot.lane.b32.xlu1 %v5144_v28, %s4607_s21  ;;  %v1230_v28 = vsel %vm1210_vm8, %v4982_v31, %v1229_v4  ;;  %v1521_v43 = vor.u32 %v1520_v44, %v1519_v5  ;;  %v666_v5 = vrot.slane %v5111_v6, 4  ;;  %v694_v6 = vshrl.u32 %v4149_v63, 16 }
  0x7c   : > { %v5207_v2 = vsel %vm6599_vm3, %v1364_v59, %v6598_v45  ;;  %v461_v59 = vsel %vm4820_vm7, %v5209_v56, %v460_v53  ;;  %v684_v45 = vld [vmem:[#allocation2 + $0x84] sm:$0x7]  ;;  %v4572_v53 = vld [vmem:[%s6532_s1 + $0x10] ss:$0 sps:$4 sm:$0x33]   ;;  %v6600_v63 = vrot.slane %v4994_v55, 1 }
  0x7d   : > { %1124 = vrot.lane.b32.xlu0 %v1089_v51, %s4606_s20  ;;  %462 = vst [vmem:[#allocation2 + $0x3c] sm:$0x8] %v461_v59  ;;  %v696_v55 = vrot.slane %v694_v6, 4 }
  0x7e   : > { %v995_v7 = vor.u32 %v5036_v57, %v6600_v63  ;;  %v464_v63 = vld [vmem:[#allocation2 + $0x44] sm:$0xf] }
  0x7f   : > { %1175 = vrot.lane.b32.xlu1 %v1089_v51, %s4605_s19  ;;  %v1231_v51 = vrot.slane %v5164_v17, 1 }
  0x81   : > { %1400 = vrot.lane.b32.xlu0 %v1365_v50, %s4607_s21  ;;  %v5213_v31 = vor.u32 %v1232_v21, %v1231_v51  ;;  %v1522_v51 = vsel %vm1470_vm1, %v5200_v22, %v1521_v43  ;;  %v442_v21 = vshrl.u32 %v5174_v37, 16  ;;  %v5236_v37 = vor.u32 %v1524_v49, %v1523_v13 }
  0x83   : > { %1451 = vrot.lane.b32.xlu1 %v1365_v50, %s4608_s22  ;;  %v671_v50 = vshll.u32 %v4148_v8, 16  ;;  %v712_v8 = vld [vmem:[#allocation2 + $0x84] sm:$0x8]  ;;  %v1234_v25 = vsel %vm1210_vm8, %v1229_v4, %v5213_v31  ;;  %v444_v4 = vrot.slane %v442_v21, 4  ;;  %v1348_v21 = vrot.slane %v5153_v36, 2 }
  0x85   : > { %1177 = vrot.lane.b32.xlu0 %v5192_v11, %s4605_s19  ;;  %v673_v44 = vrot.slane %v671_v50, 6  ;;  %v4134_v50 = vld [vmem:[%s4699_s18 + $0x34] sm:$0xf] }
  0x86   : > { %v448_v13 = vshll.u32 %v4134_v50, 16  ;;  %v452_v49 = vshrl.u32 %v4134_v50, 16 }
  0x87   : > { %1305 = vrot.lane.b32.xlu1 %v1230_v28, %s4610_s28  ;;  %v674_v27 = vor.u32 %v673_v44, %v670_v10  ;;  %v713_v28 = vsel %vm4820_vm7, %v693_v16, %v712_v8  ;;  %v4150_v44 = vld [vmem:[%s4699_s18 + $0x74] sm:$0xf]  ;;  %v999_v8 = vrot.slane %v5089_v54, 1  ;;  %vm2034_vm7 = vcmask 1041408  }
  0x88   : > { %714 = vst [vmem:[#allocation2 + $0x84] sm:$0x8] %v713_v28  ;;  %4534 = vmatprep.subr.msk.bf16.mxu0 %vm2034_vm7, %v4572_v53  ;;  %4535 = vmatprep.subr.msk.bf16.mxu1 %vm2034_vm7, %v4572_v53  ;;  %v704_v57 = vshrl.u32 %v4150_v44, 16  ;;  %v1526_v54 = vsel %vm1470_vm1, %v1521_v43, %v5236_v37  ;;  %v450_v42 = vrot.slane %v448_v13, 5  ;;  %v697_v28 = vor.u32 %v696_v55, %v693_v16 }
  0x89   : > { %1453 = vrot.lane.b32.xlu0 %v5207_v2, %s4608_s22  ;;  %v675_v59 = vsel %vm4735_vm15, %v666_v5, %v674_v27  ;;  %v676_v10 = vrot.slane %v674_v27, 4  ;;  %v2036_v5 = vsel %vm2034_vm7, %v4572_v53, 0  ;;  %v445_v27 = vor.u32 %v444_v4, %v5209_v56 }
  0x8a   : > { %683 = vst.msk [vmem:[#allocation2 + $0x80] sm:$0xf] %vm172_vm0, %v675_v59  ;;  %4491 = vmatpush3.bf16.msra.mxu0 %v2036_v5  ;;  %4533 = vmatpush3.bf16.msra.mxu1 %v2036_v5  ;;  %v6601_v53 = vrot.slane %v4938_v52, 3  ;;  %vm6602_vm15 = vcmask 1044480   ;;  %v698_v59 = vrot.slane %v697_v28, 4  ;;  %v1624_v13 = vrot.slane %v5157_v58, 3 }
  0x8b   : > { %1581 = vrot.lane.b32.xlu1 %v1522_v51, %s4611_s29  ;;  %v685_v39 = vsel %vm4776_vm9, %v676_v10, %v684_v45  ;;  %v700_v51 = vshll.u32 %v4150_v44, 16  ;;  %v454_v45 = vrot.slane %v452_v49, 4  ;;  %v446_v43 = vrot.slane %v445_v27, 4  ;;  %v4135_v10 = vld [vmem:[%s4699_s18 + $0x38] sm:$0xf]  ;;  %vm6604_vm9 = vmmov %vm6599_vm3 }
  0x8c   : > { %686 = vst [vmem:[#allocation2 + $0x84] sm:$0x7] %v685_v39  ;;  %v1623_v6 = vsel %vm6602_vm15, %v6601_v53, %v1622_v34  ;;  %v1000_v44 = vsel %vm892_vm6, %v995_v7, %v999_v8  ;;  %v471_v7 = vshrl.u32 %v4135_v10, 16  ;;  %v716_v27 = vld [vmem:[#allocation2 + $0x8c] sm:$0xf]  ;;  %v1488_v28 = vrot.slane %v5161_v20, 3 }
  0x8d   : > { %1307 = vrot.lane.b32.xlu0 %v1234_v25, %s4610_s28  ;;  %v702_v50 = vrot.slane %v700_v51, 5  ;;  %v706_v25 = vrot.slane %v704_v57, 4  ;;  %v455_v56 = vor.u32 %v454_v45, %v450_v42  ;;  %v451_v39 = vsel %vm4827_vm10, %v446_v43, %v450_v42 }
  0x8e   : > { %463 = vst.msk [vmem:[#allocation2 + $0x40] sm:$0xf] %vm172_vm0, %v451_v39  ;;  %v1003_v51 = vor.u32 %v5092_v1, %v999_v8  ;;  %v1007_v57 = vrot.slane %v5178_v30, 1  ;;  %v1487_v45 = vrot.slane %v5164_v17, 2  ;;  %v473_v53 = vrot.slane %v471_v7, 7 }
  0x8f   : > { %1382 = vrot.lane.b32.xlu1 %v4927_v48, %s4607_s21  ;;  %v6603_v48 = vrot.slane %v4897_v23, 2  ;;  %v456_v4 = vrot.slane %v455_v56, 4  ;;  %v703_v49 = vsel %vm4827_vm10, %v698_v59, %v702_v50  ;;  %v707_v5 = vor.u32 %v706_v25, %v702_v50  ;;  %vm6605_vm10 = vmmov %vm6602_vm15  ;;  %v4151_v8 = vld [vmem:[%s4699_s18 + $0x78] sm:$0xf] }
  0x90   : > { %715 = vst.msk [vmem:[#allocation2 + $0x88] sm:$0xf] %vm172_vm0, %v703_v49  ;;  %v1625_v42 = vsel %vm6605_vm10, %v1622_v34, %v1624_v13  ;;  %v474_v43 = vshll.u32 %v4135_v10, 16  ;;  %v1489_v56 = vor.u32 %v1488_v28, %v1487_v45  ;;  %v477_v59 = vrot.slane %v473_v53, 4  ;;  %v5332_v45 = vld [vmem:[#allocation2 + $0x78] sm:$0xff]   ;;  %vm6610_vm13 = vmmov %vm6605_vm10 }
  0x91   : > { %1583 = vrot.lane.b32.xlu0 %v1526_v54, %s4611_s29  ;;  %v1349_v16 = vsel %vm6604_vm9, %v6603_v48, %v1348_v21  ;;  %v465_v55 = vsel %vm4846_vm12, %v456_v4, %v464_v63  ;;  %v5279_v54 = vld [vmem:[#allocation2 + $0x30] sm:$0xff]   ;;  %v708_v19 = vrot.slane %v707_v5, 4  ;;  %v484_v48 = vor.u32 %v482_v33, %v4883_v15 }
  0x92   : > { %466 = vst [vmem:[#allocation2 + $0x44] sm:$0xf] %v465_v55  ;;  %v1350_v50 = vrot.slane %v5279_v54, 2  ;;  %v5296_v25 = vshll.u32 %v5279_v54, 16  ;;  %v5299_v34 = vshrl.u32 %v5279_v54, 16  ;;  %v476_v63 = vor.u32 %v474_v43, %v473_v53 }
  0x93   : > { %1658 = vrot.lane.b32.xlu1 %v1623_v6, %s4612_s30  ;;  %v717_v1 = vsel %vm4846_vm12, %v708_v19, %v716_v27  ;;  %v1008_v6 = vsel %vm892_vm6, %v1003_v51, %v1007_v57  ;;  %vm6606_vm12 = vmmov %vm6599_vm3  ;;  %v1108_v4 = vrot.slane %v5157_v58, 1  ;;  %v726_v5 = vshll.u32 %v4151_v8, 16  ;;  %v4152_v55 = vld [vmem:[%s4699_s18 + $0x7c] sm:$0xf]  ;;  %v742_v28 = vld [vmem:[#allocation2 + $0x90] sm:$0xf] }
  0x94   : > { %718 = vst [vmem:[#allocation2 + $0x8c] sm:$0xf] %v717_v1  ;;  %v5308_v39 = vsel %vm6606_vm12, %v1348_v21, %v1350_v50  ;;  %v1491_v10 = vrot.slane %v5299_v34, 2  ;;  %v1492_v0 = vrot.slane %v5296_v25, 3  ;;  %v1490_v15 = vsel %vm1470_vm1, %v5047_v3, %v1489_v56 }
  0x95   : > { %1065 = vrot.lane.b32.xlu0 %v1000_v44, %s4609_s23  ;;  %v723_v44 = vshrl.u32 %v4151_v8, 16  ;;  %v485_v7 = vsel %vm5058_vm4, %v477_v59, %v484_v48  ;;  %v731_v19 = vshrl.u32 %v4152_v55, 16  ;;  %v1267_v53 = vrot.slane %v5181_v26, 1 }
  0x96   : > { %493 = vst.msk [vmem:[#allocation2 + $0x4c] sm:$0xf] %vm172_vm0, %v485_v7  ;;  %v5328_v27 = vor.u32 %v1492_v0, %v1491_v10  ;;  %v1268_v1 = vrot.slane %v5178_v30, 2  ;;  %v935_v33 = vrot.slane %v5161_v20, 1  ;;  %v6609_v48 = vrot.slane %v4897_v23, 3 }
  0x97   : > { %1384 = vrot.lane.b32.xlu1 %v1349_v16, %s4607_s21  ;;  %v725_v49 = vrot.slane %v723_v44, 7  ;;  %v733_v44 = vrot.slane %v731_v19, 7  ;;  %v1110_v10 = vrot.slane %v5332_v45, 1  ;;  %v5356_v0 = vshrl.u32 %v5332_v45, 16  ;;  %v746_v7 = vld [vmem:[#allocation2 + $0x98] sm:$0x1] }
  0x98   : > { %v1494_v8 = vsel %vm1470_vm1, %v1489_v56, %v5328_v27  ;;  %v5353_v56 = vshll.u32 %v5332_v45, 16  ;;  %v943_v35 = vrot.slane %v5296_v25, 1  ;;  %vm1785_vm15 = vcmask 130048  }
  0x99   : > { %1435 = vrot.lane.b32.xlu0 %v1349_v16, %s4608_s22  ;;  %v490_v16 = vld [vmem:[#allocation2 + $0x48] sm:$0xf]  ;;  %v728_v3 = vor.u32 %v726_v5, %v725_v49  ;;  %v729_v59 = vrot.slane %v725_v49, 4  ;;  %v5364_v23 = vsel %vm1080_vm2, %v1108_v4, %v1110_v10  ;;  %v1608_v49 = vrot.slane %v5279_v54, 3 }
  0x9a   : > { %v491_v21 = vsel %vm4840_vm11, %v476_v63, %v490_v16  ;;  %vm1822_vm9 = vcmask 162816   ;;  %vm1859_vm12 = vcmask 195584  }
  0x9b   : > { %1660 = vrot.lane.b32.xlu1 %v1625_v42, %s4612_s30  ;;  %492 = vst [vmem:[#allocation2 + $0x48] sm:$0xf] %v491_v21  ;;  %v1606_v42 = vrot.slane %v5153_v36, 3  ;;  %v743_v63 = vsel %vm4840_vm11, %v728_v3, %v742_v28  ;;  %v1271_v21 = vrot.slane %v5356_v0, 1  ;;  %vm6614_vm11 = vmmov %vm6599_vm3 }
  0x9c   : > { %744 = vst [vmem:[#allocation2 + $0x90] sm:$0xf] %v743_v63  ;;  %v5422_v63 = vld [vmem:[#allocation2 + $0x80] sm:$0xff]  }
  0x9d   : > { %1067 = vrot.lane.b32.xlu0 %v1008_v6, %s4609_s23  ;;  %v6608_v6 = vrot.slane %v5003_v61, 1  ;;  %v1607_v16 = vsel %vm6610_vm13, %v6609_v48, %v1606_v42  ;;  %v1269_v61 = vor.u32 %v1268_v1, %v1267_v53  ;;  %v5404_v1 = vld [vmem:[#allocation2 + $0x38] sm:$0xff]  }
  0x9e   : > { %v5425_v48 = vshll.u32 %v5404_v1, 16 }
  0x9f   : > { %1142 = vrot.lane.b32.xlu1 %v5102_v41, %s4606_s20  ;;  %v6607_v41 = vrot.slane %v5067_v32, 1  ;;  %v734_v32 = vshll.u32 %v4152_v55, 16  ;;  %v931_v43 = vor.u32 %v5006_v62, %v6608_v6  ;;  %v1270_v5 = vsel %vm1210_vm8, %v5129_v60, %v1269_v61 }
  0xa0   : > { %v1272_v55 = vrot.slane %v5353_v56, 2  ;;  %v1368_v6 = vrot.slane %v5332_v45, 2 }
  0xa1   : > { %1437 = vrot.lane.b32.xlu0 %v5308_v39, %s4608_s22  ;;  %v1109_v51 = vsel %vm1080_vm2, %v6607_v41, %v1108_v4  ;;  %v736_v62 = vor.u32 %v734_v32, %v733_v44  ;;  %v936_v20 = vsel %vm892_vm6, %v931_v43, %v935_v33  ;;  %v738_v4 = vrot.slane %v733_v44, 4 }
  0xa2   : > { %v6612_v32 = vrot.slane %v5153_v36, 1  ;;  %v1235_v43 = vrot.slane %v5299_v34, 1  ;;  %v6613_v36 = vrot.slane %v5157_v58, 2 }
  0xa3   : > { %1565 = vrot.lane.b32.xlu1 %v1490_v15, %s4611_s29  ;;  %v737_v29 = vsel %vm5058_vm4, %v729_v59, %v736_v62  ;;  %v939_v15 = vor.u32 %v5164_v17, %v935_v33  ;;  %v747_v60 = vsel %vm4889_vm5, %v738_v4, %v746_v7  ;;  %v1094_v33 = vrot.slane %v5404_v1, 1  ;;  %vm6615_vm5 = vmmov %vm6599_vm3 }
  0xa4   : > { %745 = vst.msk [vmem:[#allocation2 + $0x94] sm:$0xf] %vm172_vm0, %v737_v29  ;;  %vm6611_vm0 = vmmov %vm6605_vm10  ;;  %v5417_v59 = vshrl.u32 %v5404_v1, 16  ;;  %v1369_v44 = vsel %vm6614_vm11, %v6613_v36, %v1368_v6  ;;  %v1527_v62 = vrot.slane %v5356_v0, 2  ;;  %v1240_v7 = vrot.slane %v5425_v48, 2 }
  0xa5   : > { %1144 = vrot.lane.b32.xlu0 %v1109_v51, %s4606_s20  ;;  %v1609_v41 = vsel %vm6611_vm0, %v1606_v42, %v1608_v49  ;;  %748 = vst [vmem:[#allocation2 + $0x98] sm:$0x1] %v747_v60  ;;  %v944_v17 = vsel %vm892_vm6, %v939_v15, %v943_v35  ;;  %v1092_v42 = vrot.slane %v5279_v54, 1  ;;  %v1370_v15 = vrot.slane %v5422_v63, 2  ;;  %vm6616_vm7 = vmmov %vm6611_vm0 }
  0xa6   : > { %vm1674_vm4 = vcmask 31744   ;;  %vm1748_vm3 = vcmask 97280   ;;  %vm6617_vm10 = vmmov %vm6615_vm5  ;;  %vm1933_vm11 = vcmask 261120  }
  0xa7   : > { %1195 = vrot.lane.b32.xlu1 %v1109_v51, %s4605_s19  ;;  %v5386_v51 = vor.u32 %v1272_v55, %v1271_v21  ;;  %v5438_v29 = vsel %vm1080_vm2, %v1092_v42, %v1094_v33  ;;  %v5444_v21 = vshll.u32 %v5422_v63, 16  ;;  %v5447_v55 = vshrl.u32 %v5422_v63, 16  ;;  %vm6618_vm13 = vmmov %vm6611_vm0 }
  0xa8   : > { %vm1896_vm0 = vcmask 228352  }
  0xa9   : > { %1567 = vrot.lane.b32.xlu0 %v1494_v8, %s4611_s29  ;;  %v1274_v18 = vsel %vm1210_vm8, %v1269_v61, %v5386_v51  ;;  %v1093_v8 = vsel %vm1080_vm2, %v6612_v32, %v1092_v42  ;;  %v1531_v32 = vrot.slane %v5447_v55, 2 }
  0xab   : > { %1642 = vrot.lane.b32.xlu1 %v1607_v16, %s4612_s30  ;;  %v5389_v3 = vpop.permute.xlu0 %1171  ;;  %v5391_v19 = vpop.permute.xlu1 %1118 }
  0xad   : > { %1049 = vrot.lane.b32.xlu0 %v936_v20, %s4609_s23  ;;  %v1528_v20 = vrot.slane %v5353_v56, 3 }
  0xaf   : > { %1197 = vrot.lane.b32.xlu1 %v5364_v23, %s4605_s19  ;;  %v5400_v28 = vpop.permute.xlu0 %1378  ;;  %v5402_v53 = vpop.permute.xlu1 %1120 }
  0xb1   : > { %1325 = vrot.lane.b32.xlu0 %v1270_v5, %s4610_s28  ;;  %v1239_v5 = vrot.slane %v5417_v59, 1 }
  0xb3   : > { %1644 = vrot.lane.b32.xlu1 %v1609_v41, %s4612_s30  ;;  %v5461_v42 = vor.u32 %v1240_v7, %v1239_v5  ;;  %v1015_v7 = vrot.slane %v5353_v56, 1 }
  0xb5   : > { %1051 = vrot.lane.b32.xlu0 %v944_v17, %s4609_s23  ;;  %v1529_v17 = vor.u32 %v1528_v20, %v1527_v62  ;;  %v1626_v62 = vrot.slane %v5332_v45, 3  ;;  %v947_v45 = vor.u32 %v5299_v34, %v943_v35 }
  0xb7   : > { %1126 = vrot.lane.b32.xlu1 %v5192_v11, %s4606_s20  ;;  %v1236_v11 = vrot.slane %v5296_v25, 2 }
  0xb9   : > { %1327 = vrot.lane.b32.xlu0 %v1274_v18, %s4610_s28  ;;  %v1237_v61 = vor.u32 %v1236_v11, %v1235_v43  ;;  %v5459_v18 = vsel %vm6615_vm5, %v1368_v6, %v1370_v15  ;;  %vm1997_vm5 = vcmask 293888  }
  0xbb   : > { %1402 = vrot.lane.b32.xlu1 %v5207_v2, %s4607_s21  ;;  %v1238_v60 = vsel %vm1210_vm8, %v5213_v31, %v1237_v61  ;;  %v1530_v31 = vsel %vm1470_vm1, %v5236_v37, %v1529_v17  ;;  %v1242_v6 = vsel %vm1210_vm8, %v1237_v61, %v5461_v42  ;;  %v1011_v61 = vor.u32 %v5181_v26, %v1007_v57 }
  0xbd   : > { %1128 = vrot.lane.b32.xlu0 %v1093_v8, %s4606_s20  ;;  %v1016_v30 = vsel %vm892_vm6, %v1011_v61, %v1015_v7 }
  0xbf   : > { %1179 = vrot.lane.b32.xlu1 %v1093_v8, %s4605_s19  ;;  %v5428_v2 = vpop.permute.xlu0 %1380  ;;  %v5430_v16 = vpop.permute.xlu1 %1173  ;;  %v1532_v8 = vrot.slane %v5444_v21, 3 }
  0xc1   : > { %1404 = vrot.lane.b32.xlu0 %v1369_v44, %s4607_s21  ;;  %v5476_v36 = vor.u32 %v1532_v8, %v1531_v32 }
  0xc3   : > { %1455 = vrot.lane.b32.xlu1 %v1369_v44, %s4608_s22  ;;  %v5450_v4 = vpop.permute.xlu0 %1433  ;;  %v1432_v41 = vpop.permute.xlu1 %1431  ;;  %v1534_v5 = vsel %vm1470_vm1, %v1529_v17, %v5476_v36  ;;  %v1352_v17 = vrot.slane %v5404_v1, 2 }
  0xc5   : > { %1181 = vrot.lane.b32.xlu0 %v5438_v29, %s4605_s19  ;;  %v1353_v58 = vsel %vm6617_vm10, %v1350_v50, %v1352_v17 }
  0xc7   : > { %1309 = vrot.lane.b32.xlu1 %v1238_v60, %s4610_s28  ;;  %v5466_v43 = vpop.permute.xlu0 %1140 }
  0xc9   : > { %v5470_v11 = vpop.permute.xlu1 %1138  ;;  %1457 = vrot.lane.b32.xlu0 %v5459_v18, %s4608_s22 }
  0xcb   : > { %1585 = vrot.lane.b32.xlu1 %v1530_v31, %s4611_s29  ;;  %v1042_v44 = vpop.permute.xlu0 %1041  ;;  %v5514_v31 = vld [vmem:[#allocation2 + $0x40] sm:$0xff]  }
  0xcc   : > { %v1676_v37 = vsel %vm1674_vm4, %v4876_v9, %v1042_v44  ;;  %v1627_v9 = vsel %vm6616_vm7, %v1624_v13, %v1626_v62  ;;  %v6555_v13 = vrot.slane %v5422_v63, 3  ;;  %vm6619_vm7 = vmmov %vm6617_vm10 }
  0xcd   : > { %v5480_v20 = vpop.permute.xlu1 %1191  ;;  %1311 = vrot.lane.b32.xlu0 %v1242_v6, %s4610_s28  ;;  %v1713_v32 = vsel %vm1711_vm14, %v1676_v37, %v5391_v19  ;;  %v6556_v6 = vrot.slane %v5444_v21, 1  ;;  %vm6620_vm10 = vmmov %vm6618_vm13 }
  0xce   : > { %v1750_v26 = vsel %vm1748_vm3, %v1713_v32, %v5389_v3  ;;  %v1019_v3 = vor.u32 %v5356_v0, %v1015_v7  ;;  %v1629_v37 = vsel %vm6618_vm13, %v1626_v62, %v6555_v13  ;;  %v1496_v0 = vrot.slane %v5425_v48, 3  ;;  %vm6621_vm13 = vmmov %vm6620_vm10 }
  0xcf   : > { %1386 = vrot.lane.b32.xlu1 %v5308_v39, %s4607_s21  ;;  %v1044_v60 = vpop.permute.xlu0 %1043  ;;  %v5540_v62 = vshrl.u32 %v5514_v31, 16 }
  0xd0   : > { %v1678_v56 = vsel %vm1674_vm4, %v4772_v40, %v1044_v60  ;;  %v5537_v60 = vshll.u32 %v5514_v31, 16 }
  0xd1   : > { %v1304_v8 = vpop.permute.xlu1 %1303  ;;  %1587 = vrot.lane.b32.xlu0 %v1534_v5, %s4611_s29  ;;  %v1715_v40 = vsel %vm1711_vm14, %v1678_v56, %v5402_v53  ;;  %v1495_v5 = vrot.slane %v5417_v59, 2  ;;  %v1024_v53 = vsel %vm892_vm6, %v1019_v3, %v6556_v6  ;;  %v1499_v56 = vrot.slane %v5540_v62, 2 }
  0xd2   : > { %v1752_v32 = vsel %vm1748_vm3, %v1715_v40, %v5430_v16  ;;  %v1500_v3 = vrot.slane %v5537_v60, 3 }
  0xd3   : > { %1662 = vrot.lane.b32.xlu1 %v1627_v9, %s4612_s30  ;;  %v1302_v57 = vpop.permute.xlu0 %1301  ;;  %v1789_v16 = vsel %vm1785_vm15, %v1752_v32, %v1304_v8  ;;  %v1275_v32 = vrot.slane %v5447_v55, 1 }
  0xd4   : > { %v1787_v39 = vsel %vm1785_vm15, %v1750_v26, %v1302_v57  ;;  %v1826_v40 = vsel %vm1822_vm9, %v1789_v16, %v5428_v2  ;;  %v1610_v2 = vrot.slane %v5404_v1, 3 }
  0xd5   : > { %v5511_v19 = vpop.permute.xlu1 %1061  ;;  %1069 = vrot.lane.b32.xlu0 %v1016_v30, %s4609_s23  ;;  %v1824_v44 = vsel %vm1822_vm9, %v1787_v39, %v5400_v28  ;;  %v6554_v28 = vrot.slane %v5514_v31, 2  ;;  %v1497_v30 = vor.u32 %v1496_v0, %v1495_v5  ;;  %v1112_v39 = vrot.slane %v5422_v63, 1  ;;  %v5581_v0 = vld [vmem:[#allocation2 + $0x88] sm:$0xff]  }
  0xd6   : > { %v1861_v7 = vsel %vm1859_vm12, %v1824_v44, %v1432_v41  ;;  %v1611_v25 = vsel %vm6620_vm10, %v1608_v49, %v1610_v2  ;;  %v5602_v34 = vrot.slane %v5581_v0, 1  ;;  %v5612_v16 = vshrl.u32 %v5581_v0, 16  ;;  %vm6622_vm10 = vmmov %vm6619_vm7 }
  0xd7   : > { %1388 = vrot.lane.b32.xlu1 %v1353_v58, %s4607_s21  ;;  %v5521_v50 = vpop.permute.xlu0 %1063  ;;  %v5550_v57 = vsel %vm6619_vm7, %v1352_v17, %v6554_v28  ;;  %v1498_v17 = vsel %vm1470_vm1, %v5328_v27, %v1497_v30  ;;  %v1863_v27 = vsel %vm1859_vm12, %v1826_v40, %v5450_v4  ;;  %v6553_v40 = vrot.slane %v5537_v60, 1 }
  0xd8   : > { %v5619_v49 = vsel %vm1080_vm2, %v1112_v39, %v5602_v34 }
  0xd9   : > { %v1562_v61 = vpop.permute.xlu1 %1561  ;;  %1439 = vrot.lane.b32.xlu0 %v1353_v58, %s4608_s22 }
  0xda   : > { %v1898_v41 = vsel %vm1896_vm0, %v1861_v7, %v1562_v61 }
  0xdb   : > { %1664 = vrot.lane.b32.xlu1 %v1629_v37, %s4612_s30  ;;  %v1564_v9 = vpop.permute.xlu0 %1563  ;;  %v1113_v37 = vsel %vm1080_vm2, %v1110_v10, %v1112_v39  ;;  %v951_v10 = vrot.slane %v5425_v48, 1 }
  0xdc   : > { %v1900_v61 = vsel %vm1896_vm0, %v1863_v27, %v1564_v9 }
  0xdd   : > { %v1639_v26 = vpop.permute.xlu1 %1638  ;;  %1071 = vrot.lane.b32.xlu0 %v1024_v53, %s4609_s23  ;;  %v952_v48 = vsel %vm892_vm6, %v947_v45, %v951_v10 }
  0xde   : > { %v1935_v58 = vsel %vm1933_vm11, %v1898_v41, %v1639_v26  ;;  %v1276_v41 = vrot.slane %v5444_v21, 2  ;;  %v5609_v26 = vshll.u32 %v5581_v0, 16 }
  0xdf   : > { %1146 = vrot.lane.b32.xlu1 %v5364_v23, %s4606_s20  ;;  %4492 = vmatprep.mubr.msk.bf16.mxu0 %vm1997_vm5, %v1935_v58  ;;  %v5560_v44 = vpop.permute.xlu0 %1045  ;;  %v5573_v23 = vor.u32 %v1500_v3, %v1499_v56  ;;  %v6552_v58 = vrot.slane %v5514_v31, 3  ;;  %v955_v3 = vor.u32 %v5417_v59, %v951_v10 }
  0xe0   : > { %v1280_v27 = vrot.slane %v5609_v26, 2  ;;  %v1536_v28 = vrot.slane %v5609_v26, 3 }
  0xe1   : > { %v5566_v8 = vpop.permute.xlu1 %1193  ;;  %1441 = vrot.lane.b32.xlu0 %v5550_v57, %s4608_s22  ;;  %v1502_v4 = vsel %vm1470_vm1, %v1497_v30, %v5573_v23  ;;  %v1277_v30 = vor.u32 %v1276_v41, %v1275_v32  ;;  %v5658_v41 = vld [vmem:[#allocation2 + $0x48] sm:$0xff]  }
  0xe2   : > { %v6557_v1 = vrot.slane %v5658_v41, 1 }
  0xe3   : > { %1569 = vrot.lane.b32.xlu1 %v1498_v17, %s4611_s29  ;;  %v5576_v5 = vpop.permute.xlu0 %1321  ;;  %v1278_v17 = vsel %vm1210_vm8, %v5386_v51, %v1277_v30  ;;  %v960_v51 = vsel %vm892_vm6, %v955_v3, %v6553_v40  ;;  %v1535_v40 = vrot.slane %v5612_v16, 2 }
  0xe5   : > { %v1641_v7 = vpop.permute.xlu1 %1640  ;;  %1148 = vrot.lane.b32.xlu0 %v1113_v37, %s4606_s20  ;;  %v1537_v22 = vor.u32 %v1536_v28, %v1535_v40 }
  0xe6   : > { %v1937_v53 = vsel %vm1933_vm11, %v1900_v61, %v1641_v7  ;;  %v1613_v61 = vsel %vm6621_vm13, %v1610_v2, %v6552_v58 }
  0xe7   : > { %1199 = vrot.lane.b32.xlu1 %v1113_v37, %s4605_s19  ;;  %4493 = vmatmul.mubr.msk.bf16.vlgmr.msra.gmra.mrb[0].mxu0 %vm1997_vm5, %v1937_v53  ;;  %v5596_v9 = vpop.permute.xlu0 %1047  ;;  %v1279_v37 = vrot.slane %v5612_v16, 1  ;;  %v1096_v53 = vrot.slane %v5514_v31, 1 }
  0xe9   : > { %v5604_v35 = vpop.permute.xlu1 %1122  ;;  %1571 = vrot.lane.b32.xlu0 %v1502_v4, %s4611_s29  ;;  %v5642_v59 = vor.u32 %v1280_v27, %v1279_v37  ;;  %v1244_v37 = vrot.slane %v5537_v60, 2 }
  0xeb   : > { %1646 = vrot.lane.b32.xlu1 %v1611_v25, %s4612_s30  ;;  %v5615_v54 = vpop.permute.xlu0 %1323  ;;  %v1282_v2 = vsel %vm1210_vm8, %v1277_v30, %v5642_v59  ;;  %v1097_v25 = vsel %vm1080_vm2, %v1094_v33, %v1096_v53  ;;  %v5664_v30 = vld [vmem:[#allocation2 + $0x50] sm:$0xff]   ;;  %v5676_v33 = vshll.u32 %v5658_v41, 16 }
  0xed   : > { %v1399_v56 = vpop.permute.xlu1 %1398  ;;  %1053 = vrot.lane.b32.xlu0 %v952_v48, %s4609_s23  ;;  %v1372_v48 = vrot.slane %v5581_v0, 2 }
  0xef   : > { %1201 = vrot.lane.b32.xlu1 %v5619_v49, %s4605_s19  ;;  %v5631_v39 = vpop.permute.xlu0 %1124 }
  0xf1   : > { %v5636_v7 = vpop.permute.xlu1 %1175  ;;  %1329 = vrot.lane.b32.xlu0 %v1278_v17, %s4610_s28  ;;  %v1243_v17 = vrot.slane %v5540_v62, 1 }
  0xf3   : > { %1648 = vrot.lane.b32.xlu1 %v1613_v61, %s4612_s30  ;;  %v5645_v45 = vpop.permute.xlu0 %1400  ;;  %v5679_v61 = vshrl.u32 %v5658_v41, 16  ;;  %v1245_v58 = vor.u32 %v1244_v37, %v1243_v17 }
  0xf5   : > { %v1452_v10 = vpop.permute.xlu1 %1451  ;;  %1055 = vrot.lane.b32.xlu0 %v960_v51, %s4609_s23  ;;  %v5686_v51 = vld [vmem:[#allocation2 + $0x90] sm:$0xff]   ;;  %v1246_v52 = vsel %vm1210_vm8, %v5461_v42, %v1245_v58 }
  0xf6   : > { %v5708_v17 = vrot.slane %v5686_v51, 2  ;;  %v6623_v40 = vshll.u32 %v5686_v51, 16 }
  0xf7   : > { %1130 = vrot.lane.b32.xlu1 %v5438_v29, %s4606_s20  ;;  %v5653_v4 = vpop.permute.xlu0 %1177  ;;  %v1696_v29 = vsel %vm1674_vm4, %v5664_v30, %v5511_v19 }
  0xf8   : > { %v1733_v19 = vsel %vm1711_vm14, %v1696_v29, %v5470_v11  ;;  %v1247_v11 = vrot.slane %v5679_v61, 1  ;;  %v5730_v42 = vsel %vm6622_vm10, %v1372_v48, %v5708_v17  ;;  %vm6627_vm10 = vmmov %vm6621_vm13 }
  0xf9   : > { %v5655_v32 = vpop.permute.xlu1 %1305  ;;  %1331 = vrot.lane.b32.xlu0 %v1282_v2, %s4610_s28  ;;  %v1770_v13 = vsel %vm1748_vm3, %v1733_v19, %v5480_v20  ;;  %v1284_v20 = vshrl.u32 %v5686_v51, 16 }
  0xfa   : > { %v1807_v29 = vsel %vm1785_vm15, %v1770_v13, %v5576_v5  ;;  %v1698_v13 = vsel %vm1674_vm4, %v5717_v24, %v5521_v50  ;;  %v1540_v50 = vrot.slane %v6623_v40, 3 }
  0xfb   : > { %1406 = vrot.lane.b32.xlu1 %v5459_v18, %s4607_s21  ;;  %v1454_v3 = vpop.permute.xlu0 %1453  ;;  %v1373_v18 = vsel %vm6619_vm7, %v1370_v15, %v1372_v48  ;;  %v5701_v15 = vsel %vm1080_vm2, %v1096_v53, %v6557_v1  ;;  %v1844_v19 = vsel %vm1822_vm9, %v1807_v29, %v1399_v56  ;;  %v1539_v28 = vrot.slane %v1284_v20, 2 }
  0xfc   : > { %v1881_v1 = vsel %vm1859_vm12, %v1844_v19, %v1452_v10 }
  0xfd   : > { %v1582_v27 = vpop.permute.xlu1 %1581  ;;  %1132 = vrot.lane.b32.xlu0 %v1097_v25, %s4606_s20  ;;  %v5754_v29 = vor.u32 %v1540_v50, %v1539_v28  ;;  %v4577_v28 = vld [vmem:[#allocation2 + $0x90] ss:$0 sps:$4 sm:$0x11]  }
  0xfe   : > { %v1918_v5 = vsel %vm1896_vm0, %v1881_v1, %v1582_v27  ;;  %v1735_v1 = vsel %vm1711_vm14, %v1698_v13, %v5466_v43 }
  0xff   : > { %1183 = vrot.lane.b32.xlu1 %v1097_v25, %s4605_s19  ;;  %v5689_v2 = vpop.permute.xlu0 %1307  ;;  %v1248_v25 = vrot.slane %v5676_v33, 2  ;;  %v1772_v48 = vsel %vm1748_vm3, %v1735_v1, %v5566_v8 }
 0x101   : > { %v5695_v6 = vpop.permute.xlu1 %1382  ;;  %1408 = vrot.lane.b32.xlu0 %v1373_v18, %s4607_s21  ;;  %v5725_v56 = vor.u32 %v1248_v25, %v1247_v11 }
 0x103   : > { %1459 = vrot.lane.b32.xlu1 %v1373_v18, %s4608_s22  ;;  %v1584_v53 = vpop.permute.xlu0 %1583  ;;  %v1538_v18 = vsel %vm1470_vm1, %v5476_v36, %v1537_v22  ;;  %v1250_v25 = vsel %vm1210_vm8, %v1245_v58, %v5725_v56  ;;  %v1542_v58 = vsel %vm1470_vm1, %v1537_v22, %v5754_v29  ;;  %v1356_v22 = vrot.slane %v5658_v41, 2 }
 0x105   : > { %v1659_v37 = vpop.permute.xlu1 %1658  ;;  %1185 = vrot.lane.b32.xlu0 %v5701_v15, %s4605_s19 }
 0x106   : > { %v1955_v10 = vsel %vm1933_vm11, %v1918_v5, %v1659_v37  ;;  %v1630_v37 = vrot.slane %v5581_v0, 3  ;;  %v6624_v5 = vrot.slane %v5444_v21, 1 }
 0x107   : > { %1313 = vrot.lane.b32.xlu1 %v1246_v52, %s4610_s28  ;;  %4512 = vmatprep.mubr.msk.bf16.mxu1 %vm1997_vm5, %v1955_v10  ;;  %v5738_v27 = vpop.permute.xlu0 %1065  ;;  %v1809_v52 = vsel %vm1785_vm15, %v1772_v48, %v5615_v54  ;;  %v1031_v10 = vrot.slane %v5609_v26, 1  ;;  %v6626_v26 = vrot.slane %v5514_v31, 2 }
 0x108   : > { %v1846_v43 = vsel %vm1822_vm9, %v1809_v52, %v5645_v45  ;;  %v1027_v45 = vor.u32 %v5447_v55, %v6624_v5  ;;  %v1037_v55 = vshll.u32 %v4577_v28, 16 }
 0x109   : > { %v5746_v11 = vpop.permute.xlu1 %1384  ;;  %1461 = vrot.lane.b32.xlu0 %v5730_v42, %s4608_s22  ;;  %v1883_v8 = vsel %vm1859_vm12, %v1846_v43, %v1454_v3  ;;  %v1357_v1 = vsel %vm6619_vm7, %v6626_v26, %v1356_v22  ;;  %v1035_v48 = vor.u32 %v5612_v16, %v1031_v10  ;;  %v1504_v16 = vrot.slane %v5676_v33, 3  ;;  %v4585_v26 = vld [vmem:[#allocation2 + $0x18] sm:$0xff]  }
 0x10a   : > { %v1920_v19 = vsel %vm1896_vm0, %v1883_v8, %v1584_v53  ;;  %v6625_v53 = vrot.slane %v5422_v63, 3  ;;  %v1032_v21 = vsel %vm892_vm6, %v1027_v45, %v1031_v10  ;;  %v1632_v63 = vrot.slane %v5686_v51, 3 }
 0x10b   : > { %1589 = vrot.lane.b32.xlu1 %v1538_v18, %s4611_s29  ;;  %v1436_v36 = vpop.permute.xlu0 %1435  ;;  %v1039_v52 = vrot.slane %v1037_v55, 1  ;;  %v1508_v55 = vrot.slane %v4964_v12, 3 }
 0x10c   : > { %v1631_v40 = vsel %vm6621_vm13, %v6625_v53, %v1630_v37  ;;  %vm6628_vm13 = vmmov %vm6619_vm7 }
 0x10d   : > { %v1661_v13 = vpop.permute.xlu1 %1660  ;;  %1315 = vrot.lane.b32.xlu0 %v1250_v25, %s4610_s28  ;;  %v1680_v25 = vsel %vm1674_vm4, %v4785_v46, %v5560_v44  ;;  %v1358_v46 = vrot.slane %v5664_v30, 2  ;;  %vm6632_vm7 = vmmov %vm6627_vm10 }
 0x10e   : > { %v1957_v54 = vsel %vm1933_vm11, %v1920_v19, %v1661_v13  ;;  %v1717_v8 = vsel %vm1711_vm14, %v1680_v25, %v5604_v35  ;;  %v1633_v19 = vsel %vm6627_vm10, %v1630_v37, %v1632_v63  ;;  %v1503_v13 = vrot.slane %v5679_v61, 2  ;;  %vm6633_vm10 = vmmov %vm6632_vm7 }
 0x10f   : > { %1390 = vrot.lane.b32.xlu1 %v5550_v57, %s4607_s21  ;;  %4513 = vmatmul.mubr.msk.bf16.vlgmr.msra.gmra.mrb[0].mxu1 %vm1997_vm5, %v1957_v54  ;;  %v5773_v3 = vpop.permute.xlu0 %1067  ;;  %v1754_v54 = vsel %vm1748_vm3, %v1717_v8, %v5636_v7  ;;  %v1040_v35 = vsel %vm892_vm6, %v1035_v48, %v1039_v52 }
 0x110   : > { %v1791_v44 = vsel %vm1785_vm15, %v1754_v54, %v5655_v32  ;;  %v1505_v7 = vor.u32 %v1504_v16, %v1503_v13  ;;  %v5821_v32 = vsel %vm6628_vm13, %v1356_v22, %v1358_v46  ;;  %v6629_v54 = vrot.slane %v5537_v60, 1 }
 0x111   : > { %v5779_v50 = vpop.permute.xlu1 %1142  ;;  %1591 = vrot.lane.b32.xlu0 %v1542_v58, %s4611_s29  ;;  %v1828_v37 = vsel %vm1822_vm9, %v1791_v44, %v5695_v6  ;;  %v1507_v6 = vrot.slane %v4986_v47, 2  ;;  %v967_v44 = vrot.slane %v5676_v33, 1 }
 0x112   : > { %v1865_v45 = vsel %vm1859_vm12, %v1828_v37, %v1436_v36  ;;  %v1682_v36 = vsel %vm1674_vm4, %v4585_v26, %v5596_v9  ;;  %v6630_v37 = vshll.u32 %v5686_v51, 16  ;;  %v1616_v26 = vrot.slane %v5664_v30, 3 }
 0x113   : > { %1666 = vrot.lane.b32.xlu1 %v1631_v40, %s4612_s30  ;;  %v1438_v57 = vpop.permute.xlu0 %1437  ;;  %v1719_v22 = vsel %vm1711_vm14, %v1682_v36, %v5631_v39  ;;  %v5848_v39 = vor.u32 %v1508_v55, %v1507_v6 }
 0x114   : > { %v1756_v48 = vsel %vm1748_vm3, %v1719_v22, %v5653_v4 }
 0x115   : > { %v1566_v18 = vpop.permute.xlu1 %1565  ;;  %1073 = vrot.lane.b32.xlu0 %v1032_v21, %s4609_s23  ;;  %v1116_v21 = vrot.slane %v4577_v28, 1  ;;  %v1506_v28 = vsel %vm1470_vm1, %v5573_v23, %v1505_v7  ;;  %v1793_v9 = vsel %vm1785_vm15, %v1756_v48, %v5689_v2  ;;  %v4578_v2 = vld [vmem:[#allocation2 + $0x98] ss:$0 sps:$4 sm:$0x11]  }
 0x116   : > { %v1902_v10 = vsel %vm1896_vm0, %v1865_v45, %v1566_v18  ;;  %v1167_v18 = vrot.slane %v5686_v51, 1  ;;  %v1830_v23 = vsel %vm1822_vm9, %v1793_v9, %v5746_v11  ;;  %v963_v11 = vor.u32 %v5540_v62, %v6629_v54  ;;  %v4579_v45 = vld [vmem:[#allocation2 + $0x98] ss:$0 sps:$4 sm:$0x33]  }
 0x117   : > { %1392 = vrot.lane.b32.xlu1 %v1357_v1, %s4607_s21  ;;  %v5794_v43 = vpop.permute.xlu0 %1144  ;;  %v1867_v4 = vsel %vm1859_vm12, %v1830_v23, %v1438_v57  ;;  %v1510_v57 = vsel %vm1470_vm1, %v1505_v7, %v5848_v39  ;;  %v6631_v62 = vrot.slane %v5514_v31, 3 }
 0x118   : > { %v1168_v8 = vsel %vm1080_vm2, %v5602_v34, %v1167_v18 }
 0x119   : > { %v5805_v58 = vpop.permute.xlu1 %1195  ;;  %1443 = vrot.lane.b32.xlu0 %v1357_v1, %s4608_s22 }
 0x11b   : > { %1668 = vrot.lane.b32.xlu1 %v1633_v19, %s4612_s30  ;;  %v1568_v5 = vpop.permute.xlu0 %1567  ;;  %v1614_v19 = vrot.slane %v5658_v41, 3 }
 0x11c   : > { %v1904_v13 = vsel %vm1896_vm0, %v1867_v4, %v1568_v5  ;;  %v1289_v5 = vrot.slane %v6630_v37, 2  ;;  %v6634_v4 = vrot.slane %v4964_v12, 1  ;;  %v1251_v37 = vrot.slane %v4986_v47, 1 }
 0x11d   : > { %v1643_v53 = vpop.permute.xlu1 %1642  ;;  %1075 = vrot.lane.b32.xlu0 %v1040_v35, %s4609_s23  ;;  %v1615_v33 = vsel %vm6632_vm7, %v6631_v62, %v1614_v19 }
 0x11e   : > { %v1939_v40 = vsel %vm1933_vm11, %v1902_v10, %v1643_v53  ;;  %v1169_v10 = vrot.slane %v4578_v2, 1 }
 0x11f   : > { %1150 = vrot.lane.b32.xlu1 %v5619_v49, %s4606_s20  ;;  %4496 = vmatprep.mubr.msk.bf16.mxu0 %vm1997_vm5, %v1939_v40  ;;  %v5831_v1 = vpop.permute.xlu0 %1049  ;;  %v1117_v49 = vsel %vm1080_vm2, %v5602_v34, %v1116_v21  ;;  %v1286_v34 = vrot.slane %v1284_v20, 1  ;;  %v968_v20 = vsel %vm892_vm6, %v963_v11, %v967_v44  ;;  %v1293_v40 = vshrl.u32 %v4579_v45, 16 }
 0x120   : > { %v1296_v21 = vshll.u32 %v4579_v45, 16  ;;  %v1170_v55 = vsel %vm1080_vm2, %v1167_v18, %v1169_v10  ;;  %v1617_v18 = vsel %vm6633_vm10, %v1614_v19, %v1616_v26  ;;  %v6635_v11 = vrot.slane %v4951_v38, 1  ;;  %v4581_v10 = vld [vmem:[#allocation2 + $0xa0] ss:$0 sps:$4 sm:$0x33]  }
 0x121   : > { %v5840_v52 = vpop.permute.xlu1 %1197  ;;  %1445 = vrot.lane.b32.xlu0 %v5821_v32, %s4608_s22  ;;  %v1290_v7 = vor.u32 %v1289_v5, %v1286_v34  ;;  %v1295_v48 = vrot.slane %v1293_v40, 1  ;;  %v1252_v5 = vrot.slane %v4964_v12, 2 }
 0x122   : > { %v1298_v9 = vrot.slane %v1296_v21, 2 }
 0x123   : > { %1573 = vrot.lane.b32.xlu1 %v1506_v28, %s4611_s29  ;;  %v5853_v25 = vpop.permute.xlu0 %1325  ;;  %v1291_v22 = vsel %vm1210_vm8, %v5642_v59, %v1290_v7  ;;  %v971_v28 = vor.u32 %v5679_v61, %v967_v44  ;;  %v6636_v44 = vrot.slane %v5658_v41, 1  ;;  %v1253_v21 = vor.u32 %v1252_v5, %v1251_v37 }
 0x125   : > { %v1645_v16 = vpop.permute.xlu1 %1644  ;;  %1152 = vrot.lane.b32.xlu0 %v1117_v49, %s4606_s20  ;;  %v976_v59 = vsel %vm892_vm6, %v971_v28, %v6634_v4 }
 0x126   : > { %v1941_v35 = vsel %vm1933_vm11, %v1904_v13, %v1645_v16  ;;  %v5913_v16 = vld [vmem:[#allocation2 + $0x98] sm:$0xff]  }
 0x127   : > { %1203 = vrot.lane.b32.xlu1 %v1168_v8, %s4605_s19  ;;  %4497 = vmatmul.mubr.msk.bf16.gmra.mrb[4].mxu0 %vm1997_vm5, %v1941_v35  ;;  %v5874_v60 = vpop.permute.xlu0 %1051  ;;  %v1299_v8 = vor.u32 %v1298_v9, %v1295_v48  ;;  %v1101_v35 = vsel %vm1080_vm2, %v6636_v44, %v6635_v11  ;;  %v1544_v62 = vshrl.u32 %v5913_v16, 16  ;;  %vm6637_vm2 = vmmov %vm6628_vm13  ;;  %v1429_v9 = vrot.slane %v4581_v10, 2 }
 0x128   : > { %vm6638_vm6 = vmmov %vm6637_vm2 }
 0x129   : > { %v5879_v53 = vpop.permute.xlu1 %1126  ;;  %1575 = vrot.lane.b32.xlu0 %v1510_v57, %s4611_s29  ;;  %v1300_v13 = vsel %vm1210_vm8, %v1290_v7, %v1299_v8  ;;  %v1376_v57 = vrot.slane %v4579_v45, 2  ;;  %vm6639_vm13 = vmmov %vm6637_vm2 }
 0x12b   : > { %1650 = vrot.lane.b32.xlu1 %v1615_v33, %s4612_s30  ;;  %v5884_v6 = vpop.permute.xlu0 %1327  ;;  %v1547_v33 = vshll.u32 %v5913_v16, 16  ;;  %v1377_v45 = vsel %vm6637_vm2, %v5708_v17, %v1376_v57  ;;  %v4587_v57 = vld [vmem:[#allocation2 + $0x68] sm:$0xff]  }
 0x12d   : > { %v1403_v36 = vpop.permute.xlu1 %1402  ;;  %1057 = vrot.lane.b32.xlu0 %v968_v20, %s4609_s23  ;;  %v5933_v20 = vld [vmem:[#allocation2 + $0xa0] ss:$0 sps:$4 sm:$0x77]  }
 0x12f   : > { %1205 = vrot.lane.b32.xlu1 %v1170_v55, %s4605_s19  ;;  %v5893_v49 = vpop.permute.xlu0 %1128  ;;  %v1546_v55 = vrot.slane %v1544_v62, 2  ;;  %v6640_v62 = vld [vmem:[#allocation7_spill] sm:$0xff] }
 0x131   : > { %v5898_v23 = vpop.permute.xlu1 %1179  ;;  %1333 = vrot.lane.b32.xlu0 %v1291_v22, %s4610_s28  ;;  %v1549_v22 = vrot.slane %v1547_v33, 3  ;;  %v1258_v33 = vsel %vm1210_vm8, %v1253_v21, %v6640_v62 }
 0x133   : > { %1652 = vrot.lane.b32.xlu1 %v1617_v18, %s4612_s30  ;;  %v5905_v61 = vpop.permute.xlu0 %1404  ;;  %v1553_v18 = vshrl.u32 %v5933_v20, 16  ;;  %v1550_v8 = vor.u32 %v1549_v22, %v1546_v55  ;;  %v6645_v55 = vld [vmem:[#allocation6_spill] sm:$0xff] }
 0x134   : > { %v1511_v22 = vrot.slane %v6645_v55, 2 }
 0x135   : > { %v1456_v2 = vpop.permute.xlu1 %1455  ;;  %1059 = vrot.lane.b32.xlu0 %v976_v59, %s4609_s23 }
 0x137   : > { %1134 = vrot.lane.b32.xlu1 %v5701_v15, %s4606_s20  ;;  %v5911_v19 = vpop.permute.xlu0 %1181  ;;  %v1427_v15 = vrot.slane %v5913_v16, 2 }
 0x139   : > { %v5915_v54 = vpop.permute.xlu1 %1309  ;;  %1335 = vrot.lane.b32.xlu0 %v1300_v13, %s4610_s28  ;;  %v1428_v47 = vsel %vm6638_vm6, %v5708_v17, %v1427_v15  ;;  %v1556_v17 = vshll.u32 %v5933_v20, 16  ;;  %v1430_v44 = vsel %vm6639_vm13, %v1427_v15, %v1429_v9 }
 0x13b   : > { %1410 = vrot.lane.b32.xlu1 %v5730_v42, %s4607_s21  ;;  %v1458_v34 = vpop.permute.xlu0 %1457  ;;  %v4586_v42 = vld [vmem:[#allocation2 + $0x60] sm:$0xff]  }
 0x13c   : > { %v1700_v7 = vsel %vm1674_vm4, %v4586_v42, %v5738_v27 }
 0x13d   : > { %v1586_v38 = vpop.permute.xlu1 %1585  ;;  %1136 = vrot.lane.b32.xlu0 %v1101_v35, %s4606_s20  ;;  %v1737_v40 = vsel %vm1711_vm14, %v1700_v7, %v5779_v50 }
 0x13e   : > { %v1774_v28 = vsel %vm1748_vm3, %v1737_v40, %v5805_v58  ;;  %v1254_v58 = vsel %vm1210_vm8, %v5725_v56, %v1253_v21  ;;  %vm6641_vm8 = vmmov %vm6632_vm7 }
 0x13f   : > { %1187 = vrot.lane.b32.xlu1 %v1101_v35, %s4605_s19  ;;  %v5938_v12 = vpop.permute.xlu0 %1311  ;;  %v1811_v27 = vsel %vm1785_vm15, %v1774_v28, %v5853_v25  ;;  %v1558_v35 = vrot.slane %v1556_v17, 3  ;;  %vm6644_vm7 = vmmov %vm6637_vm2  ;;  %v6646_v28 = vld [vmem:[#allocation5_spill] sm:$0xff]  ;;  %v4588_v17 = vld [vmem:[#allocation2 + $0x20] sm:$0xff]  }
 0x140   : > { %v1848_v50 = vsel %vm1822_vm9, %v1811_v27, %v1403_v36  ;;  %v1555_v36 = vrot.slane %v1553_v18, 2  ;;  %v1512_v27 = vrot.slane %v6646_v28, 3  ;;  %vm6647_vm10 = vmmov %vm6641_vm8 }
 0x141   : > { %v5946_v48 = vpop.permute.xlu1 %1386  ;;  %1412 = vrot.lane.b32.xlu0 %v1377_v45, %s4607_s21  ;;  %v1885_v59 = vsel %vm1859_vm12, %v1848_v50, %v1456_v2  ;;  %v1702_v2 = vsel %vm1674_vm4, %v4587_v57, %v5773_v3  ;;  %v1684_v50 = vsel %vm1674_vm4, %v4588_v17, %v5831_v1  ;;  %v1618_v1 = vrot.slane %v5717_v24, 3  ;;  %vm6650_vm2 = vmmov %vm6641_vm8 }
 0x142   : > { %v1922_v13 = vsel %vm1896_vm0, %v1885_v59, %v1586_v38  ;;  %v1739_v37 = vsel %vm1711_vm14, %v1702_v2, %v5794_v43  ;;  %v1559_v38 = vor.u32 %v1558_v35, %v1555_v36  ;;  %v1513_v18 = vor.u32 %v1512_v27, %v1511_v22 }
 0x143   : > { %1463 = vrot.lane.b32.xlu1 %v1428_v47, %s4608_s22  ;;  %v1588_v4 = vpop.permute.xlu0 %1587  ;;  %v1776_v15 = vsel %vm1748_vm3, %v1739_v37, %v5840_v52  ;;  %v1634_v52 = vrot.slane %v5913_v16, 3  ;;  %v6642_v47 = vld [vmem:[#allocation3_spill] sm:$0xff]  ;;  %v1619_v24 = vsel %vm6650_vm2, %v1616_v26, %v1618_v1  ;;  %v6651_v37 = vld [vmem:[#allocation4_spill] sm:$0xff] }
 0x144   : > { %v1813_v3 = vsel %vm1785_vm15, %v1776_v15, %v5884_v6  ;;  %v1560_v7 = vsel %vm1470_vm1, %v1550_v8, %v1559_v38  ;;  %v6643_v40 = vrot.slane %v6642_v47, 2 }
 0x145   : > { %v1663_v11 = vpop.permute.xlu1 %1662  ;;  %1189 = vrot.lane.b32.xlu0 %v4977_v14, %s4605_s19  ;;  %v1551_v14 = vsel %vm1470_vm1, %v5754_v29, %v1550_v8  ;;  %v1850_v43 = vsel %vm1822_vm9, %v1813_v3, %v5905_v61  ;;  %v1635_v16 = vsel %vm6641_vm8, %v1632_v63, %v1634_v52  ;;  %v1514_v8 = vsel %vm1470_vm1, %v5848_v39, %v1513_v18 }
 0x146   : > { %v1959_v25 = vsel %vm1933_vm11, %v1922_v13, %v1663_v11  ;;  %v1887_v45 = vsel %vm1859_vm12, %v1850_v43, %v1458_v34  ;;  %v1361_v21 = vsel %vm6644_vm7, %v1358_v46, %v6643_v40  ;;  %v6648_v11 = vld [vmem:[#allocation8_spill] sm:$0xff] }
 0x147   : > { %1317 = vrot.lane.b32.xlu1 %v1254_v58, %s4610_s28  ;;  %4516 = vmatprep.mubr.msk.bf16.mxu1 %vm1997_vm5, %v1959_v25  ;;  %v5967_v56 = vpop.permute.xlu0 %1069  ;;  %v1924_v10 = vsel %vm1896_vm0, %v1887_v45, %v1588_v4  ;;  %v6649_v25 = vld [vmem:[#allocation9_spill] sm:$0xff] }
 0x148   : > { %v4590_v40 = vld [vmem:[#allocation2 + $0x70] sm:$0xff]  }
 0x149   : > { %v5975_v5 = vpop.permute.xlu1 %1388  ;;  %1465 = vrot.lane.b32.xlu0 %v1430_v44, %s4608_s22  ;;  %v1518_v44 = vsel %vm1470_vm1, %v1513_v18, %v6649_v25  ;;  %vm6653_vm1 = vmmov %vm6650_vm2 }
 0x14b   : > { %1593 = vrot.lane.b32.xlu1 %v1551_v14, %s4611_s29  ;;  %v1440_v29 = vpop.permute.xlu0 %1439  ;;  %v6652_v14 = vrot.slane %v6651_v37, 3 }
 0x14d   : > { %v1665_v42 = vpop.permute.xlu1 %1664  ;;  %1319 = vrot.lane.b32.xlu0 %v1258_v33, %s4610_s28  ;;  %v1621_v15 = vsel %vm6653_vm1, %v1618_v1, %v6652_v14 }
 0x14e   : > { %v1961_v6 = vsel %vm1933_vm11, %v1924_v10, %v1665_v42 }
 0x14f   : > { %1394 = vrot.lane.b32.xlu1 %v5821_v32, %s4607_s21  ;;  %4517 = vmatmul.mubr.msk.bf16.gmra.mrb[4].mxu1 %vm1997_vm5, %v1961_v6  ;;  %v5994_v61 = vpop.permute.xlu0 %1071  ;;  %v1636_v32 = vrot.slane %v5933_v20, 3  ;;  %v1721_v20 = vsel %vm1711_vm14, %v1684_v50, %v5879_v53 }
 0x150   : > { %v1758_v4 = vsel %vm1748_vm3, %v1721_v20, %v5898_v23 }
 0x151   : > { %v5999_v34 = vpop.permute.xlu1 %1146  ;;  %1595 = vrot.lane.b32.xlu0 %v1560_v7, %s4611_s29  ;;  %v1637_v9 = vsel %vm6647_vm10, %v1634_v52, %v1636_v32  ;;  %v1795_v58 = vsel %vm1785_vm15, %v1758_v4, %v5915_v54 }
 0x152   : > { %v1832_v13 = vsel %vm1822_vm9, %v1795_v58, %v5946_v48  ;;  %v4589_v48 = vld [vmem:[#allocation2 + $0x28] sm:$0xff]  }
 0x153   : > { %1670 = vrot.lane.b32.xlu1 %v1635_v16, %s4612_s30  ;;  %v1442_v51 = vpop.permute.xlu0 %1441  ;;  %v1869_v23 = vsel %vm1859_vm12, %v1832_v13, %v1440_v29  ;;  %v1686_v35 = vsel %vm1674_vm4, %v4589_v48, %v5874_v60 }
 0x154   : > { %v1723_v2 = vsel %vm1711_vm14, %v1686_v35, %v5893_v49 }
 0x155   : > { %v1570_v63 = vpop.permute.xlu1 %1569  ;;  %1396 = vrot.lane.b32.xlu0 %v1361_v21, %s4607_s21  ;;  %v1760_v30 = vsel %vm1748_vm3, %v1723_v2, %v5911_v19 }
 0x156   : > { %v1906_v36 = vsel %vm1896_vm0, %v1869_v23, %v1570_v63  ;;  %v1797_v60 = vsel %vm1785_vm15, %v1760_v30, %v5938_v12 }
 0x157   : > { %1447 = vrot.lane.b32.xlu1 %v1361_v21, %s4608_s22  ;;  %v6016_v46 = vpop.permute.xlu0 %1148  ;;  %v1834_v3 = vsel %vm1822_vm9, %v1797_v60, %v5975_v5  ;;  %v1704_v21 = vsel %vm1674_vm4, %v4590_v40, %v5967_v56  ;;  %v4591_v56 = vld [vmem:[#allocation2 + $0x78] sm:$0xff]  }
 0x158   : > { %v1871_v49 = vsel %vm1859_vm12, %v1834_v3, %v1442_v51  ;;  %v1741_v55 = vsel %vm1711_vm14, %v1704_v21, %v5999_v34  ;;  %v1706_v20 = vsel %vm1674_vm4, %v4591_v56, %v5994_v61  ;;  %v4613_v21 = vmov 1983009808  }
 0x159   : > { %v1200_v59 = vpop.permute.xlu1 %1199  ;;  %1672 = vrot.lane.b32.xlu0 %v1637_v9, %s4612_s30  ;;  %v1743_v4 = vsel %vm1711_vm14, %v1706_v20, %v6016_v46 }
 0x15a   : > { %v1778_v22 = vsel %vm1748_vm3, %v1741_v55, %v1200_v59  ;;  %v2291_v55 = vlaneseq }
 0x15b   : > { %1449 = vrot.lane.b32.xlu1 %v6648_v11, %s4608_s22  ;;  %v1572_v53 = vpop.permute.xlu0 %1571 }
 0x15c   : > { %v1908_v33 = vsel %vm1896_vm0, %v1871_v49, %v1572_v53 }
 0x15d   : > { %v1647_v54 = vpop.permute.xlu1 %1646  ;;  %1577 = vrot.lane.b32.xlu0 %v1514_v8, %s4611_s29 }
 0x15e   : > { %v1943_v39 = vsel %vm1933_vm11, %v1906_v36, %v1647_v54  ;;  %v4592_v54 = vld [vmem:[#allocation2 + $0x30] sm:$0xff]  }
 0x15f   : > { %1579 = vrot.lane.b32.xlu1 %v1518_v44, %s4611_s29  ;;  %4500 = vmatprep.mubr.msk.bf16.mxu0 %vm1997_vm5, %v1943_v39  ;;  %v1054_v57 = vpop.permute.xlu0 %1053 }
 0x160   : > { %v1688_v39 = vsel %vm1674_vm4, %v4592_v54, %v1054_v57 }
 0x161   : > { %v1202_v26 = vpop.permute.xlu1 %1201  ;;  %1654 = vrot.lane.b32.xlu0 %v1619_v24, %s4612_s30 }
 0x162   : > { %v1780_v59 = vsel %vm1748_vm3, %v1743_v4, %v1202_v26 }
 0x163   : > { %1656 = vrot.lane.b32.xlu1 %v1621_v15, %s4612_s30  ;;  %v1330_v62 = vpop.permute.xlu0 %1329 }
 0x164   : > { %v1815_v27 = vsel %vm1785_vm15, %v1778_v22, %v1330_v62  ;;  %v4593_v62 = vld [vmem:[#allocation2 + $0x38] sm:$0xff]  }
 0x165   : > { %v1649_v38 = vpop.permute.xlu1 %1648 }
 0x166   : > { %v1945_v43 = vsel %vm1933_vm11, %v1908_v33, %v1649_v38 }
 0x167   : > { %4501 = vmatmul.mubr.msk.bf16.gmra.mrb[8].mxu0 %vm1997_vm5, %v1945_v43  ;;  %v1056_v19 = vpop.permute.xlu0 %1055 }
 0x168   : > { %v1690_v57 = vsel %vm1674_vm4, %v4593_v62, %v1056_v19 }
 0x169   : > { %v1131_v29 = vpop.permute.xlu1 %1130 }
 0x16a   : > { %v1725_v48 = vsel %vm1711_vm14, %v1688_v39, %v1131_v29 }
 0x16b   : > { %v1332_v45 = vpop.permute.xlu0 %1331 }
 0x16c   : > { %v1817_v8 = vsel %vm1785_vm15, %v1780_v59, %v1332_v45 }
 0x16d   : > { %v1407_v52 = vpop.permute.xlu1 %1406 }
 0x16e   : > { %v1852_v51 = vsel %vm1822_vm9, %v1815_v27, %v1407_v52 }
 0x16f   : > { %v1133_v12 = vpop.permute.xlu0 %1132 }
 0x170   : > { %v1727_v33 = vsel %vm1711_vm14, %v1690_v57, %v1133_v12 }
 0x171   : > { %v1184_v10 = vpop.permute.xlu1 %1183 }
 0x172   : > { %v1762_v35 = vsel %vm1748_vm3, %v1725_v48, %v1184_v10 }
 0x173   : > { %v1409_v42 = vpop.permute.xlu0 %1408 }
 0x174   : > { %v1854_v1 = vsel %vm1822_vm9, %v1817_v8, %v1409_v42 }
 0x175   : > { %v1460_v5 = vpop.permute.xlu1 %1459 }
 0x176   : > { %v1889_v9 = vsel %vm1859_vm12, %v1852_v51, %v1460_v5  ;;  %v2292_v51 = vshrl.u32 %v2291_v55, 7 }
 0x177   : > { %v1186_v6 = vpop.permute.xlu0 %1185 }
 0x178   : > { %v1764_v38 = vsel %vm1748_vm3, %v1727_v33, %v1186_v6 }
 0x179   : > { %v1314_v7 = vpop.permute.xlu1 %1313 }
 0x17a   : > { %v1799_v37 = vsel %vm1785_vm15, %v1762_v35, %v1314_v7 }
 0x17b   : > { %v1462_v16 = vpop.permute.xlu0 %1461 }
 0x17c   : > { %v1891_v11 = vsel %vm1859_vm12, %v1854_v1, %v1462_v16 }
 0x17d   : > { %v1590_v47 = vpop.permute.xlu1 %1589 }
 0x17e   : > { %v1926_v18 = vsel %vm1896_vm0, %v1889_v9, %v1590_v47  ;;  %v4594_v9 = vld [vmem:[#allocation2 + $0x80] sm:$0xff]  }
 0x17f   : > { %v1316_v32 = vpop.permute.xlu0 %1315 }
 0x180   : > { %v1801_v29 = vsel %vm1785_vm15, %v1764_v38, %v1316_v32  ;;  %v2289_v32 = vunpack.c.l.s4 %v4613_v21 }
 0x181   : > { %v1391_v28 = vpop.permute.xlu1 %1390 }
 0x182   : > { %v1836_v14 = vsel %vm1822_vm9, %v1799_v37, %v1391_v28  ;;  %v2290_v27 = vunpack.c.0.s8 %v2289_v32 }
 0x183   : > { %v1592_v63 = vpop.permute.xlu0 %1591 }
 0x184   : > { %v1928_v53 = vsel %vm1896_vm0, %v1891_v11, %v1592_v63 }
 0x185   : > { %v1667_v17 = vpop.permute.xlu1 %1666 }
 0x186   : > { %v1963_v50 = vsel %vm1933_vm11, %v1926_v18, %v1667_v17  ;;  %v6106_v17 = vld [vmem:[%s6533_s2] ss:$0 sm:$0xff] }
 0x187   : > { %4520 = vmatprep.mubr.msk.bf16.mxu1 %vm1997_vm5, %v1963_v50  ;;  %v1074_v34 = vpop.permute.xlu0 %1073 }
 0x188   : > { %v1708_v18 = vsel %vm1674_vm4, %v4594_v9, %v1074_v34  ;;  %v6115_v34 = vsub.s32 %v2290_v27, %v2292_v51 }
 0x189   : > { %v1393_v58 = vpop.permute.xlu1 %1392 }
 0x18a   : > { %v1838_v45 = vsel %vm1822_vm9, %v1801_v29, %v1393_v58 }
 0x18b   : > { %v1444_v13 = vpop.permute.xlu0 %1443 }
 0x18c   : > { %v1873_v30 = vsel %vm1859_vm12, %v1836_v14, %v1444_v13 }
 0x18d   : > { %v1669_v23 = vpop.permute.xlu1 %1668 }
 0x18e   : > { %v1965_v61 = vsel %vm1933_vm11, %v1928_v53, %v1669_v23 }
 0x18f   : > { %4521 = vmatmul.mubr.msk.bf16.gmra.mrb[8].mxu1 %vm1997_vm5, %v1965_v61  ;;  %v1076_v25 = vpop.permute.xlu0 %1075 }
 0x190   : > { %v1710_v56 = vsel %vm1674_vm4, %v5581_v0, %v1076_v25 }
 0x191   : > { %v1151_v44 = vpop.permute.xlu1 %1150 }
 0x192   : > { %v1745_v50 = vsel %vm1711_vm14, %v1708_v18, %v1151_v44 }
 0x193   : > { %v1446_v46 = vpop.permute.xlu0 %1445 }
 0x194   : > { %v1875_v10 = vsel %vm1859_vm12, %v1838_v45, %v1446_v46 }
 0x195   : > { %v1574_v36 = vpop.permute.xlu1 %1573 }
 0x196   : > { %v1910_v26 = vsel %vm1896_vm0, %v1873_v30, %v1574_v36 }
 0x197   : > { %v1153_v24 = vpop.permute.xlu0 %1152 }
 0x198   : > { %v1747_v59 = vsel %vm1711_vm14, %v1710_v56, %v1153_v24 }
 0x199   : > { %v1204_v2 = vpop.permute.xlu1 %1203 }
 0x19a   : > { %v1782_v4 = vsel %vm1748_vm3, %v1745_v50, %v1204_v2 }
 0x19b   : > { %v1576_v15 = vpop.permute.xlu0 %1575 }
 0x19c   : > { %v1912_v42 = vsel %vm1896_vm0, %v1875_v10, %v1576_v15 }
 0x19d   : > { %v1651_v60 = vpop.permute.xlu1 %1650 }
 0x19e   : > { %v1947_v3 = vsel %vm1933_vm11, %v1910_v26, %v1651_v60 }
 0x19f   : > { %4504 = vmatprep.mubr.msk.bf16.mxu0 %vm1997_vm5, %v1947_v3  ;;  %v1058_v49 = vpop.permute.xlu0 %1057 }
 0x1a0   : > { %v1692_v58 = vsel %vm1674_vm4, %v5514_v31, %v1058_v49 }
 0x1a1   : > { %v1206_v43 = vpop.permute.xlu1 %1205 }
 0x1a2   : > { %v1784_v1 = vsel %vm1748_vm3, %v1747_v59, %v1206_v43 }
 0x1a3   : > { %v1334_v52 = vpop.permute.xlu0 %1333 }
 0x1a4   : > { %v1819_v13 = vsel %vm1785_vm15, %v1782_v4, %v1334_v52 }
 0x1a5   : > { %v1653_v5 = vpop.permute.xlu1 %1652 }
 0x1a6   : > { %v1949_v19 = vsel %vm1933_vm11, %v1912_v42, %v1653_v5 }
 0x1a7   : > { %4505 = vmatmul.mubr.msk.bf16.gmra.mrb[12].mxu0 %vm1997_vm5, %v1949_v19  ;;  %v1060_v7 = vpop.permute.xlu0 %1059 }
 0x1a8   : > { %v1694_v11 = vsel %vm1674_vm4, %v5658_v41, %v1060_v7  ;;  %vm3916_vm4 = vcmask 1041409  }
 0x1a9   : > { %v1135_v16 = vpop.permute.xlu1 %1134 }
 0x1aa   : > { %v1729_v61 = vsel %vm1711_vm14, %v1692_v58, %v1135_v16 }
 0x1ab   : > { %v1336_v12 = vpop.permute.xlu0 %1335 }
 0x1ac   : > { %v1821_v31 = vsel %vm1785_vm15, %v1784_v1, %v1336_v12 }
 0x1ad   : > { %v1411_v47 = vpop.permute.xlu1 %1410 }
 0x1ae   : > { %v1856_v25 = vsel %vm1822_vm9, %v1819_v13, %v1411_v47 }
 0x1af   : > { %v1137_v6 = vpop.permute.xlu0 %1136 }
 0x1b0   : > { %v1731_v54 = vsel %vm1711_vm14, %v1694_v11, %v1137_v6  ;;  %vm3919_vm14 = vcmask 1042434  }
 0x1b1   : > { %v1188_v40 = vpop.permute.xlu1 %1187 }
 0x1b2   : > { %v1766_v36 = vsel %vm1748_vm3, %v1729_v61, %v1188_v40 }
 0x1b3   : > { %v1413_v22 = vpop.permute.xlu0 %1412 }
 0x1b4   : > { %v1858_v2 = vsel %vm1822_vm9, %v1821_v31, %v1413_v22 }
 0x1b5   : > { %v1464_v28 = vpop.permute.xlu1 %1463 }
 0x1b6   : > { %v1893_v35 = vsel %vm1859_vm12, %v1856_v25, %v1464_v28 }
 0x1b7   : > { %v1190_v63 = vpop.permute.xlu0 %1189 }
 0x1b8   : > { %v6135_v15 = vsel %vm1748_vm3, %v1731_v54, %v1190_v63  ;;  %vm3922_vm3 = vcmask 1043459  }
 0x1b9   : > { %v1318_v20 = vpop.permute.xlu1 %1317 }
 0x1ba   : > { %v4494_v8 = vpop.f32.mrb[0].mxu0  ;;  %v6141_v62 = vsel %vm1785_vm15, %v1766_v36, %v1318_v20 }
 0x1bb   : > { %v2081_v0 = vadd.f32 %v4494_v8, %v6106_v17  ;;  %v2072_v53 = vpop.f32.mrb[1].mxu0  ;;  %v6122_v23 = vpop.permute.xlu0 %1465 }
 0x1bc   : > { %v2073_v44 = vadd.f32 %v6106_v17, %v2072_v53  ;;  %v4495_v46 = vpop.f32.mrb[2].mxu0  ;;  %v1895_v31 = vsel %vm1859_vm12, %v1858_v2, %v6122_v23 }
 0x1bd   : > { %v2217_v39 = vmax.f32 %v2081_v0, 0.0  ;;  %v2084_v41 = vadd.f32 %v4495_v46, %v6106_v17  ;;  %v1594_v24 = vpop.permute.xlu1 %1593  ;;  %v2075_v48 = vpop.f32.mrb[3].mxu0 }
 0x1be   : > { %v2215_v37 = vmax.f32 %v2073_v44, 0.0  ;;  %v2076_v14 = vadd.f32 %v6106_v17, %v2075_v48  ;;  %v1930_v54 = vsel %vm1896_vm0, %v1893_v35, %v1594_v24 }
 0x1bf   : > { %v2321_v30 = vcombine.high %v2217_v39, %v2217_v39  ;;  %v2328_v26 = vrot.slane %v2217_v39, %v6115_v34  ;;  %v2218_v60 = vmax.f32 %v2084_v41, 0.0  ;;  %v6138_v3 = vpop.permute.xlu0 %1319 }
 0x1c0   : > { %v2287_v57 = vcombine.high %v2215_v37, %v2215_v37  ;;  %v2294_v49 = vrot.slane %v2215_v37, %v6115_v34  ;;  %v2216_v33 = vmax.f32 %v2076_v14, 0.0 }
 0x1c1   : > { %v2335_v38 = vrot.slane %v2321_v30, %v6115_v34  ;;  %v2336_v43 = vcombine.high %v2328_v26, %v2328_v26  ;;  %v2338_v29 = vcombine.high %v2218_v60, %v2218_v60  ;;  %v2345_v45 = vrot.slane %v2218_v60, %v6115_v34  ;;  %v6146_v52 = vpop.permute.xlu1 %1394 }
 0x1c2   : > { %v2301_v10 = vrot.slane %v2287_v57, %v6115_v34  ;;  %v2302_v42 = vcombine.high %v2294_v49, %v2294_v49  ;;  %v4205_v5 = vrot.slane %v2294_v49, 9  ;;  %v2304_v19 = vcombine.high %v2216_v33, %v2216_v33 }
 0x1c3   : > { %v2337_v7 = vcombine.high %v2335_v38, %v2335_v38  ;;  %v4213_v16 = vrot.slane %v2336_v43, 9  ;;  %v4214_v12 = vrot.slane %v2335_v38, 9  ;;  %v2352_v47 = vrot.slane %v2338_v29, %v6115_v34  ;;  %v6150_v6 = vpop.permute.xlu0 %1595 }
 0x1c4   : > { %v2303_v40 = vcombine.high %v2301_v10, %v2301_v10  ;;  %v4206_v21 = vrot.slane %v2302_v42, 9  ;;  %v4207_v32 = vrot.slane %v2301_v10, 9  ;;  %v3403_v55 = vmax.f32 %v2294_v49, %v4205_v5 }
 0x1c5   : > { %v4215_v22 = vrot.slane %v2337_v7, 9  ;;  %v3411_v28 = vmax.f32 %v2336_v43, %v4213_v16  ;;  %v3412_v27 = vmax.f32 %v2335_v38, %v4214_v12  ;;  %v2353_v51 = vcombine.high %v2345_v45, %v2345_v45  ;;  %v1671_v63 = vpop.permute.xlu1 %1670 }
 0x1c6   : > { %v4208_v9 = vrot.slane %v2303_v40, 9  ;;  %v3404_v18 = vmax.f32 %v2302_v42, %v4206_v21  ;;  %v3405_v50 = vmax.f32 %v2301_v10, %v4207_v32  ;;  %v2354_v56 = vcombine.high %v2352_v47, %v2352_v47 }
 0x1c7   : > { %v3413_v20 = vmax.f32 %v2337_v7, %v4215_v22  ;;  %v3531_v4 = vmax.f32 %v3403_v55, %v3411_v28  ;;  %v4216_v59 = vrot.slane %v2345_v45, 9  ;;  %v4217_v58 = vrot.slane %v2353_v51, 9  ;;  %v1397_v8 = vpop.permute.xlu0 %1396 }
 0x1c8   : > { %v3532_v1 = vmax.f32 %v3404_v18, %v3412_v27  ;;  %v4218_v13 = vrot.slane %v2352_v47, 9  ;;  %v4219_v11 = vrot.slane %v2354_v56, 9  ;;  %v3406_v0 = vmax.f32 %v2303_v40, %v4208_v9 }
 0x1c9   : > { %v3533_v53 = vmax.f32 %v3405_v50, %v3413_v20  ;;  %v4401_v61 = vpack.c.bf16 %v3531_v4, %v3531_v4  ;;  %v3414_v25 = vmax.f32 %v2345_v45, %v4216_v59  ;;  %v1448_v44 = vpop.permute.xlu1 %1447  ;;  %v3415_v36 = vmax.f32 %v2353_v51, %v4217_v58 }
 0x1ca   : > { %v4402_v46 = vpack.c.bf16 %v3532_v1, %v3532_v1  ;;  %v2311_v39 = vrot.slane %v2216_v33, %v6115_v34  ;;  %v3416_v48 = vmax.f32 %v2352_v47, %v4218_v13  ;;  %v6157_v14 = vrot.slane %v2304_v19, %v6115_v34 }
 0x1cb   : > { %v4403_v41 = vpack.c.bf16 %v3533_v53, %v3533_v53  ;;  %v3534_v37 = vmax.f32 %v3406_v0, %v3414_v25  ;;  %v1673_v30 = vpop.permute.xlu0 %1672  ;;  %v3417_v60 = vmax.f32 %v2354_v56, %v4219_v11  ;;  %v3851_v38 = vunpack.c.l.b16 %v4401_v61 }
 0x1cc   : > { %v3852_v26 = vunpack.c.l.b16 %v4402_v46  ;;  %v2319_v57 = vcombine.high %v2311_v39, %v2311_v39  ;;  %v4209_v49 = vrot.slane %v2311_v39, 9  ;;  %v4211_v43 = vrot.slane %v6157_v14, 9 }
 0x1cd   : > { %v3853_v23 = vunpack.c.l.b16 %v4403_v41  ;;  %v4404_v2 = vpack.c.bf16 %v3534_v37, %v3534_v37  ;;  %v1450_v29 = vpop.permute.xlu1 %1449  ;;  %v1967_v45 = vsel %vm1933_vm11, %v1930_v54, %v1671_v63  ;;  %v1805_v19 = vsel %vm1785_vm15, %v6135_v15, %v6138_v3 }
 0x1ce   : > { %v3915_v24 = vrot.slane %v3852_v26, 7  ;;  %v4210_v35 = vrot.slane %v2319_v57, 9  ;;  %v3407_v33 = vmax.f32 %v2311_v39, %v4209_v49  ;;  %v3409_v5 = vmax.f32 %v6157_v14, %v4211_v43  ;;  %4524 = vmatprep.mubr.msk.bf16.mxu1 %vm1997_vm5, %v1967_v45 }
 0x1cf   : > { %v3918_v10 = vrot.slane %v3853_v23, 6  ;;  %v3854_v42 = vunpack.c.l.b16 %v4404_v2  ;;  %v1578_v7 = vpop.permute.xlu0 %1577  ;;  %v1840_v40 = vsel %vm1822_vm9, %v6141_v62, %v6146_v52  ;;  %v1932_v22 = vsel %vm1896_vm0, %v1895_v31, %v6150_v6 }
 0x1d0   : > { %v3917_v16 = vsel %vm3916_vm4, %v3915_v24, %v3851_v38  ;;  %v3408_v12 = vmax.f32 %v2319_v57, %v4210_v35  ;;  %v3535_v47 = vmax.f32 %v3407_v33, %v3415_v36  ;;  %v3537_v55 = vmax.f32 %v3409_v5, %v3417_v60 }
 0x1d1   : > { %v3920_v21 = vsel %vm3919_vm14, %v3918_v10, %v3917_v16  ;;  %v3921_v32 = vrot.slane %v3854_v42, 5  ;;  %v1580_v28 = vpop.permute.xlu1 %1579  ;;  %v1877_v27 = vsel %vm1859_vm12, %v1840_v40, %v1448_v44  ;;  %v1969_v51 = vsel %vm1933_vm11, %v1932_v22, %v1673_v30 }
 0x1d2   : > { %v3536_v15 = vmax.f32 %v3408_v12, %v3416_v48  ;;  %v4405_v3 = vpack.c.bf16 %v3535_v47, %v3535_v47  ;;  %v4407_v9 = vpack.c.bf16 %v3537_v55, %v3537_v55  ;;  %v1842_v18 = vsel %vm1822_vm9, %v1805_v19, %v1397_v8  ;;  %4525 = vmatmul.mubr.msk.bf16.gmra.mrb[12].mxu1 %vm1997_vm5, %v1969_v51 }
 0x1d3   : > { %v3923_v63 = vsel %vm3922_vm3, %v3921_v32, %v3920_v21  ;;  %v1914_v62 = vsel %vm1896_vm0, %v1877_v27, %v1578_v7  ;;  %v1655_v52 = vpop.permute.xlu0 %1654  ;;  %v1879_v6 = vsel %vm1859_vm12, %v1842_v18, %v1450_v29  ;;  %vm3925_vm15 = vcmask 1044484  }
 0x1d4   : > { %v4406_v50 = vpack.c.bf16 %v3536_v15, %v3536_v15  ;;  %v3855_v56 = vunpack.c.l.b16 %v4405_v3  ;;  %v1951_v20 = vsel %vm1933_vm11, %v1914_v62, %v1655_v52  ;;  %v3857_v4 = vunpack.c.l.b16 %v4407_v9 }
 0x1d5   : > { %v1916_v59 = vsel %vm1896_vm0, %v1879_v6, %v1580_v28  ;;  %v1657_v58 = vpop.permute.xlu1 %1656  ;;  %4508 = vmatprep.mubr.msk.bf16.mxu0 %vm1997_vm5, %v1951_v20  ;;  %vm3928_vm9 = vcmask 1045509   ;;  %vm3931_vm12 = vcmask 1046534   ;;  %v2320_v39 = vcombine.high %v6157_v14, %v6157_v14 }
 0x1d6   : > { %v3856_v1 = vunpack.c.l.b16 %v4406_v50  ;;  %v3924_v8 = vrot.slane %v3855_v56, 4  ;;  %v1953_v13 = vsel %vm1933_vm11, %v1916_v59, %v1657_v58  ;;  %v3930_v53 = vrot.slane %v3857_v4, 2 }
 0x1d7   : > { %4509 = vmatmul.mubr.msk.bf16.gmra.mrb[16].mxu0 %vm1997_vm5, %v1953_v13  ;;  %v4212_v2 = vrot.slane %v2320_v39, 9  ;;  %vm3934_vm0 = vcmask 1047559   ;;  %vm4050_vm11 = vcmask 125952  }
 0x1d8   : > { %v3926_v11 = vsel %vm3925_vm15, %v3924_v8, %v3923_v63  ;;  %v3927_v0 = vrot.slane %v3856_v1, 3 }
 0x1d9   : > { %v3410_v19 = vmax.f32 %v2320_v39, %v4212_v2 }
 0x1da   : > { %v3929_v61 = vsel %vm3928_vm9, %v3927_v0, %v3926_v11 }
 0x1db   : > { %v6188_v25 = vsel %vm3931_vm12, %v3930_v53, %v3929_v61 }
 0x1e2   : > { %v6190_v31 = vpop.f32.mrb[0].mxu1 }
 0x1e3   : > { %v6192_v44 = vpop.f32.mrb[1].mxu1 }
 0x1e4   : > { %v6194_v46 = vpop.f32.mrb[2].mxu1 }
 0x1e5   : > { %v6196_v36 = vpop.f32.mrb[3].mxu1 }
 0x1fa   : > { %v4498_v54 = vpop.f32.mrb[4].mxu0 }
 0x1fb   : > { %v2097_v41 = vadd.f32 %v4498_v54, %v6106_v17  ;;  %v2088_v48 = vpop.f32.mrb[5].mxu0 }
 0x1fc   : > { %v2089_v37 = vadd.f32 %v6106_v17, %v2088_v48  ;;  %v4499_v30 = vpop.f32.mrb[6].mxu0 }
 0x1fd   : > { %v6202_v26 = vmax.f32 %v2097_v41, 0.0  ;;  %v2100_v60 = vadd.f32 %v4499_v30, %v6106_v17  ;;  %v2091_v57 = vpop.f32.mrb[7].mxu0 }
 0x1fe   : > { %v2219_v49 = vmax.f32 %v2089_v37, 0.0  ;;  %v2092_v38 = vadd.f32 %v6106_v17, %v2091_v57 }
 0x1ff   : > { %v2388_v23 = vcombine.high %v6202_v26, %v6202_v26  ;;  %v2222_v43 = vmax.f32 %v2100_v60, 0.0 }
 0x200   : > { %v2355_v14 = vcombine.high %v2219_v49, %v2219_v49  ;;  %v2362_v29 = vrot.slane %v2219_v49, %v6115_v34  ;;  %v2220_v33 = vmax.f32 %v2092_v38, 0.0 }
 0x201   : > { %v2402_v24 = vrot.slane %v2388_v23, %v6115_v34  ;;  %v2405_v35 = vcombine.high %v2222_v43, %v2222_v43  ;;  %v2412_v42 = vrot.slane %v2222_v43, %v6115_v34 }
 0x202   : > { %v2369_v45 = vrot.slane %v2355_v14, %v6115_v34  ;;  %v4220_v10 = vrot.slane %v2362_v29, 9  ;;  %v2371_v22 = vcombine.high %v2220_v33, %v2220_v33  ;;  %v2378_v50 = vrot.slane %v2220_v33, %v6115_v34 }
 0x203   : > { %v2404_v5 = vcombine.high %v2402_v24, %v2402_v24  ;;  %v2419_v7 = vrot.slane %v2405_v35, %v6115_v34  ;;  %v2420_v40 = vcombine.high %v2412_v42, %v2412_v42  ;;  %v4230_v55 = vrot.slane %v2412_v42, 9 }
 0x204   : > { %v2370_v16 = vcombine.high %v2369_v45, %v2369_v45  ;;  %v4221_v12 = vrot.slane %v2369_v45, 9  ;;  %v3418_v47 = vmax.f32 %v2362_v29, %v4220_v10  ;;  %v6215_v20 = vrot.slane %v2371_v22, %v6115_v34 }
 0x205   : > { %v4229_v21 = vrot.slane %v2404_v5, 9  ;;  %v2421_v32 = vcombine.high %v2419_v7, %v2419_v7  ;;  %v4231_v27 = vrot.slane %v2420_v40, 9  ;;  %v4232_v63 = vrot.slane %v2419_v7, 9 }
 0x206   : > { %v4222_v28 = vrot.slane %v2370_v16, 9  ;;  %v3419_v15 = vmax.f32 %v2369_v45, %v4221_v12  ;;  %v3538_v3 = vmax.f32 %v3410_v19, %v3418_v47  ;;  %v3428_v52 = vmax.f32 %v2412_v42, %v4230_v55 }
 0x207   : > { %v3427_v51 = vmax.f32 %v2404_v5, %v4229_v21  ;;  %v4233_v9 = vrot.slane %v2421_v32, 9  ;;  %v3429_v6 = vmax.f32 %v2420_v40, %v4231_v27  ;;  %v2386_v58 = vcombine.high %v2378_v50, %v2378_v50 }
 0x208   : > { %v4408_v18 = vpack.c.bf16 %v3538_v3, %v3538_v3  ;;  %v3420_v62 = vmax.f32 %v2370_v16, %v4222_v28  ;;  %v4223_v1 = vrot.slane %v2378_v50, 9  ;;  %v3430_v13 = vmax.f32 %v2419_v7, %v4232_v63 }
 0x209   : > { %v3539_v56 = vmax.f32 %v3419_v15, %v3427_v51  ;;  %v3431_v11 = vmax.f32 %v2421_v32, %v4233_v9  ;;  %v4225_v0 = vrot.slane %v6215_v20, 9  ;;  %v4224_v54 = vrot.slane %v2386_v58, 9 }
 0x20a   : > { %v3858_v4 = vunpack.c.l.b16 %v4408_v18  ;;  %v3540_v59 = vmax.f32 %v3420_v62, %v3428_v52  ;;  %v3421_v39 = vmax.f32 %v2378_v50, %v4223_v1  ;;  %v2164_v33 = vadd.f32 %v6194_v46, %v6106_v17 }
 0x20b   : > { %v4409_v8 = vpack.c.bf16 %v3539_v56, %v3539_v56  ;;  %v3423_v41 = vmax.f32 %v6215_v20, %v4225_v0  ;;  %v3422_v30 = vmax.f32 %v2386_v58, %v4224_v54  ;;  %v2161_v40 = vadd.f32 %v6190_v31, %v6106_v17 }
 0x20c   : > { %v3933_v53 = vrot.slane %v3858_v4, 1  ;;  %v4410_v61 = vpack.c.bf16 %v3540_v59, %v3540_v59  ;;  %v3541_v60 = vmax.f32 %v3421_v39, %v3429_v6  ;;  %v2238_v19 = vmax.f32 %v2164_v33, 0.0 }
 0x20d   : > { %v3543_v49 = vmax.f32 %v3423_v41, %v3431_v11  ;;  %v3859_v38 = vunpack.c.l.b16 %v4409_v8  ;;  %v3542_v2 = vmax.f32 %v3422_v30, %v3430_v13  ;;  %v6242_v46 = vmax.f32 %v2161_v40, 0.0 }
 0x20e   : > { %v3935_v48 = vsel %vm3934_vm0, %v3933_v53, %v6188_v25  ;;  %v3860_v37 = vunpack.c.l.b16 %v4410_v61  ;;  %v4411_v43 = vpack.c.bf16 %v3541_v60, %v3541_v60  ;;  %v2673_v47 = vcombine.high %v2238_v19, %v2238_v19 }
 0x20f   : > { %v4034_v57 = vpack.c.b16 %v3935_v48, %v3935_v48  ;;  %v4413_v14 = vpack.c.bf16 %v3543_v49, %v3543_v49  ;;  %v4412_v24 = vpack.c.bf16 %v3542_v2, %v3542_v2  ;;  %v2657_v15 = vcombine.high %v6242_v46, %v6242_v46 }
 0x210   : > { %v3936_v23 = vrot.slane %v3860_v37, 7  ;;  %v3861_v35 = vunpack.c.l.b16 %v4411_v43  ;;  %v6240_v21 = vrot.slane %v2673_v47, %v6115_v34  ;;  %v2680_v1 = vrot.slane %v2238_v19, %v6115_v34 }
 0x211   : > { %4051 = vst.msk [vmem:[%s6223_s11] sm:$0xf] %vm4050_vm11, %v4034_v57  ;;  %v3863_v25 = vunpack.c.l.b16 %v4413_v14  ;;  %v3862_v45 = vunpack.c.l.b16 %v4412_v24  ;;  %v2671_v52 = vrot.slane %v2657_v15, %v6115_v34 }
 0x212   : > { %v3937_v29 = vsel %vm3916_vm4, %v3936_v23, %v3859_v38  ;;  %v3938_v10 = vrot.slane %v3861_v35, 6  ;;  %v2689_v55 = vcombine.high %v6240_v21, %v6240_v21  ;;  %v2688_v43 = vcombine.high %v2680_v1, %v2680_v1 }
 0x213   : > { %v3940_v5 = vrot.slane %v3862_v45, 5  ;;  %v3942_v7 = vrot.slane %v3863_v25, 4  ;;  %v4285_v39 = vrot.slane %v2671_v52, 9  ;;  %v2672_v38 = vcombine.high %v2671_v52, %v2671_v52 }
 0x214   : > { %v3939_v42 = vsel %vm3919_vm14, %v3938_v10, %v3937_v29  ;;  %v4290_v9 = vrot.slane %v2689_v55, 9  ;;  %v2395_v45 = vrot.slane %v6202_v26, %v6115_v34  ;;  %v4289_v40 = vrot.slane %v6240_v21, 9 }
 0x215   : > { %v3941_v16 = vsel %vm3922_vm3, %v3940_v5, %v3939_v42  ;;  %v3483_v29 = vmax.f32 %v2671_v52, %v4285_v39  ;;  %v4286_v25 = vrot.slane %v2672_v38, 9  ;;  %v4288_v5 = vrot.slane %v2688_v43, 9 }
 0x216   : > { %v6235_v12 = vsel %vm3925_vm15, %v3942_v7, %v3941_v16  ;;  %v3488_v61 = vmax.f32 %v2689_v55, %v4290_v9  ;;  %v4287_v7 = vrot.slane %v2680_v1, 9  ;;  %v3487_v52 = vmax.f32 %v6240_v21, %v4289_v40 }
 0x217   : > { %v3484_v15 = vmax.f32 %v2672_v38, %v4286_v25  ;;  %v2387_v21 = vcombine.high %v6215_v20, %v6215_v20 }
 0x222   : > { %v4518_v32 = vpop.f32.mrb[4].mxu1 }
 0x223   : > { %v2177_v22 = vadd.f32 %v4518_v32, %v6106_v17  ;;  %v2168_v28 = vpop.f32.mrb[5].mxu1 }
 0x224   : > { %v2169_v3 = vadd.f32 %v6106_v17, %v2168_v28  ;;  %v6250_v27 = vpop.f32.mrb[6].mxu1 }
 0x225   : > { %v2241_v31 = vmax.f32 %v2177_v22, 0.0  ;;  %v2171_v51 = vpop.f32.mrb[7].mxu1  ;;  %v2403_v22 = vcombine.high %v2395_v45, %v2395_v45 }
 0x226   : > { %v2239_v63 = vmax.f32 %v2169_v3, 0.0  ;;  %v2172_v58 = vadd.f32 %v6106_v17, %v2171_v51 }
 0x227   : > { %v2724_v18 = vcombine.high %v2241_v31, %v2241_v31  ;;  %v2731_v62 = vrot.slane %v2241_v31, %v6115_v34  ;;  %v3486_v31 = vmax.f32 %v2688_v43, %v4288_v5  ;;  %v4226_v5 = vrot.slane %v2387_v21, 9 }
 0x228   : > { %v2690_v50 = vcombine.high %v2239_v63, %v2239_v63  ;;  %v2697_v56 = vrot.slane %v2239_v63, %v6115_v34  ;;  %v2240_v49 = vmax.f32 %v2172_v58, 0.0  ;;  %v3485_v63 = vmax.f32 %v2680_v1, %v4287_v7 }
 0x229   : > { %v2738_v6 = vrot.slane %v2724_v18, %v6115_v34  ;;  %v2739_v4 = vcombine.high %v2731_v62, %v2731_v62  ;;  %v4298_v59 = vrot.slane %v2731_v62, 9 }
 0x22a   : > { %v2704_v8 = vrot.slane %v2690_v50, %v6115_v34  ;;  %v2705_v13 = vcombine.high %v2697_v56, %v2697_v56  ;;  %v4291_v11 = vrot.slane %v2697_v56, 9  ;;  %v2707_v33 = vcombine.high %v2240_v49, %v2240_v49 }
 0x22b   : > { %v4299_v0 = vrot.slane %v2739_v4, 9  ;;  %v4300_v53 = vrot.slane %v2738_v6, 9  ;;  %v3496_v54 = vmax.f32 %v2731_v62, %v4298_v59  ;;  %v2714_v42 = vrot.slane %v2240_v49, %v6115_v34 }
 0x22c   : > { %v2706_v41 = vcombine.high %v2704_v8, %v2704_v8  ;;  %v4292_v48 = vrot.slane %v2705_v13, 9  ;;  %v3489_v37 = vmax.f32 %v2697_v56, %v4291_v11  ;;  %v2721_v19 = vrot.slane %v2707_v33, %v6115_v34 }
 0x22d   : > { %v3497_v30 = vmax.f32 %v2739_v4, %v4299_v0  ;;  %v3498_v60 = vmax.f32 %v2738_v6, %v4300_v53  ;;  %v3576_v57 = vmax.f32 %v3488_v61, %v3496_v54  ;;  %v2722_v16 = vcombine.high %v2714_v42, %v2714_v42 }
 0x22e   : > { %v4293_v23 = vrot.slane %v2706_v41, 9  ;;  %v3490_v2 = vmax.f32 %v2705_v13, %v4292_v48  ;;  %v4294_v47 = vrot.slane %v2714_v42, 9  ;;  %v2723_v32 = vcombine.high %v2721_v19, %v2721_v19 }
 0x22f   : > { %v3577_v14 = vmax.f32 %v3489_v37, %v3497_v30  ;;  %v4296_v55 = vrot.slane %v2721_v19, 9  ;;  %v4295_v28 = vrot.slane %v2722_v16, 9  ;;  %v4227_v6 = vrot.slane %v2395_v45, 9 }
 0x230   : > { %v3491_v24 = vmax.f32 %v2706_v41, %v4293_v23  ;;  %v3578_v35 = vmax.f32 %v3490_v2, %v3498_v60  ;;  %v3492_v3 = vmax.f32 %v2714_v42, %v4294_v47  ;;  %v4297_v51 = vrot.slane %v2723_v32, 9 }
 0x231   : > { %v3494_v26 = vmax.f32 %v2721_v19, %v4296_v55  ;;  %v3493_v18 = vmax.f32 %v2722_v16, %v4295_v28  ;;  %v4228_v4 = vrot.slane %v2403_v22, 9  ;;  %v4446_v13 = vpack.c.bf16 %v3576_v57, %v3576_v57 }
 0x232   : > { %v3571_v10 = vmax.f32 %v3483_v29, %v3491_v24  ;;  %v3572_v62 = vmax.f32 %v3484_v15, %v3492_v3  ;;  %v3495_v50 = vmax.f32 %v2723_v32, %v4297_v51  ;;  %v4447_v11 = vpack.c.bf16 %v3577_v14, %v3577_v14 }
 0x233   : > { %v3574_v56 = vmax.f32 %v3486_v31, %v3494_v26  ;;  %v3573_v59 = vmax.f32 %v3485_v63, %v3493_v18  ;;  %v4448_v37 = vpack.c.bf16 %v3578_v35, %v3578_v35  ;;  %v3425_v38 = vmax.f32 %v2395_v45, %v4227_v6 }
 0x234   : > { %v4441_v9 = vpack.c.bf16 %v3571_v10, %v3571_v10  ;;  %v4442_v58 = vpack.c.bf16 %v3572_v62, %v3572_v62  ;;  %v3575_v0 = vmax.f32 %v3487_v52, %v3495_v50  ;;  %v3896_v43 = vunpack.c.l.b16 %v4446_v13 }
 0x235   : > { %v4444_v53 = vpack.c.bf16 %v3574_v56, %v3574_v56  ;;  %v4443_v1 = vpack.c.bf16 %v3573_v59, %v3573_v59  ;;  %v3897_v14 = vunpack.c.l.b16 %v4447_v11  ;;  %v3898_v20 = vunpack.c.l.b16 %v4448_v37 }
 0x236   : > { %v3891_v54 = vunpack.c.l.b16 %v4441_v9  ;;  %v3892_v39 = vunpack.c.l.b16 %v4442_v58  ;;  %v4445_v30 = vpack.c.bf16 %v3575_v0, %v3575_v0  ;;  %v3426_v40 = vmax.f32 %v2403_v22, %v4228_v4 }
 0x237   : > { %v3894_v60 = vunpack.c.l.b16 %v4444_v53  ;;  %v3893_v23 = vunpack.c.l.b16 %v4443_v1  ;;  %v4000_v32 = vrot.slane %v3896_v43, 3  ;;  %v4002_v15 = vrot.slane %v3897_v14, 2 }
 0x238   : > { %v3992_v57 = vrot.slane %v3892_v39, 7  ;;  %v3895_v29 = vunpack.c.l.b16 %v4445_v30  ;;  %v4004_v26 = vrot.slane %v3898_v20, 1  ;;  %v3424_v9 = vmax.f32 %v2387_v21, %v4226_v5 }
 0x239   : > { %v3996_v24 = vrot.slane %v3894_v60, 5  ;;  %v3994_v25 = vrot.slane %v3893_v23, 6  ;;  %v2180_v20 = vadd.f32 %v6250_v27, %v6106_v17 }
 0x23a   : > { %v6265_v8 = vpop.f32.mrb[8].mxu0  ;;  %v3993_v33 = vsel %vm3916_vm4, %v3992_v57, %v3891_v54  ;;  %v3998_v35 = vrot.slane %v3895_v29, 4 }
 0x23b   : > { %v2104_v61 = vpop.f32.mrb[9].mxu0  ;;  %v3995_v45 = vsel %vm3919_vm14, %v3994_v25, %v3993_v33 }
 0x23c   : > { %v2105_v41 = vadd.f32 %v6106_v17, %v2104_v61  ;;  %v4503_v48 = vpop.f32.mrb[10].mxu0  ;;  %v3997_v55 = vsel %vm3922_vm3, %v3996_v24, %v3995_v45 }
 0x23d   : > { %v2107_v49 = vpop.f32.mrb[11].mxu0  ;;  %v2116_v19 = vadd.f32 %v4503_v48, %v6106_v17  ;;  %v3999_v3 = vsel %vm3925_vm15, %v3998_v35, %v3997_v55 }
 0x23e   : > { %v2223_v2 = vmax.f32 %v2105_v41, 0.0  ;;  %v2108_v28 = vadd.f32 %v6106_v17, %v2107_v49  ;;  %v4001_v63 = vsel %vm3928_vm9, %v4000_v32, %v3999_v3 }
 0x23f   : > { %v4003_v62 = vsel %vm3931_vm12, %v4002_v15, %v4001_v63  ;;  %v2226_v50 = vmax.f32 %v2116_v19, 0.0 }
 0x240   : > { %v2422_v10 = vcombine.high %v2223_v2, %v2223_v2  ;;  %v2429_v42 = vrot.slane %v2223_v2, %v6115_v34  ;;  %v4005_v56 = vsel %vm3934_vm0, %v4004_v26, %v4003_v62  ;;  %v2224_v4 = vmax.f32 %v2108_v28, 0.0 }
 0x241   : > { %v4039_v59 = vpack.c.b16 %v4005_v56, %v4005_v56  ;;  %v2472_v11 = vcombine.high %v2226_v50, %v2226_v50  ;;  %v2479_v53 = vrot.slane %v2226_v50, %v6115_v34  ;;  %v2242_v28 = vmax.f32 %v2180_v20, 0.0 }
 0x242   : > { %v2436_v7 = vrot.slane %v2422_v10, %v6115_v34  ;;  %v2437_v16 = vcombine.high %v2429_v42, %v2429_v42  ;;  %v4234_v47 = vrot.slane %v2429_v42, 9  ;;  %v2438_v61 = vcombine.high %v2224_v4, %v2224_v4 }
 0x243   : > { %v2445_v54 = vrot.slane %v2224_v4, %v6115_v34  ;;  %4056 = vst.msk [vmem:[%s6223_s11 + $0x14] sm:$0xf] %vm4050_vm11, %v4039_v59  ;;  %v2486_v41 = vrot.slane %v2472_v11, %v6115_v34  ;;  %v2487_v21 = vcombine.high %v2479_v53, %v2479_v53  ;;  %v2740_v26 = vcombine.high %v2242_v28, %v2242_v28 }
 0x244   : > { %v4235_v31 = vrot.slane %v2437_v16, 9  ;;  %v4236_v51 = vrot.slane %v2436_v7, 9  ;;  %v3432_v18 = vmax.f32 %v2429_v42, %v4234_v47  ;;  %v6287_v37 = vrot.slane %v2438_v61, %v6115_v34 }
 0x245   : > { %v2453_v30 = vcombine.high %v2445_v54, %v2445_v54  ;;  %v4246_v23 = vrot.slane %v2486_v41, 9  ;;  %v4245_v2 = vrot.slane %v2487_v21, 9  ;;  %v4237_v43 = vrot.slane %v2445_v54, 9 }
 0x246   : > { %v3433_v52 = vmax.f32 %v2437_v16, %v4235_v31  ;;  %v3434_v22 = vmax.f32 %v2436_v7, %v4236_v51  ;;  %v3544_v6 = vmax.f32 %v3424_v9, %v3432_v18  ;;  %v4239_v5 = vrot.slane %v6287_v37, 9 }
 0x247   : > { %v3444_v33 = vmax.f32 %v2486_v41, %v4246_v23  ;;  %v3443_v10 = vmax.f32 %v2487_v21, %v4245_v2  ;;  %v4238_v42 = vrot.slane %v2453_v30, 9  ;;  %v3435_v45 = vmax.f32 %v2445_v54, %v4237_v43 }
 0x248   : > { %v3545_v58 = vmax.f32 %v3425_v38, %v3433_v52  ;;  %v3546_v13 = vmax.f32 %v3426_v40, %v3434_v22  ;;  %v4414_v0 = vpack.c.bf16 %v3544_v6, %v3544_v6  ;;  %v2488_v38 = vcombine.high %v2486_v41, %v2486_v41 }
 0x249   : > { %v3436_v16 = vmax.f32 %v2453_v30, %v4238_v42  ;;  %v3437_v47 = vmax.f32 %v6287_v37, %v4239_v5  ;;  %v3547_v32 = vmax.f32 %v3435_v45, %v3443_v10  ;;  %v6301_v52 = vrot.slane %v2740_v26, %v6115_v34 }
 0x24a   : > { %v4415_v1 = vpack.c.bf16 %v3545_v58, %v3545_v58  ;;  %v4416_v39 = vpack.c.bf16 %v3546_v13, %v3546_v13  ;;  %v3864_v48 = vunpack.c.l.b16 %v4414_v0  ;;  %v4247_v24 = vrot.slane %v2488_v38, 9 }
 0x24b   : > { %v4417_v15 = vpack.c.bf16 %v3547_v32, %v3547_v32  ;;  %v2756_v50 = vcombine.high %v6301_v52, %v6301_v52  ;;  %v2113_v58 = vadd.f32 %v6265_v8, %v6106_v17 }
 0x24c   : > { %v3865_v60 = vunpack.c.l.b16 %v4415_v1  ;;  %v3866_v49 = vunpack.c.l.b16 %v4416_v39  ;;  %v3944_v57 = vrot.slane %v3864_v48, 3  ;;  %v3445_v19 = vmax.f32 %v2488_v38, %v4247_v24 }
 0x24d   : > { %v3867_v63 = vunpack.c.l.b16 %v4417_v15  ;;  %v4304_v59 = vrot.slane %v2756_v50, 9  ;;  %v2747_v1 = vrot.slane %v2242_v28, %v6115_v34  ;;  %v2225_v21 = vmax.f32 %v2113_v58, 0.0 }
 0x24e   : > { %v3946_v14 = vrot.slane %v3865_v60, 2  ;;  %v3948_v29 = vrot.slane %v3866_v49, 1  ;;  %v3945_v25 = vsel %vm3928_vm9, %v3944_v57, %v6235_v12  ;;  %v3548_v12 = vmax.f32 %v3436_v16, %v3444_v33 }
 0x24f   : > { %v3549_v55 = vmax.f32 %v3437_v47, %v3445_v19  ;;  %v3502_v30 = vmax.f32 %v2756_v50, %v4304_v59  ;;  %v4303_v59 = vrot.slane %v6301_v52, 9 }
 0x250   : > { %v3947_v35 = vsel %vm3931_vm12, %v3946_v14, %v3945_v25  ;;  %v4418_v3 = vpack.c.bf16 %v3548_v12, %v3548_v12  ;;  %v2462_v12 = vrot.slane %v2225_v21, %v6115_v34 }
 0x251   : > { %v3949_v7 = vsel %vm3934_vm0, %v3948_v29, %v3947_v35  ;;  %v4419_v31 = vpack.c.bf16 %v3549_v55, %v3549_v55 }
 0x252   : > { %v4035_v40 = vpack.c.b16 %v3949_v7, %v3949_v7  ;;  %v3868_v27 = vunpack.c.l.b16 %v4418_v3  ;;  %v2755_v3 = vcombine.high %v2747_v1, %v2747_v1 }
 0x253   : > { %v3869_v51 = vunpack.c.l.b16 %v4419_v31 }
 0x254   : > { %4052 = vst.msk [vmem:[%s6223_s11 + $0x4] sm:$0xf] %vm4050_vm11, %v4035_v40  ;;  %v3950_v9 = vrot.slane %v3868_v27, 7  ;;  %v4302_v50 = vrot.slane %v2755_v3, 9 }
 0x255   : > { %v3952_v18 = vrot.slane %v3869_v51, 6  ;;  %v2455_v51 = vcombine.high %v2225_v21, %v2225_v21 }
 0x256   : > { %v3951_v62 = vsel %vm3916_vm4, %v3950_v9, %v3867_v63 }
 0x257   : > { %v6304_v22 = vsel %vm3919_vm14, %v3952_v18, %v3951_v62  ;;  %v2470_v18 = vcombine.high %v2462_v12, %v2462_v12  ;;  %v6328_v58 = vrot.slane %v2455_v51, %v6115_v34 }
 0x262   : > { %v4522_v56 = vpop.f32.mrb[8].mxu1 }
 0x263   : > { %v2193_v6 = vadd.f32 %v4522_v56, %v6106_v17  ;;  %v2184_v4 = vpop.f32.mrb[9].mxu1 }
 0x264   : > { %v2185_v13 = vadd.f32 %v6106_v17, %v2184_v4  ;;  %v4523_v11 = vpop.f32.mrb[10].mxu1  ;;  %v4301_v4 = vrot.slane %v2747_v1, 9 }
 0x265   : > { %v2245_v0 = vmax.f32 %v2193_v6, 0.0  ;;  %v2196_v53 = vadd.f32 %v4523_v11, %v6106_v17  ;;  %v2187_v61 = vpop.f32.mrb[11].mxu1 }
 0x266   : > { %v2243_v54 = vmax.f32 %v2185_v13, 0.0  ;;  %v2188_v57 = vadd.f32 %v6106_v17, %v2187_v61  ;;  %v4241_v13 = vrot.slane %v2462_v12, 9  ;;  %v4242_v61 = vrot.slane %v2470_v18, 9 }
 0x267   : > { %v2791_v39 = vcombine.high %v2245_v0, %v2245_v0  ;;  %v2798_v41 = vrot.slane %v2245_v0, %v6115_v34  ;;  %v6315_v48 = vmax.f32 %v2196_v53, 0.0 }
 0x268   : > { %v2757_v60 = vcombine.high %v2243_v54, %v2243_v54  ;;  %v2764_v8 = vrot.slane %v2243_v54, %v6115_v34  ;;  %v2244_v32 = vmax.f32 %v2188_v57, 0.0  ;;  %v3500_v54 = vmax.f32 %v2755_v3, %v4302_v50 }
 0x269   : > { %v2805_v49 = vrot.slane %v2791_v39, %v6115_v34  ;;  %v2806_v38 = vcombine.high %v2798_v41, %v2798_v41  ;;  %v4312_v23 = vrot.slane %v2798_v41, 9  ;;  %v2815_v29 = vrot.slane %v6315_v48, %v6115_v34 }
 0x26a   : > { %v2771_v2 = vrot.slane %v2757_v60, %v6115_v34  ;;  %v2772_v43 = vcombine.high %v2764_v8, %v2764_v8  ;;  %v4305_v14 = vrot.slane %v2764_v8, 9  ;;  %v2774_v9 = vcombine.high %v2244_v32, %v2244_v32 }
 0x26b   : > { %v2807_v24 = vcombine.high %v2805_v49, %v2805_v49  ;;  %v4313_v33 = vrot.slane %v2806_v38, 9  ;;  %v4314_v25 = vrot.slane %v2805_v49, 9  ;;  %v3510_v10 = vmax.f32 %v2798_v41, %v4312_v23 }
 0x26c   : > { %v2773_v42 = vcombine.high %v2771_v2, %v2771_v2  ;;  %v4306_v5 = vrot.slane %v2772_v43, 9  ;;  %v4307_v20 = vrot.slane %v2771_v2, 9  ;;  %v3503_v35 = vmax.f32 %v2764_v8, %v4305_v14 }
 0x26d   : > { %v4315_v19 = vrot.slane %v2807_v24, 9  ;;  %v3511_v45 = vmax.f32 %v2806_v38, %v4313_v33  ;;  %v3512_v7 = vmax.f32 %v2805_v49, %v4314_v25  ;;  %v3582_v16 = vmax.f32 %v3502_v30, %v3510_v10  ;;  %v6343_v10 = vld [vmem:[%s6533_s2] ss:$0 sm:$0xff] }
 0x26e   : > { %v3504_v17 = vmax.f32 %v2772_v43, %v4306_v5  ;;  %v3505_v47 = vmax.f32 %v2771_v2, %v4307_v20  ;;  %v4308_v40 = vrot.slane %v2773_v42, 9  ;;  %v4316_v15 = vrot.slane %v2815_v29, 9 }
 0x26f   : > { %v3513_v55 = vmax.f32 %v2807_v24, %v4315_v19  ;;  %v3583_v28 = vmax.f32 %v3503_v35, %v3511_v45  ;;  %v2781_v56 = vrot.slane %v2244_v32, %v6115_v34  ;;  %v2788_v6 = vrot.slane %v2774_v9, %v6115_v34 }
 0x270   : > { %v3584_v31 = vmax.f32 %v3504_v17, %v3512_v7  ;;  %v3506_v27 = vmax.f32 %v2773_v42, %v4308_v40  ;;  %v3514_v63 = vmax.f32 %v2815_v29, %v4316_v15  ;;  %v3499_v30 = vmax.f32 %v2747_v1, %v4301_v4 }
 0x271   : > { %v3585_v26 = vmax.f32 %v3505_v47, %v3513_v55  ;;  %v2789_v11 = vcombine.high %v2781_v56, %v2781_v56  ;;  %v2790_v0 = vcombine.high %v2788_v6, %v2788_v6  ;;  %v4310_v53 = vrot.slane %v2788_v6, 9 }
 0x272   : > { %v3586_v62 = vmax.f32 %v3506_v27, %v3514_v63  ;;  %v3501_v60 = vmax.f32 %v6301_v52, %v4303_v59  ;;  %v4243_v8 = vrot.slane %v6328_v58, 9  ;;  %v6332_v49 = vmax.f32 %v2462_v12, %v4241_v13 }
 0x273   : > { %v4309_v39 = vrot.slane %v2789_v11, 9  ;;  %v4311_v41 = vrot.slane %v2790_v0, 9  ;;  %v3508_v21 = vmax.f32 %v2788_v6, %v4310_v53  ;;  %v6336_v43 = vmax.f32 %v2470_v18, %v4242_v61 }
 0x274   : > { %v2454_v14 = vcombine.high %v6287_v37, %v6287_v37  ;;  %v4452_v29 = vpack.c.bf16 %v3582_v16, %v3582_v16  ;;  %v4453_v24 = vpack.c.bf16 %v3583_v28, %v3583_v28  ;;  %v4454_v20 = vpack.c.bf16 %v3584_v31, %v3584_v31 }
 0x275   : > { %v3507_v38 = vmax.f32 %v2789_v11, %v4309_v39  ;;  %v3509_v23 = vmax.f32 %v2790_v0, %v4311_v41  ;;  %v3580_v57 = vmax.f32 %v3500_v54, %v3508_v21  ;;  %v4455_v35 = vpack.c.bf16 %v3585_v26, %v3585_v26 }
 0x276   : > { %v4456_v19 = vpack.c.bf16 %v3586_v62, %v3586_v62  ;;  %v4240_v40 = vrot.slane %v2454_v14, 9  ;;  %v3902_v32 = vunpack.c.l.b16 %v4452_v29  ;;  %v3903_v12 = vunpack.c.l.b16 %v4453_v24 }
 0x277   : > { %v3579_v1 = vmax.f32 %v3499_v30, %v3507_v38  ;;  %v3581_v25 = vmax.f32 %v3501_v60, %v3509_v23  ;;  %v4450_v52 = vpack.c.bf16 %v3580_v57, %v3580_v57  ;;  %v3904_v51 = vunpack.c.l.b16 %v4454_v20 }
 0x278   : > { %v3905_v31 = vunpack.c.l.b16 %v4455_v35  ;;  %v3906_v26 = vunpack.c.l.b16 %v4456_v19  ;;  %v3441_v9 = vmax.f32 %v6328_v58, %v4243_v8  ;;  %v4010_v56 = vrot.slane %v3902_v32, 5 }
 0x279   : > { %v4449_v7 = vpack.c.bf16 %v3579_v1, %v3579_v1  ;;  %v4451_v16 = vpack.c.bf16 %v3581_v25, %v3581_v25  ;;  %v3900_v17 = vunpack.c.l.b16 %v4450_v52  ;;  %v4012_v6 = vrot.slane %v3903_v12, 4 }
 0x27a   : > { %v6334_v2 = vpop.f32.mrb[12].mxu0  ;;  %v3438_v4 = vmax.f32 %v2454_v14, %v4240_v40  ;;  %v4014_v61 = vrot.slane %v3904_v51, 3  ;;  %v4016_v54 = vrot.slane %v3905_v31, 2  ;;  %v4018_v39 = vrot.slane %v3906_v26, 1 }
 0x27b   : > { %v2120_v33 = vpop.f32.mrb[13].mxu0  ;;  %v3899_v28 = vunpack.c.l.b16 %v4449_v7  ;;  %v3901_v15 = vunpack.c.l.b16 %v4451_v16  ;;  %v4006_v3 = vrot.slane %v3900_v17, 7  ;;  %v2153_v40 = vadd.f32 %v6343_v10, %v6192_v44 }
 0x27c   : > { %v2121_v42 = vadd.f32 %v6343_v10, %v2120_v33  ;;  %v4507_v5 = vpop.f32.mrb[14].mxu0  ;;  %v2156_v32 = vadd.f32 %v6343_v10, %v6196_v36 }
 0x27d   : > { %v2132_v45 = vadd.f32 %v6343_v10, %v4507_v5  ;;  %v2123_v37 = vpop.f32.mrb[15].mxu0  ;;  %v4007_v18 = vsel %vm3916_vm4, %v4006_v3, %v3899_v28  ;;  %v4008_v62 = vrot.slane %v3901_v15, 6 }
 0x27e   : > { %v2227_v47 = vmax.f32 %v2121_v42, 0.0  ;;  %v2124_v14 = vadd.f32 %v6343_v10, %v2123_v37 }
 0x27f   : > { %v6347_v55 = vmax.f32 %v2132_v45, 0.0  ;;  %v4009_v13 = vsel %vm3919_vm14, %v4008_v62, %v4007_v18  ;;  %v2471_v45 = vcombine.high %v6328_v58, %v6328_v58  ;;  %v2235_v18 = vmax.f32 %v2153_v40, 0.0 }
 0x280   : > { %v2489_v27 = vcombine.high %v2227_v47, %v2227_v47  ;;  %v2496_v63 = vrot.slane %v2227_v47, %v6115_v34  ;;  %v4011_v41 = vsel %vm3922_vm3, %v4010_v56, %v4009_v13  ;;  %v2228_v47 = vmax.f32 %v2124_v14, 0.0 }
 0x281   : > { %v2539_v59 = vcombine.high %v6347_v55, %v6347_v55  ;;  %v4013_v21 = vsel %vm3925_vm15, %v4012_v6, %v4011_v41  ;;  %v4244_v51 = vrot.slane %v2471_v45, 9  ;;  %v2236_v62 = vmax.f32 %v2156_v32, 0.0 }
 0x282   : > { %v2503_v50 = vrot.slane %v2489_v27, %v6115_v34  ;;  %v2504_v11 = vcombine.high %v2496_v63, %v2496_v63  ;;  %v4248_v53 = vrot.slane %v2496_v63, 9  ;;  %v4015_v38 = vsel %vm3928_vm9, %v4014_v61, %v4013_v21 }
 0x283   : > { %v2553_v57 = vrot.slane %v2539_v59, %v6115_v34  ;;  %v4017_v29 = vsel %vm3931_vm12, %v4016_v54, %v4015_v38  ;;  %v2506_v3 = vcombine.high %v2228_v47, %v2228_v47  ;;  %v2513_v27 = vrot.slane %v2228_v47, %v6115_v34 }
 0x284   : > { %v2505_v0 = vcombine.high %v2503_v50, %v2503_v50  ;;  %v4249_v30 = vrot.slane %v2504_v11, 9  ;;  %v4250_v60 = vrot.slane %v2503_v50, 9  ;;  %v3446_v23 = vmax.f32 %v2496_v63, %v4248_v53 }
 0x285   : > { %v4019_v25 = vsel %vm3934_vm0, %v4018_v39, %v4017_v29  ;;  %v2555_v42 = vcombine.high %v2553_v57, %v2553_v57  ;;  %v4252_v36 = vrot.slane %v2513_v27, 9  ;;  %v2623_v61 = vcombine.high %v2235_v18, %v2235_v18 }
 0x286   : > { %v4251_v8 = vrot.slane %v2505_v0, 9  ;;  %v3447_v24 = vmax.f32 %v2504_v11, %v4249_v30  ;;  %v3448_v33 = vmax.f32 %v2503_v50, %v4250_v60  ;;  %v3550_v52 = vmax.f32 %v3438_v4, %v3446_v23 }
 0x287   : > { %v4040_v5 = vpack.c.b16 %v4019_v25, %v4019_v25  ;;  %v4261_v12 = vrot.slane %v2555_v42, 9  ;;  %v3442_v4 = vmax.f32 %v2471_v45, %v4244_v51  ;;  %v3450_v59 = vmax.f32 %v2513_v27, %v4252_v36 }
 0x288   : > { %v3449_v1 = vmax.f32 %v2505_v0, %v4251_v8  ;;  %v3551_v20 = vmax.f32 %v6332_v49, %v3447_v24  ;;  %v3552_v35 = vmax.f32 %v6336_v43, %v3448_v33  ;;  %v4420_v7 = vpack.c.bf16 %v3550_v52, %v3550_v52 }
 0x289   : > { %4057 = vst.msk [vmem:[%s6223_s11 + $0x18] sm:$0xf] %vm4050_vm11, %v4040_v5  ;;  %v3459_v56 = vmax.f32 %v2555_v42, %v4261_v12  ;;  %v2129_v11 = vadd.f32 %v6343_v10, %v6334_v2  ;;  %v3554_v54 = vmax.f32 %v3442_v4, %v3450_v59  ;;  %v2640_v39 = vcombine.high %v2236_v62, %v2236_v62 }
 0x28a   : > { %v3553_v19 = vmax.f32 %v3441_v9, %v3449_v1  ;;  %v4421_v37 = vpack.c.bf16 %v3551_v20, %v3551_v20  ;;  %v4422_v16 = vpack.c.bf16 %v3552_v35, %v3552_v35  ;;  %v3870_v49 = vunpack.c.l.b16 %v4420_v7 }
 0x28b   : > { %v2520_v9 = vrot.slane %v2506_v3, %v6115_v34  ;;  %v2630_v41 = vrot.slane %v2235_v18, %v6115_v34  ;;  %v2808_v21 = vcombine.high %v6315_v48, %v6315_v48  ;;  %v4424_v30 = vpack.c.bf16 %v3554_v54, %v3554_v54 }
 0x28c   : > { %v4423_v17 = vpack.c.bf16 %v3553_v19, %v3553_v19  ;;  %v3871_v43 = vunpack.c.l.b16 %v4421_v37  ;;  %v3872_v28 = vunpack.c.l.b16 %v4422_v16  ;;  %v3954_v58 = vrot.slane %v3870_v49, 5 }
 0x28d   : > { %v4253_v6 = vrot.slane %v2520_v9, 9  ;;  %v2229_v60 = vmax.f32 %v2129_v11, 0.0  ;;  %v2664_v8 = vrot.slane %v6242_v46, %v6115_v34  ;;  %v2637_v2 = vrot.slane %v2623_v61, %v6115_v34 }
 0x28e   : > { %v3873_v15 = vunpack.c.l.b16 %v4423_v17  ;;  %v3956_v31 = vrot.slane %v3871_v43, 4  ;;  %v3958_v26 = vrot.slane %v3872_v28, 3  ;;  %v3955_v44 = vsel %vm3922_vm3, %v3954_v58, %v6304_v22 }
 0x28f   : > { %v3451_v0 = vmax.f32 %v2520_v9, %v4253_v6  ;;  %v3874_v38 = vunpack.c.l.b16 %v4424_v30  ;;  %v2647_v23 = vrot.slane %v2236_v62, %v6115_v34  ;;  %v2654_v57 = vrot.slane %v2640_v39, %v6115_v34 }
 0x290   : > { %v3960_v63 = vrot.slane %v3873_v15, 2  ;;  %v3957_v50 = vsel %vm3925_vm15, %v3956_v31, %v3955_v44  ;;  %v2638_v14 = vcombine.high %v2630_v41, %v2630_v41  ;;  %v2822_v29 = vrot.slane %v2808_v21, %v6115_v34 }
 0x291   : > { %v3959_v13 = vsel %vm3928_vm9, %v3958_v26, %v3957_v50  ;;  %v6382_v22 = vmax.f32 %v3451_v0, %v3459_v56  ;;  %v3962_v24 = vrot.slane %v3874_v38, 1  ;;  %v2522_v33 = vcombine.high %v2229_v60, %v2229_v60 }
 0x292   : > { %v3961_v53 = vsel %vm3931_vm12, %v3960_v63, %v3959_v13  ;;  %v2529_v48 = vrot.slane %v2229_v60, %v6115_v34  ;;  %v4284_v1 = vrot.slane %v2664_v8, 9  ;;  %v2639_v25 = vcombine.high %v2637_v2, %v2637_v2 }
 0x293   : > { %v2546_v46 = vrot.slane %v6347_v55, %v6115_v34  ;;  %v3963_v52 = vsel %vm3934_vm0, %v3962_v24, %v3961_v53  ;;  %v2655_v42 = vcombine.high %v2647_v23, %v2647_v23  ;;  %v2656_v5 = vcombine.high %v2654_v57, %v2654_v57 }
 0x294   : > { %v4036_v20 = vpack.c.b16 %v3963_v52, %v3963_v52  ;;  %v4277_v35 = vrot.slane %v2638_v14, 9  ;;  %v2823_v19 = vcombine.high %v2822_v29, %v2822_v29  ;;  %v4278_v45 = vrot.slane %v2637_v2, 9 }
 0x295   : > { %v2536_v7 = vrot.slane %v2522_v33, %v6115_v34  ;;  %v2537_v37 = vcombine.high %v2529_v48, %v2529_v48  ;;  %v6400_v16 = vmax.f32 %v2664_v8, %v4284_v1  ;;  %v4279_v17 = vrot.slane %v2639_v25, 9 }
 0x296   : > { %4053 = vst.msk [vmem:[%s6223_s11 + $0x8] sm:$0xf] %vm4050_vm11, %v4036_v20  ;;  %v4280_v47 = vrot.slane %v2647_v23, 9  ;;  %v2554_v40 = vcombine.high %v2546_v46, %v2546_v46  ;;  %v4281_v32 = vrot.slane %v2655_v42, 9  ;;  %v4282_v55 = vrot.slane %v2654_v57, 9 }
 0x297   : > { %v4283_v49 = vrot.slane %v2656_v5, 9  ;;  %v2521_v12 = vcombine.high %v2520_v9, %v2520_v9  ;;  %v6402_v43 = vmax.f32 %v2638_v14, %v4277_v35  ;;  %v4317_v28 = vrot.slane %v2822_v29, 9 }
 0x298   : > { %v4318_v15 = vrot.slane %v2823_v19, 9  ;;  %v4255_v3 = vrot.slane %v2529_v48, 9  ;;  %v6404_v58 = vmax.f32 %v2637_v2, %v4278_v45  ;;  %v6406_v27 = vcombine.high %v2536_v7, %v2536_v7 }
 0x299   : > { %v4256_v51 = vrot.slane %v2537_v37, 9  ;;  %v4257_v31 = vrot.slane %v2536_v7, 9  ;;  %v6408_v26 = vmax.f32 %v2639_v25, %v4279_v17  ;;  %v6410_v63 = vmax.f32 %v2647_v23, %v4280_v47 }
 0x29a   : > { %v4259_v18 = vrot.slane %v2546_v46, 9  ;;  %v4260_v44 = vrot.slane %v2554_v40, 9  ;;  %v6412_v36 = vmax.f32 %v2655_v42, %v4281_v32  ;;  %v6414_v9 = vmax.f32 %v2654_v57, %v4282_v55 }
 0x29b   : > { %v6416_v62 = vmax.f32 %v2656_v5, %v4283_v49  ;;  %v4254_v50 = vrot.slane %v2521_v12, 9  ;;  %v6418_v6 = vmax.f32 %v2822_v29, %v4317_v28  ;;  %v6420_v4 = vmax.f32 %v2529_v48, %v4255_v3 }
 0x29c   : > { %v3516_v13 = vmax.f32 %v2823_v19, %v4318_v15  ;;  %v4258_v0 = vrot.slane %v6406_v27, 9  ;;  %v6424_v53 = vmax.f32 %v2537_v37, %v4256_v51  ;;  %v6426_v61 = vmax.f32 %v2536_v7, %v4257_v31 }
 0x29d   : > { %v6429_v41 = vmax.f32 %v2546_v46, %v4259_v18  ;;  %v6431_v21 = vmax.f32 %v2554_v40, %v4260_v44  ;;  %v4425_v2 = vpack.c.bf16 %v6382_v22, %v6382_v22  ;;  %v6437_v14 = vmax.f32 %v2521_v12, %v4254_v50 }
 0x2a5   : > { %v4526_v56 = vpop.f32.mrb[12].mxu1 }
 0x2a6   : > { %v2209_v59 = vadd.f32 %v6343_v10, %v4526_v56  ;;  %v2200_v11 = vpop.f32.mrb[13].mxu1 }
 0x2a7   : > { %v2201_v54 = vadd.f32 %v6343_v10, %v2200_v11  ;;  %v4527_v39 = vpop.f32.mrb[14].mxu1 }
 0x2a8   : > { %v2249_v30 = vmax.f32 %v2209_v59, 0.0  ;;  %v2212_v60 = vadd.f32 %v6343_v10, %v4527_v39  ;;  %v2203_v8 = vpop.f32.mrb[15].mxu1 }
 0x2a9   : > { %v2247_v38 = vmax.f32 %v2201_v54, 0.0  ;;  %v2204_v23 = vadd.f32 %v6343_v10, %v2203_v8 }
 0x2aa   : > { %v4510_v57 = vpop.f32.mrb[16].mxu0  ;;  %v2858_v29 = vcombine.high %v2249_v30, %v2249_v30  ;;  %v2865_v24 = vrot.slane %v2249_v30, %v6115_v34  ;;  %v2250_v33 = vmax.f32 %v2212_v60, 0.0 }
 0x2ab   : > { %v2145_v48 = vadd.f32 %v6343_v10, %v4510_v57  ;;  %v2136_v1 = vpop.f32.mrb[17].mxu0  ;;  %v2824_v25 = vcombine.high %v2247_v38, %v2247_v38  ;;  %v2831_v46 = vrot.slane %v2247_v38, %v6115_v34  ;;  %v2248_v52 = vmax.f32 %v2204_v23, 0.0 }
 0x2ac   : > { %v2137_v42 = vadd.f32 %v6343_v10, %v2136_v1  ;;  %v6443_v5 = vpop.f32.mrb[18].mxu0  ;;  %v2872_v20 = vrot.slane %v2858_v29, %v6115_v34  ;;  %v2873_v35 = vcombine.high %v2865_v24, %v2865_v24  ;;  %v4326_v19 = vrot.slane %v2865_v24, 9 }
 0x2ad   : > { %v2875_v45 = vcombine.high %v2250_v33, %v2250_v33  ;;  %v6446_v7 = vpop.f32.mrb[19].mxu0  ;;  %v2838_v37 = vrot.slane %v2824_v25, %v6115_v34  ;;  %v2839_v17 = vcombine.high %v2831_v46, %v2831_v46  ;;  %v4319_v47 = vrot.slane %v2831_v46, 9 }
 0x2ae   : > { %v2882_v40 = vrot.slane %v2250_v33, %v6115_v34  ;;  %v2874_v32 = vcombine.high %v2872_v20, %v2872_v20  ;;  %v4327_v55 = vrot.slane %v2873_v35, 9  ;;  %v4328_v49 = vrot.slane %v2872_v20, 9 }
 0x2af   : > { %v3524_v12 = vmax.f32 %v2865_v24, %v4326_v19  ;;  %v2840_v28 = vcombine.high %v2838_v37, %v2838_v37  ;;  %v4320_v15 = vrot.slane %v2839_v17, 9  ;;  %v4321_v3 = vrot.slane %v2838_v37, 9 }
 0x2b0   : > { %v3517_v51 = vmax.f32 %v2831_v46, %v4319_v47  ;;  %v4329_v31 = vrot.slane %v2874_v32, 9  ;;  %v3525_v18 = vmax.f32 %v2873_v35, %v4327_v55  ;;  %v3526_v44 = vmax.f32 %v2872_v20, %v4328_v49 }
 0x2b1   : > { %v3588_v50 = vmax.f32 %v3516_v13, %v3524_v12  ;;  %v4322_v56 = vrot.slane %v2840_v28, 9  ;;  %v3518_v59 = vmax.f32 %v2839_v17, %v4320_v15  ;;  %v3519_v11 = vmax.f32 %v2838_v37, %v4321_v3 }
 0x2b2   : > { %v2889_v54 = vrot.slane %v2875_v45, %v6115_v34  ;;  %v3527_v39 = vmax.f32 %v2874_v32, %v4329_v31  ;;  %v3589_v60 = vmax.f32 %v3517_v51, %v3525_v18  ;;  %v2890_v8 = vcombine.high %v2882_v40, %v2882_v40 }
 0x2b3   : > { %v4458_v30 = vpack.c.bf16 %v3588_v50, %v3588_v50  ;;  %v3590_v38 = vmax.f32 %v3518_v59, %v3526_v44  ;;  %v4330_v23 = vrot.slane %v2882_v40, 9  ;;  %v3520_v29 = vmax.f32 %v2840_v28, %v4322_v56 }
 0x2b4   : > { %v4332_v57 = vrot.slane %v2889_v54, 9  ;;  %v3591_v33 = vmax.f32 %v3519_v11, %v3527_v39  ;;  %v4459_v1 = vpack.c.bf16 %v3589_v60, %v3589_v60  ;;  %v4331_v25 = vrot.slane %v2890_v8, 9 }
 0x2b5   : > { %v6451_v24 = vunpack.c.l.b16 %v4458_v30  ;;  %v4460_v46 = vpack.c.bf16 %v3590_v38, %v3590_v38  ;;  %v3528_v13 = vmax.f32 %v2882_v40, %v4330_v23  ;;  %v2841_v35 = vcombine.high %v2248_v52, %v2248_v52 }
 0x2b6   : > { %v3530_v20 = vmax.f32 %v2889_v54, %v4332_v57  ;;  %v4461_v45 = vpack.c.bf16 %v3591_v33, %v3591_v33  ;;  %v6454_v37 = vunpack.c.l.b16 %v4459_v1  ;;  %v3529_v17 = vmax.f32 %v2890_v8, %v4331_v25 }
 0x2b7   : > { %v4020_v19 = vrot.slane %v6451_v24, 7  ;;  %v6456_v47 = vunpack.c.l.b16 %v4460_v46  ;;  %v3592_v32 = vmax.f32 %v3520_v29, %v3528_v13  ;;  %v2848_v55 = vrot.slane %v2248_v52, %v6115_v34 }
 0x2b8   : > { %v2855_v49 = vrot.slane %v2841_v35, %v6115_v34  ;;  %v6460_v12 = vunpack.c.l.b16 %v4461_v45  ;;  %v4022_v28 = vrot.slane %v6454_v37, 6  ;;  %v2233_v40 = vmax.f32 %v2145_v48, 0.0 }
 0x2b9   : > { %v2231_v15 = vmax.f32 %v2137_v42, 0.0  ;;  %v4024_v3 = vrot.slane %v6456_v47, 5  ;;  %v4462_v51 = vpack.c.bf16 %v3592_v32, %v3592_v32  ;;  %v2856_v31 = vcombine.high %v2848_v55, %v2848_v55 }
 0x2ba   : > { %v2857_v18 = vcombine.high %v2855_v49, %v2855_v49  ;;  %v4026_v44 = vrot.slane %v6460_v12, 4  ;;  %v4323_v50 = vrot.slane %v2848_v55, 9  ;;  %v2589_v56 = vcombine.high %v2233_v40, %v2233_v40 }
 0x2bb   : > { %v2596_v59 = vrot.slane %v2233_v40, %v6115_v34  ;;  %v3912_v52 = vunpack.c.l.b16 %v4462_v51  ;;  %v4324_v11 = vrot.slane %v2856_v31, 9  ;;  %v2556_v39 = vcombine.high %v2231_v15, %v2231_v15 }
 0x2bc   : > { %v4325_v54 = vrot.slane %v2857_v18, 9  ;;  %v3521_v30 = vmax.f32 %v2848_v55, %v4323_v50  ;;  %v2603_v60 = vrot.slane %v2589_v56, %v6115_v34  ;;  %v2563_v57 = vrot.slane %v2231_v15, %v6115_v34 }
 0x2bd   : > { %v2604_v48 = vcombine.high %v2596_v59, %v2596_v59  ;;  %v4269_v42 = vrot.slane %v2596_v59, 9  ;;  %v4028_v8 = vrot.slane %v3912_v52, 3  ;;  %v3522_v38 = vmax.f32 %v2856_v31, %v4324_v11 }
 0x2be   : > { %v3523_v23 = vmax.f32 %v2857_v18, %v4325_v54  ;;  %v3593_v29 = vmax.f32 %v3521_v30, %v3529_v17  ;;  %v2605_v24 = vcombine.high %v2603_v60, %v2603_v60  ;;  %v4271_v1 = vrot.slane %v2603_v60, 9 }
 0x2bf   : > { %v4270_v33 = vrot.slane %v2604_v48, 9  ;;  %v3594_v46 = vmax.f32 %v3522_v38, %v3530_v20  ;;  %v3467_v13 = vmax.f32 %v2596_v59, %v4269_v42  ;;  %v2570_v35 = vrot.slane %v2556_v39, %v6115_v34 }
 0x2c0   : > { %v3587_v25 = vmax.f32 %v6418_v6, %v3523_v23  ;;  %v4463_v45 = vpack.c.bf16 %v3593_v29, %v3593_v29  ;;  %v4272_v37 = vrot.slane %v2605_v24, 9  ;;  %v3469_v32 = vmax.f32 %v2603_v60, %v4271_v1 }
 0x2c1   : > { %v3468_v47 = vmax.f32 %v2604_v48, %v4270_v33  ;;  %v4464_v49 = vpack.c.bf16 %v3594_v46, %v3594_v46  ;;  %v3563_v12 = vmax.f32 %v3467_v13, %v6402_v43  ;;  %v2571_v40 = vcombine.high %v2563_v57, %v2563_v57 }
 0x2c2   : > { %v4457_v55 = vpack.c.bf16 %v3587_v25, %v3587_v25  ;;  %v3913_v15 = vunpack.c.l.b16 %v4463_v45  ;;  %v3470_v17 = vmax.f32 %v2605_v24, %v4272_v37  ;;  %v3565_v31 = vmax.f32 %v3469_v32, %v6408_v26 }
 0x2c3   : > { %v3564_v51 = vmax.f32 %v3468_v47, %v6404_v58  ;;  %v3914_v20 = vunpack.c.l.b16 %v4464_v49  ;;  %v4433_v18 = vpack.c.bf16 %v3563_v12, %v3563_v12  ;;  %v2572_v50 = vcombine.high %v2570_v35, %v2570_v35 }
 0x2c4   : > { %v3907_v6 = vunpack.c.l.b16 %v4457_v55  ;;  %v4030_v56 = vrot.slane %v3913_v15, 2  ;;  %v3566_v59 = vmax.f32 %v3470_v17, %v6410_v63  ;;  %v4435_v11 = vpack.c.bf16 %v3565_v31, %v3565_v31 }
 0x2c5   : > { %v4434_v52 = vpack.c.bf16 %v3564_v51, %v3564_v51  ;;  %v4032_v39 = vrot.slane %v3914_v20, 1  ;;  %v3883_v43 = vunpack.c.l.b16 %v4433_v18  ;;  %v4262_v30 = vrot.slane %v2563_v57, 9 }
 0x2c6   : > { %v4021_v54 = vsel %vm3916_vm4, %v4020_v19, %v3907_v6  ;;  %v4436_v48 = vpack.c.bf16 %v3566_v59, %v3566_v59  ;;  %v3885_v42 = vunpack.c.l.b16 %v4435_v11  ;;  %v4263_v38 = vrot.slane %v2571_v40, 9 }
 0x2c7   : > { %v4023_v60 = vsel %vm3919_vm14, %v4022_v28, %v4021_v54  ;;  %v3884_v58 = vunpack.c.l.b16 %v4434_v52  ;;  %v4264_v23 = vrot.slane %v2570_v35, 9  ;;  %v4265_v29 = vrot.slane %v2572_v50, 9 }
 0x2c8   : > { %v4025_v26 = vsel %vm3922_vm3, %v4024_v3, %v4023_v60  ;;  %v3886_v63 = vunpack.c.l.b16 %v4436_v48  ;;  %v3980_v1 = vrot.slane %v3885_v42, 6  ;;  %v3460_v25 = vmax.f32 %v2563_v57, %v4262_v30 }
 0x2c9   : > { %v4027_v24 = vsel %vm3925_vm15, %v4026_v44, %v4025_v26  ;;  %v3978_v33 = vrot.slane %v3884_v58, 7  ;;  %v3461_v46 = vmax.f32 %v2571_v40, %v4263_v38  ;;  %v3462_v13 = vmax.f32 %v2570_v35, %v4264_v23 }
 0x2ca   : > { %v4029_v19 = vsel %vm3928_vm9, %v4028_v8, %v4027_v24  ;;  %v3982_v37 = vrot.slane %v3886_v63, 5  ;;  %v3463_v3 = vmax.f32 %v2572_v50, %v4265_v29  ;;  %v3556_v44 = vmax.f32 %v6437_v14, %v3460_v25 }
 0x2cb   : > { %v4031_v28 = vsel %vm3931_vm12, %v4030_v56, %v4029_v19  ;;  %v3979_v45 = vsel %vm3916_vm4, %v3978_v33, %v3883_v43  ;;  %v3557_v55 = vmax.f32 %v6420_v4, %v3461_v46  ;;  %v3558_v8 = vmax.f32 %v6424_v53, %v3462_v13 }
 0x2cc   : > { %v4033_v47 = vsel %vm3934_vm0, %v4032_v39, %v4031_v28  ;;  %v3981_v32 = vsel %vm3919_vm14, %v3980_v1, %v3979_v45  ;;  %v3559_v57 = vmax.f32 %v6426_v61, %v3463_v3  ;;  %v2148_v35 = vadd.f32 %v6343_v10, %v6443_v5 }
 0x2cd   : > { %v4041_v49 = vpack.c.b16 %v4033_v47, %v4033_v47  ;;  %v4426_v12 = vpack.c.bf16 %v3556_v44, %v3556_v44  ;;  %v4427_v40 = vpack.c.bf16 %v3557_v55, %v3557_v55  ;;  %v6490_v15 = vsel %vm3922_vm3, %v3982_v37, %v3981_v32 }
 0x2ce   : > { %v2140_v17 = vadd.f32 %v6343_v10, %v6446_v7  ;;  %v4428_v14 = vpack.c.bf16 %v3558_v8, %v3558_v8  ;;  %v4429_v4 = vpack.c.bf16 %v3559_v57, %v3559_v57  ;;  %v2234_v51 = vmax.f32 %v2148_v35, 0.0 }
 0x2cf   : > { %4058 = vst.msk [vmem:[%s6223_s11 + $0x1c] sm:$0xf] %vm4050_vm11, %v4041_v49  ;;  %v3456_v53 = vmax.f32 %v6406_v27, %v4258_v0  ;;  %v3875_v61 = vunpack.c.l.b16 %v4425_v2  ;;  %v3876_v5 = vunpack.c.l.b16 %v4426_v12  ;;  %v3877_v31 = vunpack.c.l.b16 %v4427_v40 }
 0x2d0   : > { %v2232_v6 = vmax.f32 %v2140_v17, 0.0  ;;  %v3878_v20 = vunpack.c.l.b16 %v4428_v14  ;;  %v3879_v18 = vunpack.c.l.b16 %v4429_v4  ;;  %v2606_v50 = vcombine.high %v2234_v51, %v2234_v51 }
 0x2d1   : > { %v2613_v10 = vrot.slane %v2234_v51, %v6115_v34  ;;  %v3964_v7 = vrot.slane %v3876_v5, 7  ;;  %v3966_v56 = vrot.slane %v3877_v31, 6 }
 0x2d2   : > { %v2573_v59 = vcombine.high %v2232_v6, %v2232_v6  ;;  %v2580_v52 = vrot.slane %v2232_v6, %v6115_v34  ;;  %v3968_v11 = vrot.slane %v3878_v20, 5  ;;  %v3970_v54 = vrot.slane %v3879_v18, 4 }
 0x2d3   : > { %v2620_v27 = vrot.slane %v2606_v50, %v6115_v34  ;;  %v2621_v0 = vcombine.high %v2613_v10, %v2613_v10  ;;  %v3965_v22 = vsel %vm3916_vm4, %v3964_v7, %v3875_v61  ;;  %v4273_v2 = vrot.slane %v2613_v10, 9 }
 0x2d4   : > { %v2587_v39 = vrot.slane %v2573_v59, %v6115_v34  ;;  %v2588_v43 = vcombine.high %v2580_v52, %v2580_v52  ;;  %v3967_v30 = vsel %vm3919_vm14, %v3966_v56, %v3965_v22  ;;  %v4266_v38 = vrot.slane %v2580_v52, 9 }
 0x2d5   : > { %v2622_v60 = vcombine.high %v2620_v27, %v2620_v27  ;;  %v4274_v48 = vrot.slane %v2621_v0, 9  ;;  %v4275_v58 = vrot.slane %v2620_v27, 9  ;;  %v3969_v42 = vsel %vm3922_vm3, %v3968_v11, %v3967_v30 }
 0x2d6   : > { %v3471_v26 = vmax.f32 %v2613_v10, %v4273_v2  ;;  %v4267_v23 = vrot.slane %v2588_v43, 9  ;;  %v4268_v33 = vrot.slane %v2587_v39, 9  ;;  %v3464_v19 = vmax.f32 %v2580_v52, %v4266_v38 }
 0x2d7   : > { %v4276_v29 = vrot.slane %v2622_v60, 9  ;;  %v3472_v24 = vmax.f32 %v2621_v0, %v4274_v48  ;;  %v3473_v63 = vmax.f32 %v2620_v27, %v4275_v58  ;;  %v3971_v34 = vsel %vm3925_vm15, %v3970_v54, %v3969_v42 }
 0x2d8   : > { %v3567_v1 = vmax.f32 %v3471_v26, %v6412_v36  ;;  %v3465_v25 = vmax.f32 %v2588_v43, %v4267_v23  ;;  %v3466_v45 = vmax.f32 %v2587_v39, %v4268_v33  ;;  %v3560_v3 = vmax.f32 %v3456_v53, %v3464_v19 }
 0x2d9   : > { %v3474_v46 = vmax.f32 %v2622_v60, %v4276_v29  ;;  %v3568_v13 = vmax.f32 %v3472_v24, %v6414_v9  ;;  %v3569_v28 = vmax.f32 %v3473_v63, %v6416_v62 }
 0x2da   : > { %v4437_v37 = vpack.c.bf16 %v3567_v1, %v3567_v1  ;;  %v3561_v47 = vmax.f32 %v6429_v41, %v3465_v25  ;;  %v3562_v36 = vmax.f32 %v6431_v21, %v3466_v45  ;;  %v4430_v8 = vpack.c.bf16 %v3560_v3, %v3560_v3 }
 0x2db   : > { %v3570_v32 = vmax.f32 %v3474_v46, %v6400_v16  ;;  %v4438_v44 = vpack.c.bf16 %v3568_v13, %v3568_v13  ;;  %v4439_v55 = vpack.c.bf16 %v3569_v28, %v3569_v28 }
 0x2dc   : > { %v3887_v49 = vunpack.c.l.b16 %v4437_v37  ;;  %v4431_v57 = vpack.c.bf16 %v3561_v47, %v3561_v47  ;;  %v4432_v9 = vpack.c.bf16 %v3562_v36, %v3562_v36  ;;  %v3880_v62 = vunpack.c.l.b16 %v4430_v8 }
 0x2dd   : > { %v4440_v35 = vpack.c.bf16 %v3570_v32, %v3570_v32  ;;  %v3888_v12 = vunpack.c.l.b16 %v4438_v44  ;;  %v3889_v40 = vunpack.c.l.b16 %v4439_v55 }
 0x2de   : > { %v3984_v17 = vrot.slane %v3887_v49, 4  ;;  %v3881_v14 = vunpack.c.l.b16 %v4431_v57  ;;  %v3882_v41 = vunpack.c.l.b16 %v4432_v9  ;;  %v3972_v21 = vrot.slane %v3880_v62, 3 }
 0x2df   : > { %v3890_v4 = vunpack.c.l.b16 %v4440_v35  ;;  %v3986_v51 = vrot.slane %v3888_v12, 3  ;;  %v3988_v53 = vrot.slane %v3889_v40, 2 }
 0x2e0   : > { %v3985_v16 = vsel %vm3925_vm15, %v3984_v17, %v6490_v15  ;;  %v3974_v31 = vrot.slane %v3881_v14, 2  ;;  %v3973_v20 = vsel %vm3928_vm9, %v3972_v21, %v3971_v34  ;;  %v3976_v18 = vrot.slane %v3882_v41, 1 }
 0x2e1   : > { %v3987_v61 = vsel %vm3928_vm9, %v3986_v51, %v3985_v16  ;;  %v3990_v5 = vrot.slane %v3890_v4, 1 }
 0x2e2   : > { %v3989_v6 = vsel %vm3931_vm12, %v3988_v53, %v3987_v61  ;;  %v3975_v10 = vsel %vm3931_vm12, %v3974_v31, %v3973_v20 }
 0x2e3   : > { %v3991_v50 = vsel %vm3934_vm0, %v3990_v5, %v3989_v6  ;;  %v3977_v56 = vsel %vm3934_vm0, %v3976_v18, %v3975_v10 }
 0x2e4   : > { %v4038_v7 = vpack.c.b16 %v3991_v50, %v3991_v50  ;;  %v4037_v59 = vpack.c.b16 %v3977_v56, %v3977_v56 }
 0x2e6   : > { %4055 = vst.msk [vmem:[%s6223_s11 + $0x10] sm:$0xf] %vm4050_vm11, %v4038_v7  ;;  %4054 = vst.msk [vmem:[%s6223_s11 + $0xc] sm:$0xf] %vm4050_vm11, %v4037_v59 }
 0x2e7 PF: > { %s13_s12 = sadd.s32 1, %s4602_s12  }
 0x2e8   : > { %p10_p4 = scmp.ge.s32.totalorder %s13_s12, 4  }
 0x2ea   :  { %12 = sbr.rel (!%p10_p4) target bundleno = 1 (0x1), region = 77 }

</bundles_post_ra>
